<compile_context>
chip_gen: v7x
topology: tpu7x:2x2x1
jax: 0.10.0
libtpu: 0.0.40
codegen_flags: <defaults>
</compile_context>

<pallas_src>
import functools

import jax
import jax.numpy as jnp
from jax.experimental import pallas as pl
from jax.experimental.pallas import tpu as pltpu

# ----------------------------- configuration ------------------------------
HIDDEN = 32            # hidden_dim (PyTorch default 256; small for the demo)
D_STATE = 64           # ssm_d_state=64 (fixed by the module)
SSM_RATIO = 2
D_INNER = HIDDEN * SSM_RATIO   # 64
HEADDIM = 32           # -> NHEADS = 2
NHEADS = D_INNER // HEADDIM
KDIR = 4               # 4 cross-scan directions
FFN_DIM = 2048         # linear1/linear2 width (fixed by the module)
MLP_RATIO = 4          # VSSBlock MLP branch ratio (VMamba default)
EPS = 1e-5             # LayerNorm eps (PyTorch default)


# ----------------------------- in-kernel math ------------------------------
def _gelu(x):
    # tanh-approx GELU: tanh runs on the EUP slot (cheap vs. a VALU erf polynomial).
    # TODO(synk): PyTorch nn.GELU() is exact-erf; tanh approx deviates by ~1e-3.
    c = 0.7978845608028654
    return 0.5 * x * (1.0 + jnp.tanh(c * (x + 0.044715 * x * x * x)))


def _softplus(x):
    return jnp.where(x > 20.0, x, jnp.log(1.0 + jnp.exp(jnp.minimum(x, 20.0))))


def _layernorm(x, g, b, eps=EPS):
    mu = jnp.mean(x, axis=-1, keepdims=True)
    xc = x - mu
    var = jnp.mean(xc * xc, axis=-1, keepdims=True)
    return xc * jax.lax.rsqrt(var + eps) * g + b


def _cp(sem, vmem_mib=48):
    # explicit scoped-VMEM ceiling (kept <= 56 MiB so the same code fits v7x's 64 MiB).
    return pltpu.CompilerParams(dimension_semantics=sem,
                                vmem_limit_bytes=vmem_mib * 1024 * 1024)


def _row_tile(M, max_tm=256):
    # Prefer 256-row tiles (fills the 256-wide MXU on v6e/v7x); pad instead of falling back
    # to one giant block when M is not a multiple of the tile.
    for tm in (max_tm, 128, 64, 32, 16, 8):
        if M % tm == 0:
            return tm, M
    Mp = ((M + 127) // 128) * 128
    return 128, Mp


def _pad_rows(x, Mp):
    M = x.shape[0]
    return x if Mp == M else jnp.pad(x, ((0, Mp - M), (0, 0)))


def _pick_div(n, cands):
    for c in cands:
        if n % c == 0:
            return c
    return n


# -------------------- fused LN + linear (+bias / +residual) --------------------
def _ln_linear_kernel(*refs, has_res, eps):
    if has_res:
        x_ref, g_ref, b_ref, w_ref, bias_ref, res_ref, o_ref = refs
    else:
        x_ref, g_ref, b_ref, w_ref, bias_ref, o_ref = refs
    xn = _layernorm(x_ref[...], g_ref[...], b_ref[...], eps)
    y = jnp.dot(xn.astype(jnp.bfloat16), w_ref[...],
                preferred_element_type=jnp.float32) + bias_ref[...]
    if has_res:
        y = y + res_ref[...]
    o_ref[...] = y


def ln_linear(x, g, b, w, bias=None, residual=None):
    M, Cin = x.shape
    Cout = w.shape[1]
    if bias is None:
        bias = jnp.zeros((Cout,), jnp.float32)
    TM, Mp = _row_tile(M)
    xp = _pad_rows(x, Mp)
    has_res = residual is not None
    args = [xp, g.reshape(1, Cin), b.reshape(1, Cin),
            w.astype(jnp.bfloat16), bias.reshape(1, Cout)]
    in_specs = [
        pl.BlockSpec((TM, Cin), lambda i: (i, 0)),
        pl.BlockSpec((1, Cin), lambda i: (0, 0)),
        pl.BlockSpec((1, Cin), lambda i: (0, 0)),
        pl.BlockSpec((Cin, Cout), lambda i: (0, 0)),
        pl.BlockSpec((1, Cout), lambda i: (0, 0)),
    ]
    if has_res:
        args.append(_pad_rows(residual, Mp))
        in_specs.append(pl.BlockSpec((TM, Cout), lambda i: (i, 0)))
    out = pl.pallas_call(
        functools.partial(_ln_linear_kernel, has_res=has_res, eps=EPS),
        out_shape=jax.ShapeDtypeStruct((Mp, Cout), jnp.float32),
        grid=(Mp // TM,),
        in_specs=in_specs,
        out_specs=pl.BlockSpec((TM, Cout), lambda i: (i, 0)),
        compiler_params=_cp(("parallel",)),
    )(*args)
    return out if Mp == M else out[:M]


# ----------------------------- fused add + LayerNorm ------------------------------
def _add_ln_kernel(a_ref, b_ref, g_ref, be_ref, o_ref, *, eps):
    o_ref[...] = _layernorm(a_ref[...] + b_ref[...], g_ref[...], be_ref[...], eps)


def add_ln(a, b, g, beta):
    M, C = a.shape
    TM, Mp = _row_tile(M)
    out = pl.pallas_call(
        functools.partial(_add_ln_kernel, eps=EPS),
        out_shape=jax.ShapeDtypeStruct((Mp, C), jnp.float32),
        grid=(Mp // TM,),
        in_specs=[pl.BlockSpec((TM, C), lambda i: (i, 0)),
                  pl.BlockSpec((TM, C), lambda i: (i, 0)),
                  pl.BlockSpec((1, C), lambda i: (0, 0)),
                  pl.BlockSpec((1, C), lambda i: (0, 0))],
        out_specs=pl.BlockSpec((TM, C), lambda i: (i, 0)),
        compiler_params=_cp(("parallel",)),
    )(_pad_rows(a, Mp), _pad_rows(b, Mp), g.reshape(1, C), beta.reshape(1, C))
    return out if Mp == M else out[:M]


# -------------- fused VSSBlock MLP: x + fc2(GELU(fc1(LN(x)))), Hd-tiled --------------
def _ln_mlp_res_kernel(x_ref, g_ref, b_ref, w1_ref, b1_ref, w2_ref, b2_ref,
                       o_ref, acc_ref, *, eps):
    k = pl.program_id(1)

    @pl.when(k == 0)
    def _():
        acc_ref[...] = jnp.zeros_like(acc_ref)

    x = x_ref[...]
    xn = _layernorm(x, g_ref[...], b_ref[...], eps)
    h = _gelu(jnp.dot(xn.astype(jnp.bfloat16), w1_ref[...],
                      preferred_element_type=jnp.float32) + b1_ref[...])
    acc_ref[...] += jnp.dot(h.astype(jnp.bfloat16), w2_ref[...],
                            preferred_element_type=jnp.float32)

    @pl.when(k == pl.num_programs(1) - 1)
    def _():
        o_ref[...] = x + acc_ref[...] + b2_ref[...]


def ln_mlp_res(x, g, b, w1, b1, w2, b2):
    M, C = x.shape
    Hd = w1.shape[1]
    TM, Mp = _row_tile(M)
    THd = _pick_div(Hd, (512, 256, 128))
    out = pl.pallas_call(
        functools.partial(_ln_mlp_res_kernel, eps=EPS),
        out_shape=jax.ShapeDtypeStruct((Mp, C), jnp.float32),
        grid=(Mp // TM, Hd // THd),
        in_specs=[pl.BlockSpec((TM, C), lambda i, k: (i, 0)),
                  pl.BlockSpec((1, C), lambda i, k: (0, 0)),
                  pl.BlockSpec((1, C), lambda i, k: (0, 0)),
                  pl.BlockSpec((C, THd), lambda i, k: (0, k)),
                  pl.BlockSpec((1, THd), lambda i, k: (0, k)),
                  pl.BlockSpec((THd, C), lambda i, k: (k, 0)),
                  pl.BlockSpec((1, C), lambda i, k: (0, 0))],
        out_specs=pl.BlockSpec((TM, C), lambda i, k: (i, 0)),
        scratch_shapes=[pltpu.VMEM((TM, C), jnp.float32)],
        compiler_params=_cp(("parallel", "arbitrary"), vmem_mib=56),
    )(_pad_rows(x, Mp), g.reshape(1, C), b.reshape(1, C),
      w1.astype(jnp.bfloat16), b1.reshape(1, Hd),
      w2.astype(jnp.bfloat16), b2.reshape(1, C))
    return out if Mp == M else out[:M]


# -------- fused decoder FFN: LN3((a+b) + lin2(GELU(lin1(a+b)))), Hd-tiled --------
def _add_mlp_ln_kernel(a_ref, b_ref, w1_ref, b1_ref, w2_ref, b2_ref, g_ref, be_ref,
                       o_ref, acc_ref, *, eps):
    k = pl.program_id(1)

    @pl.when(k == 0)
    def _():
        acc_ref[...] = jnp.zeros_like(acc_ref)

    s = a_ref[...] + b_ref[...]
    h = _gelu(jnp.dot(s.astype(jnp.bfloat16), w1_ref[...],
                      preferred_element_type=jnp.float32) + b1_ref[...])
    acc_ref[...] += jnp.dot(h.astype(jnp.bfloat16), w2_ref[...],
                            preferred_element_type=jnp.float32)

    @pl.when(k == pl.num_programs(1) - 1)
    def _():
        o_ref[...] = _layernorm(s + acc_ref[...] + b2_ref[...],
                                g_ref[...], be_ref[...], eps)


def add_mlp_ln(a, b, w1, b1, w2, b2, g, beta):
    M, C = a.shape
    Hd = w1.shape[1]
    TM, Mp = _row_tile(M)
    THd = _pick_div(Hd, (512, 256, 128))
    out = pl.pallas_call(
        functools.partial(_add_mlp_ln_kernel, eps=EPS),
        out_shape=jax.ShapeDtypeStruct((Mp, C), jnp.float32),
        grid=(Mp // TM, Hd // THd),
        in_specs=[pl.BlockSpec((TM, C), lambda i, k: (i, 0)),
                  pl.BlockSpec((TM, C), lambda i, k: (i, 0)),
                  pl.BlockSpec((C, THd), lambda i, k: (0, k)),
                  pl.BlockSpec((1, THd), lambda i, k: (0, k)),
                  pl.BlockSpec((THd, C), lambda i, k: (k, 0)),
                  pl.BlockSpec((1, C), lambda i, k: (0, 0)),
                  pl.BlockSpec((1, C), lambda i, k: (0, 0)),
                  pl.BlockSpec((1, C), lambda i, k: (0, 0))],
        out_specs=pl.BlockSpec((TM, C), lambda i, k: (i, 0)),
        scratch_shapes=[pltpu.VMEM((TM, C), jnp.float32)],
        compiler_params=_cp(("parallel", "arbitrary"), vmem_mib=56),
    )(_pad_rows(a, Mp), _pad_rows(b, Mp),
      w1.astype(jnp.bfloat16), b1.reshape(1, Hd),
      w2.astype(jnp.bfloat16), b2.reshape(1, C), g.reshape(1, C), beta.reshape(1, C))
    return out if Mp == M else out[:M]


# ----------------------------- depthwise 3x3 conv + GELU (channel-tiled) ----------------
def _dwconv_gelu_kernel(x_ref, w_ref, b_ref, o_ref, *, H, W):
    x = x_ref[...]                       # (H+2, W+2, TD) zero-padded slab
    w = w_ref[...]                       # (3, 3, TD)
    acc = jnp.zeros(o_ref.shape, jnp.float32)
    for di in range(3):
        for dj in range(3):
            acc = acc + x[di:di + H, dj:dj + W, :] * w[di, dj]
    o_ref[...] = _gelu(acc + b_ref[0, :])


def dwconv3x3_gelu(x, w, b):
    Bn, H, W, D = x.shape
    TD = 128 if D % 128 == 0 else D      # depthwise conv is channel-independent -> no halo on D
    xp = jnp.pad(x, ((0, 0), (1, 1), (1, 1), (0, 0)))
    return pl.pallas_call(
        functools.partial(_dwconv_gelu_kernel, H=H, W=W),
        out_shape=jax.ShapeDtypeStruct((Bn, H, W, D), jnp.float32),
        grid=(Bn, D // TD),
        in_specs=[pl.BlockSpec((None, H + 2, W + 2, TD), lambda i, j: (i, 0, 0, j)),
                  pl.BlockSpec((3, 3, TD), lambda i, j: (0, 0, j)),
                  pl.BlockSpec((1, TD), lambda i, j: (0, j))],
        out_specs=pl.BlockSpec((None, H, W, TD), lambda i, j: (i, 0, 0, j)),
        compiler_params=_cp(("parallel", "parallel")),
    )(xp, w, b.reshape(1, D))


# ---------------- chunked SSD scan: fused x_proj, fwd+rev directions in one kernel --------
def _ssd_kernel(xs_ref, wpf_ref, wpr_ref, wtf_ref, wtr_ref,
                scf_ref, scr_ref, srf_ref, srr_ref,
                o_ref, state_ref, *, S, NH, HD, Lc, NC):
    # xs_ref: (L, D_inner) f32        wp*_ref: (D_inner, 2S+NH) bf16 ([B|C|dt] fused)
    # wt*_ref: (NH, D_inner) bf16 (dt weight, row orientation)
    # sc*_ref: (3, NH) [dt_bias; A; D]     sr*_ref: (NH, 2) [dt_bias | A]
    # o_ref: (L, D_inner)             state_ref: (S, D_inner) VMEM scratch (inter-chunk carry)
    ridx = jax.lax.broadcasted_iota(jnp.int32, (Lc, Lc), 0)
    cidx = jax.lax.broadcasted_iota(jnp.int32, (Lc, Lc), 1)
    lower_f = (cidx <= ridx).astype(jnp.float32)     # [t, s]: s <= t  (causal)
    upper_f = (cidx >= ridx).astype(jnp.float32)     # [t, s]: s >= t  (anti-causal)

    def direction(wp_ref, wt_ref, sc_ref, sr_ref, reverse, accumulate):
        sc = sc_ref[...]                              # (3, NH)
        sr = sr_ref[...]                              # (NH, 2)
        dtb_c = sc[0:1, :]
        a_c = sc[1:2, :]
        dtb_r = sr[:, 0:1]
        a_r = sr[:, 1:2]
        mask = upper_f if reverse else lower_f        # decay / column-cumsum mask
        csmask = lower_f if reverse else upper_f      # row-cumsum mask

        state_ref[...] = jnp.zeros_like(state_ref)

        @pl.loop(0, NC)
        def _(ci):
            c = (NC - 1 - ci) if reverse else ci      # rev scan walks chunks back-to-front
            start = pl.multiple_of(c * Lc, Lc)
            x = xs_ref[pl.ds(start, Lc), :]           # (Lc, Dn) f32
            xb = x.astype(jnp.bfloat16)

            # fused x_proj: [B | C | dt]
            proj = jnp.dot(xb, wp_ref[...], preferred_element_type=jnp.float32)
            Bm = proj[:, :S]                          # (Lc, S)
            Cm = proj[:, S:2 * S]                     # (Lc, S)
            dt_c = _softplus(proj[:, 2 * S:2 * S + NH] + dtb_c)      # (Lc, NH)
            dtA_c = dt_c * a_c                        # (Lc, NH), <= 0

            # dt in row orientation (contraction over Dn; avoids an in-kernel transpose)
            dt_r = _softplus(
                jax.lax.dot_general(wt_ref[...], xb, (((1,), (1,)), ((), ())),
                                    preferred_element_type=jnp.float32) + dtb_r)   # (NH, Lc)
            dtA_r = dt_r * a_r

            # inclusive in-chunk cumsums (prefix for fwd, suffix for rev), all heads at once
            csum_c = jnp.dot(mask, dtA_c, preferred_element_type=jnp.float32)      # (Lc, NH)
            csum_r = jnp.dot(dtA_r, csmask, preferred_element_type=jnp.float32)    # (NH, Lc)
            tot = jnp.sum(dtA_c, axis=0, keepdims=True)                            # (1, NH)

            CB = jax.lax.dot_general(Cm, Bm, (((1,), (1,)), ((), ())),
                                     preferred_element_type=jnp.float32)           # (Lc, Lc)

            state_old = state_ref[...]                                             # (S, Dn)
            y_inter = jnp.dot(Cm, state_old, preferred_element_type=jnp.float32)   # (Lc, Dn)

            exp_cs = jnp.exp(csum_c)                   # decay from chunk boundary to row t
            w_state = jnp.exp(tot - csum_c) * dt_c     # weight of row s in the next state
            dec_tot = jnp.exp(tot)                     # whole-chunk state decay

            y_parts, xw_parts, dec_parts = [], [], []
            for h in range(NH):                        # NH small & static -> unrolled
                hc = slice(h * HD, (h + 1) * HD)
                x_h = x[:, hc]
                seg = csum_c[:, h:h + 1] - csum_r[h:h + 1, :]            # (Lc, Lc)
                decay = jnp.exp(jnp.minimum(seg, 0.0)) * mask            # masked, no inf*0
                y_h = jnp.dot(decay * CB, x_h * dt_c[:, h:h + 1],
                              preferred_element_type=jnp.float32)        # intra-chunk
                y_h = y_h + exp_cs[:, h:h + 1] * y_inter[:, hc]          # inter-chunk
                y_h = y_h + sc[2:3, h:h + 1] * x_h                       # D skip connection
                y_parts.append(y_h)
                xw_parts.append(x_h * w_state[:, h:h + 1])
                dec_parts.append(jnp.broadcast_to(dec_tot[:, h:h + 1], (1, HD)))

            y_chunk = jnp.concatenate(y_parts, axis=-1)                  # (Lc, Dn) lane-dense
            xw = jnp.concatenate(xw_parts, axis=-1)                      # (Lc, Dn)
            sdec = jnp.concatenate(dec_parts, axis=-1)                   # (1, Dn)

            state_ref[...] = state_old * sdec + jax.lax.dot_general(
                Bm, xw, (((0,), (0,)), ((), ())), preferred_element_type=jnp.float32)

            if accumulate:        # rev pass adds onto the fwd pass result (cross-merge fused)
                o_ref[pl.ds(start, Lc), :] = o_ref[pl.ds(start, Lc), :] + y_chunk
            else:
                o_ref[pl.ds(start, Lc), :] = y_chunk

    direction(wpf_ref, wtf_ref, scf_ref, srf_ref, reverse=False, accumulate=False)
    direction(wpr_ref, wtr_ref, scr_ref, srr_ref, reverse=True, accumulate=True)


def ssd_scan(xs2, wproj16, wdtT16, scal_c, scal_r, *, Lc):
    # xs2: (B, 2, L, Dn) -- the two base orderings; the fwd (dir k) and reversed (dir k+2)
    # scans are both computed in-kernel and summed before storing.
    Bn, _, L, Dn = xs2.shape
    S, NH, HD = D_STATE, NHEADS, HEADDIM
    P = 2 * S + NH
    NC = L // Lc
    return pl.pallas_call(
        functools.partial(_ssd_kernel, S=S, NH=NH, HD=HD, Lc=Lc, NC=NC),
        out_shape=jax.ShapeDtypeStruct((Bn, 2, L, Dn), jnp.float32),
        grid=(Bn, 2),
        in_specs=[
            pl.BlockSpec((None, None, L, Dn), lambda b, k: (b, k, 0, 0)),
            pl.BlockSpec((None, Dn, P), lambda b, k: (k, 0, 0)),        # fwd x_proj (dir k)
            pl.BlockSpec((None, Dn, P), lambda b, k: (k + 2, 0, 0)),    # rev x_proj (dir k+2)
            pl.BlockSpec((None, NH, Dn), lambda b, k: (k, 0, 0)),       # fwd dt row-weight
            pl.BlockSpec((None, NH, Dn), lambda b, k: (k + 2, 0, 0)),   # rev dt row-weight
            pl.BlockSpec((None, 3, NH), lambda b, k: (k, 0, 0)),        # fwd [dt_bias;A;D]
            pl.BlockSpec((None, 3, NH), lambda b, k: (k + 2, 0, 0)),    # rev [dt_bias;A;D]
            pl.BlockSpec((None, NH, 2), lambda b, k: (k, 0, 0)),        # fwd [dt_bias|A] (rows)
            pl.BlockSpec((None, NH, 2), lambda b, k: (k + 2, 0, 0)),    # rev [dt_bias|A] (rows)
        ],
        out_specs=pl.BlockSpec((None, None, L, Dn), lambda b, k: (b, k, 0, 0)),
        scratch_shapes=[pltpu.VMEM((S, Dn), jnp.float32)],
        compiler_params=_cp(("parallel", "parallel"), vmem_mib=56),
    )(xs2, wproj16, wproj16, wdtT16, wdtT16, scal_c, scal_c, scal_r, scal_r)


# ----------------------------- model glue (plain JAX between fused kernels) ----------------
def vss_block(x, p):
    # x + SS2D(LN(x));  then  x + MLP(LN(x))   (DropPath = identity, eval)
    Bn, H, W, C = x.shape
    L = H * W
    M = Bn * L
    Dn = D_INNER
    x_flat = x.reshape(M, C)

    # LN(norm) + in_proj fused
    xi = ln_linear(x_flat, p["norm_g"], p["norm_b"], p["in_proj_w"]).reshape(Bn, H, W, Dn)
    # depthwise 3x3 conv + GELU (channel-tiled)
    xc = dwconv3x3_gelu(xi, p["conv_w"], p["conv_b"])

    # cross-scan: only the two base orderings; reversals are handled inside the SSD kernel.
    x_row = xc.reshape(Bn, L, Dn)
    x_col = xc.transpose(0, 2, 1, 3).reshape(Bn, L, Dn)
    xs2 = jnp.stack([x_row, x_col], axis=1)                      # (B, 2, L, Dn)

    A = -jnp.exp(p["A_logs"])                                    # (K, NH), A < 0
    wproj16 = jnp.concatenate([p["x_proj_bc_w"], p["x_proj_dt_w"]],
                              axis=-1).astype(jnp.bfloat16)      # (K, Dn, 2S+NH)
    wdtT16 = jnp.transpose(p["x_proj_dt_w"], (0, 2, 1)).astype(jnp.bfloat16)   # (K, NH, Dn)
    scal_c = jnp.stack([p["dt_bias"], A, p["Ds"]], axis=1)       # (K, 3, NH)
    scal_r = jnp.stack([p["dt_bias"], A], axis=-1)               # (K, NH, 2)

    Lc = _pick_div(L, (256, 128, 64, 32, 16, 8))                 # SSD chunk length
    ys = ssd_scan(xs2, wproj16, wdtT16, scal_c, scal_r, Lc=Lc)   # (B, 2, L, Dn), fwd+rev summed

    # cross-merge (fwd+rev already summed in-kernel; just fold col ordering back)
    y_row = ys[:, 0]
    y_col = ys[:, 1].reshape(Bn, W, H, Dn).transpose(0, 2, 1, 3).reshape(Bn, L, Dn)
    y = (y_row + y_col).reshape(M, Dn)

    # out_norm + out_proj + residual fused
    x2 = ln_linear(y, p["out_norm_g"], p["out_norm_b"], p["out_proj_w"], residual=x_flat)
    # MLP branch: LN + fc1 + GELU + fc2 + residual fused (Hd-tiled)
    out = ln_mlp_res(x2, p["norm2_g"], p["norm2_b"],
                     p["fc1_w"], p["fc1_b"], p["fc2_w"], p["fc2_b"])
    return out.reshape(Bn, H, W, C)


def vss_decoder_layer(content, style, pos, query_pos, params):
    # all dropouts are identity (inference)
    Bn, H, W, C = content.shape
    M = Bn * H * W

    q = content + query_pos          # trivial elementwise adds left to XLA
    k = style + pos

    d1 = vss_block(q, params["vss_content"]).reshape(M, C)
    tgt = add_ln(content.reshape(M, C), d1, params["norm1_g"], params["norm1_b"])

    d2 = vss_block(k, params["vss_style"]).reshape(M, C)
    t2 = add_ln(style.reshape(M, C), d2, params["norm2_g"], params["norm2_b"])

    # (tgt + t2) + FFN + norm3, one fused (Hd-tiled) kernel
    out = add_mlp_ln(tgt, t2, params["lin1_w"], params["lin1_b"],
                     params["lin2_w"], params["lin2_b"],
                     params["norm3_g"], params["norm3_b"])
    return out.reshape(Bn, H, W, C)


# ----------------------------- deterministic parameter init ------------------------------
def _init_vss_params(key, C):
    Dn, S, K, NH = D_INNER, D_STATE, KDIR, NHEADS
    ks = jax.random.split(key, 8)
    std = 0.02
    return {
        "norm_g": jnp.ones((C,), jnp.float32), "norm_b": jnp.zeros((C,), jnp.float32),
        "in_proj_w": std * jax.random.normal(ks[0], (C, Dn), jnp.float32),
        "conv_w": std * jax.random.normal(ks[1], (3, 3, Dn), jnp.float32),
        "conv_b": jnp.zeros((Dn,), jnp.float32),
        # x_proj split as [B | C] (128-lane aligned) and dt; fused into one weight at call time
        "x_proj_bc_w": std * jax.random.normal(ks[2], (K, Dn, 2 * S), jnp.float32),
        "x_proj_dt_w": std * jax.random.normal(ks[7], (K, Dn, NH), jnp.float32),
        "dt_bias": 0.1 * jax.random.normal(ks[3], (K, NH), jnp.float32),
        "A_logs": jnp.log(jnp.arange(1, K * NH + 1, dtype=jnp.float32)).reshape(K, NH),
        "Ds": jnp.ones((K, NH), jnp.float32),
        "out_norm_g": jnp.ones((Dn,), jnp.float32), "out_norm_b": jnp.zeros((Dn,), jnp.float32),
        "out_proj_w": std * jax.random.normal(ks[4], (Dn, C), jnp.float32),
        "norm2_g": jnp.ones((C,), jnp.float32), "norm2_b": jnp.zeros((C,), jnp.float32),
        "fc1_w": std * jax.random.normal(ks[5], (C, MLP_RATIO * C), jnp.float32),
        "fc1_b": jnp.zeros((MLP_RATIO * C,), jnp.float32),
        "fc2_w": std * jax.random.normal(ks[6], (MLP_RATIO * C, C), jnp.float32),
        "fc2_b": jnp.zeros((C,), jnp.float32),
    }


def init_params(key, C):
    k1, k2, k3, k4 = jax.random.split(key, 4)
    std = 0.02
    # TODO(synk): combine_linear is defined in the PyTorch __init__ but never used in forward(); omitted.
    return {
        "vss_content": _init_vss_params(k1, C),
        "vss_style": _init_vss_params(k2, C),
        "lin1_w": std * jax.random.normal(k3, (C, FFN_DIM), jnp.float32),
        "lin1_b": jnp.zeros((FFN_DIM,), jnp.float32),
        "lin2_w": std * jax.random.normal(k4, (FFN_DIM, C), jnp.float32),
        "lin2_b": jnp.zeros((C,), jnp.float32),
        "norm1_g": jnp.ones((C,), jnp.float32), "norm1_b": jnp.zeros((C,), jnp.float32),
        "norm2_g": jnp.ones((C,), jnp.float32), "norm2_b": jnp.zeros((C,), jnp.float32),
        "norm3_g": jnp.ones((C,), jnp.float32), "norm3_b": jnp.zeros((C,), jnp.float32),
    }


# ----------------------------- main ------------------------------
if __name__ == "__main__":
    B, H, W, C = 2, 8, 8, HIDDEN
    key = jax.random.PRNGKey(0)
    k1, k2, k3, k4, k5 = jax.random.split(key, 5)
    content = jax.random.normal(k1, (B, H, W, C), jnp.float32)
    style = jax.random.normal(k2, (B, H, W, C), jnp.float32)
    pos = jax.random.normal(k3, (B, H, W, C), jnp.float32)
    query_pos = jax.random.normal(k4, (B, H, W, C), jnp.float32)
    params = init_params(k5, C)

    fwd = jax.jit(vss_decoder_layer)
    out = fwd(content, style, pos, query_pos, params)
    jax.block_until_ready(out)

    assert out.shape == (B, H, W, C) and out.dtype == jnp.float32
    assert bool(jnp.all(jnp.isfinite(out)))
    print("KERNEL_OK")
</pallas_src>

<mosaic_0001>
module attributes {stable_mosaic.version = 11 : i64} {
  func.func @_ln_linear_kernel(%arg0: i32, %arg1: memref<128x32xf32, #tpu.memory_space<vmem>>, %arg2: memref<1x32xf32, #tpu.memory_space<vmem>>, %arg3: memref<1x32xf32, #tpu.memory_space<vmem>>, %arg4: memref<32x64xbf16, #tpu.memory_space<vmem>>, %arg5: memref<1x64xf32, #tpu.memory_space<vmem>>, %arg6: memref<128x64xf32, #tpu.memory_space<vmem>>) attributes {dimension_semantics = [#tpu.dimension_semantics<parallel>], iteration_bounds = array<i64: 1>, scalar_prefetch = 0 : i64, scratch_operands = 0 : i64, tpu.core_type = #tpu.core_type<tc>, window_params = [{transform_indices = @transform_0, window_bounds = array<i64: 128, 32>}, {pipeline_mode = #tpu.pipeline_mode<synchronous>, transform_indices = @transform_1, window_bounds = array<i64: 1, 32>}, {pipeline_mode = #tpu.pipeline_mode<synchronous>, transform_indices = @transform_2, window_bounds = array<i64: 1, 32>}, {pipeline_mode = #tpu.pipeline_mode<synchronous>, transform_indices = @transform_3, window_bounds = array<i64: 32, 64>}, {pipeline_mode = #tpu.pipeline_mode<synchronous>, transform_indices = @transform_4, window_bounds = array<i64: 1, 64>}, {transform_indices = @transform_5, window_bounds = array<i64: 128, 64>}]} {
    %c0 = arith.constant 0 : index
    %c0_0 = arith.constant 0 : index
    %0 = vector.load %arg1[%c0, %c0_0] : memref<128x32xf32, #tpu.memory_space<vmem>>, vector<128x32xf32>
    %c0_1 = arith.constant 0 : index
    %c0_2 = arith.constant 0 : index
    %1 = vector.load %arg2[%c0_1, %c0_2] : memref<1x32xf32, #tpu.memory_space<vmem>>, vector<1x32xf32>
    %c0_3 = arith.constant 0 : index
    %c0_4 = arith.constant 0 : index
    %2 = vector.load %arg3[%c0_3, %c0_4] : memref<1x32xf32, #tpu.memory_space<vmem>>, vector<1x32xf32>
    %cst = arith.constant dense<0.000000e+00> : vector<128xf32>
    %3 = vector.multi_reduction <add>, %0, %cst [1] : vector<128x32xf32> to vector<128xf32>
    %4 = vector.shape_cast %3 : vector<128xf32> to vector<128x1xf32>
    %cst_5 = arith.constant 3.200000e+01 : f32
    %5 = vector.broadcast %cst_5 : f32 to vector<128x1xf32>
    %6 = arith.divf %4, %5 : vector<128x1xf32>
    %7 = vector.broadcast %6 : vector<128x1xf32> to vector<128x32xf32>
    %8 = arith.subf %0, %7 : vector<128x32xf32>
    %9 = arith.mulf %8, %8 : vector<128x32xf32>
    %cst_6 = arith.constant dense<0.000000e+00> : vector<128xf32>
    %10 = vector.multi_reduction <add>, %9, %cst_6 [1] : vector<128x32xf32> to vector<128xf32>
    %11 = vector.shape_cast %10 : vector<128xf32> to vector<128x1xf32>
    %cst_7 = arith.constant 3.200000e+01 : f32
    %12 = vector.broadcast %cst_7 : f32 to vector<128x1xf32>
    %13 = arith.divf %11, %12 : vector<128x1xf32>
    %cst_8 = arith.constant 9.99999974E-6 : f32
    %14 = vector.broadcast %cst_8 : f32 to vector<128x1xf32>
    %15 = arith.addf %13, %14 : vector<128x1xf32>
    %16 = math.rsqrt %15 : vector<128x1xf32>
    %17 = vector.broadcast %16 : vector<128x1xf32> to vector<128x32xf32>
    %18 = arith.mulf %8, %17 : vector<128x32xf32>
    %19 = vector.broadcast %1 : vector<1x32xf32> to vector<128x32xf32>
    %20 = arith.mulf %18, %19 : vector<128x32xf32>
    %21 = vector.broadcast %2 : vector<1x32xf32> to vector<128x32xf32>
    %22 = arith.addf %20, %21 : vector<128x32xf32>
    %23 = arith.truncf %22 : vector<128x32xf32> to vector<128x32xbf16>
    %c0_9 = arith.constant 0 : index
    %c0_10 = arith.constant 0 : index
    %24 = vector.load %arg4[%c0_9, %c0_10] : memref<32x64xbf16, #tpu.memory_space<vmem>>, vector<32x64xbf16>
    %cst_11 = arith.constant dense<0.000000e+00> : vector<128x64xf32>
    %25 = tpu.matmul %23, %24, %cst_11 {dimension_numbers = #tpu.dot_dimension_numbers<[1], [0], [0], [1], [0, 0, 1, 1], [], []>} : vector<128x32xbf16>, vector<32x64xbf16>, vector<128x64xf32> -> vector<128x64xf32>
    %c0_12 = arith.constant 0 : index
    %c0_13 = arith.constant 0 : index
    %26 = vector.load %arg5[%c0_12, %c0_13] : memref<1x64xf32, #tpu.memory_space<vmem>>, vector<1x64xf32>
    %27 = vector.broadcast %26 : vector<1x64xf32> to vector<128x64xf32>
    %28 = arith.addf %25, %27 : vector<128x64xf32>
    %c0_14 = arith.constant 0 : index
    %c0_15 = arith.constant 0 : index
    %29 = vector.load %arg6[%c0_14, %c0_15] : memref<128x64xf32, #tpu.memory_space<vmem>>, vector<128x64xf32>
    tpu.vector_store %arg6[%c0_14, %c0_15], %28 {strides = array<i32>} : memref<128x64xf32, #tpu.memory_space<vmem>>, vector<128x64xf32>,
    return
  }
  func.func @transform_0(%arg0: i32) -> (i32, i32) {
    %c0_i32 = arith.constant 0 : i32
    %c0_i32_0 = arith.constant 0 : i32
    return %arg0, %c0_i32 : i32, i32
  }
  func.func @transform_1(%arg0: i32) -> (i32, i32) {
    %c0_i32 = arith.constant 0 : i32
    %c0_i32_0 = arith.constant 0 : i32
    %c0_i32_1 = arith.constant 0 : i32
    return %c0_i32, %c0_i32_0 : i32, i32
  }
  func.func @transform_2(%arg0: i32) -> (i32, i32) {
    %c0_i32 = arith.constant 0 : i32
    %c0_i32_0 = arith.constant 0 : i32
    %c0_i32_1 = arith.constant 0 : i32
    return %c0_i32, %c0_i32_0 : i32, i32
  }
  func.func @transform_3(%arg0: i32) -> (i32, i32) {
    %c0_i32 = arith.constant 0 : i32
    %c0_i32_0 = arith.constant 0 : i32
    %c0_i32_1 = arith.constant 0 : i32
    return %c0_i32, %c0_i32_0 : i32, i32
  }
  func.func @transform_4(%arg0: i32) -> (i32, i32) {
    %c0_i32 = arith.constant 0 : i32
    %c0_i32_0 = arith.constant 0 : i32
    %c0_i32_1 = arith.constant 0 : i32
    return %c0_i32, %c0_i32_0 : i32, i32
  }
  func.func @transform_5(%arg0: i32) -> (i32, i32) {
    %c0_i32 = arith.constant 0 : i32
    %c0_i32_0 = arith.constant 0 : i32
    return %arg0, %c0_i32 : i32, i32
  }
}

module attributes {stable_mosaic.version = 11 : i64} {
  func.func @_dwconv_gelu_kernel(%arg0: i32, %arg1: i32, %arg2: memref<1x10x10x64xf32, #tpu.memory_space<vmem>>, %arg3: memref<3x3x64xf32, #tpu.memory_space<vmem>>, %arg4: memref<1x64xf32, #tpu.memory_space<vmem>>, %arg5: memref<1x8x8x64xf32, #tpu.memory_space<vmem>>) attributes {dimension_semantics = [#tpu.dimension_semantics<parallel>, #tpu.dimension_semantics<parallel>], iteration_bounds = array<i64: 2, 1>, scalar_prefetch = 0 : i64, scratch_operands = 0 : i64, tpu.core_type = #tpu.core_type<tc>, window_params = [{transform_indices = @transform_0, window_bounds = array<i64: 1, 10, 10, 64>}, {transform_indices = @transform_1, window_bounds = array<i64: 3, 3, 64>}, {transform_indices = @transform_2, window_bounds = array<i64: 1, 64>}, {transform_indices = @transform_3, window_bounds = array<i64: 1, 8, 8, 64>}]} {
    %c0 = arith.constant 0 : index
    %c0_0 = arith.constant 0 : index
    %c0_1 = arith.constant 0 : index
    %c0_2 = arith.constant 0 : index
    %0 = vector.load %arg2[%c0, %c0_0, %c0_1, %c0_2] : memref<1x10x10x64xf32, #tpu.memory_space<vmem>>, vector<1x10x10x64xf32>
    %1 = vector.shape_cast %0 : vector<1x10x10x64xf32> to vector<10x10x64xf32>
    %c0_3 = arith.constant 0 : index
    %c0_4 = arith.constant 0 : index
    %c0_5 = arith.constant 0 : index
    %2 = vector.load %arg3[%c0_3, %c0_4, %c0_5] : memref<3x3x64xf32, #tpu.memory_space<vmem>>, vector<3x3x64xf32>
    %cst = arith.constant 0.000000e+00 : f32
    %3 = vector.broadcast %cst : f32 to vector<8x8x64xf32>
    %4 = vector.extract_strided_slice %1 {offsets = [0, 0, 0], sizes = [8, 8, 64], strides = [1, 1, 1]} : vector<10x10x64xf32> to vector<8x8x64xf32>
    %5 = vector.extract_strided_slice %2 {offsets = [0, 0, 0], sizes = [1, 1, 64], strides = [1, 1, 1]} : vector<3x3x64xf32> to vector<1x1x64xf32>
    %6 = vector.shape_cast %5 : vector<1x1x64xf32> to vector<64xf32>
    %7 = vector.shape_cast %6 : vector<64xf32> to vector<1x1x64xf32>
    %8 = vector.broadcast %7 : vector<1x1x64xf32> to vector<8x8x64xf32>
    %9 = arith.mulf %4, %8 : vector<8x8x64xf32>
    %10 = arith.addf %3, %9 : vector<8x8x64xf32>
    %11 = vector.extract_strided_slice %1 {offsets = [0, 1, 0], sizes = [8, 8, 64], strides = [1, 1, 1]} : vector<10x10x64xf32> to vector<8x8x64xf32>
    %12 = vector.extract_strided_slice %2 {offsets = [0, 1, 0], sizes = [1, 1, 64], strides = [1, 1, 1]} : vector<3x3x64xf32> to vector<1x1x64xf32>
    %13 = vector.shape_cast %12 : vector<1x1x64xf32> to vector<64xf32>
    %14 = vector.shape_cast %13 : vector<64xf32> to vector<1x1x64xf32>
    %15 = vector.broadcast %14 : vector<1x1x64xf32> to vector<8x8x64xf32>
    %16 = arith.mulf %11, %15 : vector<8x8x64xf32>
    %17 = arith.addf %10, %16 : vector<8x8x64xf32>
    %18 = vector.extract_strided_slice %1 {offsets = [0, 2, 0], sizes = [8, 8, 64], strides = [1, 1, 1]} : vector<10x10x64xf32> to vector<8x8x64xf32>
    %19 = vector.extract_strided_slice %2 {offsets = [0, 2, 0], sizes = [1, 1, 64], strides = [1, 1, 1]} : vector<3x3x64xf32> to vector<1x1x64xf32>
    %20 = vector.shape_cast %19 : vector<1x1x64xf32> to vector<64xf32>
    %21 = vector.shape_cast %20 : vector<64xf32> to vector<1x1x64xf32>
    %22 = vector.broadcast %21 : vector<1x1x64xf32> to vector<8x8x64xf32>
    %23 = arith.mulf %18, %22 : vector<8x8x64xf32>
    %24 = arith.addf %17, %23 : vector<8x8x64xf32>
    %25 = vector.extract_strided_slice %1 {offsets = [1, 0, 0], sizes = [8, 8, 64], strides = [1, 1, 1]} : vector<10x10x64xf32> to vector<8x8x64xf32>
    %26 = vector.extract_strided_slice %2 {offsets = [1, 0, 0], sizes = [1, 1, 64], strides = [1, 1, 1]} : vector<3x3x64xf32> to vector<1x1x64xf32>
    %27 = vector.shape_cast %26 : vector<1x1x64xf32> to vector<64xf32>
    %28 = vector.shape_cast %27 : vector<64xf32> to vector<1x1x64xf32>
    %29 = vector.broadcast %28 : vector<1x1x64xf32> to vector<8x8x64xf32>
    %30 = arith.mulf %25, %29 : vector<8x8x64xf32>
    %31 = arith.addf %24, %30 : vector<8x8x64xf32>
    %32 = vector.extract_strided_slice %1 {offsets = [1, 1, 0], sizes = [8, 8, 64], strides = [1, 1, 1]} : vector<10x10x64xf32> to vector<8x8x64xf32>
    %33 = vector.extract_strided_slice %2 {offsets = [1, 1, 0], sizes = [1, 1, 64], strides = [1, 1, 1]} : vector<3x3x64xf32> to vector<1x1x64xf32>
    %34 = vector.shape_cast %33 : vector<1x1x64xf32> to vector<64xf32>
    %35 = vector.shape_cast %34 : vector<64xf32> to vector<1x1x64xf32>
    %36 = vector.broadcast %35 : vector<1x1x64xf32> to vector<8x8x64xf32>
    %37 = arith.mulf %32, %36 : vector<8x8x64xf32>
    %38 = arith.addf %31, %37 : vector<8x8x64xf32>
    %39 = vector.extract_strided_slice %1 {offsets = [1, 2, 0], sizes = [8, 8, 64], strides = [1, 1, 1]} : vector<10x10x64xf32> to vector<8x8x64xf32>
    %40 = vector.extract_strided_slice %2 {offsets = [1, 2, 0], sizes = [1, 1, 64], strides = [1, 1, 1]} : vector<3x3x64xf32> to vector<1x1x64xf32>
    %41 = vector.shape_cast %40 : vector<1x1x64xf32> to vector<64xf32>
    %42 = vector.shape_cast %41 : vector<64xf32> to vector<1x1x64xf32>
    %43 = vector.broadcast %42 : vector<1x1x64xf32> to vector<8x8x64xf32>
    %44 = arith.mulf %39, %43 : vector<8x8x64xf32>
    %45 = arith.addf %38, %44 : vector<8x8x64xf32>
    %46 = vector.extract_strided_slice %1 {offsets = [2, 0, 0], sizes = [8, 8, 64], strides = [1, 1, 1]} : vector<10x10x64xf32> to vector<8x8x64xf32>
    %47 = vector.extract_strided_slice %2 {offsets = [2, 0, 0], sizes = [1, 1, 64], strides = [1, 1, 1]} : vector<3x3x64xf32> to vector<1x1x64xf32>
    %48 = vector.shape_cast %47 : vector<1x1x64xf32> to vector<64xf32>
    %49 = vector.shape_cast %48 : vector<64xf32> to vector<1x1x64xf32>
    %50 = vector.broadcast %49 : vector<1x1x64xf32> to vector<8x8x64xf32>
    %51 = arith.mulf %46, %50 : vector<8x8x64xf32>
    %52 = arith.addf %45, %51 : vector<8x8x64xf32>
    %53 = vector.extract_strided_slice %1 {offsets = [2, 1, 0], sizes = [8, 8, 64], strides = [1, 1, 1]} : vector<10x10x64xf32> to vector<8x8x64xf32>
    %54 = vector.extract_strided_slice %2 {offsets = [2, 1, 0], sizes = [1, 1, 64], strides = [1, 1, 1]} : vector<3x3x64xf32> to vector<1x1x64xf32>
    %55 = vector.shape_cast %54 : vector<1x1x64xf32> to vector<64xf32>
    %56 = vector.shape_cast %55 : vector<64xf32> to vector<1x1x64xf32>
    %57 = vector.broadcast %56 : vector<1x1x64xf32> to vector<8x8x64xf32>
    %58 = arith.mulf %53, %57 : vector<8x8x64xf32>
    %59 = arith.addf %52, %58 : vector<8x8x64xf32>
    %60 = vector.extract_strided_slice %1 {offsets = [2, 2, 0], sizes = [8, 8, 64], strides = [1, 1, 1]} : vector<10x10x64xf32> to vector<8x8x64xf32>
    %61 = vector.extract_strided_slice %2 {offsets = [2, 2, 0], sizes = [1, 1, 64], strides = [1, 1, 1]} : vector<3x3x64xf32> to vector<1x1x64xf32>
    %62 = vector.shape_cast %61 : vector<1x1x64xf32> to vector<64xf32>
    %63 = vector.shape_cast %62 : vector<64xf32> to vector<1x1x64xf32>
    %64 = vector.broadcast %63 : vector<1x1x64xf32> to vector<8x8x64xf32>
    %65 = arith.mulf %60, %64 : vector<8x8x64xf32>
    %66 = arith.addf %59, %65 : vector<8x8x64xf32>
    %c0_6 = arith.constant 0 : index
    %c0_7 = arith.constant 0 : index
    %67 = vector.load %arg4[%c0_6, %c0_7] : memref<1x64xf32, #tpu.memory_space<vmem>>, vector<1x64xf32>
    %68 = vector.shape_cast %67 : vector<1x64xf32> to vector<64xf32>
    %69 = vector.shape_cast %68 : vector<64xf32> to vector<1x1x64xf32>
    %70 = vector.broadcast %69 : vector<1x1x64xf32> to vector<8x8x64xf32>
    %71 = arith.addf %66, %70 : vector<8x8x64xf32>
    %cst_8 = arith.constant 5.000000e-01 : f32
    %72 = vector.broadcast %cst_8 : f32 to vector<8x8x64xf32>
    %73 = arith.mulf %72, %71 : vector<8x8x64xf32>
    %cst_9 = arith.constant 4.471500e-02 : f32
    %74 = vector.broadcast %cst_9 : f32 to vector<8x8x64xf32>
    %75 = arith.mulf %74, %71 : vector<8x8x64xf32>
    %76 = arith.mulf %75, %71 : vector<8x8x64xf32>
    %77 = arith.mulf %76, %71 : vector<8x8x64xf32>
    %78 = arith.addf %71, %77 : vector<8x8x64xf32>
    %cst_10 = arith.constant 0.797884583 : f32
    %79 = vector.broadcast %cst_10 : f32 to vector<8x8x64xf32>
    %80 = arith.mulf %79, %78 : vector<8x8x64xf32>
    %81 = math.tanh %80 : vector<8x8x64xf32>
    %cst_11 = arith.constant 1.000000e+00 : f32
    %82 = vector.broadcast %cst_11 : f32 to vector<8x8x64xf32>
    %83 = arith.addf %82, %81 : vector<8x8x64xf32>
    %84 = arith.mulf %73, %83 : vector<8x8x64xf32>
    %c0_12 = arith.constant 0 : index
    %c0_13 = arith.constant 0 : index
    %c0_14 = arith.constant 0 : index
    %c0_15 = arith.constant 0 : index
    %85 = vector.load %arg5[%c0_12, %c0_13, %c0_14, %c0_15] : memref<1x8x8x64xf32, #tpu.memory_space<vmem>>, vector<1x8x8x64xf32>
    %86 = vector.shape_cast %85 : vector<1x8x8x64xf32> to vector<8x8x64xf32>
    %87 = vector.shape_cast %84 : vector<8x8x64xf32> to vector<1x8x8x64xf32>
    tpu.vector_store %arg5[%c0_12, %c0_13, %c0_14, %c0_15], %87 {strides = array<i32>} : memref<1x8x8x64xf32, #tpu.memory_space<vmem>>, vector<1x8x8x64xf32>,
    return
  }
  func.func @transform_0(%arg0: i32, %arg1: i32) -> (i32, i32, i32, i32) {
    %c0_i32 = arith.constant 0 : i32
    %c0_i32_0 = arith.constant 0 : i32
    %c0_i32_1 = arith.constant 0 : i32
    return %arg0, %c0_i32, %c0_i32_0, %arg1 : i32, i32, i32, i32
  }
  func.func @transform_1(%arg0: i32, %arg1: i32) -> (i32, i32, i32) {
    %c0_i32 = arith.constant 0 : i32
    %c0_i32_0 = arith.constant 0 : i32
    %c0_i32_1 = arith.constant 0 : i32
    return %c0_i32, %c0_i32_0, %arg1 : i32, i32, i32
  }
  func.func @transform_2(%arg0: i32, %arg1: i32) -> (i32, i32) {
    %c0_i32 = arith.constant 0 : i32
    %c0_i32_0 = arith.constant 0 : i32
    return %c0_i32, %arg1 : i32, i32
  }
  func.func @transform_3(%arg0: i32, %arg1: i32) -> (i32, i32, i32, i32) {
    %c0_i32 = arith.constant 0 : i32
    %c0_i32_0 = arith.constant 0 : i32
    %c0_i32_1 = arith.constant 0 : i32
    return %arg0, %c0_i32, %c0_i32_0, %arg1 : i32, i32, i32, i32
  }
}

module attributes {stable_mosaic.version = 11 : i64} {
  func.func @_ssd_kernel(%arg0: i32, %arg1: i32, %arg2: memref<1x1x64x64xf32, #tpu.memory_space<vmem>>, %arg3: memref<1x64x130xbf16, #tpu.memory_space<vmem>>, %arg4: memref<1x64x130xbf16, #tpu.memory_space<vmem>>, %arg5: memref<1x2x64xbf16, #tpu.memory_space<vmem>>, %arg6: memref<1x2x64xbf16, #tpu.memory_space<vmem>>, %arg7: memref<1x3x2xf32, #tpu.memory_space<vmem>>, %arg8: memref<1x3x2xf32, #tpu.memory_space<vmem>>, %arg9: memref<1x2x2xf32, #tpu.memory_space<vmem>>, %arg10: memref<1x2x2xf32, #tpu.memory_space<vmem>>, %arg11: memref<1x1x64x64xf32, #tpu.memory_space<vmem>>, %arg12: memref<64x64xf32, #tpu.memory_space<vmem>>) attributes {dimension_semantics = [#tpu.dimension_semantics<parallel>, #tpu.dimension_semantics<parallel>], iteration_bounds = array<i64: 2, 2>, scalar_prefetch = 0 : i64, scratch_operands = 1 : i64, tpu.core_type = #tpu.core_type<tc>, window_params = [{transform_indices = @transform_0, window_bounds = array<i64: 1, 1, 64, 64>}, {transform_indices = @transform_1, window_bounds = array<i64: 1, 64, 130>}, {transform_indices = @transform_2, window_bounds = array<i64: 1, 64, 130>}, {transform_indices = @transform_3, window_bounds = array<i64: 1, 2, 64>}, {transform_indices = @transform_4, window_bounds = array<i64: 1, 2, 64>}, {transform_indices = @transform_5, window_bounds = array<i64: 1, 3, 2>}, {transform_indices = @transform_6, window_bounds = array<i64: 1, 3, 2>}, {transform_indices = @transform_7, window_bounds = array<i64: 1, 2, 2>}, {transform_indices = @transform_8, window_bounds = array<i64: 1, 2, 2>}, {transform_indices = @transform_9, window_bounds = array<i64: 1, 1, 64, 64>}]} {
    %0 = tpu.iota {dimensions = array<i32: 0>} : vector<64x64xi32>
    %1 = tpu.iota {dimensions = array<i32: 1>} : vector<64x64xi32>
    %2 = arith.cmpi sle, %1, %0 : vector<64x64xi32>
    %3 = arith.extui %2 : vector<64x64xi1> to vector<64x64xi32>
    %4 = arith.sitofp %3 : vector<64x64xi32> to vector<64x64xf32>
    %5 = arith.cmpi sge, %1, %0 : vector<64x64xi32>
    %6 = arith.extui %5 : vector<64x64xi1> to vector<64x64xi32>
    %7 = arith.sitofp %6 : vector<64x64xi32> to vector<64x64xf32>
    %c0 = arith.constant 0 : index
    %c0_0 = arith.constant 0 : index
    %c0_1 = arith.constant 0 : index
    %8 = vector.load %arg7[%c0, %c0_0, %c0_1] : memref<1x3x2xf32, #tpu.memory_space<vmem>>, vector<1x3x2xf32>
    %9 = vector.shape_cast %8 : vector<1x3x2xf32> to vector<3x2xf32>
    %c0_2 = arith.constant 0 : index
    %c0_3 = arith.constant 0 : index
    %c0_4 = arith.constant 0 : index
    %10 = vector.load %arg9[%c0_2, %c0_3, %c0_4] : memref<1x2x2xf32, #tpu.memory_space<vmem>>, vector<1x2x2xf32>
    %11 = vector.shape_cast %10 : vector<1x2x2xf32> to vector<2x2xf32>
    %12 = vector.extract_strided_slice %9 {offsets = [0, 0], sizes = [1, 2], strides = [1, 1]} : vector<3x2xf32> to vector<1x2xf32>
    %13 = vector.extract_strided_slice %9 {offsets = [1, 0], sizes = [1, 2], strides = [1, 1]} : vector<3x2xf32> to vector<1x2xf32>
    %14 = vector.extract_strided_slice %11 {offsets = [0, 0], sizes = [2, 1], strides = [1, 1]} : vector<2x2xf32> to vector<2x1xf32>
    %15 = vector.extract_strided_slice %11 {offsets = [0, 1], sizes = [2, 1], strides = [1, 1]} : vector<2x2xf32> to vector<2x1xf32>
    %cst = arith.constant 0.000000e+00 : f32
    %16 = vector.broadcast %cst : f32 to vector<64x64xf32>
    %c0_5 = arith.constant 0 : index
    %c0_6 = arith.constant 0 : index
    %17 = vector.load %arg12[%c0_5, %c0_6] : memref<64x64xf32, #tpu.memory_space<vmem>>, vector<64x64xf32>
    tpu.vector_store %arg12[%c0_5, %c0_6], %16 {strides = array<i32>} : memref<64x64xf32, #tpu.memory_space<vmem>>, vector<64x64xf32>,
    %c0_i32 = arith.constant 0 : i32
    %c1_i32 = arith.constant 1 : i32
    %18 = arith.muli %c0_i32, %c1_i32 : i32
    %c0_i32_7 = arith.constant 0 : i32
    %19 = arith.addi %c0_i32_7, %18 : i32
    %c64_i32 = arith.constant 64 : i32
    %20 = arith.muli %19, %c64_i32 : i32
    %21 = tpu.assume_multiple %20, 64 : i32
    %c0_8 = arith.constant 0 : index
    %c0_9 = arith.constant 0 : index
    %22 = arith.index_cast %21 : i32 to index
    %c0_10 = arith.constant 0 : index
    %23 = vector.load %arg2[%c0_8, %c0_9, %22, %c0_10] : memref<1x1x64x64xf32, #tpu.memory_space<vmem>>, vector<1x1x64x64xf32>
    %24 = vector.shape_cast %23 : vector<1x1x64x64xf32> to vector<64x64xf32>
    %25 = arith.truncf %24 : vector<64x64xf32> to vector<64x64xbf16>
    %c0_11 = arith.constant 0 : index
    %c0_12 = arith.constant 0 : index
    %c0_13 = arith.constant 0 : index
    %26 = vector.load %arg3[%c0_11, %c0_12, %c0_13] : memref<1x64x130xbf16, #tpu.memory_space<vmem>>, vector<1x64x130xbf16>
    %27 = vector.shape_cast %26 : vector<1x64x130xbf16> to vector<64x130xbf16>
    %cst_14 = arith.constant dense<0.000000e+00> : vector<64x130xf32>
    %28 = tpu.matmul %25, %27, %cst_14 {dimension_numbers = #tpu.dot_dimension_numbers<[1], [0], [0], [1], [0, 0, 1, 1], [], []>} : vector<64x64xbf16>, vector<64x130xbf16>, vector<64x130xf32> -> vector<64x130xf32>
    %29 = vector.extract_strided_slice %28 {offsets = [0, 0], sizes = [64, 64], strides = [1, 1]} : vector<64x130xf32> to vector<64x64xf32>
    %30 = vector.extract_strided_slice %28 {offsets = [0, 64], sizes = [64, 64], strides = [1, 1]} : vector<64x130xf32> to vector<64x64xf32>
    %31 = vector.extract_strided_slice %28 {offsets = [0, 128], sizes = [64, 2], strides = [1, 1]} : vector<64x130xf32> to vector<64x2xf32>
    %32 = vector.broadcast %12 : vector<1x2xf32> to vector<64x2xf32>
    %33 = arith.addf %31, %32 : vector<64x2xf32>
    %cst_15 = arith.constant 2.000000e+01 : f32
    %34 = vector.broadcast %cst_15 : f32 to vector<64x2xf32>
    %35 = arith.cmpf ogt, %33, %34 : vector<64x2xf32>
    %cst_16 = arith.constant 2.000000e+01 : f32
    %36 = vector.broadcast %cst_16 : f32 to vector<64x2xf32>
    %37 = arith.minimumf %33, %36 : vector<64x2xf32>
    %38 = math.exp %37 : vector<64x2xf32>
    %cst_17 = arith.constant 1.000000e+00 : f32
    %39 = vector.broadcast %cst_17 : f32 to vector<64x2xf32>
    %40 = arith.addf %39, %38 : vector<64x2xf32>
    %41 = math.log %40 : vector<64x2xf32>
    %42 = arith.select %35, %33, %41 : vector<64x2xi1>, vector<64x2xf32>
    %43 = vector.broadcast %13 : vector<1x2xf32> to vector<64x2xf32>
    %44 = arith.mulf %42, %43 : vector<64x2xf32>
    %c0_18 = arith.constant 0 : index
    %c0_19 = arith.constant 0 : index
    %c0_20 = arith.constant 0 : index
    %45 = vector.load %arg5[%c0_18, %c0_19, %c0_20] : memref<1x2x64xbf16, #tpu.memory_space<vmem>>, vector<1x2x64xbf16>
    %46 = vector.shape_cast %45 : vector<1x2x64xbf16> to vector<2x64xbf16>
    %cst_21 = arith.constant dense<0.000000e+00> : vector<2x64xf32>
    %47 = tpu.matmul %46, %25, %cst_21 {dimension_numbers = #tpu.dot_dimension_numbers<[1], [1], [0], [0], [0, 0, 1, 0], [], []>} : vector<2x64xbf16>, vector<64x64xbf16>, vector<2x64xf32> -> vector<2x64xf32>
    %48 = vector.broadcast %14 : vector<2x1xf32> to vector<2x64xf32>
    %49 = arith.addf %47, %48 : vector<2x64xf32>
    %cst_22 = arith.constant 2.000000e+01 : f32
    %50 = vector.broadcast %cst_22 : f32 to vector<2x64xf32>
    %51 = arith.cmpf ogt, %49, %50 : vector<2x64xf32>
    %cst_23 = arith.constant 2.000000e+01 : f32
    %52 = vector.broadcast %cst_23 : f32 to vector<2x64xf32>
    %53 = arith.minimumf %49, %52 : vector<2x64xf32>
    %54 = math.exp %53 : vector<2x64xf32>
    %cst_24 = arith.constant 1.000000e+00 : f32
    %55 = vector.broadcast %cst_24 : f32 to vector<2x64xf32>
    %56 = arith.addf %55, %54 : vector<2x64xf32>
    %57 = math.log %56 : vector<2x64xf32>
    %58 = arith.select %51, %49, %57 : vector<2x64xi1>, vector<2x64xf32>
    %59 = vector.broadcast %15 : vector<2x1xf32> to vector<2x64xf32>
    %60 = arith.mulf %58, %59 : vector<2x64xf32>
    %cst_25 = arith.constant dense<0.000000e+00> : vector<64x2xf32>
    %61 = tpu.matmul %4, %44, %cst_25 {dimension_numbers = #tpu.dot_dimension_numbers<[1], [0], [0], [1], [0, 0, 1, 1], [], []>} : vector<64x64xf32>, vector<64x2xf32>, vector<64x2xf32> -> vector<64x2xf32>
    %cst_26 = arith.constant dense<0.000000e+00> : vector<2x64xf32>
    %62 = tpu.matmul %60, %7, %cst_26 {dimension_numbers = #tpu.dot_dimension_numbers<[1], [0], [0], [1], [0, 0, 1, 1], [], []>} : vector<2x64xf32>, vector<64x64xf32>, vector<2x64xf32> -> vector<2x64xf32>
    %cst_27 = arith.constant dense<0.000000e+00> : vector<2xf32>
    %63 = vector.multi_reduction <add>, %44, %cst_27 [0] : vector<64x2xf32> to vector<2xf32>
    %64 = vector.shape_cast %63 : vector<2xf32> to vector<1x2xf32>
    %cst_28 = arith.constant dense<0.000000e+00> : vector<64x64xf32>
    %65 = tpu.matmul %30, %29, %cst_28 {dimension_numbers = #tpu.dot_dimension_numbers<[1], [1], [0], [0], [0, 0, 1, 0], [], []>} : vector<64x64xf32>, vector<64x64xf32>, vector<64x64xf32> -> vector<64x64xf32>
    %c0_29 = arith.constant 0 : index
    %c0_30 = arith.constant 0 : index
    %66 = vector.load %arg12[%c0_29, %c0_30] : memref<64x64xf32, #tpu.memory_space<vmem>>, vector<64x64xf32>
    %cst_31 = arith.constant dense<0.000000e+00> : vector<64x64xf32>
    %67 = tpu.matmul %30, %66, %cst_31 {dimension_numbers = #tpu.dot_dimension_numbers<[1], [0], [0], [1], [0, 0, 1, 1], [], []>} : vector<64x64xf32>, vector<64x64xf32>, vector<64x64xf32> -> vector<64x64xf32>
    %68 = math.exp %61 : vector<64x2xf32>
    %69 = vector.broadcast %64 : vector<1x2xf32> to vector<64x2xf32>
    %70 = arith.subf %69, %61 : vector<64x2xf32>
    %71 = math.exp %70 : vector<64x2xf32>
    %72 = arith.mulf %71, %42 : vector<64x2xf32>
    %73 = math.exp %64 : vector<1x2xf32>
    %74 = vector.extract_strided_slice %24 {offsets = [0, 0], sizes = [64, 32], strides = [1, 1]} : vector<64x64xf32> to vector<64x32xf32>
    %75 = vector.extract_strided_slice %61 {offsets = [0, 0], sizes = [64, 1], strides = [1, 1]} : vector<64x2xf32> to vector<64x1xf32>
    %76 = vector.extract_strided_slice %62 {offsets = [0, 0], sizes = [1, 64], strides = [1, 1]} : vector<2x64xf32> to vector<1x64xf32>
    %77 = vector.broadcast %75 : vector<64x1xf32> to vector<64x64xf32>
    %78 = vector.broadcast %76 : vector<1x64xf32> to vector<64x64xf32>
    %79 = arith.subf %77, %78 : vector<64x64xf32>
    %cst_32 = arith.constant 0.000000e+00 : f32
    %80 = vector.broadcast %cst_32 : f32 to vector<64x64xf32>
    %81 = arith.minimumf %79, %80 : vector<64x64xf32>
    %82 = math.exp %81 : vector<64x64xf32>
    %83 = arith.mulf %82, %4 : vector<64x64xf32>
    %84 = arith.mulf %83, %65 : vector<64x64xf32>
    %85 = vector.extract_strided_slice %42 {offsets = [0, 0], sizes = [64, 1], strides = [1, 1]} : vector<64x2xf32> to vector<64x1xf32>
    %86 = vector.broadcast %85 : vector<64x1xf32> to vector<64x32xf32>
    %87 = arith.mulf %74, %86 : vector<64x32xf32>
    %cst_33 = arith.constant dense<0.000000e+00> : vector<64x32xf32>
    %88 = tpu.matmul %84, %87, %cst_33 {dimension_numbers = #tpu.dot_dimension_numbers<[1], [0], [0], [1], [0, 0, 1, 1], [], []>} : vector<64x64xf32>, vector<64x32xf32>, vector<64x32xf32> -> vector<64x32xf32>
    %89 = vector.extract_strided_slice %68 {offsets = [0, 0], sizes = [64, 1], strides = [1, 1]} : vector<64x2xf32> to vector<64x1xf32>
    %90 = vector.extract_strided_slice %67 {offsets = [0, 0], sizes = [64, 32], strides = [1, 1]} : vector<64x64xf32> to vector<64x32xf32>
    %91 = vector.broadcast %89 : vector<64x1xf32> to vector<64x32xf32>
    %92 = arith.mulf %91, %90 : vector<64x32xf32>
    %93 = arith.addf %88, %92 : vector<64x32xf32>
    %94 = vector.extract_strided_slice %9 {offsets = [2, 0], sizes = [1, 1], strides = [1, 1]} : vector<3x2xf32> to vector<1x1xf32>
    %95 = vector.broadcast %94 : vector<1x1xf32> to vector<64x32xf32>
    %96 = arith.mulf %95, %74 : vector<64x32xf32>
    %97 = arith.addf %93, %96 : vector<64x32xf32>
    %98 = vector.extract_strided_slice %72 {offsets = [0, 0], sizes = [64, 1], strides = [1, 1]} : vector<64x2xf32> to vector<64x1xf32>
    %99 = vector.broadcast %98 : vector<64x1xf32> to vector<64x32xf32>
    %100 = arith.mulf %74, %99 : vector<64x32xf32>
    %101 = vector.extract_strided_slice %73 {offsets = [0, 0], sizes = [1, 1], strides = [1, 1]} : vector<1x2xf32> to vector<1x1xf32>
    %102 = vector.shape_cast %101 : vector<1x1xf32> to vector<1x1xf32>
    %103 = vector.broadcast %102 : vector<1x1xf32> to vector<1x32xf32>
    %104 = vector.extract_strided_slice %24 {offsets = [0, 32], sizes = [64, 32], strides = [1, 1]} : vector<64x64xf32> to vector<64x32xf32>
    %105 = vector.extract_strided_slice %61 {offsets = [0, 1], sizes = [64, 1], strides = [1, 1]} : vector<64x2xf32> to vector<64x1xf32>
    %106 = vector.extract_strided_slice %62 {offsets = [1, 0], sizes = [1, 64], strides = [1, 1]} : vector<2x64xf32> to vector<1x64xf32>
    %107 = vector.broadcast %105 : vector<64x1xf32> to vector<64x64xf32>
    %108 = vector.broadcast %106 : vector<1x64xf32> to vector<64x64xf32>
    %109 = arith.subf %107, %108 : vector<64x64xf32>
    %cst_34 = arith.constant 0.000000e+00 : f32
    %110 = vector.broadcast %cst_34 : f32 to vector<64x64xf32>
    %111 = arith.minimumf %109, %110 : vector<64x64xf32>
    %112 = math.exp %111 : vector<64x64xf32>
    %113 = arith.mulf %112, %4 : vector<64x64xf32>
    %114 = arith.mulf %113, %65 : vector<64x64xf32>
    %115 = vector.extract_strided_slice %42 {offsets = [0, 1], sizes = [64, 1], strides = [1, 1]} : vector<64x2xf32> to vector<64x1xf32>
    %116 = vector.broadcast %115 : vector<64x1xf32> to vector<64x32xf32>
    %117 = arith.mulf %104, %116 : vector<64x32xf32>
    %cst_35 = arith.constant dense<0.000000e+00> : vector<64x32xf32>
    %118 = tpu.matmul %114, %117, %cst_35 {dimension_numbers = #tpu.dot_dimension_numbers<[1], [0], [0], [1], [0, 0, 1, 1], [], []>} : vector<64x64xf32>, vector<64x32xf32>, vector<64x32xf32> -> vector<64x32xf32>
    %119 = vector.extract_strided_slice %68 {offsets = [0, 1], sizes = [64, 1], strides = [1, 1]} : vector<64x2xf32> to vector<64x1xf32>
    %120 = vector.extract_strided_slice %67 {offsets = [0, 32], sizes = [64, 32], strides = [1, 1]} : vector<64x64xf32> to vector<64x32xf32>
    %121 = vector.broadcast %119 : vector<64x1xf32> to vector<64x32xf32>
    %122 = arith.mulf %121, %120 : vector<64x32xf32>
    %123 = arith.addf %118, %122 : vector<64x32xf32>
    %124 = vector.extract_strided_slice %9 {offsets = [2, 1], sizes = [1, 1], strides = [1, 1]} : vector<3x2xf32> to vector<1x1xf32>
    %125 = vector.broadcast %124 : vector<1x1xf32> to vector<64x32xf32>
    %126 = arith.mulf %125, %104 : vector<64x32xf32>
    %127 = arith.addf %123, %126 : vector<64x32xf32>
    %128 = vector.extract_strided_slice %72 {offsets = [0, 1], sizes = [64, 1], strides = [1, 1]} : vector<64x2xf32> to vector<64x1xf32>
    %129 = vector.broadcast %128 : vector<64x1xf32> to vector<64x32xf32>
    %130 = arith.mulf %104, %129 : vector<64x32xf32>
    %131 = vector.extract_strided_slice %73 {offsets = [0, 1], sizes = [1, 1], strides = [1, 1]} : vector<1x2xf32> to vector<1x1xf32>
    %132 = vector.shape_cast %131 : vector<1x1xf32> to vector<1x1xf32>
    %133 = vector.broadcast %132 : vector<1x1xf32> to vector<1x32xf32>
    %134 = tpu.concatenate %97, %127 in 1 : vector<64x32xf32>, vector<64x32xf32> -> vector<64x64xf32>
    %135 = tpu.concatenate %100, %130 in 1 : vector<64x32xf32>, vector<64x32xf32> -> vector<64x64xf32>
    %136 = tpu.concatenate %103, %133 in 1 : vector<1x32xf32>, vector<1x32xf32> -> vector<1x64xf32>
    %137 = vector.broadcast %136 : vector<1x64xf32> to vector<64x64xf32>
    %138 = arith.mulf %66, %137 : vector<64x64xf32>
    %cst_36 = arith.constant dense<0.000000e+00> : vector<64x64xf32>
    %139 = tpu.matmul %29, %135, %cst_36 {dimension_numbers = #tpu.dot_dimension_numbers<[0], [0], [1], [1], [0, 1, 1, 1], [], []>} : vector<64x64xf32>, vector<64x64xf32>, vector<64x64xf32> -> vector<64x64xf32>
    %140 = arith.addf %138, %139 : vector<64x64xf32>
    %c0_37 = arith.constant 0 : index
    %c0_38 = arith.constant 0 : index
    %141 = vector.load %arg12[%c0_37, %c0_38] : memref<64x64xf32, #tpu.memory_space<vmem>>, vector<64x64xf32>
    tpu.vector_store %arg12[%c0_37, %c0_38], %140 {strides = array<i32>} : memref<64x64xf32, #tpu.memory_space<vmem>>, vector<64x64xf32>,
    %c0_39 = arith.constant 0 : index
    %c0_40 = arith.constant 0 : index
    %142 = arith.index_cast %21 : i32 to index
    %c0_41 = arith.constant 0 : index
    %143 = vector.load %arg11[%c0_39, %c0_40, %142, %c0_41] : memref<1x1x64x64xf32, #tpu.memory_space<vmem>>, vector<1x1x64x64xf32>
    %144 = vector.shape_cast %143 : vector<1x1x64x64xf32> to vector<64x64xf32>
    %145 = vector.shape_cast %134 : vector<64x64xf32> to vector<1x1x64x64xf32>
    tpu.vector_store %arg11[%c0_39, %c0_40, %142, %c0_41], %145 {strides = array<i32>} : memref<1x1x64x64xf32, #tpu.memory_space<vmem>>, vector<1x1x64x64xf32>,
    %c1_i32_42 = arith.constant 1 : i32
    %c0_43 = arith.constant 0 : index
    %c0_44 = arith.constant 0 : index
    %c0_45 = arith.constant 0 : index
    %146 = vector.load %arg8[%c0_43, %c0_44, %c0_45] : memref<1x3x2xf32, #tpu.memory_space<vmem>>, vector<1x3x2xf32>
    %147 = vector.shape_cast %146 : vector<1x3x2xf32> to vector<3x2xf32>
    %c0_46 = arith.constant 0 : index
    %c0_47 = arith.constant 0 : index
    %c0_48 = arith.constant 0 : index
    %148 = vector.load %arg10[%c0_46, %c0_47, %c0_48] : memref<1x2x2xf32, #tpu.memory_space<vmem>>, vector<1x2x2xf32>
    %149 = vector.shape_cast %148 : vector<1x2x2xf32> to vector<2x2xf32>
    %150 = vector.extract_strided_slice %147 {offsets = [0, 0], sizes = [1, 2], strides = [1, 1]} : vector<3x2xf32> to vector<1x2xf32>
    %151 = vector.extract_strided_slice %147 {offsets = [1, 0], sizes = [1, 2], strides = [1, 1]} : vector<3x2xf32> to vector<1x2xf32>
    %152 = vector.extract_strided_slice %149 {offsets = [0, 0], sizes = [2, 1], strides = [1, 1]} : vector<2x2xf32> to vector<2x1xf32>
    %153 = vector.extract_strided_slice %149 {offsets = [0, 1], sizes = [2, 1], strides = [1, 1]} : vector<2x2xf32> to vector<2x1xf32>
    %cst_49 = arith.constant 0.000000e+00 : f32
    %154 = vector.broadcast %cst_49 : f32 to vector<64x64xf32>
    %c0_50 = arith.constant 0 : index
    %c0_51 = arith.constant 0 : index
    %155 = vector.load %arg12[%c0_50, %c0_51] : memref<64x64xf32, #tpu.memory_space<vmem>>, vector<64x64xf32>
    tpu.vector_store %arg12[%c0_50, %c0_51], %154 {strides = array<i32>} : memref<64x64xf32, #tpu.memory_space<vmem>>, vector<64x64xf32>,
    %c0_i32_52 = arith.constant 0 : i32
    %c1_i32_53 = arith.constant 1 : i32
    %156 = arith.muli %c0_i32_52, %c1_i32_53 : i32
    %c0_i32_54 = arith.constant 0 : i32
    %157 = arith.addi %c0_i32_54, %156 : i32
    %c0_i32_55 = arith.constant 0 : i32
    %158 = arith.subi %c0_i32_55, %157 : i32
    %c64_i32_56 = arith.constant 64 : i32
    %159 = arith.muli %158, %c64_i32_56 : i32
    %160 = tpu.assume_multiple %159, 64 : i32
    %c0_57 = arith.constant 0 : index
    %c0_58 = arith.constant 0 : index
    %161 = arith.index_cast %160 : i32 to index
    %c0_59 = arith.constant 0 : index
    %162 = vector.load %arg2[%c0_57, %c0_58, %161, %c0_59] : memref<1x1x64x64xf32, #tpu.memory_space<vmem>>, vector<1x1x64x64xf32>
    %163 = vector.shape_cast %162 : vector<1x1x64x64xf32> to vector<64x64xf32>
    %164 = arith.truncf %163 : vector<64x64xf32> to vector<64x64xbf16>
    %c0_60 = arith.constant 0 : index
    %c0_61 = arith.constant 0 : index
    %c0_62 = arith.constant 0 : index
    %165 = vector.load %arg4[%c0_60, %c0_61, %c0_62] : memref<1x64x130xbf16, #tpu.memory_space<vmem>>, vector<1x64x130xbf16>
    %166 = vector.shape_cast %165 : vector<1x64x130xbf16> to vector<64x130xbf16>
    %cst_63 = arith.constant dense<0.000000e+00> : vector<64x130xf32>
    %167 = tpu.matmul %164, %166, %cst_63 {dimension_numbers = #tpu.dot_dimension_numbers<[1], [0], [0], [1], [0, 0, 1, 1], [], []>} : vector<64x64xbf16>, vector<64x130xbf16>, vector<64x130xf32> -> vector<64x130xf32>
    %168 = vector.extract_strided_slice %167 {offsets = [0, 0], sizes = [64, 64], strides = [1, 1]} : vector<64x130xf32> to vector<64x64xf32>
    %169 = vector.extract_strided_slice %167 {offsets = [0, 64], sizes = [64, 64], strides = [1, 1]} : vector<64x130xf32> to vector<64x64xf32>
    %170 = vector.extract_strided_slice %167 {offsets = [0, 128], sizes = [64, 2], strides = [1, 1]} : vector<64x130xf32> to vector<64x2xf32>
    %171 = vector.broadcast %150 : vector<1x2xf32> to vector<64x2xf32>
    %172 = arith.addf %170, %171 : vector<64x2xf32>
    %cst_64 = arith.constant 2.000000e+01 : f32
    %173 = vector.broadcast %cst_64 : f32 to vector<64x2xf32>
    %174 = arith.cmpf ogt, %172, %173 : vector<64x2xf32>
    %cst_65 = arith.constant 2.000000e+01 : f32
    %175 = vector.broadcast %cst_65 : f32 to vector<64x2xf32>
    %176 = arith.minimumf %172, %175 : vector<64x2xf32>
    %177 = math.exp %176 : vector<64x2xf32>
    %cst_66 = arith.constant 1.000000e+00 : f32
    %178 = vector.broadcast %cst_66 : f32 to vector<64x2xf32>
    %179 = arith.addf %178, %177 : vector<64x2xf32>
    %180 = math.log %179 : vector<64x2xf32>
    %181 = arith.select %174, %172, %180 : vector<64x2xi1>, vector<64x2xf32>
    %182 = vector.broadcast %151 : vector<1x2xf32> to vector<64x2xf32>
    %183 = arith.mulf %181, %182 : vector<64x2xf32>
    %c0_67 = arith.constant 0 : index
    %c0_68 = arith.constant 0 : index
    %c0_69 = arith.constant 0 : index
    %184 = vector.load %arg6[%c0_67, %c0_68, %c0_69] : memref<1x2x64xbf16, #tpu.memory_space<vmem>>, vector<1x2x64xbf16>
    %185 = vector.shape_cast %184 : vector<1x2x64xbf16> to vector<2x64xbf16>
    %cst_70 = arith.constant dense<0.000000e+00> : vector<2x64xf32>
    %186 = tpu.matmul %185, %164, %cst_70 {dimension_numbers = #tpu.dot_dimension_numbers<[1], [1], [0], [0], [0, 0, 1, 0], [], []>} : vector<2x64xbf16>, vector<64x64xbf16>, vector<2x64xf32> -> vector<2x64xf32>
    %187 = vector.broadcast %152 : vector<2x1xf32> to vector<2x64xf32>
    %188 = arith.addf %186, %187 : vector<2x64xf32>
    %cst_71 = arith.constant 2.000000e+01 : f32
    %189 = vector.broadcast %cst_71 : f32 to vector<2x64xf32>
    %190 = arith.cmpf ogt, %188, %189 : vector<2x64xf32>
    %cst_72 = arith.constant 2.000000e+01 : f32
    %191 = vector.broadcast %cst_72 : f32 to vector<2x64xf32>
    %192 = arith.minimumf %188, %191 : vector<2x64xf32>
    %193 = math.exp %192 : vector<2x64xf32>
    %cst_73 = arith.constant 1.000000e+00 : f32
    %194 = vector.broadcast %cst_73 : f32 to vector<2x64xf32>
    %195 = arith.addf %194, %193 : vector<2x64xf32>
    %196 = math.log %195 : vector<2x64xf32>
    %197 = arith.select %190, %188, %196 : vector<2x64xi1>, vector<2x64xf32>
    %198 = vector.broadcast %153 : vector<2x1xf32> to vector<2x64xf32>
    %199 = arith.mulf %197, %198 : vector<2x64xf32>
    %cst_74 = arith.constant dense<0.000000e+00> : vector<64x2xf32>
    %200 = tpu.matmul %7, %183, %cst_74 {dimension_numbers = #tpu.dot_dimension_numbers<[1], [0], [0], [1], [0, 0, 1, 1], [], []>} : vector<64x64xf32>, vector<64x2xf32>, vector<64x2xf32> -> vector<64x2xf32>
    %cst_75 = arith.constant dense<0.000000e+00> : vector<2x64xf32>
    %201 = tpu.matmul %199, %4, %cst_75 {dimension_numbers = #tpu.dot_dimension_numbers<[1], [0], [0], [1], [0, 0, 1, 1], [], []>} : vector<2x64xf32>, vector<64x64xf32>, vector<2x64xf32> -> vector<2x64xf32>
    %cst_76 = arith.constant dense<0.000000e+00> : vector<2xf32>
    %202 = vector.multi_reduction <add>, %183, %cst_76 [0] : vector<64x2xf32> to vector<2xf32>
    %203 = vector.shape_cast %202 : vector<2xf32> to vector<1x2xf32>
    %cst_77 = arith.constant dense<0.000000e+00> : vector<64x64xf32>
    %204 = tpu.matmul %169, %168, %cst_77 {dimension_numbers = #tpu.dot_dimension_numbers<[1], [1], [0], [0], [0, 0, 1, 0], [], []>} : vector<64x64xf32>, vector<64x64xf32>, vector<64x64xf32> -> vector<64x64xf32>
    %c0_78 = arith.constant 0 : index
    %c0_79 = arith.constant 0 : index
    %205 = vector.load %arg12[%c0_78, %c0_79] : memref<64x64xf32, #tpu.memory_space<vmem>>, vector<64x64xf32>
    %cst_80 = arith.constant dense<0.000000e+00> : vector<64x64xf32>
    %206 = tpu.matmul %169, %205, %cst_80 {dimension_numbers = #tpu.dot_dimension_numbers<[1], [0], [0], [1], [0, 0, 1, 1], [], []>} : vector<64x64xf32>, vector<64x64xf32>, vector<64x64xf32> -> vector<64x64xf32>
    %207 = math.exp %200 : vector<64x2xf32>
    %208 = vector.broadcast %203 : vector<1x2xf32> to vector<64x2xf32>
    %209 = arith.subf %208, %200 : vector<64x2xf32>
    %210 = math.exp %209 : vector<64x2xf32>
    %211 = arith.mulf %210, %181 : vector<64x2xf32>
    %212 = math.exp %203 : vector<1x2xf32>
    %213 = vector.extract_strided_slice %163 {offsets = [0, 0], sizes = [64, 32], strides = [1, 1]} : vector<64x64xf32> to vector<64x32xf32>
    %214 = vector.extract_strided_slice %200 {offsets = [0, 0], sizes = [64, 1], strides = [1, 1]} : vector<64x2xf32> to vector<64x1xf32>
    %215 = vector.extract_strided_slice %201 {offsets = [0, 0], sizes = [1, 64], strides = [1, 1]} : vector<2x64xf32> to vector<1x64xf32>
    %216 = vector.broadcast %214 : vector<64x1xf32> to vector<64x64xf32>
    %217 = vector.broadcast %215 : vector<1x64xf32> to vector<64x64xf32>
    %218 = arith.subf %216, %217 : vector<64x64xf32>
    %cst_81 = arith.constant 0.000000e+00 : f32
    %219 = vector.broadcast %cst_81 : f32 to vector<64x64xf32>
    %220 = arith.minimumf %218, %219 : vector<64x64xf32>
    %221 = math.exp %220 : vector<64x64xf32>
    %222 = arith.mulf %221, %7 : vector<64x64xf32>
    %223 = arith.mulf %222, %204 : vector<64x64xf32>
    %224 = vector.extract_strided_slice %181 {offsets = [0, 0], sizes = [64, 1], strides = [1, 1]} : vector<64x2xf32> to vector<64x1xf32>
    %225 = vector.broadcast %224 : vector<64x1xf32> to vector<64x32xf32>
    %226 = arith.mulf %213, %225 : vector<64x32xf32>
    %cst_82 = arith.constant dense<0.000000e+00> : vector<64x32xf32>
    %227 = tpu.matmul %223, %226, %cst_82 {dimension_numbers = #tpu.dot_dimension_numbers<[1], [0], [0], [1], [0, 0, 1, 1], [], []>} : vector<64x64xf32>, vector<64x32xf32>, vector<64x32xf32> -> vector<64x32xf32>
    %228 = vector.extract_strided_slice %207 {offsets = [0, 0], sizes = [64, 1], strides = [1, 1]} : vector<64x2xf32> to vector<64x1xf32>
    %229 = vector.extract_strided_slice %206 {offsets = [0, 0], sizes = [64, 32], strides = [1, 1]} : vector<64x64xf32> to vector<64x32xf32>
    %230 = vector.broadcast %228 : vector<64x1xf32> to vector<64x32xf32>
    %231 = arith.mulf %230, %229 : vector<64x32xf32>
    %232 = arith.addf %227, %231 : vector<64x32xf32>
    %233 = vector.extract_strided_slice %147 {offsets = [2, 0], sizes = [1, 1], strides = [1, 1]} : vector<3x2xf32> to vector<1x1xf32>
    %234 = vector.broadcast %233 : vector<1x1xf32> to vector<64x32xf32>
    %235 = arith.mulf %234, %213 : vector<64x32xf32>
    %236 = arith.addf %232, %235 : vector<64x32xf32>
    %237 = vector.extract_strided_slice %211 {offsets = [0, 0], sizes = [64, 1], strides = [1, 1]} : vector<64x2xf32> to vector<64x1xf32>
    %238 = vector.broadcast %237 : vector<64x1xf32> to vector<64x32xf32>
    %239 = arith.mulf %213, %238 : vector<64x32xf32>
    %240 = vector.extract_strided_slice %212 {offsets = [0, 0], sizes = [1, 1], strides = [1, 1]} : vector<1x2xf32> to vector<1x1xf32>
    %241 = vector.shape_cast %240 : vector<1x1xf32> to vector<1x1xf32>
    %242 = vector.broadcast %241 : vector<1x1xf32> to vector<1x32xf32>
    %243 = vector.extract_strided_slice %163 {offsets = [0, 32], sizes = [64, 32], strides = [1, 1]} : vector<64x64xf32> to vector<64x32xf32>
    %244 = vector.extract_strided_slice %200 {offsets = [0, 1], sizes = [64, 1], strides = [1, 1]} : vector<64x2xf32> to vector<64x1xf32>
    %245 = vector.extract_strided_slice %201 {offsets = [1, 0], sizes = [1, 64], strides = [1, 1]} : vector<2x64xf32> to vector<1x64xf32>
    %246 = vector.broadcast %244 : vector<64x1xf32> to vector<64x64xf32>
    %247 = vector.broadcast %245 : vector<1x64xf32> to vector<64x64xf32>
    %248 = arith.subf %246, %247 : vector<64x64xf32>
    %cst_83 = arith.constant 0.000000e+00 : f32
    %249 = vector.broadcast %cst_83 : f32 to vector<64x64xf32>
    %250 = arith.minimumf %248, %249 : vector<64x64xf32>
    %251 = math.exp %250 : vector<64x64xf32>
    %252 = arith.mulf %251, %7 : vector<64x64xf32>
    %253 = arith.mulf %252, %204 : vector<64x64xf32>
    %254 = vector.extract_strided_slice %181 {offsets = [0, 1], sizes = [64, 1], strides = [1, 1]} : vector<64x2xf32> to vector<64x1xf32>
    %255 = vector.broadcast %254 : vector<64x1xf32> to vector<64x32xf32>
    %256 = arith.mulf %243, %255 : vector<64x32xf32>
    %cst_84 = arith.constant dense<0.000000e+00> : vector<64x32xf32>
    %257 = tpu.matmul %253, %256, %cst_84 {dimension_numbers = #tpu.dot_dimension_numbers<[1], [0], [0], [1], [0, 0, 1, 1], [], []>} : vector<64x64xf32>, vector<64x32xf32>, vector<64x32xf32> -> vector<64x32xf32>
    %258 = vector.extract_strided_slice %207 {offsets = [0, 1], sizes = [64, 1], strides = [1, 1]} : vector<64x2xf32> to vector<64x1xf32>
    %259 = vector.extract_strided_slice %206 {offsets = [0, 32], sizes = [64, 32], strides = [1, 1]} : vector<64x64xf32> to vector<64x32xf32>
    %260 = vector.broadcast %258 : vector<64x1xf32> to vector<64x32xf32>
    %261 = arith.mulf %260, %259 : vector<64x32xf32>
    %262 = arith.addf %257, %261 : vector<64x32xf32>
    %263 = vector.extract_strided_slice %147 {offsets = [2, 1], sizes = [1, 1], strides = [1, 1]} : vector<3x2xf32> to vector<1x1xf32>
    %264 = vector.broadcast %263 : vector<1x1xf32> to vector<64x32xf32>
    %265 = arith.mulf %264, %243 : vector<64x32xf32>
    %266 = arith.addf %262, %265 : vector<64x32xf32>
    %267 = vector.extract_strided_slice %211 {offsets = [0, 1], sizes = [64, 1], strides = [1, 1]} : vector<64x2xf32> to vector<64x1xf32>
    %268 = vector.broadcast %267 : vector<64x1xf32> to vector<64x32xf32>
    %269 = arith.mulf %243, %268 : vector<64x32xf32>
    %270 = vector.extract_strided_slice %212 {offsets = [0, 1], sizes = [1, 1], strides = [1, 1]} : vector<1x2xf32> to vector<1x1xf32>
    %271 = vector.shape_cast %270 : vector<1x1xf32> to vector<1x1xf32>
    %272 = vector.broadcast %271 : vector<1x1xf32> to vector<1x32xf32>
    %273 = tpu.concatenate %236, %266 in 1 : vector<64x32xf32>, vector<64x32xf32> -> vector<64x64xf32>
    %274 = tpu.concatenate %239, %269 in 1 : vector<64x32xf32>, vector<64x32xf32> -> vector<64x64xf32>
    %275 = tpu.concatenate %242, %272 in 1 : vector<1x32xf32>, vector<1x32xf32> -> vector<1x64xf32>
    %276 = vector.broadcast %275 : vector<1x64xf32> to vector<64x64xf32>
    %277 = arith.mulf %205, %276 : vector<64x64xf32>
    %cst_85 = arith.constant dense<0.000000e+00> : vector<64x64xf32>
    %278 = tpu.matmul %168, %274, %cst_85 {dimension_numbers = #tpu.dot_dimension_numbers<[0], [0], [1], [1], [0, 1, 1, 1], [], []>} : vector<64x64xf32>, vector<64x64xf32>, vector<64x64xf32> -> vector<64x64xf32>
    %279 = arith.addf %277, %278 : vector<64x64xf32>
    %c0_86 = arith.constant 0 : index
    %c0_87 = arith.constant 0 : index
    %280 = vector.load %arg12[%c0_86, %c0_87] : memref<64x64xf32, #tpu.memory_space<vmem>>, vector<64x64xf32>
    tpu.vector_store %arg12[%c0_86, %c0_87], %279 {strides = array<i32>} : memref<64x64xf32, #tpu.memory_space<vmem>>, vector<64x64xf32>,
    %c0_88 = arith.constant 0 : index
    %c0_89 = arith.constant 0 : index
    %281 = arith.index_cast %160 : i32 to index
    %c0_90 = arith.constant 0 : index
    %282 = vector.load %arg11[%c0_88, %c0_89, %281, %c0_90] : memref<1x1x64x64xf32, #tpu.memory_space<vmem>>, vector<1x1x64x64xf32>
    %283 = vector.shape_cast %282 : vector<1x1x64x64xf32> to vector<64x64xf32>
    %284 = arith.addf %283, %273 : vector<64x64xf32>
    %c0_91 = arith.constant 0 : index
    %c0_92 = arith.constant 0 : index
    %285 = arith.index_cast %160 : i32 to index
    %c0_93 = arith.constant 0 : index
    %286 = vector.load %arg11[%c0_91, %c0_92, %285, %c0_93] : memref<1x1x64x64xf32, #tpu.memory_space<vmem>>, vector<1x1x64x64xf32>
    %287 = vector.shape_cast %286 : vector<1x1x64x64xf32> to vector<64x64xf32>
    %288 = vector.shape_cast %284 : vector<64x64xf32> to vector<1x1x64x64xf32>
    tpu.vector_store %arg11[%c0_91, %c0_92, %285, %c0_93], %288 {strides = array<i32>} : memref<1x1x64x64xf32, #tpu.memory_space<vmem>>, vector<1x1x64x64xf32>,
    %c1_i32_94 = arith.constant 1 : i32
    return
  }
  func.func @transform_0(%arg0: i32, %arg1: i32) -> (i32, i32, i32, i32) {
    %c0_i32 = arith.constant 0 : i32
    %c0_i32_0 = arith.constant 0 : i32
    %c0_i32_1 = arith.constant 0 : i32
    return %arg0, %arg1, %c0_i32, %c0_i32_0 : i32, i32, i32, i32
  }
  func.func @transform_1(%arg0: i32, %arg1: i32) -> (i32, i32, i32) {
    %c0_i32 = arith.constant 0 : i32
    %c0_i32_0 = arith.constant 0 : i32
    %c0_i32_1 = arith.constant 0 : i32
    return %arg1, %c0_i32, %c0_i32_0 : i32, i32, i32
  }
  func.func @transform_2(%arg0: i32, %arg1: i32) -> (i32, i32, i32) {
    %c2_i32 = arith.constant 2 : i32
    %0 = arith.addi %arg1, %c2_i32 : i32
    %c0_i32 = arith.constant 0 : i32
    %c0_i32_0 = arith.constant 0 : i32
    %c0_i32_1 = arith.constant 0 : i32
    return %0, %c0_i32, %c0_i32_0 : i32, i32, i32
  }
  func.func @transform_3(%arg0: i32, %arg1: i32) -> (i32, i32, i32) {
    %c0_i32 = arith.constant 0 : i32
    %c0_i32_0 = arith.constant 0 : i32
    %c0_i32_1 = arith.constant 0 : i32
    return %arg1, %c0_i32, %c0_i32_0 : i32, i32, i32
  }
  func.func @transform_4(%arg0: i32, %arg1: i32) -> (i32, i32, i32) {
    %c2_i32 = arith.constant 2 : i32
    %0 = arith.addi %arg1, %c2_i32 : i32
    %c0_i32 = arith.constant 0 : i32
    %c0_i32_0 = arith.constant 0 : i32
    %c0_i32_1 = arith.constant 0 : i32
    return %0, %c0_i32, %c0_i32_0 : i32, i32, i32
  }
  func.func @transform_5(%arg0: i32, %arg1: i32) -> (i32, i32, i32) {
    %c0_i32 = arith.constant 0 : i32
    %c0_i32_0 = arith.constant 0 : i32
    %c0_i32_1 = arith.constant 0 : i32
    return %arg1, %c0_i32, %c0_i32_0 : i32, i32, i32
  }
  func.func @transform_6(%arg0: i32, %arg1: i32) -> (i32, i32, i32) {
    %c2_i32 = arith.constant 2 : i32
    %0 = arith.addi %arg1, %c2_i32 : i32
    %c0_i32 = arith.constant 0 : i32
    %c0_i32_0 = arith.constant 0 : i32
    %c0_i32_1 = arith.constant 0 : i32
    return %0, %c0_i32, %c0_i32_0 : i32, i32, i32
  }
  func.func @transform_7(%arg0: i32, %arg1: i32) -> (i32, i32, i32) {
    %c0_i32 = arith.constant 0 : i32
    %c0_i32_0 = arith.constant 0 : i32
    %c0_i32_1 = arith.constant 0 : i32
    return %arg1, %c0_i32, %c0_i32_0 : i32, i32, i32
  }
  func.func @transform_8(%arg0: i32, %arg1: i32) -> (i32, i32, i32) {
    %c2_i32 = arith.constant 2 : i32
    %0 = arith.addi %arg1, %c2_i32 : i32
    %c0_i32 = arith.constant 0 : i32
    %c0_i32_0 = arith.constant 0 : i32
    %c0_i32_1 = arith.constant 0 : i32
    return %0, %c0_i32, %c0_i32_0 : i32, i32, i32
  }
  func.func @transform_9(%arg0: i32, %arg1: i32) -> (i32, i32, i32, i32) {
    %c0_i32 = arith.constant 0 : i32
    %c0_i32_0 = arith.constant 0 : i32
    %c0_i32_1 = arith.constant 0 : i32
    return %arg0, %arg1, %c0_i32, %c0_i32_0 : i32, i32, i32, i32
  }
}

module attributes {stable_mosaic.version = 11 : i64} {
  func.func @_ln_mlp_res_kernel(%arg0: i32, %arg1: i32, %arg2: memref<128x32xf32, #tpu.memory_space<vmem>>, %arg3: memref<1x32xf32, #tpu.memory_space<vmem>>, %arg4: memref<1x32xf32, #tpu.memory_space<vmem>>, %arg5: memref<32x128xbf16, #tpu.memory_space<vmem>>, %arg6: memref<1x128xf32, #tpu.memory_space<vmem>>, %arg7: memref<128x32xbf16, #tpu.memory_space<vmem>>, %arg8: memref<1x32xf32, #tpu.memory_space<vmem>>, %arg9: memref<128x32xf32, #tpu.memory_space<vmem>>, %arg10: memref<128x32xf32, #tpu.memory_space<vmem>>) attributes {dimension_semantics = [#tpu.dimension_semantics<parallel>, #tpu.dimension_semantics<arbitrary>], iteration_bounds = array<i64: 1, 1>, scalar_prefetch = 0 : i64, scratch_operands = 1 : i64, tpu.core_type = #tpu.core_type<tc>, window_params = [{transform_indices = @transform_0, window_bounds = array<i64: 128, 32>}, {pipeline_mode = #tpu.pipeline_mode<synchronous>, transform_indices = @transform_1, window_bounds = array<i64: 1, 32>}, {pipeline_mode = #tpu.pipeline_mode<synchronous>, transform_indices = @transform_2, window_bounds = array<i64: 1, 32>}, {transform_indices = @transform_3, window_bounds = array<i64: 32, 128>}, {transform_indices = @transform_4, window_bounds = array<i64: 1, 128>}, {transform_indices = @transform_5, window_bounds = array<i64: 128, 32>}, {pipeline_mode = #tpu.pipeline_mode<synchronous>, transform_indices = @transform_6, window_bounds = array<i64: 1, 32>}, {transform_indices = @transform_7, window_bounds = array<i64: 128, 32>}]} {
    %c0_i32 = arith.constant 0 : i32
    %0 = arith.cmpi eq, %arg1, %c0_i32 : i32
    %1 = arith.extui %0 : i1 to i32
    %c0_i32_0 = arith.constant 0 : i32
    %2 = arith.cmpi ne, %1, %c0_i32_0 : i32
    scf.if %2 {
      %cst_28 = arith.constant 0.000000e+00 : f32
      %54 = vector.broadcast %cst_28 : f32 to vector<128x32xf32>
      %c0_29 = arith.constant 0 : index
      %c0_30 = arith.constant 0 : index
      %55 = vector.load %arg10[%c0_29, %c0_30] : memref<128x32xf32, #tpu.memory_space<vmem>>, vector<128x32xf32>
      tpu.vector_store %arg10[%c0_29, %c0_30], %54 {strides = array<i32>} : memref<128x32xf32, #tpu.memory_space<vmem>>, vector<128x32xf32>,
    } else {
    }
    %c0 = arith.constant 0 : index
    %c0_1 = arith.constant 0 : index
    %3 = vector.load %arg2[%c0, %c0_1] : memref<128x32xf32, #tpu.memory_space<vmem>>, vector<128x32xf32>
    %c0_2 = arith.constant 0 : index
    %c0_3 = arith.constant 0 : index
    %4 = vector.load %arg3[%c0_2, %c0_3] : memref<1x32xf32, #tpu.memory_space<vmem>>, vector<1x32xf32>
    %c0_4 = arith.constant 0 : index
    %c0_5 = arith.constant 0 : index
    %5 = vector.load %arg4[%c0_4, %c0_5] : memref<1x32xf32, #tpu.memory_space<vmem>>, vector<1x32xf32>
    %cst = arith.constant dense<0.000000e+00> : vector<128xf32>
    %6 = vector.multi_reduction <add>, %3, %cst [1] : vector<128x32xf32> to vector<128xf32>
    %7 = vector.shape_cast %6 : vector<128xf32> to vector<128x1xf32>
    %cst_6 = arith.constant 3.200000e+01 : f32
    %8 = vector.broadcast %cst_6 : f32 to vector<128x1xf32>
    %9 = arith.divf %7, %8 : vector<128x1xf32>
    %10 = vector.broadcast %9 : vector<128x1xf32> to vector<128x32xf32>
    %11 = arith.subf %3, %10 : vector<128x32xf32>
    %12 = arith.mulf %11, %11 : vector<128x32xf32>
    %cst_7 = arith.constant dense<0.000000e+00> : vector<128xf32>
    %13 = vector.multi_reduction <add>, %12, %cst_7 [1] : vector<128x32xf32> to vector<128xf32>
    %14 = vector.shape_cast %13 : vector<128xf32> to vector<128x1xf32>
    %cst_8 = arith.constant 3.200000e+01 : f32
    %15 = vector.broadcast %cst_8 : f32 to vector<128x1xf32>
    %16 = arith.divf %14, %15 : vector<128x1xf32>
    %cst_9 = arith.constant 9.99999974E-6 : f32
    %17 = vector.broadcast %cst_9 : f32 to vector<128x1xf32>
    %18 = arith.addf %16, %17 : vector<128x1xf32>
    %19 = math.rsqrt %18 : vector<128x1xf32>
    %20 = vector.broadcast %19 : vector<128x1xf32> to vector<128x32xf32>
    %21 = arith.mulf %11, %20 : vector<128x32xf32>
    %22 = vector.broadcast %4 : vector<1x32xf32> to vector<128x32xf32>
    %23 = arith.mulf %21, %22 : vector<128x32xf32>
    %24 = vector.broadcast %5 : vector<1x32xf32> to vector<128x32xf32>
    %25 = arith.addf %23, %24 : vector<128x32xf32>
    %26 = arith.truncf %25 : vector<128x32xf32> to vector<128x32xbf16>
    %c0_10 = arith.constant 0 : index
    %c0_11 = arith.constant 0 : index
    %27 = vector.load %arg5[%c0_10, %c0_11] : memref<32x128xbf16, #tpu.memory_space<vmem>>, vector<32x128xbf16>
    %cst_12 = arith.constant dense<0.000000e+00> : vector<128x128xf32>
    %28 = tpu.matmul %26, %27, %cst_12 {dimension_numbers = #tpu.dot_dimension_numbers<[1], [0], [0], [1], [0, 0, 1, 1], [], []>} : vector<128x32xbf16>, vector<32x128xbf16>, vector<128x128xf32> -> vector<128x128xf32>
    %c0_13 = arith.constant 0 : index
    %c0_14 = arith.constant 0 : index
    %29 = vector.load %arg6[%c0_13, %c0_14] : memref<1x128xf32, #tpu.memory_space<vmem>>, vector<1x128xf32>
    %30 = vector.broadcast %29 : vector<1x128xf32> to vector<128x128xf32>
    %31 = arith.addf %28, %30 : vector<128x128xf32>
    %cst_15 = arith.constant 5.000000e-01 : f32
    %32 = vector.broadcast %cst_15 : f32 to vector<128x128xf32>
    %33 = arith.mulf %32, %31 : vector<128x128xf32>
    %cst_16 = arith.constant 4.471500e-02 : f32
    %34 = vector.broadcast %cst_16 : f32 to vector<128x128xf32>
    %35 = arith.mulf %34, %31 : vector<128x128xf32>
    %36 = arith.mulf %35, %31 : vector<128x128xf32>
    %37 = arith.mulf %36, %31 : vector<128x128xf32>
    %38 = arith.addf %31, %37 : vector<128x128xf32>
    %cst_17 = arith.constant 0.797884583 : f32
    %39 = vector.broadcast %cst_17 : f32 to vector<128x128xf32>
    %40 = arith.mulf %39, %38 : vector<128x128xf32>
    %41 = math.tanh %40 : vector<128x128xf32>
    %cst_18 = arith.constant 1.000000e+00 : f32
    %42 = vector.broadcast %cst_18 : f32 to vector<128x128xf32>
    %43 = arith.addf %42, %41 : vector<128x128xf32>
    %44 = arith.mulf %33, %43 : vector<128x128xf32>
    %c0_19 = arith.constant 0 : index
    %c0_20 = arith.constant 0 : index
    %45 = vector.load %arg10[%c0_19, %c0_20] : memref<128x32xf32, #tpu.memory_space<vmem>>, vector<128x32xf32>
    %46 = arith.truncf %44 : vector<128x128xf32> to vector<128x128xbf16>
    %c0_21 = arith.constant 0 : index
    %c0_22 = arith.constant 0 : index
    %47 = vector.load %arg7[%c0_21, %c0_22] : memref<128x32xbf16, #tpu.memory_space<vmem>>, vector<128x32xbf16>
    %cst_23 = arith.constant dense<0.000000e+00> : vector<128x32xf32>
    %48 = tpu.matmul %46, %47, %cst_23 {dimension_numbers = #tpu.dot_dimension_numbers<[1], [0], [0], [1], [0, 0, 1, 1], [], []>} : vector<128x128xbf16>, vector<128x32xbf16>, vector<128x32xf32> -> vector<128x32xf32>
    %49 = arith.addf %45, %48 : vector<128x32xf32>
    %c0_24 = arith.constant 0 : index
    %c0_25 = arith.constant 0 : index
    %50 = vector.load %arg10[%c0_24, %c0_25] : memref<128x32xf32, #tpu.memory_space<vmem>>, vector<128x32xf32>
    tpu.vector_store %arg10[%c0_24, %c0_25], %49 {strides = array<i32>} : memref<128x32xf32, #tpu.memory_space<vmem>>, vector<128x32xf32>,
    %c0_i32_26 = arith.constant 0 : i32
    %51 = arith.cmpi eq, %arg1, %c0_i32_26 : i32
    %52 = arith.extui %51 : i1 to i32
    %c0_i32_27 = arith.constant 0 : i32
    %53 = arith.cmpi ne, %52, %c0_i32_27 : i32
    scf.if %53 {
      %c0_28 = arith.constant 0 : index
      %c0_29 = arith.constant 0 : index
      %54 = vector.load %arg10[%c0_28, %c0_29] : memref<128x32xf32, #tpu.memory_space<vmem>>, vector<128x32xf32>
      %55 = arith.addf %3, %54 : vector<128x32xf32>
      %c0_30 = arith.constant 0 : index
      %c0_31 = arith.constant 0 : index
      %56 = vector.load %arg8[%c0_30, %c0_31] : memref<1x32xf32, #tpu.memory_space<vmem>>, vector<1x32xf32>
      %57 = vector.broadcast %56 : vector<1x32xf32> to vector<128x32xf32>
      %58 = arith.addf %55, %57 : vector<128x32xf32>
      %c0_32 = arith.constant 0 : index
      %c0_33 = arith.constant 0 : index
      %59 = vector.load %arg9[%c0_32, %c0_33] : memref<128x32xf32, #tpu.memory_space<vmem>>, vector<128x32xf32>
      tpu.vector_store %arg9[%c0_32, %c0_33], %58 {strides = array<i32>} : memref<128x32xf32, #tpu.memory_space<vmem>>, vector<128x32xf32>,
    } else {
    }
    return
  }
  func.func @transform_0(%arg0: i32, %arg1: i32) -> (i32, i32) {
    %c0_i32 = arith.constant 0 : i32
    %c0_i32_0 = arith.constant 0 : i32
    return %arg0, %c0_i32 : i32, i32
  }
  func.func @transform_1(%arg0: i32, %arg1: i32) -> (i32, i32) {
    %c0_i32 = arith.constant 0 : i32
    %c0_i32_0 = arith.constant 0 : i32
    %c0_i32_1 = arith.constant 0 : i32
    return %c0_i32, %c0_i32_0 : i32, i32
  }
  func.func @transform_2(%arg0: i32, %arg1: i32) -> (i32, i32) {
    %c0_i32 = arith.constant 0 : i32
    %c0_i32_0 = arith.constant 0 : i32
    %c0_i32_1 = arith.constant 0 : i32
    return %c0_i32, %c0_i32_0 : i32, i32
  }
  func.func @transform_3(%arg0: i32, %arg1: i32) -> (i32, i32) {
    %c0_i32 = arith.constant 0 : i32
    %c0_i32_0 = arith.constant 0 : i32
    return %c0_i32, %arg1 : i32, i32
  }
  func.func @transform_4(%arg0: i32, %arg1: i32) -> (i32, i32) {
    %c0_i32 = arith.constant 0 : i32
    %c0_i32_0 = arith.constant 0 : i32
    return %c0_i32, %arg1 : i32, i32
  }
  func.func @transform_5(%arg0: i32, %arg1: i32) -> (i32, i32) {
    %c0_i32 = arith.constant 0 : i32
    %c0_i32_0 = arith.constant 0 : i32
    return %arg1, %c0_i32 : i32, i32
  }
  func.func @transform_6(%arg0: i32, %arg1: i32) -> (i32, i32) {
    %c0_i32 = arith.constant 0 : i32
    %c0_i32_0 = arith.constant 0 : i32
    %c0_i32_1 = arith.constant 0 : i32
    return %c0_i32, %c0_i32_0 : i32, i32
  }
  func.func @transform_7(%arg0: i32, %arg1: i32) -> (i32, i32) {
    %c0_i32 = arith.constant 0 : i32
    %c0_i32_0 = arith.constant 0 : i32
    return %arg0, %c0_i32 : i32, i32
  }
}

module attributes {stable_mosaic.version = 11 : i64} {
  func.func @_add_ln_kernel(%arg0: i32, %arg1: memref<128x32xf32, #tpu.memory_space<vmem>>, %arg2: memref<128x32xf32, #tpu.memory_space<vmem>>, %arg3: memref<1x32xf32, #tpu.memory_space<vmem>>, %arg4: memref<1x32xf32, #tpu.memory_space<vmem>>, %arg5: memref<128x32xf32, #tpu.memory_space<vmem>>) attributes {dimension_semantics = [#tpu.dimension_semantics<parallel>], iteration_bounds = array<i64: 1>, scalar_prefetch = 0 : i64, scratch_operands = 0 : i64, tpu.core_type = #tpu.core_type<tc>, window_params = [{transform_indices = @transform_0, window_bounds = array<i64: 128, 32>}, {transform_indices = @transform_1, window_bounds = array<i64: 128, 32>}, {pipeline_mode = #tpu.pipeline_mode<synchronous>, transform_indices = @transform_2, window_bounds = array<i64: 1, 32>}, {pipeline_mode = #tpu.pipeline_mode<synchronous>, transform_indices = @transform_3, window_bounds = array<i64: 1, 32>}, {transform_indices = @transform_4, window_bounds = array<i64: 128, 32>}]} {
    %c0 = arith.constant 0 : index
    %c0_0 = arith.constant 0 : index
    %0 = vector.load %arg1[%c0, %c0_0] : memref<128x32xf32, #tpu.memory_space<vmem>>, vector<128x32xf32>
    %c0_1 = arith.constant 0 : index
    %c0_2 = arith.constant 0 : index
    %1 = vector.load %arg2[%c0_1, %c0_2] : memref<128x32xf32, #tpu.memory_space<vmem>>, vector<128x32xf32>
    %2 = arith.addf %0, %1 : vector<128x32xf32>
    %c0_3 = arith.constant 0 : index
    %c0_4 = arith.constant 0 : index
    %3 = vector.load %arg3[%c0_3, %c0_4] : memref<1x32xf32, #tpu.memory_space<vmem>>, vector<1x32xf32>
    %c0_5 = arith.constant 0 : index
    %c0_6 = arith.constant 0 : index
    %4 = vector.load %arg4[%c0_5, %c0_6] : memref<1x32xf32, #tpu.memory_space<vmem>>, vector<1x32xf32>
    %cst = arith.constant dense<0.000000e+00> : vector<128xf32>
    %5 = vector.multi_reduction <add>, %2, %cst [1] : vector<128x32xf32> to vector<128xf32>
    %6 = vector.shape_cast %5 : vector<128xf32> to vector<128x1xf32>
    %cst_7 = arith.constant 3.200000e+01 : f32
    %7 = vector.broadcast %cst_7 : f32 to vector<128x1xf32>
    %8 = arith.divf %6, %7 : vector<128x1xf32>
    %9 = vector.broadcast %8 : vector<128x1xf32> to vector<128x32xf32>
    %10 = arith.subf %2, %9 : vector<128x32xf32>
    %11 = arith.mulf %10, %10 : vector<128x32xf32>
    %cst_8 = arith.constant dense<0.000000e+00> : vector<128xf32>
    %12 = vector.multi_reduction <add>, %11, %cst_8 [1] : vector<128x32xf32> to vector<128xf32>
    %13 = vector.shape_cast %12 : vector<128xf32> to vector<128x1xf32>
    %cst_9 = arith.constant 3.200000e+01 : f32
    %14 = vector.broadcast %cst_9 : f32 to vector<128x1xf32>
    %15 = arith.divf %13, %14 : vector<128x1xf32>
    %cst_10 = arith.constant 9.99999974E-6 : f32
    %16 = vector.broadcast %cst_10 : f32 to vector<128x1xf32>
    %17 = arith.addf %15, %16 : vector<128x1xf32>
    %18 = math.rsqrt %17 : vector<128x1xf32>
    %19 = vector.broadcast %18 : vector<128x1xf32> to vector<128x32xf32>
    %20 = arith.mulf %10, %19 : vector<128x32xf32>
    %21 = vector.broadcast %3 : vector<1x32xf32> to vector<128x32xf32>
    %22 = arith.mulf %20, %21 : vector<128x32xf32>
    %23 = vector.broadcast %4 : vector<1x32xf32> to vector<128x32xf32>
    %24 = arith.addf %22, %23 : vector<128x32xf32>
    %c0_11 = arith.constant 0 : index
    %c0_12 = arith.constant 0 : index
    %25 = vector.load %arg5[%c0_11, %c0_12] : memref<128x32xf32, #tpu.memory_space<vmem>>, vector<128x32xf32>
    tpu.vector_store %arg5[%c0_11, %c0_12], %24 {strides = array<i32>} : memref<128x32xf32, #tpu.memory_space<vmem>>, vector<128x32xf32>,
    return
  }
  func.func @transform_0(%arg0: i32) -> (i32, i32) {
    %c0_i32 = arith.constant 0 : i32
    %c0_i32_0 = arith.constant 0 : i32
    return %arg0, %c0_i32 : i32, i32
  }
  func.func @transform_1(%arg0: i32) -> (i32, i32) {
    %c0_i32 = arith.constant 0 : i32
    %c0_i32_0 = arith.constant 0 : i32
    return %arg0, %c0_i32 : i32, i32
  }
  func.func @transform_2(%arg0: i32) -> (i32, i32) {
    %c0_i32 = arith.constant 0 : i32
    %c0_i32_0 = arith.constant 0 : i32
    %c0_i32_1 = arith.constant 0 : i32
    return %c0_i32, %c0_i32_0 : i32, i32
  }
  func.func @transform_3(%arg0: i32) -> (i32, i32) {
    %c0_i32 = arith.constant 0 : i32
    %c0_i32_0 = arith.constant 0 : i32
    %c0_i32_1 = arith.constant 0 : i32
    return %c0_i32, %c0_i32_0 : i32, i32
  }
  func.func @transform_4(%arg0: i32) -> (i32, i32) {
    %c0_i32 = arith.constant 0 : i32
    %c0_i32_0 = arith.constant 0 : i32
    return %arg0, %c0_i32 : i32, i32
  }
}

module attributes {stable_mosaic.version = 11 : i64} {
  func.func @_ln_linear_kernel(%arg0: i32, %arg1: memref<128x64xf32, #tpu.memory_space<vmem>>, %arg2: memref<1x64xf32, #tpu.memory_space<vmem>>, %arg3: memref<1x64xf32, #tpu.memory_space<vmem>>, %arg4: memref<64x32xbf16, #tpu.memory_space<vmem>>, %arg5: memref<1x32xf32, #tpu.memory_space<vmem>>, %arg6: memref<128x32xf32, #tpu.memory_space<vmem>>, %arg7: memref<128x32xf32, #tpu.memory_space<vmem>>) attributes {dimension_semantics = [#tpu.dimension_semantics<parallel>], iteration_bounds = array<i64: 1>, scalar_prefetch = 0 : i64, scratch_operands = 0 : i64, tpu.core_type = #tpu.core_type<tc>, window_params = [{transform_indices = @transform_0, window_bounds = array<i64: 128, 64>}, {pipeline_mode = #tpu.pipeline_mode<synchronous>, transform_indices = @transform_1, window_bounds = array<i64: 1, 64>}, {pipeline_mode = #tpu.pipeline_mode<synchronous>, transform_indices = @transform_2, window_bounds = array<i64: 1, 64>}, {pipeline_mode = #tpu.pipeline_mode<synchronous>, transform_indices = @transform_3, window_bounds = array<i64: 64, 32>}, {pipeline_mode = #tpu.pipeline_mode<synchronous>, transform_indices = @transform_4, window_bounds = array<i64: 1, 32>}, {transform_indices = @transform_5, window_bounds = array<i64: 128, 32>}, {transform_indices = @transform_6, window_bounds = array<i64: 128, 32>}]} {
    %c0 = arith.constant 0 : index
    %c0_0 = arith.constant 0 : index
    %0 = vector.load %arg1[%c0, %c0_0] : memref<128x64xf32, #tpu.memory_space<vmem>>, vector<128x64xf32>
    %c0_1 = arith.constant 0 : index
    %c0_2 = arith.constant 0 : index
    %1 = vector.load %arg2[%c0_1, %c0_2] : memref<1x64xf32, #tpu.memory_space<vmem>>, vector<1x64xf32>
    %c0_3 = arith.constant 0 : index
    %c0_4 = arith.constant 0 : index
    %2 = vector.load %arg3[%c0_3, %c0_4] : memref<1x64xf32, #tpu.memory_space<vmem>>, vector<1x64xf32>
    %cst = arith.constant dense<0.000000e+00> : vector<128xf32>
    %3 = vector.multi_reduction <add>, %0, %cst [1] : vector<128x64xf32> to vector<128xf32>
    %4 = vector.shape_cast %3 : vector<128xf32> to vector<128x1xf32>
    %cst_5 = arith.constant 6.400000e+01 : f32
    %5 = vector.broadcast %cst_5 : f32 to vector<128x1xf32>
    %6 = arith.divf %4, %5 : vector<128x1xf32>
    %7 = vector.broadcast %6 : vector<128x1xf32> to vector<128x64xf32>
    %8 = arith.subf %0, %7 : vector<128x64xf32>
    %9 = arith.mulf %8, %8 : vector<128x64xf32>
    %cst_6 = arith.constant dense<0.000000e+00> : vector<128xf32>
    %10 = vector.multi_reduction <add>, %9, %cst_6 [1] : vector<128x64xf32> to vector<128xf32>
    %11 = vector.shape_cast %10 : vector<128xf32> to vector<128x1xf32>
    %cst_7 = arith.constant 6.400000e+01 : f32
    %12 = vector.broadcast %cst_7 : f32 to vector<128x1xf32>
    %13 = arith.divf %11, %12 : vector<128x1xf32>
    %cst_8 = arith.constant 9.99999974E-6 : f32
    %14 = vector.broadcast %cst_8 : f32 to vector<128x1xf32>
    %15 = arith.addf %13, %14 : vector<128x1xf32>
    %16 = math.rsqrt %15 : vector<128x1xf32>
    %17 = vector.broadcast %16 : vector<128x1xf32> to vector<128x64xf32>
    %18 = arith.mulf %8, %17 : vector<128x64xf32>
    %19 = vector.broadcast %1 : vector<1x64xf32> to vector<128x64xf32>
    %20 = arith.mulf %18, %19 : vector<128x64xf32>
    %21 = vector.broadcast %2 : vector<1x64xf32> to vector<128x64xf32>
    %22 = arith.addf %20, %21 : vector<128x64xf32>
    %23 = arith.truncf %22 : vector<128x64xf32> to vector<128x64xbf16>
    %c0_9 = arith.constant 0 : index
    %c0_10 = arith.constant 0 : index
    %24 = vector.load %arg4[%c0_9, %c0_10] : memref<64x32xbf16, #tpu.memory_space<vmem>>, vector<64x32xbf16>
    %cst_11 = arith.constant dense<0.000000e+00> : vector<128x32xf32>
    %25 = tpu.matmul %23, %24, %cst_11 {dimension_numbers = #tpu.dot_dimension_numbers<[1], [0], [0], [1], [0, 0, 1, 1], [], []>} : vector<128x64xbf16>, vector<64x32xbf16>, vector<128x32xf32> -> vector<128x32xf32>
    %c0_12 = arith.constant 0 : index
    %c0_13 = arith.constant 0 : index
    %26 = vector.load %arg5[%c0_12, %c0_13] : memref<1x32xf32, #tpu.memory_space<vmem>>, vector<1x32xf32>
    %27 = vector.broadcast %26 : vector<1x32xf32> to vector<128x32xf32>
    %28 = arith.addf %25, %27 : vector<128x32xf32>
    %c0_14 = arith.constant 0 : index
    %c0_15 = arith.constant 0 : index
    %29 = vector.load %arg6[%c0_14, %c0_15] : memref<128x32xf32, #tpu.memory_space<vmem>>, vector<128x32xf32>
    %30 = arith.addf %28, %29 : vector<128x32xf32>
    %c0_16 = arith.constant 0 : index
    %c0_17 = arith.constant 0 : index
    %31 = vector.load %arg7[%c0_16, %c0_17] : memref<128x32xf32, #tpu.memory_space<vmem>>, vector<128x32xf32>
    tpu.vector_store %arg7[%c0_16, %c0_17], %30 {strides = array<i32>} : memref<128x32xf32, #tpu.memory_space<vmem>>, vector<128x32xf32>,
    return
  }
  func.func @transform_0(%arg0: i32) -> (i32, i32) {
    %c0_i32 = arith.constant 0 : i32
    %c0_i32_0 = arith.constant 0 : i32
    return %arg0, %c0_i32 : i32, i32
  }
  func.func @transform_1(%arg0: i32) -> (i32, i32) {
    %c0_i32 = arith.constant 0 : i32
    %c0_i32_0 = arith.constant 0 : i32
    %c0_i32_1 = arith.constant 0 : i32
    return %c0_i32, %c0_i32_0 : i32, i32
  }
  func.func @transform_2(%arg0: i32) -> (i32, i32) {
    %c0_i32 = arith.constant 0 : i32
    %c0_i32_0 = arith.constant 0 : i32
    %c0_i32_1 = arith.constant 0 : i32
    return %c0_i32, %c0_i32_0 : i32, i32
  }
  func.func @transform_3(%arg0: i32) -> (i32, i32) {
    %c0_i32 = arith.constant 0 : i32
    %c0_i32_0 = arith.constant 0 : i32
    %c0_i32_1 = arith.constant 0 : i32
    return %c0_i32, %c0_i32_0 : i32, i32
  }
  func.func @transform_4(%arg0: i32) -> (i32, i32) {
    %c0_i32 = arith.constant 0 : i32
    %c0_i32_0 = arith.constant 0 : i32
    %c0_i32_1 = arith.constant 0 : i32
    return %c0_i32, %c0_i32_0 : i32, i32
  }
  func.func @transform_5(%arg0: i32) -> (i32, i32) {
    %c0_i32 = arith.constant 0 : i32
    %c0_i32_0 = arith.constant 0 : i32
    return %arg0, %c0_i32 : i32, i32
  }
  func.func @transform_6(%arg0: i32) -> (i32, i32) {
    %c0_i32 = arith.constant 0 : i32
    %c0_i32_0 = arith.constant 0 : i32
    return %arg0, %c0_i32 : i32, i32
  }
}

module attributes {stable_mosaic.version = 11 : i64} {
  func.func @_add_mlp_ln_kernel(%arg0: i32, %arg1: i32, %arg2: memref<128x32xf32, #tpu.memory_space<vmem>>, %arg3: memref<128x32xf32, #tpu.memory_space<vmem>>, %arg4: memref<32x512xbf16, #tpu.memory_space<vmem>>, %arg5: memref<1x512xf32, #tpu.memory_space<vmem>>, %arg6: memref<512x32xbf16, #tpu.memory_space<vmem>>, %arg7: memref<1x32xf32, #tpu.memory_space<vmem>>, %arg8: memref<1x32xf32, #tpu.memory_space<vmem>>, %arg9: memref<1x32xf32, #tpu.memory_space<vmem>>, %arg10: memref<128x32xf32, #tpu.memory_space<vmem>>, %arg11: memref<128x32xf32, #tpu.memory_space<vmem>>) attributes {dimension_semantics = [#tpu.dimension_semantics<parallel>, #tpu.dimension_semantics<arbitrary>], iteration_bounds = array<i64: 1, 4>, scalar_prefetch = 0 : i64, scratch_operands = 1 : i64, tpu.core_type = #tpu.core_type<tc>, window_params = [{transform_indices = @transform_0, window_bounds = array<i64: 128, 32>}, {transform_indices = @transform_1, window_bounds = array<i64: 128, 32>}, {transform_indices = @transform_2, window_bounds = array<i64: 32, 512>}, {transform_indices = @transform_3, window_bounds = array<i64: 1, 512>}, {transform_indices = @transform_4, window_bounds = array<i64: 512, 32>}, {pipeline_mode = #tpu.pipeline_mode<synchronous>, transform_indices = @transform_5, window_bounds = array<i64: 1, 32>}, {pipeline_mode = #tpu.pipeline_mode<synchronous>, transform_indices = @transform_6, window_bounds = array<i64: 1, 32>}, {pipeline_mode = #tpu.pipeline_mode<synchronous>, transform_indices = @transform_7, window_bounds = array<i64: 1, 32>}, {transform_indices = @transform_8, window_bounds = array<i64: 128, 32>}]} {
    %c0_i32 = arith.constant 0 : i32
    %0 = arith.cmpi eq, %arg1, %c0_i32 : i32
    %1 = arith.extui %0 : i1 to i32
    %c0_i32_0 = arith.constant 0 : i32
    %2 = arith.cmpi ne, %1, %c0_i32_0 : i32
    scf.if %2 {
      %cst_20 = arith.constant 0.000000e+00 : f32
      %34 = vector.broadcast %cst_20 : f32 to vector<128x32xf32>
      %c0_21 = arith.constant 0 : index
      %c0_22 = arith.constant 0 : index
      %35 = vector.load %arg11[%c0_21, %c0_22] : memref<128x32xf32, #tpu.memory_space<vmem>>, vector<128x32xf32>
      tpu.vector_store %arg11[%c0_21, %c0_22], %34 {strides = array<i32>} : memref<128x32xf32, #tpu.memory_space<vmem>>, vector<128x32xf32>,
    } else {
    }
    %c0 = arith.constant 0 : index
    %c0_1 = arith.constant 0 : index
    %3 = vector.load %arg2[%c0, %c0_1] : memref<128x32xf32, #tpu.memory_space<vmem>>, vector<128x32xf32>
    %c0_2 = arith.constant 0 : index
    %c0_3 = arith.constant 0 : index
    %4 = vector.load %arg3[%c0_2, %c0_3] : memref<128x32xf32, #tpu.memory_space<vmem>>, vector<128x32xf32>
    %5 = arith.addf %3, %4 : vector<128x32xf32>
    %6 = arith.truncf %5 : vector<128x32xf32> to vector<128x32xbf16>
    %c0_4 = arith.constant 0 : index
    %c0_5 = arith.constant 0 : index
    %7 = vector.load %arg4[%c0_4, %c0_5] : memref<32x512xbf16, #tpu.memory_space<vmem>>, vector<32x512xbf16>
    %cst = arith.constant dense<0.000000e+00> : vector<128x512xf32>
    %8 = tpu.matmul %6, %7, %cst {dimension_numbers = #tpu.dot_dimension_numbers<[1], [0], [0], [1], [0, 0, 1, 1], [], []>} : vector<128x32xbf16>, vector<32x512xbf16>, vector<128x512xf32> -> vector<128x512xf32>
    %c0_6 = arith.constant 0 : index
    %c0_7 = arith.constant 0 : index
    %9 = vector.load %arg5[%c0_6, %c0_7] : memref<1x512xf32, #tpu.memory_space<vmem>>, vector<1x512xf32>
    %10 = vector.broadcast %9 : vector<1x512xf32> to vector<128x512xf32>
    %11 = arith.addf %8, %10 : vector<128x512xf32>
    %cst_8 = arith.constant 5.000000e-01 : f32
    %12 = vector.broadcast %cst_8 : f32 to vector<128x512xf32>
    %13 = arith.mulf %12, %11 : vector<128x512xf32>
    %cst_9 = arith.constant 4.471500e-02 : f32
    %14 = vector.broadcast %cst_9 : f32 to vector<128x512xf32>
    %15 = arith.mulf %14, %11 : vector<128x512xf32>
    %16 = arith.mulf %15, %11 : vector<128x512xf32>
    %17 = arith.mulf %16, %11 : vector<128x512xf32>
    %18 = arith.addf %11, %17 : vector<128x512xf32>
    %cst_10 = arith.constant 0.797884583 : f32
    %19 = vector.broadcast %cst_10 : f32 to vector<128x512xf32>
    %20 = arith.mulf %19, %18 : vector<128x512xf32>
    %21 = math.tanh %20 : vector<128x512xf32>
    %cst_11 = arith.constant 1.000000e+00 : f32
    %22 = vector.broadcast %cst_11 : f32 to vector<128x512xf32>
    %23 = arith.addf %22, %21 : vector<128x512xf32>
    %24 = arith.mulf %13, %23 : vector<128x512xf32>
    %c0_12 = arith.constant 0 : index
    %c0_13 = arith.constant 0 : index
    %25 = vector.load %arg11[%c0_12, %c0_13] : memref<128x32xf32, #tpu.memory_space<vmem>>, vector<128x32xf32>
    %26 = arith.truncf %24 : vector<128x512xf32> to vector<128x512xbf16>
    %c0_14 = arith.constant 0 : index
    %c0_15 = arith.constant 0 : index
    %27 = vector.load %arg6[%c0_14, %c0_15] : memref<512x32xbf16, #tpu.memory_space<vmem>>, vector<512x32xbf16>
    %cst_16 = arith.constant dense<0.000000e+00> : vector<128x32xf32>
    %28 = tpu.matmul %26, %27, %cst_16 {dimension_numbers = #tpu.dot_dimension_numbers<[1], [0], [0], [1], [0, 0, 1, 1], [], []>} : vector<128x512xbf16>, vector<512x32xbf16>, vector<128x32xf32> -> vector<128x32xf32>
    %29 = arith.addf %25, %28 : vector<128x32xf32>
    %c0_17 = arith.constant 0 : index
    %c0_18 = arith.constant 0 : index
    %30 = vector.load %arg11[%c0_17, %c0_18] : memref<128x32xf32, #tpu.memory_space<vmem>>, vector<128x32xf32>
    tpu.vector_store %arg11[%c0_17, %c0_18], %29 {strides = array<i32>} : memref<128x32xf32, #tpu.memory_space<vmem>>, vector<128x32xf32>,
    %c3_i32 = arith.constant 3 : i32
    %31 = arith.cmpi eq, %arg1, %c3_i32 : i32
    %32 = arith.extui %31 : i1 to i32
    %c0_i32_19 = arith.constant 0 : i32
    %33 = arith.cmpi ne, %32, %c0_i32_19 : i32
    scf.if %33 {
      %c0_20 = arith.constant 0 : index
      %c0_21 = arith.constant 0 : index
      %34 = vector.load %arg11[%c0_20, %c0_21] : memref<128x32xf32, #tpu.memory_space<vmem>>, vector<128x32xf32>
      %35 = arith.addf %5, %34 : vector<128x32xf32>
      %c0_22 = arith.constant 0 : index
      %c0_23 = arith.constant 0 : index
      %36 = vector.load %arg7[%c0_22, %c0_23] : memref<1x32xf32, #tpu.memory_space<vmem>>, vector<1x32xf32>
      %37 = vector.broadcast %36 : vector<1x32xf32> to vector<128x32xf32>
      %38 = arith.addf %35, %37 : vector<128x32xf32>
      %c0_24 = arith.constant 0 : index
      %c0_25 = arith.constant 0 : index
      %39 = vector.load %arg8[%c0_24, %c0_25] : memref<1x32xf32, #tpu.memory_space<vmem>>, vector<1x32xf32>
      %c0_26 = arith.constant 0 : index
      %c0_27 = arith.constant 0 : index
      %40 = vector.load %arg9[%c0_26, %c0_27] : memref<1x32xf32, #tpu.memory_space<vmem>>, vector<1x32xf32>
      %cst_28 = arith.constant dense<0.000000e+00> : vector<128xf32>
      %41 = vector.multi_reduction <add>, %38, %cst_28 [1] : vector<128x32xf32> to vector<128xf32>
      %42 = vector.shape_cast %41 : vector<128xf32> to vector<128x1xf32>
      %cst_29 = arith.constant 3.200000e+01 : f32
      %43 = vector.broadcast %cst_29 : f32 to vector<128x1xf32>
      %44 = arith.divf %42, %43 : vector<128x1xf32>
      %45 = vector.broadcast %44 : vector<128x1xf32> to vector<128x32xf32>
      %46 = arith.subf %38, %45 : vector<128x32xf32>
      %47 = arith.mulf %46, %46 : vector<128x32xf32>
      %cst_30 = arith.constant dense<0.000000e+00> : vector<128xf32>
      %48 = vector.multi_reduction <add>, %47, %cst_30 [1] : vector<128x32xf32> to vector<128xf32>
      %49 = vector.shape_cast %48 : vector<128xf32> to vector<128x1xf32>
      %cst_31 = arith.constant 3.200000e+01 : f32
      %50 = vector.broadcast %cst_31 : f32 to vector<128x1xf32>
      %51 = arith.divf %49, %50 : vector<128x1xf32>
      %cst_32 = arith.constant 9.99999974E-6 : f32
      %52 = vector.broadcast %cst_32 : f32 to vector<128x1xf32>
      %53 = arith.addf %51, %52 : vector<128x1xf32>
      %54 = math.rsqrt %53 : vector<128x1xf32>
      %55 = vector.broadcast %54 : vector<128x1xf32> to vector<128x32xf32>
      %56 = arith.mulf %46, %55 : vector<128x32xf32>
      %57 = vector.broadcast %39 : vector<1x32xf32> to vector<128x32xf32>
      %58 = arith.mulf %56, %57 : vector<128x32xf32>
      %59 = vector.broadcast %40 : vector<1x32xf32> to vector<128x32xf32>
      %60 = arith.addf %58, %59 : vector<128x32xf32>
      %c0_33 = arith.constant 0 : index
      %c0_34 = arith.constant 0 : index
      %61 = vector.load %arg10[%c0_33, %c0_34] : memref<128x32xf32, #tpu.memory_space<vmem>>, vector<128x32xf32>
      tpu.vector_store %arg10[%c0_33, %c0_34], %60 {strides = array<i32>} : memref<128x32xf32, #tpu.memory_space<vmem>>, vector<128x32xf32>,
    } else {
    }
    return
  }
  func.func @transform_0(%arg0: i32, %arg1: i32) -> (i32, i32) {
    %c0_i32 = arith.constant 0 : i32
    %c0_i32_0 = arith.constant 0 : i32
    return %arg0, %c0_i32 : i32, i32
  }
  func.func @transform_1(%arg0: i32, %arg1: i32) -> (i32, i32) {
    %c0_i32 = arith.constant 0 : i32
    %c0_i32_0 = arith.constant 0 : i32
    return %arg0, %c0_i32 : i32, i32
  }
  func.func @transform_2(%arg0: i32, %arg1: i32) -> (i32, i32) {
    %c0_i32 = arith.constant 0 : i32
    %c0_i32_0 = arith.constant 0 : i32
    return %c0_i32, %arg1 : i32, i32
  }
  func.func @transform_3(%arg0: i32, %arg1: i32) -> (i32, i32) {
    %c0_i32 = arith.constant 0 : i32
    %c0_i32_0 = arith.constant 0 : i32
    return %c0_i32, %arg1 : i32, i32
  }
  func.func @transform_4(%arg0: i32, %arg1: i32) -> (i32, i32) {
    %c0_i32 = arith.constant 0 : i32
    %c0_i32_0 = arith.constant 0 : i32
    return %arg1, %c0_i32 : i32, i32
  }
  func.func @transform_5(%arg0: i32, %arg1: i32) -> (i32, i32) {
    %c0_i32 = arith.constant 0 : i32
    %c0_i32_0 = arith.constant 0 : i32
    %c0_i32_1 = arith.constant 0 : i32
    return %c0_i32, %c0_i32_0 : i32, i32
  }
  func.func @transform_6(%arg0: i32, %arg1: i32) -> (i32, i32) {
    %c0_i32 = arith.constant 0 : i32
    %c0_i32_0 = arith.constant 0 : i32
    %c0_i32_1 = arith.constant 0 : i32
    return %c0_i32, %c0_i32_0 : i32, i32
  }
  func.func @transform_7(%arg0: i32, %arg1: i32) -> (i32, i32) {
    %c0_i32 = arith.constant 0 : i32
    %c0_i32_0 = arith.constant 0 : i32
    %c0_i32_1 = arith.constant 0 : i32
    return %c0_i32, %c0_i32_0 : i32, i32
  }
  func.func @transform_8(%arg0: i32, %arg1: i32) -> (i32, i32) {
    %c0_i32 = arith.constant 0 : i32
    %c0_i32_0 = arith.constant 0 : i32
    return %arg0, %c0_i32 : i32, i32
  }
}

</mosaic_0001>

<bundles_post_ra>
// kernel: vss_decoder_layer.20
= control target key start
LH: loop header
LB: loop body
LE: loop exit
PB: predicated region body
PF: predicated region fallthrough
CT: control target
= control target key end

     0   :  { %s1080_s12 = smov 0   ;;  %s1082_s13 = smov 0   ;;  %s1489_s0 = inlined_call_operand.vmem [shape: f32[2,10,10,64], index: 0, kind: input, shape index: {}]   ;;  %s1490_s1 = inlined_call_operand.vmem [shape: f32[3,3,64], index: 1, kind: input, shape index: {}]   ;;  %s1491_s2 = inlined_call_operand.vmem [shape: f32[1,64], index: 2, kind: input, shape index: {}]   ;;  %s1492_s3 = inlined_call_operand.vmem [shape: f32[2,8,8,64], index: 3, kind: output, shape index: {}]  }
   0x1   :  { %s1084_s14 = smov 0  }
   0x2 LB: > { %s25_s15 = sadd.s32 1, %s1054_s13  ;;  %p987_p0 = scmp.ge.s32.totalorder %s1058_s14, 1  ;;  %s1058_s14 = sphi %s1084_s14, %s13_s14   ;;  %s1054_s13 = sphi %s1082_s13, %s1494_s13   ;;  %s1050_s12 = sphi %s1080_s12, %s1493_s12  }
   0x3   : > { %p27_p1 = scmp.ge.s32.totalorder %s25_s15, 2  ;;  %p173_p2 = scmp.lt.s32.totalorder %s1058_s14, 3 }
   0x5   : > { %s1496_s15 = smov (%p27_p1, %s25_s15), 0  ;;  %p174_p3 = pnand %p987_p0, %p173_p2 }
   0x6   : > { %p210_p4 = scmp.lt.s32.totalorder (!%p174_p3), %s1050_s12, 1  ;;  %v256_v0 = vlaneseq (!%p174_p3)  ;;  %v253_v2 = vld [vmem:[%s1490_s1] sm:$0x7] (!%p174_p3)  ;;  %v254_v3 = vld [vmem:[%s1490_s1 + $0x4] sm:$0x7] (!%p174_p3)  ;;  %vm312_vm0 = vcmask (!%p174_p3), 1046528  }
   0x7   : > { %177 = sbr.rel (%p174_p3) target bundleno = 151 (0x97), region = 32  ;;  %v255_v4 = vld [vmem:[%s1490_s1 + $0x8] sm:$0x7] (!%p174_p3)  ;;  %vm389_vm1 = vcmask (!%p174_p3), 1045504   ;;  %vm861_vm2 = vcmask (!%p174_p3), 523264  }
   0x8   : > { %v257_v1 = vshrl.u32 (!%p174_p3), %v256_v0, 7 }
   0xa   : > { %v258_v5 = vsub.s32 (!%p174_p3), 0, %v257_v1  ;;  %v278_v6 = vsub.s32 (!%p174_p3), 1, %v257_v1  ;;  %v355_v7 = vsub.s32 (!%p174_p3), 2, %v257_v1 }
   0xc   : > { %v1115_v8 = vrot.slane (!%p174_p3), %v253_v2, %v258_v5  ;;  %v1117_v9 = vrot.slane (!%p174_p3), %v253_v2, %v278_v6  ;;  %v1119_v10 = vrot.slane (!%p174_p3), %v253_v2, %v355_v7  ;;  %v1123_v13 = vrot.slane (!%p174_p3), %v254_v3, %v258_v5 }
   0xd   : > { %v1125_v14 = vrot.slane (!%p174_p3), %v254_v3, %v278_v6  ;;  %v1127_v15 = vrot.slane (!%p174_p3), %v254_v3, %v355_v7  ;;  %v1129_v16 = vrot.slane (!%p174_p3), %v255_v4, %v258_v5  ;;  %v1136_v22 = vrot.slane (!%p174_p3), %v255_v4, %v278_v6 }
   0xe   : > { %s1498_s12 = smov (!%p210_p4, %s1050_s12), 1  ;;  %v1160_v48 = vrot.slane %v255_v4, %v355_v7 }
   0xf   : > { %s995_s20 = smul.u32 160, %s1498_s12  ;;  %s994_s28 = sshll.u32 %s1498_s12, 6 }
  0x10   : > { %s1304_s4 = scalar_lea.vmem %s1492_s3, %s994_s28 }
  0x11   : > { %s1113_s25 = scalar_lea.vmem %s1489_s0, %s995_s20 }
  0x12   : > { %v233_v11 = vld [vmem:[%s1113_s25] sm:$0xff]  ;;  %v234_v12 = vld [vmem:[%s1113_s25 + $0x8] sm:$0x3]  ;;  %v235_v17 = vld [vmem:[%s1113_s25 + $0x10] sm:$0xff] }
  0x13   : > { %v236_v18 = vld [vmem:[%s1113_s25 + $0x18] sm:$0x3]  ;;  %v280_v19 = vmul.f32 %v1117_v9, %v233_v11  ;;  %v281_v20 = vmul.f32 %v1117_v9, %v234_v12  ;;  %v357_v21 = vmul.f32 %v1119_v10, %v233_v11  ;;  %v260_v23 = vmul.f32 %v1115_v8, %v233_v11  ;;  %v1144_v31 = vld [vmem:[%s1113_s25 + $0x20] sm:$0xff]  ;;  %v1152_v40 = vld [vmem:[%s1113_s25 + $0x28] sm:$0x3] }
  0x14   : > { %v358_v24 = vmul.f32 %v1119_v10, %v234_v12  ;;  %v454_v25 = vmul.f32 %v1125_v14, %v235_v17  ;;  %v455_v26 = vmul.f32 %v1125_v14, %v236_v18  ;;  %v530_v30 = vmul.f32 %v1127_v15, %v235_v17 }
  0x15   : > { %v313_v27 = vrot.slane %v280_v19, 1  ;;  %v314_v28 = vrot.slane %v281_v20, 1  ;;  %v390_v29 = vrot.slane %v357_v21, 2  ;;  %v531_v35 = vmul.f32 %v1127_v15, %v236_v18  ;;  %v1187_v21 = vld [vmem:[%s1113_s25 + $0x30] sm:$0xff] }
  0x16   : > { %v391_v32 = vrot.slane %v358_v24, 2  ;;  %v486_v33 = vrot.slane %v454_v25, 1  ;;  %v487_v34 = vrot.slane %v455_v26, 1  ;;  %v434_v37 = vmul.f32 %v1123_v13, %v235_v17 }
  0x17   : > { %v315_v36 = vsel %vm312_vm0, %v313_v27, %v314_v28  ;;  %v562_v38 = vrot.slane %v530_v30, 2  ;;  %v626_v39 = vmul.f32 %v1136_v22, %v1144_v31  ;;  %v606_v44 = vmul.f32 %v1129_v16, %v1144_v31  ;;  %v1190_v27 = vld [vmem:[%s1113_s25 + $0x38] sm:$0x3] }
  0x18   : > { %v345_v41 = vadd.f32 %v315_v36, %v260_v23  ;;  %v392_v42 = vsel %vm389_vm1, %v390_v29, %v391_v32  ;;  %v488_v43 = vsel %vm312_vm0, %v486_v33, %v487_v34  ;;  %v563_v45 = vrot.slane %v531_v35, 2 }
  0x19   : > { %v627_v46 = vmul.f32 %v1136_v22, %v1152_v40  ;;  %v658_v47 = vrot.slane %v626_v39, 1  ;;  %v261_v50 = vmul.f32 %v1115_v8, %v235_v17  ;;  %v282_v51 = vmul.f32 %v1117_v9, %v235_v17 }
  0x1a   : > { %v422_v49 = vadd.f32 %v392_v42, %v345_v41  ;;  %v283_v52 = vmul.f32 %v1117_v9, %v236_v18  ;;  %v702_v54 = vmul.f32 %v1160_v48, %v1144_v31  ;;  %v703_v55 = vmul.f32 %v1160_v48, %v1152_v40  ;;  %v1205_v41 = vld [vmem:[%s1491_s2] ss:$0 sm:$0xff] }
  0x1b   : > { %v659_v53 = vrot.slane %v627_v46, 1  ;;  %v359_v56 = vmul.f32 %v1119_v10, %v235_v17  ;;  %v316_v58 = vrot.slane %v282_v51, 1  ;;  %v360_v60 = vmul.f32 %v1119_v10, %v236_v18 }
  0x1c   : > { %v442_v57 = vadd.f32 %v434_v37, %v422_v49  ;;  %v317_v59 = vrot.slane %v283_v52, 1  ;;  %v564_v61 = vsel %vm389_vm1, %v562_v38, %v563_v45  ;;  %v734_v62 = vrot.slane %v702_v54, 2 }
  0x1d   : > { %v735_v63 = vrot.slane %v703_v55, 2  ;;  %v393_v0 = vrot.slane %v359_v56, 2  ;;  %v660_v2 = vsel %vm312_vm0, %v658_v47, %v659_v53  ;;  %v394_v4 = vrot.slane %v360_v60, 2 }
  0x1e   : > { %v518_v1 = vadd.f32 %v488_v43, %v442_v57  ;;  %v318_v3 = vsel %vm312_vm0, %v316_v58, %v317_v59  ;;  %v435_v6 = vmul.f32 %v1123_v13, %v1144_v31  ;;  %v456_v7 = vmul.f32 %v1125_v14, %v1144_v31 }
  0x1f   : > { %v346_v5 = vadd.f32 %v318_v3, %v261_v50  ;;  %v457_v11 = vmul.f32 %v1125_v14, %v1152_v40  ;;  %v395_v17 = vsel %vm389_vm1, %v393_v0, %v394_v4  ;;  %v532_v18 = vmul.f32 %v1127_v15, %v1144_v31 }
  0x20   : > { %v594_v12 = vadd.f32 %v564_v61, %v518_v1  ;;  %v533_v19 = vmul.f32 %v1127_v15, %v1152_v40  ;;  %v736_v20 = vsel %vm389_vm1, %v734_v62, %v735_v63  ;;  %v489_v24 = vrot.slane %v456_v7, 1 }
  0x21   : > { %v423_v23 = vadd.f32 %v395_v17, %v346_v5  ;;  %v490_v25 = vrot.slane %v457_v11, 1  ;;  %v565_v28 = vrot.slane %v532_v18, 2  ;;  %v628_v30 = vmul.f32 %v1136_v22, %v1187_v21  ;;  %v1237_v18 = vld [vmem:[%s1113_s25 + $0x40] sm:$0xff] }
  0x22   : > { %v614_v26 = vadd.f32 %v606_v44, %v594_v12  ;;  %v566_v29 = vrot.slane %v533_v19, 2  ;;  %v629_v34 = vmul.f32 %v1136_v22, %v1190_v27  ;;  %v704_v35 = vmul.f32 %v1160_v48, %v1187_v21 }
  0x23   : > { %v443_v32 = vadd.f32 %v435_v6, %v423_v23  ;;  %v491_v33 = vsel %vm312_vm0, %v489_v24, %v490_v25  ;;  %v661_v38 = vrot.slane %v628_v30, 1  ;;  %v705_v39 = vmul.f32 %v1160_v48, %v1190_v27  ;;  %v1240_v24 = vld [vmem:[%s1113_s25 + $0x48] sm:$0x3] }
  0x24   : > { %v690_v36 = vadd.f32 %v660_v2, %v614_v26  ;;  %v567_v37 = vsel %vm389_vm1, %v565_v28, %v566_v29  ;;  %v607_v43 = vmul.f32 %v1129_v16, %v1187_v21  ;;  %v662_v44 = vrot.slane %v629_v34, 1 }
  0x25   : > { %v519_v42 = vadd.f32 %v491_v33, %v443_v32  ;;  %v737_v45 = vrot.slane %v704_v35, 2  ;;  %v738_v47 = vrot.slane %v705_v39, 2  ;;  %v284_v49 = vmul.f32 %v1117_v9, %v1144_v31 }
  0x26   : > { %v766_v46 = vadd.f32 %v736_v20, %v690_v36  ;;  %v285_v50 = vmul.f32 %v1117_v9, %v1152_v40  ;;  %v262_v52 = vmul.f32 %v1115_v8, %v1144_v31  ;;  %v361_v53 = vmul.f32 %v1119_v10, %v1144_v31 }
  0x27   : > { %v595_v51 = vadd.f32 %v567_v37, %v519_v42  ;;  %v362_v54 = vmul.f32 %v1119_v10, %v1152_v40  ;;  %v663_v56 = vsel %vm312_vm0, %v661_v38, %v662_v44  ;;  %v319_v57 = vrot.slane %v284_v49, 1 }
  0x28   : > { %v781_v55 = vadd.f32 %v1205_v41, %v766_v46  ;;  %v320_v58 = vrot.slane %v285_v50, 1  ;;  %v739_v60 = vsel %vm389_vm1, %v737_v45, %v738_v47  ;;  %v396_v61 = vrot.slane %v361_v53, 2 }
  0x29   : > { %v615_v59 = vadd.f32 %v607_v43, %v595_v51  ;;  %v397_v62 = vrot.slane %v362_v54, 2  ;;  %v436_v31 = vmul.f32 %v1123_v13, %v1187_v21  ;;  %v458_v40 = vmul.f32 %v1125_v14, %v1187_v21 }
  0x2a   : > { %v797_v63 = vmul.f32 0.044715, %v781_v55  ;;  %v321_v0 = vsel %vm312_vm0, %v319_v57, %v320_v58  ;;  %v459_v4 = vmul.f32 %v1125_v14, %v1190_v27  ;;  %v534_v7 = vmul.f32 %v1127_v15, %v1187_v21 }
  0x2b   : > { %v691_v1 = vadd.f32 %v663_v56, %v615_v59  ;;  %v347_v2 = vadd.f32 %v321_v0, %v262_v52  ;;  %v398_v3 = vsel %vm389_vm1, %v396_v61, %v397_v62  ;;  %v492_v6 = vrot.slane %v458_v40, 1 }
  0x2c   : > { %v805_v5 = vmul.f32 %v797_v63, %v781_v55  ;;  %v535_v11 = vmul.f32 %v1127_v15, %v1190_v27  ;;  %v1234_v12 = vmul.f32 0.5, %v781_v55  ;;  %v493_v20 = vrot.slane %v459_v4, 1 }
  0x2d   : > { %v767_v17 = vadd.f32 %v739_v60, %v691_v1  ;;  %v424_v19 = vadd.f32 %v398_v3, %v347_v2  ;;  %v568_v25 = vrot.slane %v534_v7, 2  ;;  %v630_v28 = vmul.f32 %v1136_v22, %v1237_v18 }
  0x2e   : > { %v813_v23 = vmul.f32 %v805_v5, %v781_v55  ;;  %v569_v26 = vrot.slane %v535_v11, 2  ;;  %v494_v32 = vsel %vm312_vm0, %v492_v6, %v493_v20  ;;  %v631_v33 = vmul.f32 %v1136_v22, %v1240_v24 }
  0x2f   : > { %v782_v29 = vadd.f32 %v1205_v41, %v767_v17  ;;  %v444_v30 = vadd.f32 %v436_v31, %v424_v19  ;;  %v664_v36 = vrot.slane %v630_v28, 1  ;;  %v706_v37 = vmul.f32 %v1160_v48, %v1237_v18  ;;  %v1284_v28 = vld [vmem:[%s1113_s25 + $0x58] sm:$0x3] }
  0x30   : > { %v821_v34 = vadd.f32 %v813_v23, %v781_v55  ;;  %v570_v35 = vsel %vm389_vm1, %v568_v25, %v569_v26  ;;  %v608_v42 = vmul.f32 %v1129_v16, %v1237_v18  ;;  %v665_v43 = vrot.slane %v631_v33, 1  ;;  %v1281_v26 = vld [vmem:[%s1113_s25 + $0x50] sm:$0xff] }
  0x31   : > { %v798_v38 = vmul.f32 0.044715, %v782_v29  ;;  %v520_v39 = vadd.f32 %v494_v32, %v444_v30  ;;  %v707_v45 = vmul.f32 %v1160_v48, %v1240_v24  ;;  %v740_v46 = vrot.slane %v706_v37, 2 }
  0x32   : > { %v829_v44 = vmul.f32 0.7978846, %v821_v34  ;;  %v263_v47 = vmul.f32 %v1115_v8, %v1187_v21  ;;  %v666_v51 = vsel %vm312_vm0, %v664_v36, %v665_v43  ;;  %v286_v52 = vmul.f32 %v1117_v9, %v1187_v21 }
  0x33   : > { %v806_v49 = vmul.f32 %v798_v38, %v782_v29  ;;  %v596_v50 = vadd.f32 %v570_v35, %v520_v39  ;;  %v741_v53 = vrot.slane %v707_v45, 2  ;;  %v287_v54 = vmul.f32 %v1117_v9, %v1190_v27 }
  0x34   : > { %1020 = vtanh.f32 %v829_v44  ;;  %v363_v55 = vmul.f32 %v1119_v10, %v1187_v21  ;;  %v322_v58 = vrot.slane %v286_v52, 1  ;;  %v364_v59 = vmul.f32 %v1119_v10, %v1190_v27 }
  0x35   : > { %v814_v56 = vmul.f32 %v806_v49, %v782_v29  ;;  %v616_v57 = vadd.f32 %v608_v42, %v596_v50  ;;  %v742_v60 = vsel %vm389_vm1, %v740_v46, %v741_v53  ;;  %v323_v61 = vrot.slane %v287_v54, 1 }
  0x36   : > { %v399_v62 = vrot.slane %v363_v55, 2  ;;  %v437_v63 = vmul.f32 %v1123_v13, %v1237_v18  ;;  %v400_v40 = vrot.slane %v364_v59, 2  ;;  %v460_v1 = vmul.f32 %v1125_v14, %v1237_v18 }
  0x37   : > { %v822_v0 = vadd.f32 %v814_v56, %v782_v29  ;;  %v692_v31 = vadd.f32 %v666_v51, %v616_v57  ;;  %v324_v21 = vsel %vm312_vm0, %v322_v58, %v323_v61  ;;  %v461_v27 = vmul.f32 %v1125_v14, %v1240_v24 }
  0x38   : > { %v536_v2 = vmul.f32 %v1127_v15, %v1237_v18  ;;  %v537_v3 = vmul.f32 %v1127_v15, %v1240_v24  ;;  %v348_v6 = vadd.f32 %v324_v21, %v263_v47  ;;  %v401_v7 = vsel %vm389_vm1, %v399_v62, %v400_v40 }
  0x39   : > { %v830_v4 = vmul.f32 0.7978846, %v822_v0  ;;  %v768_v5 = vadd.f32 %v742_v60, %v692_v31  ;;  %v495_v11 = vrot.slane %v460_v1, 1  ;;  %v496_v17 = vrot.slane %v461_v27, 1 }
  0x3a   : > { %v571_v19 = vrot.slane %v536_v2, 2  ;;  %v572_v20 = vrot.slane %v537_v3, 2  ;;  %v790_v23 = vmul.f32 0.5, %v782_v29  ;;  %v425_v30 = vadd.f32 %v401_v7, %v348_v6 }
  0x3b   : > { %1022 = vtanh.f32 %v830_v4  ;;  %v783_v25 = vadd.f32 %v1205_v41, %v768_v5  ;;  %v497_v32 = vsel %vm312_vm0, %v495_v11, %v496_v17  ;;  %v609_v33 = vmul.f32 %v1129_v16, %v1281_v26 }
  0x3c   : > { %v632_v34 = vmul.f32 %v1136_v22, %v1281_v26  ;;  %v633_v35 = vmul.f32 %v1136_v22, %v1284_v28  ;;  %v445_v36 = vadd.f32 %v437_v63, %v425_v30  ;;  %v573_v37 = vsel %vm389_vm1, %v571_v19, %v572_v20 }
  0x3d   : > { %v799_v29 = vmul.f32 0.044715, %v783_v25  ;;  %v708_v38 = vmul.f32 %v1160_v48, %v1281_v26  ;;  %v709_v44 = vmul.f32 %v1160_v48, %v1284_v28  ;;  %v264_v45 = vmul.f32 %v1115_v8, %v1237_v18 }
  0x3e   : > { %v1021_v39 = vpop.eup %1020  ;;  %v667_v42 = vrot.slane %v632_v34, 1  ;;  %v668_v43 = vrot.slane %v633_v35, 1  ;;  %v521_v49 = vadd.f32 %v497_v32, %v445_v36  ;;  %v288_v53 = vmul.f32 %v1117_v9, %v1237_v18  ;;  %v1337_v36 = vld [vmem:[%s1113_s25 + $0x68] sm:$0x3] }
  0x3f   : > { %v845_v46 = vadd.f32 1.0, %v1021_v39  ;;  %v807_v47 = vmul.f32 %v799_v29, %v783_v25  ;;  %v743_v50 = vrot.slane %v708_v38, 2  ;;  %v744_v52 = vrot.slane %v709_v44, 2 }
  0x40   : > { %v669_v51 = vsel %vm312_vm0, %v667_v42, %v668_v43  ;;  %v289_v54 = vmul.f32 %v1117_v9, %v1240_v24  ;;  %v597_v57 = vadd.f32 %v573_v37, %v521_v49  ;;  %v365_v58 = vmul.f32 %v1119_v10, %v1237_v18 }
  0x41   : > { %v853_v55 = vmul.f32 %v845_v46, %v1234_v12  ;;  %v815_v56 = vmul.f32 %v807_v47, %v783_v25  ;;  %v745_v59 = vsel %vm389_vm1, %v743_v50, %v744_v52  ;;  %v325_v60 = vrot.slane %v288_v53, 1 }
  0x42   : > { %v326_v61 = vrot.slane %v289_v54, 1  ;;  %v366_v62 = vmul.f32 %v1119_v10, %v1240_v24  ;;  %v617_v0 = vadd.f32 %v609_v33, %v597_v57  ;;  %v402_v31 = vrot.slane %v365_v58, 2  ;;  %v1332_v33 = vld [vmem:[%s1113_s25 + $0x60] sm:$0xff] }
  0x43   : > { %862 = vst.msk [vmem:[%s1304_s4] sm:$0xff] %vm861_vm2, %v853_v55  ;;  %v823_v63 = vadd.f32 %v815_v56, %v783_v25  ;;  %v438_v12 = vmul.f32 %v1123_v13, %v1281_v26  ;;  %v462_v18 = vmul.f32 %v1125_v14, %v1281_v26  ;;  %v463_v21 = vmul.f32 %v1125_v14, %v1284_v28 }
  0x44   : > { %v327_v40 = vsel %vm312_vm0, %v325_v60, %v326_v61  ;;  %v403_v1 = vrot.slane %v366_v62, 2  ;;  %v693_v2 = vadd.f32 %v669_v51, %v617_v0  ;;  %v538_v4 = vmul.f32 %v1127_v15, %v1281_v26 }
  0x45   : > { %v1023_v27 = vpop.eup %1022  ;;  %v831_v24 = vmul.f32 0.7978846, %v823_v63  ;;  %v349_v3 = vadd.f32 %v327_v40, %v264_v45  ;;  %v498_v7 = vrot.slane %v462_v18, 1  ;;  %v499_v11 = vrot.slane %v463_v21, 1 }
  0x46   : > { %v846_v5 = vadd.f32 1.0, %v1023_v27  ;;  %v404_v6 = vsel %vm389_vm1, %v402_v31, %v403_v1  ;;  %v769_v17 = vadd.f32 %v745_v59, %v693_v2  ;;  %v539_v20 = vmul.f32 %v1127_v15, %v1284_v28 }
  0x47   : > { %1024 = vtanh.f32 %v831_v24  ;;  %v426_v19 = vadd.f32 %v404_v6, %v349_v3  ;;  %v791_v32 = vmul.f32 0.5, %v783_v25  ;;  %v500_v34 = vsel %vm312_vm0, %v498_v7, %v499_v11 }
  0x48   : > { %v854_v30 = vmul.f32 %v846_v5, %v790_v23  ;;  %v574_v35 = vrot.slane %v538_v4, 2  ;;  %v784_v29 = vadd.f32 %v1205_v41, %v769_v17  ;;  %v575_v38 = vrot.slane %v539_v20, 2 }
  0x49   : > { %v446_v37 = vadd.f32 %v438_v12, %v426_v19  ;;  %v634_v39 = vmul.f32 %v1136_v22, %v1332_v33  ;;  %v610_v23 = vmul.f32 %v1129_v16, %v1332_v33  ;;  %v635_v25 = vmul.f32 %v1136_v22, %v1337_v36 }
  0x4a   : > { %863 = vst.msk [vmem:[%s1304_s4 + $0x8] sm:$0xff] %vm861_vm2, %v854_v30  ;;  %v710_v42 = vmul.f32 %v1160_v48, %v1332_v33  ;;  %v711_v43 = vmul.f32 %v1160_v48, %v1337_v36  ;;  %v800_v44 = vmul.f32 0.044715, %v784_v29  ;;  %v576_v46 = vsel %vm389_vm1, %v574_v35, %v575_v38  ;;  %v1378_v35 = vld [vmem:[%s1113_s25 + $0x70] sm:$0xff] }
  0x4b   : > { %v522_v45 = vadd.f32 %v500_v34, %v446_v37  ;;  %v265_v47 = vmul.f32 %v1115_v8, %v1281_v26  ;;  %v670_v49 = vrot.slane %v634_v39, 1  ;;  %v671_v50 = vrot.slane %v635_v25, 1  ;;  %v1381_v37 = vld [vmem:[%s1113_s25 + $0x78] sm:$0x3] }
  0x4c   : > { %v746_v51 = vrot.slane %v710_v42, 2  ;;  %v747_v52 = vrot.slane %v711_v43, 2  ;;  %v808_v53 = vmul.f32 %v800_v44, %v784_v29  ;;  %v290_v55 = vmul.f32 %v1117_v9, %v1281_v26 }
  0x4d   : > { %v598_v54 = vadd.f32 %v576_v46, %v522_v45  ;;  %v291_v56 = vmul.f32 %v1117_v9, %v1284_v28  ;;  %v672_v57 = vsel %vm312_vm0, %v670_v49, %v671_v50  ;;  %v367_v59 = vmul.f32 %v1119_v10, %v1281_v26 }
  0x4e   : > { %v748_v58 = vsel %vm389_vm1, %v746_v51, %v747_v52  ;;  %v368_v60 = vmul.f32 %v1119_v10, %v1284_v28  ;;  %v816_v61 = vmul.f32 %v808_v53, %v784_v29  ;;  %v328_v63 = vrot.slane %v290_v55, 1 }
  0x4f   : > { %v618_v62 = vadd.f32 %v610_v23, %v598_v54  ;;  %v329_v0 = vrot.slane %v291_v56, 1  ;;  %v405_v31 = vrot.slane %v367_v59, 2  ;;  %v439_v40 = vmul.f32 %v1123_v13, %v1332_v33 }
  0x50   : > { %v406_v12 = vrot.slane %v368_v60, 2  ;;  %v464_v1 = vmul.f32 %v1125_v14, %v1332_v33  ;;  %v824_v21 = vadd.f32 %v816_v61, %v784_v29  ;;  %v465_v28 = vmul.f32 %v1125_v14, %v1337_v36 }
  0x51   : > { %v1025_v18 = vpop.eup %1024  ;;  %v694_v27 = vadd.f32 %v672_v57, %v618_v62  ;;  %v330_v26 = vsel %vm312_vm0, %v328_v63, %v329_v0  ;;  %v540_v11 = vmul.f32 %v1127_v15, %v1332_v33  ;;  %v792_v19 = vmul.f32 0.5, %v784_v29 }
  0x52   : > { %v847_v24 = vadd.f32 1.0, %v1025_v18  ;;  %v350_v2 = vadd.f32 %v330_v26, %v265_v47  ;;  %v407_v3 = vsel %vm389_vm1, %v405_v31, %v406_v12  ;;  %v501_v4 = vrot.slane %v464_v1, 1 }
  0x53   : > { %v832_v5 = vmul.f32 0.7978846, %v824_v21  ;;  %v770_v6 = vadd.f32 %v748_v58, %v694_v27  ;;  %v502_v7 = vrot.slane %v465_v28, 1  ;;  %v541_v30 = vmul.f32 %v1127_v15, %v1337_v36 }
  0x54   : > { %v855_v17 = vmul.f32 %v847_v24, %v791_v32  ;;  %v427_v20 = vadd.f32 %v407_v3, %v350_v2  ;;  %v577_v39 = vrot.slane %v540_v11, 2  ;;  %v636_v32 = vmul.f32 %v1136_v22, %v1378_v35 }
  0x55   : > { %1026 = vtanh.f32 %v832_v5  ;;  %v785_v34 = vadd.f32 %v1205_v41, %v770_v6  ;;  %v503_v38 = vsel %vm312_vm0, %v501_v4, %v502_v7  ;;  %v578_v25 = vrot.slane %v541_v30, 2 }
  0x56   : > { %864 = vst.msk [vmem:[%s1304_s4 + $0x10] sm:$0xff] %vm861_vm2, %v855_v17  ;;  %v447_v23 = vadd.f32 %v439_v40, %v427_v20  ;;  %v637_v29 = vmul.f32 %v1136_v22, %v1381_v37  ;;  %v611_v43 = vmul.f32 %v1129_v16, %v1378_v35  ;;  %v712_v44 = vmul.f32 %v1160_v48, %v1378_v35 }
  0x57   : > { %v801_v42 = vmul.f32 0.044715, %v785_v34  ;;  %v713_v45 = vmul.f32 %v1160_v48, %v1381_v37  ;;  %v579_v47 = vsel %vm389_vm1, %v577_v39, %v578_v25  ;;  %v673_v49 = vrot.slane %v636_v32, 1  ;;  %v250_v25 = vld [vmem:[%s1113_s25 + $0x88] sm:$0x3] }
  0x58   : > { %v523_v46 = vadd.f32 %v503_v38, %v447_v23  ;;  %v674_v50 = vrot.slane %v637_v29, 1  ;;  %v749_v52 = vrot.slane %v712_v44, 2  ;;  %v266_v54 = vmul.f32 %v1115_v8, %v1332_v33  ;;  %v249_v23 = vld [vmem:[%s1113_s25 + $0x80] sm:$0xff] }
  0x59   : > { %v809_v51 = vmul.f32 %v801_v42, %v785_v34  ;;  %v750_v53 = vrot.slane %v713_v45, 2  ;;  %v292_v57 = vmul.f32 %v1117_v9, %v1332_v33  ;;  %v293_v58 = vmul.f32 %v1117_v9, %v1337_v36 }
  0x5a   : > { %v599_v55 = vadd.f32 %v579_v47, %v523_v46  ;;  %v675_v56 = vsel %vm312_vm0, %v673_v49, %v674_v50  ;;  %v369_v61 = vmul.f32 %v1119_v10, %v1332_v33  ;;  %v370_v62 = vmul.f32 %v1119_v10, %v1337_v36 }
  0x5b   : > { %v817_v59 = vmul.f32 %v809_v51, %v785_v34  ;;  %v751_v60 = vsel %vm389_vm1, %v749_v52, %v750_v53  ;;  %v331_v0 = vrot.slane %v292_v57, 1  ;;  %v332_v31 = vrot.slane %v293_v58, 1 }
  0x5c   : > { %v619_v63 = vadd.f32 %v611_v43, %v599_v55  ;;  %v440_v12 = vmul.f32 %v1123_v13, %v1378_v35  ;;  %v408_v1 = vrot.slane %v369_v61, 2  ;;  %v409_v18 = vrot.slane %v370_v62, 2 }
  0x5d   : > { %v825_v40 = vadd.f32 %v817_v59, %v785_v34  ;;  %v466_v21 = vmul.f32 %v1125_v14, %v1378_v35  ;;  %v333_v26 = vsel %vm312_vm0, %v331_v0, %v332_v31  ;;  %v467_v33 = vmul.f32 %v1125_v14, %v1381_v37 }
  0x5e   : > { %v695_v27 = vadd.f32 %v675_v56, %v619_v63  ;;  %v542_v36 = vmul.f32 %v1127_v15, %v1378_v35  ;;  %v351_v2 = vadd.f32 %v333_v26, %v266_v54  ;;  %v410_v3 = vsel %vm389_vm1, %v408_v1, %v409_v18 }
  0x5f   : > { %v1027_v28 = vpop.eup %1026  ;;  %v833_v24 = vmul.f32 0.7978846, %v825_v40  ;;  %v504_v4 = vrot.slane %v466_v21, 1  ;;  %v505_v7 = vrot.slane %v467_v33, 1  ;;  %v543_v11 = vmul.f32 %v1127_v15, %v1381_v37 }
  0x60   : > { %v848_v5 = vadd.f32 1.0, %v1027_v28  ;;  %v771_v6 = vadd.f32 %v751_v60, %v695_v27  ;;  %v793_v17 = vmul.f32 0.5, %v785_v34  ;;  %v428_v20 = vadd.f32 %v410_v3, %v351_v2  ;;  %v252_v3 = vld [vmem:[%s1113_s25 + $0x98] sm:$0x3] }
  0x61   : > { %1028 = vtanh.f32 %v833_v24  ;;  %v580_v30 = vrot.slane %v542_v36, 2  ;;  %v506_v32 = vsel %vm312_vm0, %v504_v4, %v505_v7  ;;  %v581_v29 = vrot.slane %v543_v11, 2 }
  0x62   : > { %v856_v38 = vmul.f32 %v848_v5, %v792_v19  ;;  %v1422_v39 = vadd.f32 %v1205_v41, %v771_v6  ;;  %v448_v42 = vadd.f32 %v440_v12, %v428_v20  ;;  %v638_v43 = vmul.f32 %v1136_v22, %v249_v23 }
  0x63   : > { %v639_v44 = vmul.f32 %v1136_v22, %v250_v25  ;;  %v714_v45 = vmul.f32 %v1160_v48, %v249_v23  ;;  %v582_v19 = vsel %vm389_vm1, %v580_v30, %v581_v29  ;;  %v612_v46 = vmul.f32 %v1129_v16, %v249_v23 }
  0x64   : > { %865 = vst.msk [vmem:[%s1304_s4 + $0x18] sm:$0xff] %vm861_vm2, %v856_v38  ;;  %v802_v34 = vmul.f32 0.044715, %v1422_v39  ;;  %v715_v47 = vmul.f32 %v1160_v48, %v250_v25  ;;  %v524_v49 = vadd.f32 %v506_v32, %v448_v42  ;;  %v676_v50 = vrot.slane %v638_v43, 1 }
  0x65   : > { %v677_v51 = vrot.slane %v639_v44, 1  ;;  %v752_v52 = vrot.slane %v714_v45, 2  ;;  %v267_v55 = vmul.f32 %v1115_v8, %v1378_v35  ;;  %v294_v56 = vmul.f32 %v1117_v9, %v1378_v35 }
  0x66   : > { %v810_v53 = vmul.f32 %v802_v34, %v1422_v39  ;;  %v753_v54 = vrot.slane %v715_v47, 2  ;;  %v600_v57 = vadd.f32 %v582_v19, %v524_v49  ;;  %v295_v59 = vmul.f32 %v1117_v9, %v1381_v37 }
  0x67   : > { %v678_v58 = vsel %vm312_vm0, %v676_v50, %v677_v51  ;;  %v371_v60 = vmul.f32 %v1119_v10, %v1378_v35  ;;  %v334_v63 = vrot.slane %v294_v56, 1  ;;  %v372_v8 = vmul.f32 %v1119_v10, %v1381_v37 }
  0x68   : > { %v818_v61 = vmul.f32 %v810_v53, %v1422_v39  ;;  %v754_v62 = vsel %vm389_vm1, %v752_v52, %v753_v54  ;;  %v620_v0 = vadd.f32 %v612_v46, %v600_v57  ;;  %v335_v31 = vrot.slane %v295_v59, 1 }
  0x69   : > { %v411_v12 = vrot.slane %v371_v60, 2  ;;  %v441_v40 = vmul.f32 %v1123_v13, %v249_v23  ;;  %v412_v1 = vrot.slane %v372_v8, 2  ;;  %v468_v35 = vmul.f32 %v1125_v14, %v249_v23  ;;  %v251_v13 = vld [vmem:[%s1113_s25 + $0x90] sm:$0xff] }
  0x6a   : > { %v826_v9 = vadd.f32 %v818_v61, %v1422_v39  ;;  %v469_v18 = vmul.f32 %v1125_v14, %v250_v25  ;;  %v696_v27 = vadd.f32 %v678_v58, %v620_v0  ;;  %v336_v26 = vsel %vm312_vm0, %v334_v63, %v335_v31 }
  0x6b   : > { %v1029_v21 = vpop.eup %1028  ;;  %v544_v10 = vmul.f32 %v1127_v15, %v249_v23  ;;  %v545_v37 = vmul.f32 %v1127_v15, %v250_v25  ;;  %v352_v28 = vadd.f32 %v336_v26, %v267_v55  ;;  %v413_v24 = vsel %vm389_vm1, %v411_v12, %v412_v1 }
  0x6c   : > { %v849_v33 = vadd.f32 1.0, %v1029_v21  ;;  %v834_v36 = vmul.f32 0.7978846, %v826_v9  ;;  %v772_v2 = vadd.f32 %v754_v62, %v696_v27  ;;  %v507_v4 = vrot.slane %v468_v35, 1 }
  0x6d   : > { %v508_v5 = vrot.slane %v469_v18, 1  ;;  %v583_v14 = vrot.slane %v544_v10, 2  ;;  %v429_v7 = vadd.f32 %v413_v24, %v352_v28  ;;  %v584_v11 = vrot.slane %v545_v37, 2 }
  0x6e   : > { %v857_v6 = vmul.f32 %v849_v33, %v793_v17  ;;  %1030 = vtanh.f32 %v834_v36  ;;  %v787_v20 = vadd.f32 %v1205_v41, %v772_v2  ;;  %v640_v30 = vmul.f32 %v1136_v22, %v251_v13 }
  0x6f   : > { %v509_v15 = vsel %vm312_vm0, %v507_v4, %v508_v5  ;;  %v449_v38 = vadd.f32 %v441_v40, %v429_v7  ;;  %v641_v23 = vmul.f32 %v1136_v22, %v252_v3  ;;  %v716_v25 = vmul.f32 %v1160_v48, %v251_v13 }
  0x70   : > { %866 = vst.msk [vmem:[%s1304_s4 + $0x20] sm:$0xff] %vm861_vm2, %v857_v6  ;;  %v803_v32 = vmul.f32 0.044715, %v787_v20  ;;  %v585_v29 = vsel %vm389_vm1, %v583_v14, %v584_v11  ;;  %v679_v17 = vrot.slane %v640_v30, 1  ;;  %v717_v42 = vmul.f32 %v1160_v48, %v252_v3 }
  0x71   : > { %v525_v43 = vadd.f32 %v509_v15, %v449_v38  ;;  %v613_v44 = vmul.f32 %v1129_v16, %v251_v13  ;;  %v680_v45 = vrot.slane %v641_v23, 1  ;;  %v755_v19 = vrot.slane %v716_v25, 2 }
  0x72   : > { %v811_v34 = vmul.f32 %v803_v32, %v787_v20  ;;  %v756_v46 = vrot.slane %v717_v42, 2  ;;  %v794_v51 = vmul.f32 0.5, %v1422_v39  ;;  %v795_v39 = vmul.f32 0.5, %v787_v20 }
  0x73   : > { %v601_v47 = vadd.f32 %v585_v29, %v525_v43  ;;  %v681_v22 = vsel %vm312_vm0, %v679_v17, %v680_v45 }
  0x74   : > { %v819_v49 = vmul.f32 %v811_v34, %v787_v20  ;;  %v757_v53 = vsel %vm389_vm1, %v755_v19, %v756_v46 }
  0x75   : > { %v621_v50 = vadd.f32 %v613_v44, %v601_v47 }
  0x76   : > { %v827_v52 = vadd.f32 %v819_v49, %v787_v20 }
  0x77   : > { %v697_v48 = vadd.f32 %v681_v22, %v621_v50 }
  0x78   : > { %v1031_v54 = vpop.eup %1030  ;;  %v835_v56 = vmul.f32 0.7978846, %v827_v52 }
  0x79   : > { %v850_v55 = vadd.f32 1.0, %v1031_v54  ;;  %v773_v16 = vadd.f32 %v757_v53, %v697_v48 }
  0x7a   : > { %1032 = vtanh.f32 %v835_v56 }
  0x7b   : > { %v858_v57 = vmul.f32 %v850_v55, %v794_v51  ;;  %v788_v58 = vadd.f32 %v1205_v41, %v773_v16 }
  0x7d   : > { %867 = vst.msk [vmem:[%s1304_s4 + $0x28] sm:$0xff] %vm861_vm2, %v858_v57  ;;  %v804_v59 = vmul.f32 0.044715, %v788_v58  ;;  %v796_v12 = vmul.f32 0.5, %v788_v58 }
  0x7f   : > { %v812_v60 = vmul.f32 %v804_v59, %v788_v58 }
  0x81   : > { %v820_v61 = vmul.f32 %v812_v60, %v788_v58 }
  0x83   : > { %v828_v62 = vadd.f32 %v820_v61, %v788_v58 }
  0x84   : > { %v1033_v63 = vpop.eup %1032 }
  0x85   : > { %v851_v8 = vadd.f32 1.0, %v1033_v63  ;;  %v836_v0 = vmul.f32 0.7978846, %v828_v62 }
  0x87   : > { %v859_v31 = vmul.f32 %v851_v8, %v795_v39  ;;  %1034 = vtanh.f32 %v836_v0 }
  0x89   : > { %868 = vst.msk [vmem:[%s1304_s4 + $0x30] sm:$0xff] %vm861_vm2, %v859_v31 }
  0x91   : > { %v1035_v40 = vpop.eup %1034 }
  0x92   : > { %v852_v9 = vadd.f32 1.0, %v1035_v40 }
  0x94   : > { %v860_v1 = vmul.f32 %v852_v9, %v796_v12 }
  0x96   : > { %869 = vst.msk [vmem:[%s1304_s4 + $0x38] sm:$0xff] %vm861_vm2, %v860_v1 }
  0x97 PF: > { %s13_s14 = sadd.s32 1, %s1058_s14   ;;  %s1493_s12 = smov %s1054_s13 }
  0x98   : > { %p10_p5 = scmp.ge.s32.totalorder %s13_s14, 4   ;;  %s1494_s13 = smov %s1496_s15 }
  0x9a   :  { %12 = sbr.rel (!%p10_p5) target bundleno = 2 (0x2), region = 68 }

// kernel: vss_decoder_layer.19
= control target key start
LH: loop header
LB: loop body
LE: loop exit
PB: predicated region body
PF: predicated region fallthrough
CT: control target
= control target key end

     0   :  { %vm39_vm0 = vcmask 261120   ;;  %vm445_vm1 = vcmask 523264   ;;  %s900_s0 = inlined_call_operand.vmem [shape: f32[128,32], index: 0, kind: input, shape index: {}]   ;;  %s901_s3 = inlined_call_operand.vmem [shape: bf16[32,64], index: 3, kind: input, shape index: {}]   ;;  %s902_s1 = inlined_call_operand.vmem [shape: f32[1,32], index: 1, kind: input, shape index: {}]   ;;  %s903_s2 = inlined_call_operand.vmem [shape: f32[1,32], index: 2, kind: input, shape index: {}]   ;;  %s904_s4 = inlined_call_operand.vmem [shape: f32[1,64], index: 4, kind: input, shape index: {}]   ;;  %s905_s5 = inlined_call_operand.vmem [shape: f32[128,64], index: 5, kind: output, shape index: {}]  }
   0x1   :  { %v21_v0 = vld [vmem:[%s900_s0] sm:$0xff]  ;;  %v22_v2 = vld [vmem:[%s900_s0 + $0x8] sm:$0xff]  ;;  %v23_v8 = vld [vmem:[%s900_s0 + $0x10] sm:$0xff] }
   0x2   :  { %v29_v1 = vld [vmem:[%s900_s0 + $0x40] sm:$0xff]  ;;  %v40_v3 = vsel %vm39_vm0, %v21_v0, 0.0  ;;  %v30_v5 = vld [vmem:[%s900_s0 + $0x48] sm:$0xff]  ;;  %v43_v6 = vsel %vm39_vm0, %v22_v2, 0.0  ;;  %v24_v9 = vld [vmem:[%s900_s0 + $0x18] sm:$0xff]  ;;  %v46_v10 = vsel %vm39_vm0, %v23_v8, 0.0 }
   0x3   :  { %v64_v4 = vsel %vm39_vm0, %v29_v1, 0.0  ;;  %41 = vadd.xlane.f32.xlu0 %v40_v3  ;;  %v67_v7 = vsel %vm39_vm0, %v30_v5, 0.0  ;;  %v49_v11 = vsel %vm39_vm0, %v24_v9, 0.0  ;;  %v604_v12 = vld [vmem:[%s900_s0 + $0x50] sm:$0xff]  ;;  %v609_v13 = vld [vmem:[%s900_s0 + $0x58] sm:$0xff]  ;;  %v618_v16 = vld [vmem:[%s900_s0 + $0x20] sm:$0xff] }
   0x4   :  { %65 = vadd.xlane.f32.xlu1 %v64_v4  ;;  %v70_v14 = vsel %vm39_vm0, %v604_v12, 0.0  ;;  %v73_v15 = vsel %vm39_vm0, %v609_v13, 0.0  ;;  %v623_v17 = vld [vmem:[%s900_s0 + $0x28] sm:$0xff]  ;;  %v52_v18 = vsel %vm39_vm0, %v618_v16, 0.0  ;;  %v632_v20 = vld [vmem:[%s900_s0 + $0x60] sm:$0xff]  ;;  %v646_v24 = vld [vmem:[%s900_s0 + $0x30] sm:$0xff] }
   0x5   :  { %v55_v19 = vsel %vm39_vm0, %v623_v17, 0.0  ;;  %v637_v21 = vld [vmem:[%s900_s0 + $0x68] sm:$0xff]  ;;  %v76_v22 = vsel %vm39_vm0, %v632_v20, 0.0  ;;  %v651_v25 = vld [vmem:[%s900_s0 + $0x38] sm:$0xff]  ;;  %v58_v26 = vsel %vm39_vm0, %v646_v24, 0.0  ;;  %v660_v28 = vld [vmem:[%s900_s0 + $0x70] sm:$0xff] }
   0x6   :  { %v79_v23 = vsel %vm39_vm0, %v637_v21, 0.0  ;;  %v61_v27 = vsel %vm39_vm0, %v651_v25, 0.0  ;;  %v665_v29 = vld [vmem:[%s900_s0 + $0x78] sm:$0xff]  ;;  %v82_v30 = vsel %vm39_vm0, %v660_v28, 0.0 }
   0x7   :  { %44 = vadd.xlane.f32.xlu0 %v43_v6  ;;  %v85_v31 = vsel %vm39_vm0, %v665_v29, 0.0 }
   0x8   :  { %68 = vadd.xlane.f32.xlu1 %v67_v7 }
   0xb   :  { %47 = vadd.xlane.f32.xlu0 %v46_v10 }
   0xc   :  { %50 = vadd.xlane.f32.xlu1 %v49_v11 }
   0xf   :  { %71 = vadd.xlane.f32.xlu0 %v70_v14 }
  0x10   :  { %74 = vadd.xlane.f32.xlu1 %v73_v15 }
  0x13   :  { %53 = vadd.xlane.f32.xlu0 %v52_v18 }
  0x14   :  { %56 = vadd.xlane.f32.xlu1 %v55_v19 }
  0x17   :  { %77 = vadd.xlane.f32.xlu0 %v76_v22 }
  0x18   :  { %80 = vadd.xlane.f32.xlu1 %v79_v23 }
  0x1b   :  { %59 = vadd.xlane.f32.xlu0 %v58_v26 }
  0x1c   :  { %62 = vadd.xlane.f32.xlu1 %v61_v27 }
  0x1f   :  { %83 = vadd.xlane.f32.xlu0 %v82_v30 }
  0x20   :  { %86 = vadd.xlane.f32.xlu1 %v85_v31 }
  0x90   :  { %v42_v32 = vpop.xlane.xlu0 %41 }
  0x91   :  { %v66_v33 = vpop.xlane.xlu1 %65  ;;  %v89_v34 = vmul.f32 0.03125, %v42_v32 }
  0x92   :  { %v97_v35 = vmul.f32 0.03125, %v66_v33 }
  0x93   :  { %v671_v36 = vsub.f32 %v21_v0, %v89_v34 }
  0x94   :  { %v673_v37 = vsub.f32 %v29_v1, %v97_v35  ;;  %v45_v38 = vpop.xlane.xlu0 %44 }
  0x95   :  { %v69_v39 = vpop.xlane.xlu1 %68  ;;  %v90_v40 = vmul.f32 0.03125, %v45_v38  ;;  %v121_v42 = vmul.f32 %v671_v36, %v671_v36 }
  0x96   :  { %v98_v41 = vmul.f32 0.03125, %v69_v39  ;;  %v129_v43 = vmul.f32 %v673_v37, %v673_v37 }
  0x97   :  { %v679_v44 = vsub.f32 %v22_v2, %v90_v40  ;;  %v137_v46 = vsel %vm39_vm0, %v121_v42, 0.0 }
  0x98   :  { %v681_v45 = vsub.f32 %v30_v5, %v98_v41  ;;  %138 = vadd.xlane.f32.xlu0 %v137_v46  ;;  %v48_v47 = vpop.xlane.xlu0 %47  ;;  %v161_v49 = vsel %vm39_vm0, %v129_v43, 0.0 }
  0x99   :  { %v51_v48 = vpop.xlane.xlu1 %50  ;;  %v91_v50 = vmul.f32 0.03125, %v48_v47  ;;  %v122_v52 = vmul.f32 %v679_v44, %v679_v44 }
  0x9a   :  { %v92_v51 = vmul.f32 0.03125, %v51_v48  ;;  %v130_v53 = vmul.f32 %v681_v45, %v681_v45 }
  0x9b   :  { %v689_v54 = vsub.f32 %v23_v8, %v91_v50  ;;  %v140_v56 = vsel %vm39_vm0, %v122_v52, 0.0 }
  0x9c   :  { %v691_v55 = vsub.f32 %v24_v9, %v92_v51  ;;  %162 = vadd.xlane.f32.xlu0 %v161_v49  ;;  %141 = vadd.xlane.f32.xlu1 %v140_v56  ;;  %v72_v57 = vpop.xlane.xlu0 %71  ;;  %v164_v59 = vsel %vm39_vm0, %v130_v53, 0.0  ;;  %v514_v53 = vld [vmem:[%s901_s3 + $0x8] sm:$0xff]  }
  0x9d   :  { %v75_v58 = vpop.xlane.xlu1 %74  ;;  %v99_v60 = vmul.f32 0.03125, %v72_v57  ;;  %v123_v62 = vmul.f32 %v689_v54, %v689_v54 }
  0x9e   :  { %v100_v61 = vmul.f32 0.03125, %v75_v58  ;;  %v124_v63 = vmul.f32 %v691_v55, %v691_v55 }
  0x9f   :  { %v700_v0 = vsub.f32 %v604_v12, %v99_v60  ;;  %v143_v2 = vsel %vm39_vm0, %v123_v62, 0.0 }
  0xa0   :  { %v703_v1 = vsub.f32 %v609_v13, %v100_v61  ;;  %165 = vadd.xlane.f32.xlu1 %v164_v59  ;;  %144 = vadd.xlane.f32.xlu0 %v143_v2  ;;  %v54_v3 = vpop.xlane.xlu0 %53  ;;  %v146_v5 = vsel %vm39_vm0, %v124_v63, 0.0 }
  0xa1   :  { %v57_v4 = vpop.xlane.xlu1 %56  ;;  %v93_v6 = vmul.f32 0.03125, %v54_v3  ;;  %v131_v8 = vmul.f32 %v700_v0, %v700_v0 }
  0xa2   :  { %v94_v7 = vmul.f32 0.03125, %v57_v4  ;;  %v132_v9 = vmul.f32 %v703_v1, %v703_v1 }
  0xa3   :  { %v712_v10 = vsub.f32 %v618_v16, %v93_v6  ;;  %v167_v12 = vsel %vm39_vm0, %v131_v8, 0.0 }
  0xa4   :  { %v715_v11 = vsub.f32 %v623_v17, %v94_v7  ;;  %147 = vadd.xlane.f32.xlu1 %v146_v5  ;;  %168 = vadd.xlane.f32.xlu0 %v167_v12  ;;  %v78_v13 = vpop.xlane.xlu0 %77  ;;  %v170_v15 = vsel %vm39_vm0, %v132_v9, 0.0 }
  0xa5   :  { %v81_v14 = vpop.xlane.xlu1 %80  ;;  %v101_v18 = vmul.f32 0.03125, %v78_v13  ;;  %v125_v22 = vmul.f32 %v712_v10, %v712_v10 }
  0xa6   :  { %v102_v19 = vmul.f32 0.03125, %v81_v14  ;;  %v126_v16 = vmul.f32 %v715_v11, %v715_v11 }
  0xa7   :  { %v724_v23 = vsub.f32 %v632_v20, %v101_v18  ;;  %v149_v26 = vsel %vm39_vm0, %v125_v22, 0.0 }
  0xa8   :  { %v727_v17 = vsub.f32 %v637_v21, %v102_v19  ;;  %171 = vadd.xlane.f32.xlu1 %v170_v15  ;;  %150 = vadd.xlane.f32.xlu0 %v149_v26  ;;  %v60_v27 = vpop.xlane.xlu0 %59  ;;  %v152_v31 = vsel %vm39_vm0, %v126_v16, 0.0 }
  0xa9   :  { %v63_v30 = vpop.xlane.xlu1 %62  ;;  %v95_v32 = vmul.f32 0.03125, %v60_v27  ;;  %v133_v34 = vmul.f32 %v724_v23, %v724_v23 }
  0xaa   :  { %v96_v33 = vmul.f32 0.03125, %v63_v30  ;;  %v134_v20 = vmul.f32 %v727_v17, %v727_v17 }
  0xab   :  { %v736_v35 = vsub.f32 %v646_v24, %v95_v32  ;;  %v173_v38 = vsel %vm39_vm0, %v133_v34, 0.0 }
  0xac   :  { %v739_v21 = vsub.f32 %v651_v25, %v96_v33  ;;  %153 = vadd.xlane.f32.xlu1 %v152_v31  ;;  %174 = vadd.xlane.f32.xlu0 %v173_v38  ;;  %v84_v39 = vpop.xlane.xlu0 %83  ;;  %v176_v41 = vsel %vm39_vm0, %v134_v20, 0.0  ;;  %v771_v31 = vld [vmem:[%s902_s1] ss:$0 sm:$0xff] }
  0xad   :  { %v87_v40 = vpop.xlane.xlu1 %86  ;;  %v103_v42 = vmul.f32 0.03125, %v84_v39  ;;  %v127_v46 = vmul.f32 %v736_v35, %v736_v35 }
  0xae   :  { %v104_v43 = vmul.f32 0.03125, %v87_v40  ;;  %v128_v24 = vmul.f32 %v739_v21, %v739_v21 }
  0xaf   :  { %v748_v47 = vsub.f32 %v660_v28, %v103_v42  ;;  %v155_v48 = vsel %vm39_vm0, %v127_v46, 0.0 }
  0xb0   :  { %v751_v25 = vsub.f32 %v665_v29, %v104_v43  ;;  %177 = vadd.xlane.f32.xlu1 %v176_v41  ;;  %156 = vadd.xlane.f32.xlu0 %v155_v48  ;;  %v158_v49 = vsel %vm39_vm0, %v128_v24, 0.0  ;;  %v513_v29 = vld [vmem:[%s901_s3] sm:$0xff]  }
  0xb1   :  { %v135_v50 = vmul.f32 %v748_v47, %v748_v47  ;;  %489 = vmatprep.subr.bf16.mxu0 %v513_v29  ;;  %509 = vmatprep.subr.bf16.mxu1 %v513_v29  ;;  %v778_v43 = vld [vmem:[%s903_s2] ss:$0 sm:$0xff] }
  0xb2   :  { %v136_v51 = vmul.f32 %v751_v25, %v751_v25  ;;  %490 = vmatpush3.bf16.msra.mxu0 %v513_v29  ;;  %511 = vmatpush3.bf16.msra.mxu1 %v513_v29 }
  0xb3   :  { %v179_v52 = vsel %vm39_vm0, %v135_v50, 0.0  ;;  %491 = vmatprep.subr.bf16.mxu0 %v514_v53  ;;  %510 = vmatprep.subr.bf16.mxu1 %v514_v53 }
  0xb4   :  { %159 = vadd.xlane.f32.xlu1 %v158_v49  ;;  %180 = vadd.xlane.f32.xlu0 %v179_v52  ;;  %v182_v28 = vsel %vm39_vm0, %v136_v51, 0.0 }
  0xb6   :  { %492 = vmatpush3.bf16.msra.mxu0 %v514_v53  ;;  %512 = vmatpush3.bf16.msra.mxu1 %v514_v53 }
  0xb8   :  { %183 = vadd.xlane.f32.xlu1 %v182_v28 }
 0x125   :  { %v139_v56 = vpop.xlane.xlu0 %138 }
 0x126   :  { %v185_v57 = vmul.f32 0.03125, %v139_v56 }
 0x128   :  { %v201_v58 = vadd.f32 1e-05, %v185_v57 }
 0x129   :  { %v142_v59 = vpop.xlane.xlu1 %141  ;;  %v163_v60 = vpop.xlane.xlu0 %162 }
 0x12a   :  { %515 = vrsqrt.f32 %v201_v58  ;;  %v186_v61 = vmul.f32 0.03125, %v142_v59  ;;  %v193_v62 = vmul.f32 0.03125, %v163_v60 }
 0x12c   :  { %v202_v63 = vadd.f32 1e-05, %v186_v61  ;;  %v209_v2 = vadd.f32 1e-05, %v193_v62 }
 0x12d   :  { %v166_v3 = vpop.xlane.xlu1 %165  ;;  %v145_v4 = vpop.xlane.xlu0 %144 }
 0x12e   :  { %517 = vrsqrt.f32 %v202_v63  ;;  %v194_v5 = vmul.f32 0.03125, %v166_v3  ;;  %v187_v6 = vmul.f32 0.03125, %v145_v4 }
 0x12f   :  { %519 = vrsqrt.f32 %v209_v2 }
 0x130   :  { %v210_v7 = vadd.f32 1e-05, %v194_v5  ;;  %v203_v8 = vadd.f32 1e-05, %v187_v6 }
 0x131   :  { %v148_v9 = vpop.xlane.xlu1 %147  ;;  %v169_v12 = vpop.xlane.xlu0 %168 }
 0x132   :  { %521 = vrsqrt.f32 %v210_v7  ;;  %v188_v13 = vmul.f32 0.03125, %v148_v9  ;;  %v195_v14 = vmul.f32 0.03125, %v169_v12 }
 0x133   :  { %523 = vrsqrt.f32 %v203_v8 }
 0x134   :  { %v516_v15 = vpop.eup %515  ;;  %v204_v18 = vadd.f32 1e-05, %v188_v13  ;;  %v211_v19 = vadd.f32 1e-05, %v195_v14 }
 0x135   :  { %v172_v22 = vpop.xlane.xlu1 %171  ;;  %v151_v16 = vpop.xlane.xlu0 %150  ;;  %v233_v26 = vmul.f32 %v516_v15, %v671_v36 }
 0x136   :  { %525 = vrsqrt.f32 %v204_v18  ;;  %v196_v27 = vmul.f32 0.03125, %v172_v22  ;;  %v189_v30 = vmul.f32 0.03125, %v151_v16 }
 0x137   :  { %527 = vrsqrt.f32 %v211_v19  ;;  %v255_v41 = vmul.f32 %v771_v31, %v233_v26 }
 0x138   :  { %v518_v32 = vpop.eup %517  ;;  %v212_v33 = vadd.f32 1e-05, %v196_v27  ;;  %v205_v34 = vadd.f32 1e-05, %v189_v30 }
 0x139   :  { %v520_v20 = vpop.eup %519  ;;  %v154_v38 = vpop.xlane.xlu1 %153  ;;  %v234_v40 = vmul.f32 %v518_v32, %v679_v44  ;;  %v277_v28 = vadd.f32 %v778_v43, %v255_v41 }
 0x13a   :  { %v175_v39 = vpop.xlane.xlu0 %174  ;;  %529 = vrsqrt.f32 %v212_v33  ;;  %v190_v36 = vmul.f32 0.03125, %v154_v38  ;;  %v241_v46 = vmul.f32 %v520_v20, %v673_v37 }
 0x13b   :  { %v197_v42 = vmul.f32 0.03125, %v175_v39  ;;  %531 = vrsqrt.f32 %v205_v34  ;;  %v256_v24 = vmul.f32 %v771_v31, %v234_v40 }
 0x13c   :  { %v522_v48 = vpop.eup %521  ;;  %v206_v49 = vadd.f32 1e-05, %v190_v36  ;;  %v263_v56 = vmul.f32 %v771_v31, %v241_v46 }
 0x13d   :  { %v213_v50 = vadd.f32 1e-05, %v197_v42  ;;  %v524_v51 = vpop.eup %523  ;;  %v178_v44 = vpop.xlane.xlu1 %177  ;;  %v278_v29 = vadd.f32 %v778_v43, %v256_v24  ;;  %v242_v53 = vmul.f32 %v522_v48, %v681_v45 }
 0x13e   :  { %v157_v52 = vpop.xlane.xlu0 %156  ;;  %v235_v57 = vmul.f32 %v524_v51, %v689_v54  ;;  %533 = vrsqrt.f32 %v206_v49  ;;  %v198_v37 = vmul.f32 0.03125, %v178_v44  ;;  %v285_v5 = vadd.f32 %v778_v43, %v263_v56 }
 0x13f   :  { %v191_v58 = vmul.f32 0.03125, %v157_v52  ;;  %535 = vrsqrt.f32 %v213_v50  ;;  %v293_v59 = vpack.c.bf16 %v278_v29, %v277_v28  ;;  %v264_v60 = vmul.f32 %v771_v31, %v242_v53 }
 0x140   :  { %v526_v61 = vpop.eup %525  ;;  %v214_v62 = vadd.f32 1e-05, %v198_v37  ;;  %v257_v6 = vmul.f32 %v771_v31, %v235_v57 }
 0x141   :  { %v207_v63 = vadd.f32 1e-05, %v191_v58  ;;  %v528_v2 = vpop.eup %527  ;;  %v236_v3 = vmul.f32 %v526_v61, %v691_v55  ;;  %v160_v4 = vpop.xlane.xlu1 %159  ;;  %493 = vmatprep.mubr.msk.bf16.mxu0 %vm39_vm0, %v293_v59  ;;  %v286_v54 = vadd.f32 %v778_v43, %v264_v60 }
 0x142   :  { %v181_v45 = vpop.xlane.xlu0 %180  ;;  %v243_v7 = vmul.f32 %v528_v2, %v700_v0  ;;  %537 = vrsqrt.f32 %v214_v62  ;;  %v192_v8 = vmul.f32 0.03125, %v160_v4  ;;  %v279_v16 = vadd.f32 %v778_v43, %v257_v6 }
 0x143   :  { %v199_v9 = vmul.f32 0.03125, %v181_v45  ;;  %539 = vrsqrt.f32 %v207_v63  ;;  %v297_v12 = vpack.c.bf16 %v286_v54, %v285_v5  ;;  %v258_v13 = vmul.f32 %v771_v31, %v236_v3 }
 0x144   :  { %v530_v55 = vpop.eup %529  ;;  %v208_v14 = vadd.f32 1e-05, %v192_v8  ;;  %v265_v26 = vmul.f32 %v771_v31, %v243_v7 }
 0x145   :  { %v215_v15 = vadd.f32 1e-05, %v199_v9  ;;  %v532_v18 = vpop.eup %531  ;;  %v244_v19 = vmul.f32 %v530_v55, %v703_v1  ;;  %v184_v22 = vpop.xlane.xlu1 %183  ;;  %501 = vmatprep.mubr.msk.bf16.mxu1 %vm39_vm0, %v297_v12  ;;  %v280_v0 = vadd.f32 %v778_v43, %v258_v13 }
 0x146   :  { %v237_v27 = vmul.f32 %v532_v18, %v712_v10  ;;  %541 = vrsqrt.f32 %v208_v14  ;;  %v200_v30 = vmul.f32 0.03125, %v184_v22  ;;  %v287_v39 = vadd.f32 %v778_v43, %v265_v26 }
 0x147   :  { %543 = vrsqrt.f32 %v215_v15  ;;  %v294_v32 = vpack.c.bf16 %v280_v0, %v279_v16  ;;  %v266_v33 = vmul.f32 %v771_v31, %v244_v19 }
 0x148   :  { %v534_v34 = vpop.eup %533  ;;  %v216_v20 = vadd.f32 1e-05, %v200_v30  ;;  %v259_v41 = vmul.f32 %v771_v31, %v237_v27 }
 0x149   :  { %v536_v1 = vpop.eup %535  ;;  %v238_v38 = vmul.f32 %v534_v34, %v715_v11  ;;  %494 = vmatmul.mubr.msk.bf16.vlgmr.msra.gmra.mrb[0].mxu0 %vm39_vm0, %v294_v32  ;;  %v288_v40 = vadd.f32 %v778_v43, %v266_v33 }
 0x14a   :  { %v245_v10 = vmul.f32 %v536_v1, %v724_v23  ;;  %545 = vrsqrt.f32 %v216_v20  ;;  %v281_v11 = vadd.f32 %v778_v43, %v259_v41 }
 0x14b   :  { %v298_v36 = vpack.c.bf16 %v288_v40, %v287_v39  ;;  %v260_v42 = vmul.f32 %v771_v31, %v238_v38 }
 0x14c   :  { %v538_v46 = vpop.eup %537  ;;  %v267_v50 = vmul.f32 %v771_v31, %v245_v10 }
 0x14d   :  { %v540_v24 = vpop.eup %539  ;;  %v246_v48 = vmul.f32 %v538_v46, %v727_v17  ;;  %502 = vmatmul.mubr.msk.bf16.vlgmr.msra.gmra.mrb[0].mxu1 %vm39_vm0, %v298_v36  ;;  %v282_v49 = vadd.f32 %v778_v43, %v260_v42 }
 0x14e   :  { %v239_v51 = vmul.f32 %v540_v24, %v736_v35  ;;  %v289_v17 = vadd.f32 %v778_v43, %v267_v50 }
 0x14f   :  { %v295_v44 = vpack.c.bf16 %v282_v49, %v281_v11  ;;  %v268_v23 = vmul.f32 %v771_v31, %v246_v48 }
 0x150   :  { %v542_v52 = vpop.eup %541  ;;  %v261_v56 = vmul.f32 %v771_v31, %v239_v51 }
 0x151   :  { %v544_v28 = vpop.eup %543  ;;  %v240_v29 = vmul.f32 %v542_v52, %v739_v21  ;;  %497 = vmatprep.mubr.msk.bf16.mxu0 %vm39_vm0, %v295_v44  ;;  %v290_v53 = vadd.f32 %v778_v43, %v268_v23 }
 0x152   :  { %v247_v57 = vmul.f32 %v544_v28, %v748_v47  ;;  %v283_v21 = vadd.f32 %v778_v43, %v261_v56 }
 0x153   :  { %v299_v37 = vpack.c.bf16 %v290_v53, %v289_v17  ;;  %v262_v35 = vmul.f32 %v771_v31, %v240_v29 }
 0x154   :  { %v546_v58 = vpop.eup %545  ;;  %v269_v61 = vmul.f32 %v771_v31, %v247_v57 }
 0x155   :  { %v248_v59 = vmul.f32 %v546_v58, %v751_v25  ;;  %505 = vmatprep.mubr.msk.bf16.mxu1 %vm39_vm0, %v299_v37  ;;  %v284_v60 = vadd.f32 %v778_v43, %v262_v35  ;;  %v468_v25 = vld [vmem:[%s904_s4] ss:$0 sm:$0xff] }
 0x156   :  { %v291_v47 = vadd.f32 %v778_v43, %v269_v61 }
 0x157   :  { %v296_v62 = vpack.c.bf16 %v284_v60, %v283_v21  ;;  %v270_v63 = vmul.f32 %v771_v31, %v248_v59 }
 0x159   :  { %498 = vmatmul.mubr.msk.bf16.gmra.mrb[4].mxu0 %vm39_vm0, %v296_v62  ;;  %v292_v2 = vadd.f32 %v778_v43, %v270_v63 }
 0x15b   :  { %v300_v3 = vpack.c.bf16 %v292_v2, %v291_v47 }
 0x15d   :  { %506 = vmatmul.mubr.msk.bf16.gmra.mrb[4].mxu1 %vm39_vm0, %v300_v3 }
 0x21c   :  { %v495_v4 = vpop.f32.mrb[0].mxu0 }
 0x21d   :  { %v391_v45 = vadd.f32 %v495_v4, %v468_v25  ;;  %v382_v5 = vpop.f32.mrb[1].mxu0 }
 0x21e   :  { %v383_v54 = vadd.f32 %v468_v25, %v382_v5  ;;  %v496_v6 = vpop.f32.mrb[2].mxu0 }
 0x21f   :  { %448 = vst.msk [vmem:[%s905_s5 + $0x10] sm:$0xff] %vm445_vm1, %v391_v45  ;;  %v394_v31 = vadd.f32 %v496_v6, %v468_v25  ;;  %v385_v43 = vpop.f32.mrb[3].mxu0 }
 0x220   :  { %446 = vst.msk [vmem:[%s905_s5] sm:$0xff] %vm445_vm1, %v383_v54  ;;  %v386_v7 = vadd.f32 %v468_v25, %v385_v43  ;;  %v503_v8 = vpop.f32.mrb[0].mxu1 }
 0x221   :  { %449 = vst.msk [vmem:[%s905_s5 + $0x18] sm:$0xff] %vm445_vm1, %v394_v31  ;;  %v423_v9 = vadd.f32 %v503_v8, %v468_v25  ;;  %v414_v12 = vpop.f32.mrb[1].mxu1 }
 0x222   :  { %447 = vst.msk [vmem:[%s905_s5 + $0x8] sm:$0xff] %vm445_vm1, %v386_v7  ;;  %v415_v13 = vadd.f32 %v468_v25, %v414_v12  ;;  %v504_v55 = vpop.f32.mrb[2].mxu1 }
 0x223   :  { %456 = vst.msk [vmem:[%s905_s5 + $0x50] sm:$0xff] %vm445_vm1, %v423_v9  ;;  %v426_v14 = vadd.f32 %v504_v55, %v468_v25  ;;  %v417_v15 = vpop.f32.mrb[3].mxu1 }
 0x224   :  { %454 = vst.msk [vmem:[%s905_s5 + $0x40] sm:$0xff] %vm445_vm1, %v415_v13  ;;  %v418_v18 = vadd.f32 %v468_v25, %v417_v15 }
 0x225   :  { %457 = vst.msk [vmem:[%s905_s5 + $0x58] sm:$0xff] %vm445_vm1, %v426_v14 }
 0x226   :  { %455 = vst.msk [vmem:[%s905_s5 + $0x48] sm:$0xff] %vm445_vm1, %v418_v18 }
 0x22c   :  { %v499_v19 = vpop.f32.mrb[4].mxu0 }
 0x22d   :  { %v407_v22 = vadd.f32 %v499_v19, %v468_v25  ;;  %v398_v16 = vpop.f32.mrb[5].mxu0 }
 0x22e   :  { %v399_v0 = vadd.f32 %v468_v25, %v398_v16  ;;  %v500_v26 = vpop.f32.mrb[6].mxu0 }
 0x22f   :  { %452 = vst.msk [vmem:[%s905_s5 + $0x30] sm:$0xff] %vm445_vm1, %v407_v22  ;;  %v410_v27 = vadd.f32 %v500_v26, %v468_v25  ;;  %v401_v30 = vpop.f32.mrb[7].mxu0 }
 0x230   :  { %450 = vst.msk [vmem:[%s905_s5 + $0x20] sm:$0xff] %vm445_vm1, %v399_v0  ;;  %v402_v32 = vadd.f32 %v468_v25, %v401_v30  ;;  %v507_v33 = vpop.f32.mrb[4].mxu1 }
 0x231   :  { %453 = vst.msk [vmem:[%s905_s5 + $0x38] sm:$0xff] %vm445_vm1, %v410_v27  ;;  %v439_v34 = vadd.f32 %v507_v33, %v468_v25  ;;  %v430_v20 = vpop.f32.mrb[5].mxu1 }
 0x232   :  { %451 = vst.msk [vmem:[%s905_s5 + $0x28] sm:$0xff] %vm445_vm1, %v402_v32  ;;  %v431_v1 = vadd.f32 %v468_v25, %v430_v20  ;;  %v508_v38 = vpop.f32.mrb[6].mxu1 }
 0x233   :  { %460 = vst.msk [vmem:[%s905_s5 + $0x70] sm:$0xff] %vm445_vm1, %v439_v34  ;;  %v442_v39 = vadd.f32 %v508_v38, %v468_v25  ;;  %v433_v40 = vpop.f32.mrb[7].mxu1 }
 0x234   :  { %458 = vst.msk [vmem:[%s905_s5 + $0x60] sm:$0xff] %vm445_vm1, %v431_v1  ;;  %v434_v41 = vadd.f32 %v468_v25, %v433_v40 }
 0x235   :  { %461 = vst.msk [vmem:[%s905_s5 + $0x78] sm:$0xff] %vm445_vm1, %v442_v39 }
 0x236   :  { %459 = vst.msk [vmem:[%s905_s5 + $0x68] sm:$0xff] %vm445_vm1, %v434_v41 }

// kernel: vss_decoder_layer.24
= control target key start
LH: loop header
LB: loop body
LE: loop exit
PB: predicated region body
PF: predicated region fallthrough
CT: control target
= control target key end

     0   :  { %vm67_vm0 = vcmask 261120   ;;  %s778_s0 = inlined_call_operand.vmem [shape: f32[128,32], index: 0, kind: input, shape index: {}]   ;;  %s779_s1 = inlined_call_operand.vmem [shape: f32[128,32], index: 1, kind: input, shape index: {}]   ;;  %s780_s2 = inlined_call_operand.vmem [shape: f32[1,32], index: 2, kind: input, shape index: {}]   ;;  %s781_s3 = inlined_call_operand.vmem [shape: f32[1,32], index: 3, kind: input, shape index: {}]   ;;  %s782_s4 = inlined_call_operand.vmem [shape: f32[128,32], index: 4, kind: output, shape index: {}]  }
   0x1   :  { %v17_v0 = vld [vmem:[%s778_s0] sm:$0xff]  ;;  %v19_v2 = vld [vmem:[%s778_s0 + $0x10] sm:$0xff]  ;;  %v18_v5 = vld [vmem:[%s778_s0 + $0x8] sm:$0xff] }
   0x2   :  { %v33_v1 = vld [vmem:[%s779_s1] sm:$0xff]  ;;  %v35_v4 = vld [vmem:[%s779_s1 + $0x10] sm:$0xff]  ;;  %v34_v6 = vld [vmem:[%s779_s1 + $0x8] sm:$0xff] }
   0x3   :  { %v409_v3 = vadd.f32 %v33_v1, %v17_v0  ;;  %v420_v7 = vadd.f32 %v35_v4, %v19_v2  ;;  %v422_v8 = vadd.f32 %v34_v6, %v18_v5  ;;  %v20_v9 = vld [vmem:[%s778_s0 + $0x18] sm:$0xff]  ;;  %v21_v11 = vld [vmem:[%s778_s0 + $0x20] sm:$0xff]  ;;  %v22_v15 = vld [vmem:[%s778_s0 + $0x28] sm:$0xff] }
   0x4   :  { %v36_v10 = vld [vmem:[%s779_s1 + $0x18] sm:$0xff]  ;;  %v37_v14 = vld [vmem:[%s779_s1 + $0x20] sm:$0xff]  ;;  %v38_v16 = vld [vmem:[%s779_s1 + $0x28] sm:$0xff] }
   0x5   :  { %v68_v12 = vsel %vm67_vm0, %v409_v3, 0.0  ;;  %v435_v13 = vadd.f32 %v36_v10, %v20_v9  ;;  %v74_v17 = vsel %vm67_vm0, %v420_v7, 0.0  ;;  %v71_v18 = vsel %vm67_vm0, %v422_v8, 0.0  ;;  %v23_v22 = vld [vmem:[%s778_s0 + $0x30] sm:$0xff]  ;;  %v24_v24 = vld [vmem:[%s778_s0 + $0x38] sm:$0xff]  ;;  %v25_v30 = vld [vmem:[%s778_s0 + $0x40] sm:$0xff] }
   0x6   :  { %69 = vadd.xlane.f32.xlu0 %v68_v12  ;;  %75 = vadd.xlane.f32.xlu1 %v74_v17  ;;  %v450_v19 = vadd.f32 %v37_v14, %v21_v11  ;;  %v454_v21 = vadd.f32 %v38_v16, %v22_v15  ;;  %v39_v23 = vld [vmem:[%s779_s1 + $0x30] sm:$0xff]  ;;  %v40_v25 = vld [vmem:[%s779_s1 + $0x38] sm:$0xff]  ;;  %v41_v31 = vld [vmem:[%s779_s1 + $0x40] sm:$0xff] }
   0x7   :  { %v77_v20 = vsel %vm67_vm0, %v435_v13, 0.0  ;;  %v470_v27 = vadd.f32 %v39_v23, %v23_v22  ;;  %v474_v29 = vadd.f32 %v40_v25, %v24_v24  ;;  %v26_v32 = vld [vmem:[%s778_s0 + $0x48] sm:$0xff]  ;;  %v490_v35 = vadd.f32 %v41_v31, %v25_v30  ;;  %v27_v38 = vld [vmem:[%s778_s0 + $0x50] sm:$0xff]  ;;  %v28_v40 = vld [vmem:[%s778_s0 + $0x58] sm:$0xff] }
   0x8   :  { %v80_v26 = vsel %vm67_vm0, %v450_v19, 0.0  ;;  %v83_v28 = vsel %vm67_vm0, %v454_v21, 0.0  ;;  %v42_v33 = vld [vmem:[%s779_s1 + $0x48] sm:$0xff]  ;;  %v43_v39 = vld [vmem:[%s779_s1 + $0x50] sm:$0xff]  ;;  %v44_v41 = vld [vmem:[%s779_s1 + $0x58] sm:$0xff] }
   0x9   :  { %v86_v34 = vsel %vm67_vm0, %v470_v27, 0.0  ;;  %v89_v36 = vsel %vm67_vm0, %v474_v29, 0.0  ;;  %v494_v37 = vadd.f32 %v42_v33, %v26_v32  ;;  %v92_v42 = vsel %vm67_vm0, %v490_v35, 0.0  ;;  %v29_v46 = vld [vmem:[%s778_s0 + $0x60] sm:$0xff]  ;;  %v30_v48 = vld [vmem:[%s778_s0 + $0x68] sm:$0xff]  ;;  %v31_v54 = vld [vmem:[%s778_s0 + $0x70] sm:$0xff] }
   0xa   :  { %72 = vadd.xlane.f32.xlu0 %v71_v18  ;;  %78 = vadd.xlane.f32.xlu1 %v77_v20  ;;  %v510_v43 = vadd.f32 %v43_v39, %v27_v38  ;;  %v514_v45 = vadd.f32 %v44_v41, %v28_v40  ;;  %v45_v47 = vld [vmem:[%s779_s1 + $0x60] sm:$0xff]  ;;  %v46_v49 = vld [vmem:[%s779_s1 + $0x68] sm:$0xff]  ;;  %v47_v55 = vld [vmem:[%s779_s1 + $0x70] sm:$0xff] }
   0xb   :  { %v95_v44 = vsel %vm67_vm0, %v494_v37, 0.0  ;;  %v530_v51 = vadd.f32 %v45_v47, %v29_v46  ;;  %v534_v53 = vadd.f32 %v46_v49, %v30_v48  ;;  %v32_v56 = vld [vmem:[%s778_s0 + $0x78] sm:$0xff]  ;;  %v550_v59 = vadd.f32 %v47_v55, %v31_v54 }
   0xc   :  { %v98_v50 = vsel %vm67_vm0, %v510_v43, 0.0  ;;  %v101_v52 = vsel %vm67_vm0, %v514_v45, 0.0  ;;  %v48_v57 = vld [vmem:[%s779_s1 + $0x78] sm:$0xff] }
   0xd   :  { %v104_v58 = vsel %vm67_vm0, %v530_v51, 0.0  ;;  %v107_v60 = vsel %vm67_vm0, %v534_v53, 0.0  ;;  %v554_v61 = vadd.f32 %v48_v57, %v32_v56  ;;  %v110_v62 = vsel %vm67_vm0, %v550_v59, 0.0 }
   0xe   :  { %81 = vadd.xlane.f32.xlu0 %v80_v26  ;;  %84 = vadd.xlane.f32.xlu1 %v83_v28 }
   0xf   :  { %v113_v63 = vsel %vm67_vm0, %v554_v61, 0.0 }
  0x12   :  { %87 = vadd.xlane.f32.xlu0 %v86_v34  ;;  %90 = vadd.xlane.f32.xlu1 %v89_v36 }
  0x16   :  { %93 = vadd.xlane.f32.xlu0 %v92_v42  ;;  %96 = vadd.xlane.f32.xlu1 %v95_v44 }
  0x1a   :  { %99 = vadd.xlane.f32.xlu0 %v98_v50  ;;  %102 = vadd.xlane.f32.xlu1 %v101_v52 }
  0x1e   :  { %105 = vadd.xlane.f32.xlu0 %v104_v58  ;;  %108 = vadd.xlane.f32.xlu1 %v107_v60 }
  0x22   :  { %111 = vadd.xlane.f32.xlu0 %v110_v62  ;;  %114 = vadd.xlane.f32.xlu1 %v113_v63 }
  0x93   :  { %v70_v0 = vpop.xlane.xlu0 %69  ;;  %v76_v2 = vpop.xlane.xlu1 %75 }
  0x94   :  { %v117_v1 = vmul.f32 0.03125, %v70_v0  ;;  %v119_v4 = vmul.f32 0.03125, %v76_v2 }
  0x96   :  { %v561_v5 = vsub.f32 %v409_v3, %v117_v1  ;;  %v564_v6 = vsub.f32 %v420_v7, %v119_v4 }
  0x97   :  { %v73_v9 = vpop.xlane.xlu0 %72  ;;  %v79_v11 = vpop.xlane.xlu1 %78 }
  0x98   :  { %v118_v10 = vmul.f32 0.03125, %v73_v9  ;;  %v149_v12 = vmul.f32 %v561_v5, %v561_v5  ;;  %v120_v14 = vmul.f32 0.03125, %v79_v11  ;;  %v151_v15 = vmul.f32 %v564_v6, %v564_v6 }
  0x9a   :  { %v571_v16 = vsub.f32 %v422_v8, %v118_v10  ;;  %v165_v17 = vsel %vm67_vm0, %v149_v12, 0.0  ;;  %v575_v3 = vsub.f32 %v435_v13, %v120_v14  ;;  %v171_v22 = vsel %vm67_vm0, %v151_v15, 0.0 }
  0x9b   :  { %166 = vadd.xlane.f32.xlu0 %v165_v17  ;;  %v82_v7 = vpop.xlane.xlu0 %81  ;;  %v85_v20 = vpop.xlane.xlu1 %84 }
  0x9c   :  { %v121_v18 = vmul.f32 0.03125, %v82_v7  ;;  %v150_v23 = vmul.f32 %v571_v16, %v571_v16  ;;  %v122_v24 = vmul.f32 0.03125, %v85_v20  ;;  %v152_v25 = vmul.f32 %v575_v3, %v575_v3 }
  0x9e   :  { %v583_v8 = vsub.f32 %v450_v19, %v121_v18  ;;  %v168_v26 = vsel %vm67_vm0, %v150_v23, 0.0  ;;  %v587_v13 = vsub.f32 %v454_v21, %v122_v24  ;;  %v174_v32 = vsel %vm67_vm0, %v152_v25, 0.0 }
  0x9f   :  { %172 = vadd.xlane.f32.xlu0 %v171_v22  ;;  %169 = vadd.xlane.f32.xlu1 %v168_v26  ;;  %v88_v28 = vpop.xlane.xlu0 %87  ;;  %v91_v31 = vpop.xlane.xlu1 %90 }
  0xa0   :  { %v123_v30 = vmul.f32 0.03125, %v88_v28  ;;  %v153_v33 = vmul.f32 %v583_v8, %v583_v8  ;;  %v124_v34 = vmul.f32 0.03125, %v91_v31  ;;  %v154_v19 = vmul.f32 %v587_v13, %v587_v13 }
  0xa2   :  { %v595_v36 = vsub.f32 %v470_v27, %v123_v30  ;;  %v177_v21 = vsel %vm67_vm0, %v153_v33, 0.0  ;;  %v599_v38 = vsub.f32 %v474_v29, %v124_v34  ;;  %v180_v42 = vsel %vm67_vm0, %v154_v19, 0.0 }
  0xa3   :  { %175 = vadd.xlane.f32.xlu1 %v174_v32  ;;  %178 = vadd.xlane.f32.xlu0 %v177_v21  ;;  %v94_v39 = vpop.xlane.xlu0 %93  ;;  %v97_v41 = vpop.xlane.xlu1 %96 }
  0xa4   :  { %v125_v40 = vmul.f32 0.03125, %v94_v39  ;;  %v155_v44 = vmul.f32 %v595_v36, %v595_v36  ;;  %v126_v46 = vmul.f32 0.03125, %v97_v41  ;;  %v156_v27 = vmul.f32 %v599_v38, %v599_v38 }
  0xa6   :  { %v607_v47 = vsub.f32 %v490_v35, %v125_v40  ;;  %v183_v29 = vsel %vm67_vm0, %v155_v44, 0.0  ;;  %v611_v48 = vsub.f32 %v494_v37, %v126_v46  ;;  %v186_v54 = vsel %vm67_vm0, %v156_v27, 0.0 }
  0xa7   :  { %181 = vadd.xlane.f32.xlu1 %v180_v42  ;;  %184 = vadd.xlane.f32.xlu0 %v183_v29  ;;  %v100_v49 = vpop.xlane.xlu0 %99  ;;  %v103_v52 = vpop.xlane.xlu1 %102 }
  0xa8   :  { %v127_v50 = vmul.f32 0.03125, %v100_v49  ;;  %v157_v55 = vmul.f32 %v607_v47, %v607_v47  ;;  %v128_v56 = vmul.f32 0.03125, %v103_v52  ;;  %v158_v35 = vmul.f32 %v611_v48, %v611_v48 }
  0xaa   :  { %v619_v57 = vsub.f32 %v510_v43, %v127_v50  ;;  %v189_v37 = vsel %vm67_vm0, %v157_v55, 0.0  ;;  %v623_v58 = vsub.f32 %v514_v45, %v128_v56  ;;  %v192_v0 = vsel %vm67_vm0, %v158_v35, 0.0  ;;  %v659_v50 = vld [vmem:[%s780_s2] ss:$0 sm:$0xff] }
  0xab   :  { %187 = vadd.xlane.f32.xlu1 %v186_v54  ;;  %190 = vadd.xlane.f32.xlu0 %v189_v37  ;;  %v106_v60 = vpop.xlane.xlu0 %105  ;;  %v109_v63 = vpop.xlane.xlu1 %108  ;;  %v665_v37 = vld [vmem:[%s781_s3] ss:$0 sm:$0xff] }
  0xac   :  { %v129_v62 = vmul.f32 0.03125, %v106_v60  ;;  %v159_v1 = vmul.f32 %v619_v57, %v619_v57  ;;  %v130_v2 = vmul.f32 0.03125, %v109_v63  ;;  %v160_v43 = vmul.f32 %v623_v58, %v623_v58 }
  0xae   :  { %v631_v4 = vsub.f32 %v530_v51, %v129_v62  ;;  %v195_v45 = vsel %vm67_vm0, %v159_v1, 0.0  ;;  %v635_v9 = vsub.f32 %v534_v53, %v130_v2  ;;  %v198_v14 = vsel %vm67_vm0, %v160_v43, 0.0 }
  0xaf   :  { %193 = vadd.xlane.f32.xlu1 %v192_v0  ;;  %196 = vadd.xlane.f32.xlu0 %v195_v45  ;;  %v112_v10 = vpop.xlane.xlu0 %111  ;;  %v115_v12 = vpop.xlane.xlu1 %114 }
  0xb0   :  { %v131_v11 = vmul.f32 0.03125, %v112_v10  ;;  %v161_v15 = vmul.f32 %v631_v4, %v631_v4  ;;  %v132_v17 = vmul.f32 0.03125, %v115_v12  ;;  %v162_v51 = vmul.f32 %v635_v9, %v635_v9 }
  0xb2   :  { %v643_v7 = vsub.f32 %v550_v59, %v131_v11  ;;  %v201_v53 = vsel %vm67_vm0, %v161_v15, 0.0  ;;  %v647_v18 = vsub.f32 %v554_v61, %v132_v17  ;;  %v204_v20 = vsel %vm67_vm0, %v162_v51, 0.0 }
  0xb3   :  { %199 = vadd.xlane.f32.xlu1 %v198_v14  ;;  %202 = vadd.xlane.f32.xlu0 %v201_v53 }
  0xb4   :  { %v163_v22 = vmul.f32 %v643_v7, %v643_v7  ;;  %v164_v23 = vmul.f32 %v647_v18, %v647_v18 }
  0xb6   :  { %v207_v24 = vsel %vm67_vm0, %v163_v22, 0.0  ;;  %v210_v59 = vsel %vm67_vm0, %v164_v23, 0.0 }
  0xb7   :  { %205 = vadd.xlane.f32.xlu1 %v204_v20  ;;  %208 = vadd.xlane.f32.xlu0 %v207_v24 }
  0xbb   :  { %211 = vadd.xlane.f32.xlu1 %v210_v59 }
 0x128   :  { %v167_v25 = vpop.xlane.xlu0 %166 }
 0x129   :  { %v213_v61 = vmul.f32 0.03125, %v167_v25 }
 0x12b   :  { %v229_v26 = vadd.f32 1e-05, %v213_v61 }
 0x12c   :  { %v170_v28 = vpop.xlane.xlu1 %169  ;;  %v173_v30 = vpop.xlane.xlu0 %172 }
 0x12d   :  { %343 = vrsqrt.f32 %v229_v26  ;;  %v214_v31 = vmul.f32 0.03125, %v170_v28  ;;  %v215_v32 = vmul.f32 0.03125, %v173_v30 }
 0x12f   :  { %v230_v33 = vadd.f32 1e-05, %v214_v31  ;;  %v231_v34 = vadd.f32 1e-05, %v215_v32 }
 0x130   :  { %v176_v19 = vpop.xlane.xlu1 %175  ;;  %v179_v21 = vpop.xlane.xlu0 %178 }
 0x131   :  { %345 = vrsqrt.f32 %v230_v33  ;;  %v216_v39 = vmul.f32 0.03125, %v176_v19  ;;  %v217_v40 = vmul.f32 0.03125, %v179_v21 }
 0x132   :  { %347 = vrsqrt.f32 %v231_v34 }
 0x133   :  { %v232_v41 = vadd.f32 1e-05, %v216_v39  ;;  %v233_v42 = vadd.f32 1e-05, %v217_v40 }
 0x134   :  { %v182_v44 = vpop.xlane.xlu1 %181  ;;  %v185_v46 = vpop.xlane.xlu0 %184 }
 0x135   :  { %349 = vrsqrt.f32 %v232_v41  ;;  %v218_v27 = vmul.f32 0.03125, %v182_v44  ;;  %v219_v29 = vmul.f32 0.03125, %v185_v46 }
 0x136   :  { %351 = vrsqrt.f32 %v233_v42 }
 0x137   :  { %v344_v49 = vpop.eup %343  ;;  %v234_v52 = vadd.f32 1e-05, %v218_v27  ;;  %v235_v54 = vadd.f32 1e-05, %v219_v29 }
 0x138   :  { %v261_v55 = vmul.f32 %v344_v49, %v561_v5  ;;  %v188_v56 = vpop.xlane.xlu1 %187  ;;  %v191_v35 = vpop.xlane.xlu0 %190 }
 0x139   :  { %353 = vrsqrt.f32 %v234_v52  ;;  %v220_v60 = vmul.f32 0.03125, %v188_v56  ;;  %v221_v62 = vmul.f32 0.03125, %v191_v35 }
 0x13a   :  { %v283_v63 = vmul.f32 %v659_v50, %v261_v55  ;;  %355 = vrsqrt.f32 %v235_v54 }
 0x13b   :  { %v346_v0 = vpop.eup %345  ;;  %v236_v1 = vadd.f32 1e-05, %v220_v60  ;;  %v237_v2 = vadd.f32 1e-05, %v221_v62 }
 0x13c   :  { %v348_v43 = vpop.eup %347  ;;  %v305_v45 = vadd.f32 %v665_v37, %v283_v63  ;;  %v262_v5 = vmul.f32 %v346_v0, %v571_v16  ;;  %v194_v10 = vpop.xlane.xlu1 %193 }
 0x13d   :  { %v197_v11 = vpop.xlane.xlu0 %196  ;;  %v263_v12 = vmul.f32 %v348_v43, %v564_v6  ;;  %357 = vrsqrt.f32 %v236_v1  ;;  %v222_v14 = vmul.f32 0.03125, %v194_v10 }
 0x13e   :  { %v223_v15 = vmul.f32 0.03125, %v197_v11  ;;  %321 = vst.msk [vmem:[%s782_s4] sm:$0xff] %vm67_vm0, %v305_v45  ;;  %v284_v17 = vmul.f32 %v659_v50, %v262_v5  ;;  %359 = vrsqrt.f32 %v237_v2 }
 0x13f   :  { %v350_v51 = vpop.eup %349  ;;  %v285_v53 = vmul.f32 %v659_v50, %v263_v12  ;;  %v238_v20 = vadd.f32 1e-05, %v222_v14 }
 0x140   :  { %v239_v16 = vadd.f32 1e-05, %v223_v15  ;;  %v352_v22 = vpop.eup %351  ;;  %v306_v23 = vadd.f32 %v665_v37, %v284_v17  ;;  %v264_v6 = vmul.f32 %v350_v51, %v575_v3  ;;  %v200_v24 = vpop.xlane.xlu1 %199 }
 0x141   :  { %v203_v59 = vpop.xlane.xlu0 %202  ;;  %v307_v25 = vadd.f32 %v665_v37, %v285_v53  ;;  %v265_v61 = vmul.f32 %v352_v22, %v583_v8  ;;  %361 = vrsqrt.f32 %v238_v20  ;;  %v224_v26 = vmul.f32 0.03125, %v200_v24 }
 0x142   :  { %322 = vst.msk [vmem:[%s782_s4 + $0x8] sm:$0xff] %vm67_vm0, %v306_v23  ;;  %v286_v28 = vmul.f32 %v659_v50, %v264_v6  ;;  %363 = vrsqrt.f32 %v239_v16  ;;  %v225_v30 = vmul.f32 0.03125, %v203_v59 }
 0x143   :  { %v354_v31 = vpop.eup %353  ;;  %323 = vst.msk [vmem:[%s782_s4 + $0x10] sm:$0xff] %vm67_vm0, %v307_v25  ;;  %v287_v3 = vmul.f32 %v659_v50, %v265_v61  ;;  %v240_v8 = vadd.f32 1e-05, %v224_v26 }
 0x144   :  { %v356_v32 = vpop.eup %355  ;;  %v308_v33 = vadd.f32 %v665_v37, %v286_v28  ;;  %v266_v34 = vmul.f32 %v354_v31, %v587_v13  ;;  %v241_v19 = vadd.f32 1e-05, %v225_v30  ;;  %v206_v21 = vpop.xlane.xlu1 %205 }
 0x145   :  { %v209_v39 = vpop.xlane.xlu0 %208  ;;  %v309_v40 = vadd.f32 %v665_v37, %v287_v3  ;;  %v267_v41 = vmul.f32 %v356_v32, %v595_v36  ;;  %365 = vrsqrt.f32 %v240_v8  ;;  %v226_v42 = vmul.f32 0.03125, %v206_v21 }
 0x146   :  { %324 = vst.msk [vmem:[%s782_s4 + $0x18] sm:$0xff] %vm67_vm0, %v308_v33  ;;  %v288_v44 = vmul.f32 %v659_v50, %v266_v34  ;;  %367 = vrsqrt.f32 %v241_v19  ;;  %v227_v46 = vmul.f32 0.03125, %v209_v39 }
 0x147   :  { %v358_v27 = vpop.eup %357  ;;  %325 = vst.msk [vmem:[%s782_s4 + $0x20] sm:$0xff] %vm67_vm0, %v309_v40  ;;  %v289_v13 = vmul.f32 %v659_v50, %v267_v41  ;;  %v242_v36 = vadd.f32 1e-05, %v226_v42 }
 0x148   :  { %v360_v29 = vpop.eup %359  ;;  %v310_v49 = vadd.f32 %v665_v37, %v288_v44  ;;  %v268_v52 = vmul.f32 %v358_v27, %v599_v38  ;;  %v243_v54 = vadd.f32 1e-05, %v227_v46  ;;  %v212_v55 = vpop.xlane.xlu1 %211 }
 0x149   :  { %v311_v56 = vadd.f32 %v665_v37, %v289_v13  ;;  %v269_v35 = vmul.f32 %v360_v29, %v607_v47  ;;  %369 = vrsqrt.f32 %v242_v36  ;;  %v228_v60 = vmul.f32 0.03125, %v212_v55 }
 0x14a   :  { %326 = vst.msk [vmem:[%s782_s4 + $0x28] sm:$0xff] %vm67_vm0, %v310_v49  ;;  %v290_v62 = vmul.f32 %v659_v50, %v268_v52  ;;  %371 = vrsqrt.f32 %v243_v54 }
 0x14b   :  { %v362_v63 = vpop.eup %361  ;;  %327 = vst.msk [vmem:[%s782_s4 + $0x30] sm:$0xff] %vm67_vm0, %v311_v56  ;;  %v291_v38 = vmul.f32 %v659_v50, %v269_v35  ;;  %v244_v0 = vadd.f32 1e-05, %v228_v60 }
 0x14c   :  { %v364_v47 = vpop.eup %363  ;;  %v312_v1 = vadd.f32 %v665_v37, %v290_v62  ;;  %v270_v2 = vmul.f32 %v362_v63, %v611_v48 }
 0x14d   :  { %v313_v43 = vadd.f32 %v665_v37, %v291_v38  ;;  %v271_v45 = vmul.f32 %v364_v47, %v619_v57  ;;  %373 = vrsqrt.f32 %v244_v0 }
 0x14e   :  { %328 = vst.msk [vmem:[%s782_s4 + $0x38] sm:$0xff] %vm67_vm0, %v312_v1  ;;  %v292_v5 = vmul.f32 %v659_v50, %v270_v2 }
 0x14f   :  { %v366_v10 = vpop.eup %365  ;;  %329 = vst.msk [vmem:[%s782_s4 + $0x40] sm:$0xff] %vm67_vm0, %v313_v43  ;;  %v293_v48 = vmul.f32 %v659_v50, %v271_v45 }
 0x150   :  { %v368_v11 = vpop.eup %367  ;;  %v314_v12 = vadd.f32 %v665_v37, %v292_v5  ;;  %v272_v57 = vmul.f32 %v366_v10, %v623_v58 }
 0x151   :  { %v315_v14 = vadd.f32 %v665_v37, %v293_v48  ;;  %v273_v15 = vmul.f32 %v368_v11, %v631_v4 }
 0x152   :  { %330 = vst.msk [vmem:[%s782_s4 + $0x48] sm:$0xff] %vm67_vm0, %v314_v12  ;;  %v294_v17 = vmul.f32 %v659_v50, %v272_v57 }
 0x153   :  { %v370_v51 = vpop.eup %369  ;;  %331 = vst.msk [vmem:[%s782_s4 + $0x50] sm:$0xff] %vm67_vm0, %v315_v14  ;;  %v295_v53 = vmul.f32 %v659_v50, %v273_v15 }
 0x154   :  { %v372_v58 = vpop.eup %371  ;;  %v316_v20 = vadd.f32 %v665_v37, %v294_v17  ;;  %v274_v4 = vmul.f32 %v370_v51, %v635_v9 }
 0x155   :  { %v317_v16 = vadd.f32 %v665_v37, %v295_v53  ;;  %v275_v22 = vmul.f32 %v372_v58, %v643_v7 }
 0x156   :  { %332 = vst.msk [vmem:[%s782_s4 + $0x58] sm:$0xff] %vm67_vm0, %v316_v20  ;;  %v296_v23 = vmul.f32 %v659_v50, %v274_v4 }
 0x157   :  { %v374_v6 = vpop.eup %373  ;;  %333 = vst.msk [vmem:[%s782_s4 + $0x60] sm:$0xff] %vm67_vm0, %v317_v16  ;;  %v297_v24 = vmul.f32 %v659_v50, %v275_v22 }
 0x158   :  { %v318_v9 = vadd.f32 %v665_v37, %v296_v23  ;;  %v276_v59 = vmul.f32 %v374_v6, %v647_v18 }
 0x159   :  { %v319_v7 = vadd.f32 %v665_v37, %v297_v24 }
 0x15a   :  { %334 = vst.msk [vmem:[%s782_s4 + $0x68] sm:$0xff] %vm67_vm0, %v318_v9  ;;  %v298_v25 = vmul.f32 %v659_v50, %v276_v59 }
 0x15b   :  { %335 = vst.msk [vmem:[%s782_s4 + $0x70] sm:$0xff] %vm67_vm0, %v319_v7 }
 0x15c   :  { %v320_v61 = vadd.f32 %v665_v37, %v298_v25 }
 0x15e   :  { %336 = vst.msk [vmem:[%s782_s4 + $0x78] sm:$0xff] %vm67_vm0, %v320_v61 }

// kernel: vss_decoder_layer.22
= control target key start
LH: loop header
LB: loop body
LE: loop exit
PB: predicated region body
PF: predicated region fallthrough
CT: control target
= control target key end

     0   :  { %vm42_vm0 = vcmask 523264   ;;  %vm496_vm1 = vcmask 261120   ;;  %s1042_s0 = inlined_call_operand.vmem [shape: f32[128,64], index: 0, kind: input, shape index: {}]   ;;  %s1043_s3 = inlined_call_operand.vmem [shape: bf16[64,32], index: 3, kind: input, shape index: {}]   ;;  %s1044_s1 = inlined_call_operand.vmem [shape: f32[1,64], index: 1, kind: input, shape index: {}]   ;;  %s1045_s2 = inlined_call_operand.vmem [shape: f32[1,64], index: 2, kind: input, shape index: {}]   ;;  %s1046_s4 = inlined_call_operand.vmem [shape: f32[1,32], index: 4, kind: input, shape index: {}]   ;;  %s1047_s5 = inlined_call_operand.vmem [shape: f32[128,32], index: 5, kind: input, shape index: {}]   ;;  %s1048_s6 = inlined_call_operand.vmem [shape: f32[128,32], index: 6, kind: output, shape index: {}]  }
   0x1   :  { %v24_v0 = vld [vmem:[%s1042_s0] sm:$0xff]  ;;  %v25_v2 = vld [vmem:[%s1042_s0 + $0x8] sm:$0xff]  ;;  %v26_v8 = vld [vmem:[%s1042_s0 + $0x10] sm:$0xff] }
   0x2   :  { %v32_v1 = vld [vmem:[%s1042_s0 + $0x40] sm:$0xff]  ;;  %v43_v3 = vsel %vm42_vm0, %v24_v0, 0.0  ;;  %v33_v5 = vld [vmem:[%s1042_s0 + $0x48] sm:$0xff]  ;;  %v46_v6 = vsel %vm42_vm0, %v25_v2, 0.0  ;;  %v27_v9 = vld [vmem:[%s1042_s0 + $0x18] sm:$0xff]  ;;  %v49_v10 = vsel %vm42_vm0, %v26_v8, 0.0 }
   0x3   :  { %v67_v4 = vsel %vm42_vm0, %v32_v1, 0.0  ;;  %44 = vadd.xlane.f32.xlu0 %v43_v3  ;;  %v70_v7 = vsel %vm42_vm0, %v33_v5, 0.0  ;;  %v52_v11 = vsel %vm42_vm0, %v27_v9, 0.0  ;;  %v674_v12 = vld [vmem:[%s1042_s0 + $0x50] sm:$0xff]  ;;  %v679_v13 = vld [vmem:[%s1042_s0 + $0x58] sm:$0xff]  ;;  %v688_v16 = vld [vmem:[%s1042_s0 + $0x20] sm:$0xff] }
   0x4   :  { %68 = vadd.xlane.f32.xlu1 %v67_v4  ;;  %v73_v14 = vsel %vm42_vm0, %v674_v12, 0.0  ;;  %v76_v15 = vsel %vm42_vm0, %v679_v13, 0.0  ;;  %v693_v17 = vld [vmem:[%s1042_s0 + $0x28] sm:$0xff]  ;;  %v55_v18 = vsel %vm42_vm0, %v688_v16, 0.0  ;;  %v702_v20 = vld [vmem:[%s1042_s0 + $0x60] sm:$0xff]  ;;  %v716_v24 = vld [vmem:[%s1042_s0 + $0x30] sm:$0xff] }
   0x5   :  { %v58_v19 = vsel %vm42_vm0, %v693_v17, 0.0  ;;  %v707_v21 = vld [vmem:[%s1042_s0 + $0x68] sm:$0xff]  ;;  %v79_v22 = vsel %vm42_vm0, %v702_v20, 0.0  ;;  %v721_v25 = vld [vmem:[%s1042_s0 + $0x38] sm:$0xff]  ;;  %v61_v26 = vsel %vm42_vm0, %v716_v24, 0.0  ;;  %v730_v28 = vld [vmem:[%s1042_s0 + $0x70] sm:$0xff] }
   0x6   :  { %v82_v23 = vsel %vm42_vm0, %v707_v21, 0.0  ;;  %v64_v27 = vsel %vm42_vm0, %v721_v25, 0.0  ;;  %v735_v29 = vld [vmem:[%s1042_s0 + $0x78] sm:$0xff]  ;;  %v85_v30 = vsel %vm42_vm0, %v730_v28, 0.0 }
   0x7   :  { %47 = vadd.xlane.f32.xlu0 %v46_v6  ;;  %v88_v31 = vsel %vm42_vm0, %v735_v29, 0.0 }
   0x8   :  { %71 = vadd.xlane.f32.xlu1 %v70_v7 }
   0xb   :  { %50 = vadd.xlane.f32.xlu0 %v49_v10 }
   0xc   :  { %53 = vadd.xlane.f32.xlu1 %v52_v11 }
   0xf   :  { %74 = vadd.xlane.f32.xlu0 %v73_v14 }
  0x10   :  { %77 = vadd.xlane.f32.xlu1 %v76_v15 }
  0x13   :  { %56 = vadd.xlane.f32.xlu0 %v55_v18 }
  0x14   :  { %59 = vadd.xlane.f32.xlu1 %v58_v19 }
  0x17   :  { %80 = vadd.xlane.f32.xlu0 %v79_v22 }
  0x18   :  { %83 = vadd.xlane.f32.xlu1 %v82_v23 }
  0x1b   :  { %62 = vadd.xlane.f32.xlu0 %v61_v26 }
  0x1c   :  { %65 = vadd.xlane.f32.xlu1 %v64_v27 }
  0x1f   :  { %86 = vadd.xlane.f32.xlu0 %v85_v30 }
  0x20   :  { %89 = vadd.xlane.f32.xlu1 %v88_v31 }
  0x90   :  { %v45_v32 = vpop.xlane.xlu0 %44 }
  0x91   :  { %v69_v33 = vpop.xlane.xlu1 %68  ;;  %v92_v34 = vmul.f32 0.015625, %v45_v32 }
  0x92   :  { %v100_v35 = vmul.f32 0.015625, %v69_v33 }
  0x93   :  { %v741_v36 = vsub.f32 %v24_v0, %v92_v34 }
  0x94   :  { %v743_v37 = vsub.f32 %v32_v1, %v100_v35  ;;  %v48_v38 = vpop.xlane.xlu0 %47 }
  0x95   :  { %v72_v39 = vpop.xlane.xlu1 %71  ;;  %v93_v40 = vmul.f32 0.015625, %v48_v38  ;;  %v124_v42 = vmul.f32 %v741_v36, %v741_v36 }
  0x96   :  { %v101_v41 = vmul.f32 0.015625, %v72_v39  ;;  %v132_v43 = vmul.f32 %v743_v37, %v743_v37 }
  0x97   :  { %v749_v44 = vsub.f32 %v25_v2, %v93_v40  ;;  %v140_v46 = vsel %vm42_vm0, %v124_v42, 0.0 }
  0x98   :  { %v751_v45 = vsub.f32 %v33_v5, %v101_v41  ;;  %141 = vadd.xlane.f32.xlu0 %v140_v46  ;;  %v51_v47 = vpop.xlane.xlu0 %50  ;;  %v164_v49 = vsel %vm42_vm0, %v132_v43, 0.0 }
  0x99   :  { %v54_v48 = vpop.xlane.xlu1 %53  ;;  %v94_v50 = vmul.f32 0.015625, %v51_v47  ;;  %v125_v52 = vmul.f32 %v749_v44, %v749_v44 }
  0x9a   :  { %v95_v51 = vmul.f32 0.015625, %v54_v48  ;;  %v133_v53 = vmul.f32 %v751_v45, %v751_v45 }
  0x9b   :  { %v759_v54 = vsub.f32 %v26_v8, %v94_v50  ;;  %v143_v56 = vsel %vm42_vm0, %v125_v52, 0.0 }
  0x9c   :  { %v761_v55 = vsub.f32 %v27_v9, %v95_v51  ;;  %165 = vadd.xlane.f32.xlu0 %v164_v49  ;;  %144 = vadd.xlane.f32.xlu1 %v143_v56  ;;  %v75_v57 = vpop.xlane.xlu0 %74  ;;  %v167_v59 = vsel %vm42_vm0, %v133_v53, 0.0  ;;  %v577_v53 = vld [vmem:[%s1043_s3 + $0x8] sm:$0xff]   ;;  %v578_v56 = vld [vmem:[%s1043_s3 + $0x10] sm:$0xff]  }
  0x9d   :  { %v78_v58 = vpop.xlane.xlu1 %77  ;;  %v102_v60 = vmul.f32 0.015625, %v75_v57  ;;  %v126_v62 = vmul.f32 %v759_v54, %v759_v54  ;;  %v579_v57 = vld [vmem:[%s1043_s3 + $0x18] sm:$0xff]  }
  0x9e   :  { %v103_v61 = vmul.f32 0.015625, %v78_v58  ;;  %v127_v63 = vmul.f32 %v761_v55, %v761_v55 }
  0x9f   :  { %v770_v0 = vsub.f32 %v674_v12, %v102_v60  ;;  %v146_v2 = vsel %vm42_vm0, %v126_v62, 0.0 }
  0xa0   :  { %v773_v1 = vsub.f32 %v679_v13, %v103_v61  ;;  %168 = vadd.xlane.f32.xlu1 %v167_v59  ;;  %147 = vadd.xlane.f32.xlu0 %v146_v2  ;;  %v57_v3 = vpop.xlane.xlu0 %56  ;;  %v149_v5 = vsel %vm42_vm0, %v127_v63, 0.0 }
  0xa1   :  { %v60_v4 = vpop.xlane.xlu1 %59  ;;  %v96_v6 = vmul.f32 0.015625, %v57_v3  ;;  %v134_v8 = vmul.f32 %v770_v0, %v770_v0 }
  0xa2   :  { %v97_v7 = vmul.f32 0.015625, %v60_v4  ;;  %v135_v9 = vmul.f32 %v773_v1, %v773_v1 }
  0xa3   :  { %v782_v10 = vsub.f32 %v688_v16, %v96_v6  ;;  %v170_v12 = vsel %vm42_vm0, %v134_v8, 0.0 }
  0xa4   :  { %v785_v11 = vsub.f32 %v693_v17, %v97_v7  ;;  %150 = vadd.xlane.f32.xlu1 %v149_v5  ;;  %171 = vadd.xlane.f32.xlu0 %v170_v12  ;;  %v81_v13 = vpop.xlane.xlu0 %80  ;;  %v173_v15 = vsel %vm42_vm0, %v135_v9, 0.0 }
  0xa5   :  { %v84_v14 = vpop.xlane.xlu1 %83  ;;  %v104_v18 = vmul.f32 0.015625, %v81_v13  ;;  %v128_v22 = vmul.f32 %v782_v10, %v782_v10 }
  0xa6   :  { %v105_v19 = vmul.f32 0.015625, %v84_v14  ;;  %v129_v16 = vmul.f32 %v785_v11, %v785_v11 }
  0xa7   :  { %v794_v23 = vsub.f32 %v702_v20, %v104_v18  ;;  %v152_v26 = vsel %vm42_vm0, %v128_v22, 0.0 }
  0xa8   :  { %v797_v17 = vsub.f32 %v707_v21, %v105_v19  ;;  %174 = vadd.xlane.f32.xlu1 %v173_v15  ;;  %153 = vadd.xlane.f32.xlu0 %v152_v26  ;;  %v63_v27 = vpop.xlane.xlu0 %62  ;;  %v155_v31 = vsel %vm42_vm0, %v129_v16, 0.0 }
  0xa9   :  { %v66_v30 = vpop.xlane.xlu1 %65  ;;  %v98_v32 = vmul.f32 0.015625, %v63_v27  ;;  %v136_v34 = vmul.f32 %v794_v23, %v794_v23 }
  0xaa   :  { %v99_v33 = vmul.f32 0.015625, %v66_v30  ;;  %v137_v20 = vmul.f32 %v797_v17, %v797_v17 }
  0xab   :  { %v806_v35 = vsub.f32 %v716_v24, %v98_v32  ;;  %v176_v38 = vsel %vm42_vm0, %v136_v34, 0.0 }
  0xac   :  { %v809_v21 = vsub.f32 %v721_v25, %v99_v33  ;;  %156 = vadd.xlane.f32.xlu1 %v155_v31  ;;  %177 = vadd.xlane.f32.xlu0 %v176_v38  ;;  %v87_v39 = vpop.xlane.xlu0 %86  ;;  %v179_v41 = vsel %vm42_vm0, %v137_v20, 0.0  ;;  %v847_v33 = vld [vmem:[%s1044_s1] ss:$0 sm:$0xff] }
  0xad   :  { %v90_v40 = vpop.xlane.xlu1 %89  ;;  %v106_v42 = vmul.f32 0.015625, %v87_v39  ;;  %v130_v46 = vmul.f32 %v806_v35, %v806_v35 }
  0xae   :  { %v107_v43 = vmul.f32 0.015625, %v90_v40  ;;  %v131_v24 = vmul.f32 %v809_v21, %v809_v21 }
  0xaf   :  { %v818_v47 = vsub.f32 %v730_v28, %v106_v42  ;;  %v158_v48 = vsel %vm42_vm0, %v130_v46, 0.0 }
  0xb0   :  { %v821_v25 = vsub.f32 %v735_v29, %v107_v43  ;;  %180 = vadd.xlane.f32.xlu1 %v179_v41  ;;  %159 = vadd.xlane.f32.xlu0 %v158_v48  ;;  %v161_v49 = vsel %vm42_vm0, %v131_v24, 0.0  ;;  %v576_v29 = vld [vmem:[%s1043_s3] sm:$0xff]  }
  0xb1   :  { %v138_v50 = vmul.f32 %v818_v47, %v818_v47  ;;  %544 = vmatprep.subr.bf16.mxu0 %v576_v29  ;;  %568 = vmatprep.subr.bf16.mxu1 %v576_v29  ;;  %v854_v24 = vld [vmem:[%s1045_s2] ss:$0 sm:$0xff] }
  0xb2   :  { %v139_v51 = vmul.f32 %v821_v25, %v821_v25  ;;  %545 = vmatpush3.bf16.msra.mxu0 %v576_v29  ;;  %572 = vmatpush3.bf16.msra.mxu1 %v576_v29 }
  0xb3   :  { %v182_v52 = vsel %vm42_vm0, %v138_v50, 0.0  ;;  %546 = vmatprep.subr.bf16.mxu0 %v577_v53  ;;  %569 = vmatprep.subr.bf16.mxu1 %v577_v53 }
  0xb4   :  { %162 = vadd.xlane.f32.xlu1 %v161_v49  ;;  %183 = vadd.xlane.f32.xlu0 %v182_v52  ;;  %v185_v28 = vsel %vm42_vm0, %v139_v51, 0.0 }
  0xb6   :  { %547 = vmatpush3.bf16.msra.mxu0 %v577_v53  ;;  %573 = vmatpush3.bf16.msra.mxu1 %v577_v53 }
  0xb7   :  { %548 = vmatprep.subr.bf16.mxu0 %v578_v56  ;;  %570 = vmatprep.subr.bf16.mxu1 %v578_v56 }
  0xb8   :  { %186 = vadd.xlane.f32.xlu1 %v185_v28 }
  0xba   :  { %549 = vmatpush3.bf16.msra.mxu0 %v578_v56  ;;  %574 = vmatpush3.bf16.msra.mxu1 %v578_v56 }
  0xbb   :  { %550 = vmatprep.subr.bf16.mxu0 %v579_v57  ;;  %571 = vmatprep.subr.bf16.mxu1 %v579_v57 }
  0xbe   :  { %551 = vmatpush3.bf16.msra.mxu0 %v579_v57  ;;  %575 = vmatpush3.bf16.msra.mxu1 %v579_v57 }
 0x125   :  { %v142_v58 = vpop.xlane.xlu0 %141 }
 0x126   :  { %v188_v59 = vmul.f32 0.015625, %v142_v58 }
 0x128   :  { %v204_v60 = vadd.f32 1e-05, %v188_v59 }
 0x129   :  { %v145_v61 = vpop.xlane.xlu1 %144  ;;  %v166_v62 = vpop.xlane.xlu0 %165 }
 0x12a   :  { %580 = vrsqrt.f32 %v204_v60  ;;  %v189_v63 = vmul.f32 0.015625, %v145_v61  ;;  %v196_v2 = vmul.f32 0.015625, %v166_v62 }
 0x12c   :  { %v205_v3 = vadd.f32 1e-05, %v189_v63  ;;  %v212_v4 = vadd.f32 1e-05, %v196_v2 }
 0x12d   :  { %v169_v5 = vpop.xlane.xlu1 %168  ;;  %v148_v6 = vpop.xlane.xlu0 %147 }
 0x12e   :  { %582 = vrsqrt.f32 %v205_v3  ;;  %v197_v7 = vmul.f32 0.015625, %v169_v5  ;;  %v190_v8 = vmul.f32 0.015625, %v148_v6 }
 0x12f   :  { %584 = vrsqrt.f32 %v212_v4 }
 0x130   :  { %v213_v9 = vadd.f32 1e-05, %v197_v7  ;;  %v206_v12 = vadd.f32 1e-05, %v190_v8 }
 0x131   :  { %v151_v13 = vpop.xlane.xlu1 %150  ;;  %v172_v14 = vpop.xlane.xlu0 %171 }
 0x132   :  { %586 = vrsqrt.f32 %v213_v9  ;;  %v191_v15 = vmul.f32 0.015625, %v151_v13  ;;  %v198_v18 = vmul.f32 0.015625, %v172_v14 }
 0x133   :  { %588 = vrsqrt.f32 %v206_v12 }
 0x134   :  { %v581_v19 = vpop.eup %580  ;;  %v207_v22 = vadd.f32 1e-05, %v191_v15  ;;  %v214_v16 = vadd.f32 1e-05, %v198_v18 }
 0x135   :  { %v175_v26 = vpop.xlane.xlu1 %174  ;;  %v154_v27 = vpop.xlane.xlu0 %153  ;;  %v236_v30 = vmul.f32 %v581_v19, %v741_v36 }
 0x136   :  { %590 = vrsqrt.f32 %v207_v22  ;;  %v199_v31 = vmul.f32 0.015625, %v175_v26  ;;  %v192_v32 = vmul.f32 0.015625, %v154_v27 }
 0x137   :  { %592 = vrsqrt.f32 %v214_v16  ;;  %v258_v43 = vmul.f32 %v847_v33, %v236_v30 }
 0x138   :  { %v583_v34 = vpop.eup %582  ;;  %v215_v20 = vadd.f32 1e-05, %v199_v31  ;;  %v208_v38 = vadd.f32 1e-05, %v192_v32 }
 0x139   :  { %v585_v39 = vpop.eup %584  ;;  %v157_v40 = vpop.xlane.xlu1 %156  ;;  %v237_v42 = vmul.f32 %v583_v34, %v749_v44  ;;  %v280_v53 = vadd.f32 %v854_v24, %v258_v43 }
 0x13a   :  { %v178_v41 = vpop.xlane.xlu0 %177  ;;  %594 = vrsqrt.f32 %v215_v20  ;;  %v193_v36 = vmul.f32 0.015625, %v157_v40  ;;  %v244_v48 = vmul.f32 %v585_v39, %v743_v37 }
 0x13b   :  { %v200_v46 = vmul.f32 0.015625, %v178_v41  ;;  %596 = vrsqrt.f32 %v208_v38  ;;  %v259_v49 = vmul.f32 %v847_v33, %v237_v42 }
 0x13c   :  { %v587_v50 = vpop.eup %586  ;;  %v209_v51 = vadd.f32 1e-05, %v193_v36  ;;  %v266_v58 = vmul.f32 %v847_v33, %v244_v48 }
 0x13d   :  { %v216_v52 = vadd.f32 1e-05, %v200_v46  ;;  %v589_v28 = vpop.eup %588  ;;  %v181_v44 = vpop.xlane.xlu1 %180  ;;  %v281_v56 = vadd.f32 %v854_v24, %v259_v49  ;;  %v245_v57 = vmul.f32 %v587_v50, %v751_v45 }
 0x13e   :  { %v160_v29 = vpop.xlane.xlu0 %159  ;;  %v238_v59 = vmul.f32 %v589_v28, %v759_v54  ;;  %598 = vrsqrt.f32 %v209_v51  ;;  %v201_v37 = vmul.f32 0.015625, %v181_v44  ;;  %v288_v7 = vadd.f32 %v854_v24, %v266_v58 }
 0x13f   :  { %v194_v60 = vmul.f32 0.015625, %v160_v29  ;;  %600 = vrsqrt.f32 %v216_v52  ;;  %v296_v61 = vpack.c.bf16 %v281_v56, %v280_v53  ;;  %v267_v62 = vmul.f32 %v847_v33, %v245_v57 }
 0x140   :  { %v591_v63 = vpop.eup %590  ;;  %v217_v2 = vadd.f32 1e-05, %v201_v37  ;;  %v260_v8 = vmul.f32 %v847_v33, %v238_v59 }
 0x141   :  { %v210_v3 = vadd.f32 1e-05, %v194_v60  ;;  %v593_v4 = vpop.eup %592  ;;  %v239_v5 = vmul.f32 %v591_v63, %v761_v55  ;;  %v163_v6 = vpop.xlane.xlu1 %162  ;;  %552 = vmatprep.mubr.msk.bf16.mxu0 %vm42_vm0, %v296_v61  ;;  %v289_v54 = vadd.f32 %v854_v24, %v267_v62 }
 0x142   :  { %v184_v45 = vpop.xlane.xlu0 %183  ;;  %v246_v9 = vmul.f32 %v593_v4, %v770_v0  ;;  %602 = vrsqrt.f32 %v217_v2  ;;  %v195_v12 = vmul.f32 0.015625, %v163_v6  ;;  %v282_v27 = vadd.f32 %v854_v24, %v260_v8 }
 0x143   :  { %v202_v13 = vmul.f32 0.015625, %v184_v45  ;;  %604 = vrsqrt.f32 %v210_v3  ;;  %v300_v14 = vpack.c.bf16 %v289_v54, %v288_v7  ;;  %v261_v15 = vmul.f32 %v847_v33, %v239_v5  ;;  %v466_v45 = vld [vmem:[%s1047_s5 + $0x10] sm:$0xff] }
 0x144   :  { %v595_v55 = vpop.eup %594  ;;  %v211_v18 = vadd.f32 1e-05, %v195_v12  ;;  %v268_v30 = vmul.f32 %v847_v33, %v246_v9  ;;  %v467_v9 = vld [vmem:[%s1047_s5 + $0x18] sm:$0xff] }
 0x145   :  { %v218_v19 = vadd.f32 1e-05, %v202_v13  ;;  %v597_v22 = vpop.eup %596  ;;  %v247_v16 = vmul.f32 %v595_v55, %v773_v1  ;;  %v187_v26 = vpop.xlane.xlu1 %186  ;;  %560 = vmatprep.mubr.msk.bf16.mxu1 %vm42_vm0, %v300_v14  ;;  %v283_v0 = vadd.f32 %v854_v24, %v261_v15  ;;  %v465_v15 = vld [vmem:[%s1047_s5 + $0x8] sm:$0xff] }
 0x146   :  { %v240_v31 = vmul.f32 %v597_v22, %v782_v10  ;;  %606 = vrsqrt.f32 %v211_v18  ;;  %v203_v32 = vmul.f32 0.015625, %v187_v26  ;;  %v290_v41 = vadd.f32 %v854_v24, %v268_v30  ;;  %v474_v22 = vld [vmem:[%s1047_s5 + $0x50] sm:$0xff] }
 0x147   :  { %608 = vrsqrt.f32 %v218_v19  ;;  %v297_v34 = vpack.c.bf16 %v283_v0, %v282_v27  ;;  %v269_v20 = vmul.f32 %v847_v33, %v247_v16  ;;  %v472_v0 = vld [vmem:[%s1047_s5 + $0x40] sm:$0xff] }
 0x148   :  { %v599_v38 = vpop.eup %598  ;;  %v219_v39 = vadd.f32 1e-05, %v203_v32  ;;  %v262_v43 = vmul.f32 %v847_v33, %v240_v31 }
 0x149   :  { %v601_v1 = vpop.eup %600  ;;  %v241_v40 = vmul.f32 %v599_v38, %v785_v11  ;;  %553 = vmatmul.mubr.msk.bf16.vlgmr.msra.gmra.mrb[0].mxu0 %vm42_vm0, %v297_v34  ;;  %v291_v42 = vadd.f32 %v854_v24, %v269_v20  ;;  %v475_v34 = vld [vmem:[%s1047_s5 + $0x58] sm:$0xff] }
 0x14a   :  { %v248_v10 = vmul.f32 %v601_v1, %v794_v23  ;;  %610 = vrsqrt.f32 %v219_v39  ;;  %v284_v11 = vadd.f32 %v854_v24, %v262_v43  ;;  %v473_v1 = vld [vmem:[%s1047_s5 + $0x48] sm:$0xff] }
 0x14b   :  { %v301_v36 = vpack.c.bf16 %v291_v42, %v290_v41  ;;  %v263_v46 = vmul.f32 %v847_v33, %v241_v40 }
 0x14c   :  { %v603_v48 = vpop.eup %602  ;;  %v270_v52 = vmul.f32 %v847_v33, %v248_v10 }
 0x14d   :  { %v605_v49 = vpop.eup %604  ;;  %v249_v50 = vmul.f32 %v603_v48, %v797_v17  ;;  %561 = vmatmul.mubr.msk.bf16.vlgmr.msra.gmra.mrb[0].mxu1 %vm42_vm0, %v301_v36  ;;  %v285_v51 = vadd.f32 %v854_v24, %v263_v46  ;;  %v470_v36 = vld [vmem:[%s1047_s5 + $0x30] sm:$0xff] }
 0x14e   :  { %v242_v28 = vmul.f32 %v605_v49, %v806_v35  ;;  %v292_v17 = vadd.f32 %v854_v24, %v270_v52  ;;  %v468_v49 = vld [vmem:[%s1047_s5 + $0x20] sm:$0xff] }
 0x14f   :  { %v298_v44 = vpack.c.bf16 %v285_v51, %v284_v11  ;;  %v271_v23 = vmul.f32 %v847_v33, %v249_v50  ;;  %v471_v51 = vld [vmem:[%s1047_s5 + $0x38] sm:$0xff] }
 0x150   :  { %v607_v29 = vpop.eup %606  ;;  %v264_v58 = vmul.f32 %v847_v33, %v242_v28 }
 0x151   :  { %v609_v53 = vpop.eup %608  ;;  %v243_v56 = vmul.f32 %v607_v29, %v809_v21  ;;  %556 = vmatprep.mubr.msk.bf16.mxu0 %vm42_vm0, %v298_v44  ;;  %v293_v57 = vadd.f32 %v854_v24, %v271_v23  ;;  %v469_v23 = vld [vmem:[%s1047_s5 + $0x28] sm:$0xff] }
 0x152   :  { %v250_v59 = vmul.f32 %v609_v53, %v818_v47  ;;  %v286_v21 = vadd.f32 %v854_v24, %v264_v58 }
 0x153   :  { %v302_v37 = vpack.c.bf16 %v293_v57, %v292_v17  ;;  %v265_v35 = vmul.f32 %v847_v33, %v243_v56  ;;  %v478_v17 = vld [vmem:[%s1047_s5 + $0x70] sm:$0xff] }
 0x154   :  { %v611_v60 = vpop.eup %610  ;;  %v272_v63 = vmul.f32 %v847_v33, %v250_v59 }
 0x155   :  { %v251_v61 = vmul.f32 %v611_v60, %v821_v25  ;;  %564 = vmatprep.mubr.msk.bf16.mxu1 %vm42_vm0, %v302_v37  ;;  %v287_v62 = vadd.f32 %v854_v24, %v265_v35  ;;  %v912_v25 = vld [vmem:[%s1046_s4] ss:$0 sm:$0xff] }
 0x156   :  { %v294_v47 = vadd.f32 %v854_v24, %v272_v63  ;;  %v476_v37 = vld [vmem:[%s1047_s5 + $0x60] sm:$0xff] }
 0x157   :  { %v299_v2 = vpack.c.bf16 %v287_v62, %v286_v21  ;;  %v273_v3 = vmul.f32 %v847_v33, %v251_v61  ;;  %v479_v21 = vld [vmem:[%s1047_s5 + $0x78] sm:$0xff] }
 0x159   :  { %557 = vmatmul.mubr.msk.bf16.gmra.mrb[4].mxu0 %vm42_vm0, %v299_v2  ;;  %v295_v4 = vadd.f32 %v854_v24, %v273_v3  ;;  %v464_v24 = vld [vmem:[%s1047_s5] sm:$0xff]  ;;  %v477_v3 = vld [vmem:[%s1047_s5 + $0x68] sm:$0xff] }
 0x15b   :  { %v303_v5 = vpack.c.bf16 %v295_v4, %v294_v47 }
 0x15d   :  { %565 = vmatmul.mubr.msk.bf16.gmra.mrb[4].mxu1 %vm42_vm0, %v303_v5 }
 0x21c   :  { %v554_v6 = vpop.f32.mrb[0].mxu0 }
 0x21d   :  { %v410_v33 = vadd.f32 %v554_v6, %v912_v25  ;;  %v401_v7 = vpop.f32.mrb[1].mxu0 }
 0x21e   :  { %v402_v54 = vadd.f32 %v912_v25, %v401_v7  ;;  %v555_v8 = vpop.f32.mrb[2].mxu0 }
 0x21f   :  { %v482_v12 = vadd.f32 %v466_v45, %v410_v33  ;;  %v413_v13 = vadd.f32 %v555_v8, %v912_v25  ;;  %v404_v14 = vpop.f32.mrb[3].mxu0 }
 0x220   :  { %v480_v55 = vadd.f32 %v464_v24, %v402_v54  ;;  %v405_v18 = vadd.f32 %v912_v25, %v404_v14  ;;  %v562_v19 = vpop.f32.mrb[0].mxu1 }
 0x221   :  { %499 = vst.msk [vmem:[%s1048_s6 + $0x10] sm:$0xff] %vm496_vm1, %v482_v12  ;;  %v483_v16 = vadd.f32 %v467_v9, %v413_v13  ;;  %v442_v26 = vadd.f32 %v562_v19, %v912_v25  ;;  %v433_v27 = vpop.f32.mrb[1].mxu1 }
 0x222   :  { %497 = vst.msk [vmem:[%s1048_s6] sm:$0xff] %vm496_vm1, %v480_v55  ;;  %v481_v30 = vadd.f32 %v465_v15, %v405_v18  ;;  %v434_v31 = vadd.f32 %v912_v25, %v433_v27  ;;  %v563_v32 = vpop.f32.mrb[2].mxu1 }
 0x223   :  { %500 = vst.msk [vmem:[%s1048_s6 + $0x18] sm:$0xff] %vm496_vm1, %v483_v16  ;;  %v490_v20 = vadd.f32 %v474_v22, %v442_v26  ;;  %v445_v38 = vadd.f32 %v563_v32, %v912_v25  ;;  %v436_v39 = vpop.f32.mrb[3].mxu1 }
 0x224   :  { %498 = vst.msk [vmem:[%s1048_s6 + $0x8] sm:$0xff] %vm496_vm1, %v481_v30  ;;  %v488_v40 = vadd.f32 %v472_v0, %v434_v31  ;;  %v437_v41 = vadd.f32 %v912_v25, %v436_v39 }
 0x225   :  { %507 = vst.msk [vmem:[%s1048_s6 + $0x50] sm:$0xff] %vm496_vm1, %v490_v20  ;;  %v491_v42 = vadd.f32 %v475_v34, %v445_v38 }
 0x226   :  { %505 = vst.msk [vmem:[%s1048_s6 + $0x40] sm:$0xff] %vm496_vm1, %v488_v40  ;;  %v489_v43 = vadd.f32 %v473_v1, %v437_v41 }
 0x227   :  { %508 = vst.msk [vmem:[%s1048_s6 + $0x58] sm:$0xff] %vm496_vm1, %v491_v42 }
 0x228   :  { %506 = vst.msk [vmem:[%s1048_s6 + $0x48] sm:$0xff] %vm496_vm1, %v489_v43 }
 0x22c   :  { %v558_v10 = vpop.f32.mrb[4].mxu0 }
 0x22d   :  { %v426_v46 = vadd.f32 %v558_v10, %v912_v25  ;;  %v417_v48 = vpop.f32.mrb[5].mxu0 }
 0x22e   :  { %v418_v50 = vadd.f32 %v912_v25, %v417_v48  ;;  %v559_v11 = vpop.f32.mrb[6].mxu0 }
 0x22f   :  { %v486_v52 = vadd.f32 %v470_v36, %v426_v46  ;;  %v429_v28 = vadd.f32 %v559_v11, %v912_v25  ;;  %v420_v44 = vpop.f32.mrb[7].mxu0 }
 0x230   :  { %v484_v29 = vadd.f32 %v468_v49, %v418_v50  ;;  %v421_v53 = vadd.f32 %v912_v25, %v420_v44  ;;  %v566_v56 = vpop.f32.mrb[4].mxu1 }
 0x231   :  { %503 = vst.msk [vmem:[%s1048_s6 + $0x30] sm:$0xff] %vm496_vm1, %v486_v52  ;;  %v487_v57 = vadd.f32 %v471_v51, %v429_v28  ;;  %v458_v58 = vadd.f32 %v566_v56, %v912_v25  ;;  %v449_v59 = vpop.f32.mrb[5].mxu1 }
 0x232   :  { %501 = vst.msk [vmem:[%s1048_s6 + $0x20] sm:$0xff] %vm496_vm1, %v484_v29  ;;  %v485_v35 = vadd.f32 %v469_v23, %v421_v53  ;;  %v450_v60 = vadd.f32 %v912_v25, %v449_v59  ;;  %v567_v61 = vpop.f32.mrb[6].mxu1 }
 0x233   :  { %504 = vst.msk [vmem:[%s1048_s6 + $0x38] sm:$0xff] %vm496_vm1, %v487_v57  ;;  %v494_v62 = vadd.f32 %v478_v17, %v458_v58  ;;  %v461_v63 = vadd.f32 %v567_v61, %v912_v25  ;;  %v452_v2 = vpop.f32.mrb[7].mxu1 }
 0x234   :  { %502 = vst.msk [vmem:[%s1048_s6 + $0x28] sm:$0xff] %vm496_vm1, %v485_v35  ;;  %v492_v47 = vadd.f32 %v476_v37, %v450_v60  ;;  %v453_v4 = vadd.f32 %v912_v25, %v452_v2 }
 0x235   :  { %511 = vst.msk [vmem:[%s1048_s6 + $0x70] sm:$0xff] %vm496_vm1, %v494_v62  ;;  %v495_v5 = vadd.f32 %v479_v21, %v461_v63 }
 0x236   :  { %509 = vst.msk [vmem:[%s1048_s6 + $0x60] sm:$0xff] %vm496_vm1, %v492_v47  ;;  %v493_v6 = vadd.f32 %v477_v3, %v453_v4 }
 0x237   :  { %512 = vst.msk [vmem:[%s1048_s6 + $0x78] sm:$0xff] %vm496_vm1, %v495_v5 }
 0x238   :  { %510 = vst.msk [vmem:[%s1048_s6 + $0x68] sm:$0xff] %vm496_vm1, %v493_v6 }

// kernel: vss_decoder_layer.23
= control target key start
LH: loop header
LB: loop body
LE: loop exit
PB: predicated region body
PF: predicated region fallthrough
CT: control target
= control target key end

     0   :  { %vm31_vm0 = vcmask 261120   ;;  %s1719_s0 = inlined_call_operand.vmem [shape: f32[128,32], index: 0, kind: input, shape index: {}]   ;;  %s1720_s3 = inlined_call_operand.vmem [shape: bf16[32,128], index: 3, kind: input, shape index: {}]   ;;  %s1721_s1 = inlined_call_operand.vmem [shape: f32[1,32], index: 1, kind: input, shape index: {}]   ;;  %s1722_s2 = inlined_call_operand.vmem [shape: f32[1,32], index: 2, kind: input, shape index: {}]   ;;  %s1723_s5 = inlined_call_operand.vmem [shape: bf16[128,32], index: 5, kind: input, shape index: {}]   ;;  %s1724_s4 = inlined_call_operand.vmem [shape: f32[1,128], index: 4, kind: input, shape index: {}]   ;;  %s1725_s6 = inlined_call_operand.vmem [shape: f32[1,32], index: 6, kind: input, shape index: {}]   ;;  %s1726_s7 = inlined_call_operand.vmem [shape: f32[128,32], index: 7, kind: output, shape index: {}]  }
   0x1   :  { %v48_v0 = vld [vmem:[%s1719_s0] sm:$0xff]  ;;  %v50_v1 = vld [vmem:[%s1719_s0 + $0x10] sm:$0xff]  ;;  %v49_v2 = vld [vmem:[%s1719_s0 + $0x8] sm:$0xff] }
   0x2   :  { %v67_v3 = vsel %vm31_vm0, %v48_v0, 0.0  ;;  %v73_v4 = vsel %vm31_vm0, %v50_v1, 0.0  ;;  %v51_v5 = vld [vmem:[%s1719_s0 + $0x18] sm:$0xff]  ;;  %v70_v6 = vsel %vm31_vm0, %v49_v2, 0.0  ;;  %v52_v8 = vld [vmem:[%s1719_s0 + $0x20] sm:$0xff]  ;;  %v53_v9 = vld [vmem:[%s1719_s0 + $0x28] sm:$0xff] }
   0x3   :  { %68 = vadd.xlane.f32.xlu0 %v67_v3  ;;  %74 = vadd.xlane.f32.xlu1 %v73_v4  ;;  %v76_v7 = vsel %vm31_vm0, %v51_v5, 0.0  ;;  %v79_v10 = vsel %vm31_vm0, %v52_v8, 0.0  ;;  %v82_v11 = vsel %vm31_vm0, %v53_v9, 0.0  ;;  %v1186_v12 = vld [vmem:[%s1719_s0 + $0x30] sm:$0xff]  ;;  %v1191_v13 = vld [vmem:[%s1719_s0 + $0x38] sm:$0xff]  ;;  %v1200_v16 = vld [vmem:[%s1719_s0 + $0x40] sm:$0xff] }
   0x4   :  { %v85_v14 = vsel %vm31_vm0, %v1186_v12, 0.0  ;;  %v88_v15 = vsel %vm31_vm0, %v1191_v13, 0.0  ;;  %v1205_v17 = vld [vmem:[%s1719_s0 + $0x48] sm:$0xff]  ;;  %v91_v18 = vsel %vm31_vm0, %v1200_v16, 0.0  ;;  %v1214_v20 = vld [vmem:[%s1719_s0 + $0x50] sm:$0xff]  ;;  %v1219_v21 = vld [vmem:[%s1719_s0 + $0x58] sm:$0xff] }
   0x5   :  { %v94_v19 = vsel %vm31_vm0, %v1205_v17, 0.0  ;;  %v97_v22 = vsel %vm31_vm0, %v1214_v20, 0.0  ;;  %v100_v23 = vsel %vm31_vm0, %v1219_v21, 0.0  ;;  %v1228_v24 = vld [vmem:[%s1719_s0 + $0x60] sm:$0xff]  ;;  %v1233_v25 = vld [vmem:[%s1719_s0 + $0x68] sm:$0xff]  ;;  %v1242_v28 = vld [vmem:[%s1719_s0 + $0x70] sm:$0xff] }
   0x6   :  { %v103_v26 = vsel %vm31_vm0, %v1228_v24, 0.0  ;;  %v106_v27 = vsel %vm31_vm0, %v1233_v25, 0.0  ;;  %v1247_v29 = vld [vmem:[%s1719_s0 + $0x78] sm:$0xff]  ;;  %v109_v30 = vsel %vm31_vm0, %v1242_v28, 0.0 }
   0x7   :  { %71 = vadd.xlane.f32.xlu0 %v70_v6  ;;  %77 = vadd.xlane.f32.xlu1 %v76_v7  ;;  %v112_v31 = vsel %vm31_vm0, %v1247_v29, 0.0 }
   0xb   :  { %80 = vadd.xlane.f32.xlu0 %v79_v10  ;;  %83 = vadd.xlane.f32.xlu1 %v82_v11 }
   0xf   :  { %86 = vadd.xlane.f32.xlu0 %v85_v14  ;;  %89 = vadd.xlane.f32.xlu1 %v88_v15 }
  0x13   :  { %92 = vadd.xlane.f32.xlu0 %v91_v18  ;;  %95 = vadd.xlane.f32.xlu1 %v94_v19 }
  0x17   :  { %98 = vadd.xlane.f32.xlu0 %v97_v22  ;;  %101 = vadd.xlane.f32.xlu1 %v100_v23 }
  0x1b   :  { %104 = vadd.xlane.f32.xlu0 %v103_v26  ;;  %107 = vadd.xlane.f32.xlu1 %v106_v27 }
  0x1f   :  { %110 = vadd.xlane.f32.xlu0 %v109_v30  ;;  %113 = vadd.xlane.f32.xlu1 %v112_v31 }
  0x90   :  { %v69_v32 = vpop.xlane.xlu0 %68  ;;  %v75_v33 = vpop.xlane.xlu1 %74 }
  0x91   :  { %v116_v34 = vmul.f32 0.03125, %v69_v32  ;;  %v118_v35 = vmul.f32 0.03125, %v75_v33 }
  0x93   :  { %v1253_v36 = vsub.f32 %v48_v0, %v116_v34  ;;  %v1255_v37 = vsub.f32 %v50_v1, %v118_v35 }
  0x94   :  { %v72_v38 = vpop.xlane.xlu0 %71  ;;  %v78_v39 = vpop.xlane.xlu1 %77 }
  0x95   :  { %v117_v40 = vmul.f32 0.03125, %v72_v38  ;;  %v119_v41 = vmul.f32 0.03125, %v78_v39  ;;  %v148_v42 = vmul.f32 %v1253_v36, %v1253_v36  ;;  %v150_v43 = vmul.f32 %v1255_v37, %v1255_v37 }
  0x97   :  { %v1261_v44 = vsub.f32 %v49_v2, %v117_v40  ;;  %v1263_v45 = vsub.f32 %v51_v5, %v119_v41  ;;  %v164_v46 = vsel %vm31_vm0, %v148_v42, 0.0  ;;  %v170_v49 = vsel %vm31_vm0, %v150_v43, 0.0 }
  0x98   :  { %165 = vadd.xlane.f32.xlu0 %v164_v46  ;;  %v81_v47 = vpop.xlane.xlu0 %80  ;;  %v84_v48 = vpop.xlane.xlu1 %83 }
  0x99   :  { %v120_v50 = vmul.f32 0.03125, %v81_v47  ;;  %v121_v51 = vmul.f32 0.03125, %v84_v48  ;;  %v149_v52 = vmul.f32 %v1261_v44, %v1261_v44  ;;  %v151_v53 = vmul.f32 %v1263_v45, %v1263_v45 }
  0x9b   :  { %v1271_v54 = vsub.f32 %v52_v8, %v120_v50  ;;  %v1273_v55 = vsub.f32 %v53_v9, %v121_v51  ;;  %v167_v56 = vsel %vm31_vm0, %v149_v52, 0.0  ;;  %v173_v59 = vsel %vm31_vm0, %v151_v53, 0.0  ;;  %v1029_v53 = vld [vmem:[%s1720_s3 + $0x8] sm:$0xff]  }
  0x9c   :  { %171 = vadd.xlane.f32.xlu0 %v170_v49  ;;  %168 = vadd.xlane.f32.xlu1 %v167_v56  ;;  %v87_v57 = vpop.xlane.xlu0 %86  ;;  %v90_v58 = vpop.xlane.xlu1 %89 }
  0x9d   :  { %v122_v60 = vmul.f32 0.03125, %v87_v57  ;;  %v123_v61 = vmul.f32 0.03125, %v90_v58  ;;  %v152_v62 = vmul.f32 %v1271_v54, %v1271_v54  ;;  %v153_v63 = vmul.f32 %v1273_v55, %v1273_v55 }
  0x9f   :  { %v1282_v0 = vsub.f32 %v1186_v12, %v122_v60  ;;  %v1285_v1 = vsub.f32 %v1191_v13, %v123_v61  ;;  %v176_v2 = vsel %vm31_vm0, %v152_v62, 0.0  ;;  %v179_v5 = vsel %vm31_vm0, %v153_v63, 0.0 }
  0xa0   :  { %174 = vadd.xlane.f32.xlu1 %v173_v59  ;;  %177 = vadd.xlane.f32.xlu0 %v176_v2  ;;  %v93_v3 = vpop.xlane.xlu0 %92  ;;  %v96_v4 = vpop.xlane.xlu1 %95 }
  0xa1   :  { %v124_v6 = vmul.f32 0.03125, %v93_v3  ;;  %v125_v7 = vmul.f32 0.03125, %v96_v4  ;;  %v154_v8 = vmul.f32 %v1282_v0, %v1282_v0  ;;  %v155_v9 = vmul.f32 %v1285_v1, %v1285_v1 }
  0xa3   :  { %v1294_v10 = vsub.f32 %v1200_v16, %v124_v6  ;;  %v1297_v11 = vsub.f32 %v1205_v17, %v125_v7  ;;  %v182_v12 = vsel %vm31_vm0, %v154_v8, 0.0  ;;  %v185_v15 = vsel %vm31_vm0, %v155_v9, 0.0 }
  0xa4   :  { %180 = vadd.xlane.f32.xlu1 %v179_v5  ;;  %183 = vadd.xlane.f32.xlu0 %v182_v12  ;;  %v99_v13 = vpop.xlane.xlu0 %98  ;;  %v102_v14 = vpop.xlane.xlu1 %101 }
  0xa5   :  { %v126_v18 = vmul.f32 0.03125, %v99_v13  ;;  %v127_v19 = vmul.f32 0.03125, %v102_v14  ;;  %v156_v22 = vmul.f32 %v1294_v10, %v1294_v10  ;;  %v157_v16 = vmul.f32 %v1297_v11, %v1297_v11 }
  0xa7   :  { %v1306_v23 = vsub.f32 %v1214_v20, %v126_v18  ;;  %v1309_v17 = vsub.f32 %v1219_v21, %v127_v19  ;;  %v188_v26 = vsel %vm31_vm0, %v156_v22, 0.0  ;;  %v191_v31 = vsel %vm31_vm0, %v157_v16, 0.0 }
  0xa8   :  { %186 = vadd.xlane.f32.xlu1 %v185_v15  ;;  %189 = vadd.xlane.f32.xlu0 %v188_v26  ;;  %v105_v27 = vpop.xlane.xlu0 %104  ;;  %v108_v30 = vpop.xlane.xlu1 %107 }
  0xa9   :  { %v128_v32 = vmul.f32 0.03125, %v105_v27  ;;  %v129_v33 = vmul.f32 0.03125, %v108_v30  ;;  %v158_v34 = vmul.f32 %v1306_v23, %v1306_v23  ;;  %v159_v20 = vmul.f32 %v1309_v17, %v1309_v17 }
  0xab   :  { %v1318_v35 = vsub.f32 %v1228_v24, %v128_v32  ;;  %v1321_v21 = vsub.f32 %v1233_v25, %v129_v33  ;;  %v194_v38 = vsel %vm31_vm0, %v158_v34, 0.0  ;;  %v197_v41 = vsel %vm31_vm0, %v159_v20, 0.0 }
  0xac   :  { %192 = vadd.xlane.f32.xlu1 %v191_v31  ;;  %195 = vadd.xlane.f32.xlu0 %v194_v38  ;;  %v111_v39 = vpop.xlane.xlu0 %110  ;;  %v114_v40 = vpop.xlane.xlu1 %113  ;;  %v1353_v31 = vld [vmem:[%s1721_s1] ss:$0 sm:$0xff] }
  0xad   :  { %v130_v42 = vmul.f32 0.03125, %v111_v39  ;;  %v131_v43 = vmul.f32 0.03125, %v114_v40  ;;  %v160_v46 = vmul.f32 %v1318_v35, %v1318_v35  ;;  %v161_v24 = vmul.f32 %v1321_v21, %v1321_v21 }
  0xaf   :  { %v1330_v47 = vsub.f32 %v1242_v28, %v130_v42  ;;  %v1333_v25 = vsub.f32 %v1247_v29, %v131_v43  ;;  %v200_v48 = vsel %vm31_vm0, %v160_v46, 0.0  ;;  %v203_v49 = vsel %vm31_vm0, %v161_v24, 0.0  ;;  %v1028_v29 = vld [vmem:[%s1720_s3] sm:$0xff]  }
  0xb0   :  { %198 = vadd.xlane.f32.xlu1 %v197_v41  ;;  %201 = vadd.xlane.f32.xlu0 %v200_v48  ;;  %v1361_v46 = vld [vmem:[%s1722_s2] ss:$0 sm:$0xff] }
  0xb1   :  { %v162_v50 = vmul.f32 %v1330_v47, %v1330_v47  ;;  %v163_v51 = vmul.f32 %v1333_v25, %v1333_v25  ;;  %959 = vmatprep.subr.bf16.mxu0 %v1028_v29 }
  0xb2   :  { %960 = vmatpush3.bf16.msra.mxu0 %v1028_v29 }
  0xb3   :  { %v206_v52 = vsel %vm31_vm0, %v162_v50, 0.0  ;;  %v209_v28 = vsel %vm31_vm0, %v163_v51, 0.0  ;;  %961 = vmatprep.subr.bf16.mxu0 %v1029_v53 }
  0xb4   :  { %204 = vadd.xlane.f32.xlu1 %v203_v49  ;;  %207 = vadd.xlane.f32.xlu0 %v206_v52 }
  0xb6   :  { %962 = vmatpush3.bf16.msra.mxu0 %v1029_v53 }
  0xb8   :  { %210 = vadd.xlane.f32.xlu1 %v209_v28 }
 0x125   :  { %v166_v56 = vpop.xlane.xlu0 %165 }
 0x126   :  { %v212_v57 = vmul.f32 0.03125, %v166_v56 }
 0x128   :  { %v228_v58 = vadd.f32 1e-05, %v212_v57 }
 0x129   :  { %v169_v59 = vpop.xlane.xlu1 %168  ;;  %v172_v60 = vpop.xlane.xlu0 %171 }
 0x12a   :  { %1038 = vrsqrt.f32 %v228_v58  ;;  %v213_v61 = vmul.f32 0.03125, %v169_v59  ;;  %v214_v62 = vmul.f32 0.03125, %v172_v60 }
 0x12c   :  { %v229_v63 = vadd.f32 1e-05, %v213_v61  ;;  %v230_v2 = vadd.f32 1e-05, %v214_v62 }
 0x12d   :  { %v175_v3 = vpop.xlane.xlu1 %174  ;;  %v178_v4 = vpop.xlane.xlu0 %177 }
 0x12e   :  { %1040 = vrsqrt.f32 %v229_v63  ;;  %v215_v5 = vmul.f32 0.03125, %v175_v3  ;;  %v216_v6 = vmul.f32 0.03125, %v178_v4 }
 0x12f   :  { %1042 = vrsqrt.f32 %v230_v2 }
 0x130   :  { %v231_v7 = vadd.f32 1e-05, %v215_v5  ;;  %v232_v8 = vadd.f32 1e-05, %v216_v6 }
 0x131   :  { %v181_v9 = vpop.xlane.xlu1 %180  ;;  %v184_v12 = vpop.xlane.xlu0 %183 }
 0x132   :  { %1044 = vrsqrt.f32 %v231_v7  ;;  %v217_v13 = vmul.f32 0.03125, %v181_v9  ;;  %v218_v14 = vmul.f32 0.03125, %v184_v12 }
 0x133   :  { %1046 = vrsqrt.f32 %v232_v8 }
 0x134   :  { %v1039_v15 = vpop.eup %1038  ;;  %v233_v18 = vadd.f32 1e-05, %v217_v13  ;;  %v234_v19 = vadd.f32 1e-05, %v218_v14 }
 0x135   :  { %v187_v22 = vpop.xlane.xlu1 %186  ;;  %v190_v16 = vpop.xlane.xlu0 %189  ;;  %v260_v26 = vmul.f32 %v1039_v15, %v1253_v36 }
 0x136   :  { %1048 = vrsqrt.f32 %v233_v18  ;;  %v219_v27 = vmul.f32 0.03125, %v187_v22  ;;  %v220_v30 = vmul.f32 0.03125, %v190_v16 }
 0x137   :  { %1050 = vrsqrt.f32 %v234_v19  ;;  %v282_v41 = vmul.f32 %v1353_v31, %v260_v26 }
 0x138   :  { %v1041_v32 = vpop.eup %1040  ;;  %v235_v33 = vadd.f32 1e-05, %v219_v27  ;;  %v236_v34 = vadd.f32 1e-05, %v220_v30 }
 0x139   :  { %v1043_v20 = vpop.eup %1042  ;;  %v193_v38 = vpop.xlane.xlu1 %192  ;;  %v261_v40 = vmul.f32 %v1041_v32, %v1261_v44 }
 0x13a   :  { %v196_v39 = vpop.xlane.xlu0 %195  ;;  %v262_v36 = vmul.f32 %v1043_v20, %v1255_v37  ;;  %1052 = vrsqrt.f32 %v235_v33  ;;  %v221_v42 = vmul.f32 0.03125, %v193_v38  ;;  %v304_v37 = vadd.f32 %v1361_v46, %v282_v41 }
 0x13b   :  { %v222_v43 = vmul.f32 0.03125, %v196_v39  ;;  %1054 = vrsqrt.f32 %v236_v34  ;;  %v283_v24 = vmul.f32 %v1353_v31, %v261_v40 }
 0x13c   :  { %v1045_v48 = vpop.eup %1044  ;;  %v237_v49 = vadd.f32 1e-05, %v221_v42  ;;  %v284_v53 = vmul.f32 %v1353_v31, %v262_v36 }
 0x13d   :  { %v238_v50 = vadd.f32 1e-05, %v222_v43  ;;  %v1047_v51 = vpop.eup %1046  ;;  %v263_v44 = vmul.f32 %v1045_v48, %v1263_v45  ;;  %v199_v52 = vpop.xlane.xlu1 %198  ;;  %v305_v29 = vadd.f32 %v1361_v46, %v283_v24 }
 0x13e   :  { %v202_v28 = vpop.xlane.xlu0 %201  ;;  %v264_v56 = vmul.f32 %v1047_v51, %v1271_v54  ;;  %1056 = vrsqrt.f32 %v237_v49  ;;  %v223_v57 = vmul.f32 0.03125, %v199_v52  ;;  %v306_v5 = vadd.f32 %v1361_v46, %v284_v53 }
 0x13f   :  { %v224_v58 = vmul.f32 0.03125, %v202_v28  ;;  %1058 = vrsqrt.f32 %v238_v50  ;;  %v320_v59 = vpack.c.bf16 %v305_v29, %v304_v37  ;;  %v285_v60 = vmul.f32 %v1353_v31, %v263_v44 }
 0x140   :  { %v1049_v61 = vpop.eup %1048  ;;  %v239_v62 = vadd.f32 1e-05, %v223_v57  ;;  %v286_v6 = vmul.f32 %v1353_v31, %v264_v56 }
 0x141   :  { %v240_v45 = vadd.f32 1e-05, %v224_v58  ;;  %v1051_v63 = vpop.eup %1050  ;;  %v265_v2 = vmul.f32 %v1049_v61, %v1273_v55  ;;  %v205_v3 = vpop.xlane.xlu1 %204  ;;  %963 = vmatprep.mubr.msk.bf16.mxu0 %vm31_vm0, %v320_v59  ;;  %v307_v54 = vadd.f32 %v1361_v46, %v285_v60 }
 0x142   :  { %v208_v4 = vpop.xlane.xlu0 %207  ;;  %v266_v7 = vmul.f32 %v1051_v63, %v1282_v0  ;;  %1060 = vrsqrt.f32 %v239_v62  ;;  %v225_v8 = vmul.f32 0.03125, %v205_v3  ;;  %v308_v16 = vadd.f32 %v1361_v46, %v286_v6  ;;  %v1033_v3 = vld [vmem:[%s1723_s5 + $0x18] sm:$0xff]  }
 0x143   :  { %v226_v9 = vmul.f32 0.03125, %v208_v4  ;;  %1062 = vrsqrt.f32 %v240_v45  ;;  %v321_v12 = vpack.c.bf16 %v307_v54, %v306_v5  ;;  %v287_v13 = vmul.f32 %v1353_v31, %v265_v2  ;;  %v1034_v4 = vld [vmem:[%s1723_s5 + $0x20] sm:$0xff]   ;;  %v1035_v5 = vld [vmem:[%s1723_s5 + $0x28] sm:$0xff]   ;;  %v1036_v54 = vld [vmem:[%s1723_s5 + $0x30] sm:$0xff]  }
 0x144   :  { %v1053_v55 = vpop.eup %1052  ;;  %v241_v14 = vadd.f32 1e-05, %v225_v8  ;;  %v288_v26 = vmul.f32 %v1353_v31, %v266_v7  ;;  %v1037_v6 = vld [vmem:[%s1723_s5 + $0x38] sm:$0xff]   ;;  %v1118_v7 = vmov 0.0   ;;  %v1458_v8 = vld [vmem:[%s1724_s4] ss:$0 sm:$0xff] }
 0x145   :  { %v242_v15 = vadd.f32 1e-05, %v226_v9  ;;  %v1055_v18 = vpop.eup %1054  ;;  %v267_v19 = vmul.f32 %v1053_v55, %v1285_v1  ;;  %v211_v22 = vpop.xlane.xlu1 %210  ;;  %964 = vmatmul.mubr.msk.bf16.vlgmr.msra.gmra.mrb[0].mxu0 %vm31_vm0, %v321_v12  ;;  %v309_v0 = vadd.f32 %v1361_v46, %v287_v13  ;;  %34 = vst.msk [vmem:[#allocation2 + $0x10] sm:$0xff] %vm31_vm0, %v1118_v7  ;;  %32 = vst.msk [vmem:[#allocation2] sm:$0xff] %vm31_vm0, %v1118_v7 }
 0x146   :  { %v268_v27 = vmul.f32 %v1055_v18, %v1294_v10  ;;  %1064 = vrsqrt.f32 %v241_v14  ;;  %v227_v30 = vmul.f32 0.03125, %v211_v22  ;;  %v310_v39 = vadd.f32 %v1361_v46, %v288_v26  ;;  %33 = vst.msk [vmem:[#allocation2 + $0x8] sm:$0xff] %vm31_vm0, %v1118_v7  ;;  %35 = vst.msk [vmem:[#allocation2 + $0x18] sm:$0xff] %vm31_vm0, %v1118_v7 }
 0x147   :  { %1066 = vrsqrt.f32 %v242_v15  ;;  %v322_v32 = vpack.c.bf16 %v309_v0, %v308_v16  ;;  %v289_v33 = vmul.f32 %v1353_v31, %v267_v19  ;;  %36 = vst.msk [vmem:[#allocation2 + $0x20] sm:$0xff] %vm31_vm0, %v1118_v7  ;;  %37 = vst.msk [vmem:[#allocation2 + $0x28] sm:$0xff] %vm31_vm0, %v1118_v7 }
 0x148   :  { %v1057_v34 = vpop.eup %1056  ;;  %v243_v20 = vadd.f32 1e-05, %v227_v30  ;;  %v290_v41 = vmul.f32 %v1353_v31, %v268_v27  ;;  %38 = vst.msk [vmem:[#allocation2 + $0x30] sm:$0xff] %vm31_vm0, %v1118_v7  ;;  %39 = vst.msk [vmem:[#allocation2 + $0x38] sm:$0xff] %vm31_vm0, %v1118_v7 }
 0x149   :  { %v1059_v1 = vpop.eup %1058  ;;  %v269_v38 = vmul.f32 %v1057_v34, %v1297_v11  ;;  %967 = vmatprep.mubr.msk.bf16.mxu0 %vm31_vm0, %v322_v32  ;;  %v311_v40 = vadd.f32 %v1361_v46, %v289_v33  ;;  %40 = vst.msk [vmem:[#allocation2 + $0x40] sm:$0xff] %vm31_vm0, %v1118_v7  ;;  %41 = vst.msk [vmem:[#allocation2 + $0x48] sm:$0xff] %vm31_vm0, %v1118_v7 }
 0x14a   :  { %v270_v10 = vmul.f32 %v1059_v1, %v1306_v23  ;;  %1068 = vrsqrt.f32 %v243_v20  ;;  %v312_v11 = vadd.f32 %v1361_v46, %v290_v41  ;;  %42 = vst.msk [vmem:[#allocation2 + $0x50] sm:$0xff] %vm31_vm0, %v1118_v7  ;;  %43 = vst.msk [vmem:[#allocation2 + $0x58] sm:$0xff] %vm31_vm0, %v1118_v7 }
 0x14b   :  { %v323_v36 = vpack.c.bf16 %v311_v40, %v310_v39  ;;  %v291_v42 = vmul.f32 %v1353_v31, %v269_v38  ;;  %44 = vst.msk [vmem:[#allocation2 + $0x60] sm:$0xff] %vm31_vm0, %v1118_v7  ;;  %45 = vst.msk [vmem:[#allocation2 + $0x68] sm:$0xff] %vm31_vm0, %v1118_v7 }
 0x14c   :  { %v1061_v43 = vpop.eup %1060  ;;  %v292_v50 = vmul.f32 %v1353_v31, %v270_v10  ;;  %46 = vst.msk [vmem:[#allocation2 + $0x70] sm:$0xff] %vm31_vm0, %v1118_v7  ;;  %47 = vst.msk [vmem:[#allocation2 + $0x78] sm:$0xff] %vm31_vm0, %v1118_v7 }
 0x14d   :  { %v1063_v24 = vpop.eup %1062  ;;  %v271_v48 = vmul.f32 %v1061_v43, %v1309_v17  ;;  %968 = vmatmul.mubr.msk.bf16.gmra.mrb[4].mxu0 %vm31_vm0, %v323_v36  ;;  %v313_v49 = vadd.f32 %v1361_v46, %v291_v42 }
 0x14e   :  { %v272_v51 = vmul.f32 %v1063_v24, %v1318_v35  ;;  %v314_v17 = vadd.f32 %v1361_v46, %v292_v50 }
 0x14f   :  { %v324_v44 = vpack.c.bf16 %v313_v49, %v312_v11  ;;  %v293_v23 = vmul.f32 %v1353_v31, %v271_v48 }
 0x150   :  { %v1065_v52 = vpop.eup %1064  ;;  %v294_v53 = vmul.f32 %v1353_v31, %v272_v51 }
 0x151   :  { %v1067_v28 = vpop.eup %1066  ;;  %v273_v37 = vmul.f32 %v1065_v52, %v1321_v21  ;;  %971 = vmatprep.mubr.msk.bf16.mxu0 %vm31_vm0, %v324_v44  ;;  %v315_v29 = vadd.f32 %v1361_v46, %v293_v23 }
 0x152   :  { %v274_v56 = vmul.f32 %v1067_v28, %v1330_v47  ;;  %v316_v21 = vadd.f32 %v1361_v46, %v294_v53 }
 0x153   :  { %v325_v57 = vpack.c.bf16 %v315_v29, %v314_v17  ;;  %v295_v35 = vmul.f32 %v1353_v31, %v273_v37 }
 0x154   :  { %v1069_v58 = vpop.eup %1068  ;;  %v296_v61 = vmul.f32 %v1353_v31, %v274_v56 }
 0x155   :  { %v275_v59 = vmul.f32 %v1069_v58, %v1333_v25  ;;  %972 = vmatmul.mubr.msk.bf16.gmra.mrb[8].mxu0 %vm31_vm0, %v325_v57  ;;  %v317_v60 = vadd.f32 %v1361_v46, %v295_v35  ;;  %v1030_v25 = vld [vmem:[%s1723_s5] sm:$0xff]  }
 0x156   :  { %v318_v47 = vadd.f32 %v1361_v46, %v296_v61  ;;  %979 = vmatprep.subr.bf16.mxu0 %v1030_v25  ;;  %1011 = vmatprep.subr.bf16.mxu1 %v1030_v25 }
 0x157   :  { %v326_v62 = vpack.c.bf16 %v317_v60, %v316_v21  ;;  %v297_v45 = vmul.f32 %v1353_v31, %v275_v59  ;;  %980 = vmatpush3.bf16.msra.mxu0 %v1030_v25  ;;  %1019 = vmatpush3.bf16.msra.mxu1 %v1030_v25  ;;  %v1031_v31 = vld [vmem:[%s1723_s5 + $0x8] sm:$0xff]  }
 0x158   :  { %981 = vmatprep.subr.bf16.mxu0 %v1031_v31  ;;  %1012 = vmatprep.subr.bf16.mxu1 %v1031_v31 }
 0x159   :  { %975 = vmatprep.mubr.msk.bf16.mxu0 %vm31_vm0, %v326_v62  ;;  %v319_v63 = vadd.f32 %v1361_v46, %v297_v45  ;;  %v1032_v46 = vld [vmem:[%s1723_s5 + $0x10] sm:$0xff]  }
 0x15b   :  { %v327_v2 = vpack.c.bf16 %v319_v63, %v318_v47  ;;  %982 = vmatpush3.bf16.msra.mxu0 %v1031_v31  ;;  %1020 = vmatpush3.bf16.msra.mxu1 %v1031_v31 }
 0x15c   :  { %983 = vmatprep.subr.bf16.mxu0 %v1032_v46  ;;  %1013 = vmatprep.subr.bf16.mxu1 %v1032_v46 }
 0x15d   :  { %976 = vmatmul.mubr.msk.bf16.gmra.mrb[12].mxu0 %vm31_vm0, %v327_v2 }
 0x15f   :  { %984 = vmatpush3.bf16.msra.mxu0 %v1032_v46  ;;  %1021 = vmatpush3.bf16.msra.mxu1 %v1032_v46 }
 0x160   :  { %985 = vmatprep.subr.bf16.mxu0 %v1033_v3  ;;  %1014 = vmatprep.subr.bf16.mxu1 %v1033_v3 }
 0x163   :  { %986 = vmatpush3.bf16.msra.mxu0 %v1033_v3  ;;  %1022 = vmatpush3.bf16.msra.mxu1 %v1033_v3 }
 0x164   :  { %987 = vmatprep.subr.bf16.mxu0 %v1034_v4  ;;  %1015 = vmatprep.subr.bf16.mxu1 %v1034_v4 }
 0x167   :  { %988 = vmatpush3.bf16.msra.mxu0 %v1034_v4  ;;  %1023 = vmatpush3.bf16.msra.mxu1 %v1034_v4 }
 0x168   :  { %989 = vmatprep.subr.bf16.mxu0 %v1035_v5  ;;  %1016 = vmatprep.subr.bf16.mxu1 %v1035_v5 }
 0x16b   :  { %990 = vmatpush3.bf16.msra.mxu0 %v1035_v5  ;;  %1024 = vmatpush3.bf16.msra.mxu1 %v1035_v5 }
 0x16c   :  { %991 = vmatprep.subr.bf16.mxu0 %v1036_v54  ;;  %1017 = vmatprep.subr.bf16.mxu1 %v1036_v54 }
 0x16f   :  { %992 = vmatpush3.bf16.msra.mxu0 %v1036_v54  ;;  %1025 = vmatpush3.bf16.msra.mxu1 %v1036_v54 }
 0x170   :  { %993 = vmatprep.subr.bf16.mxu0 %v1037_v6  ;;  %1018 = vmatprep.subr.bf16.mxu1 %v1037_v6 }
 0x173   :  { %994 = vmatpush3.bf16.msra.mxu0 %v1037_v6  ;;  %1026 = vmatpush3.bf16.msra.mxu1 %v1037_v6 }
 0x218   :  { %v965_v9 = vpop.f32.mrb[0].mxu0 }
 0x219   :  { %v418_v12 = vadd.f32 %v965_v9, %v1458_v8  ;;  %v409_v13 = vpop.f32.mrb[1].mxu0 }
 0x21a   :  { %v410_v55 = vadd.f32 %v1458_v8, %v409_v13  ;;  %v966_v14 = vpop.f32.mrb[2].mxu0 }
 0x21b   :  { %v490_v15 = vmul.f32 0.044715, %v418_v12  ;;  %v1463_v18 = vadd.f32 %v966_v14, %v1458_v8  ;;  %v412_v19 = vpop.f32.mrb[3].mxu0  ;;  %v474_v21 = vmul.f32 0.5, %v418_v12 }
 0x21c   :  { %v488_v22 = vmul.f32 0.044715, %v410_v55  ;;  %v1466_v16 = vadd.f32 %v1458_v8, %v412_v19  ;;  %v472_v2 = vmul.f32 0.5, %v410_v55 }
 0x21d   :  { %v506_v0 = vmul.f32 %v490_v15, %v418_v12  ;;  %v491_v26 = vmul.f32 0.044715, %v1463_v18 }
 0x21e   :  { %v504_v27 = vmul.f32 %v488_v22, %v410_v55  ;;  %v489_v30 = vmul.f32 0.044715, %v1466_v16 }
 0x21f   :  { %v522_v32 = vmul.f32 %v506_v0, %v418_v12  ;;  %v507_v33 = vmul.f32 %v491_v26, %v1463_v18 }
 0x220   :  { %v520_v34 = vmul.f32 %v504_v27, %v410_v55  ;;  %v505_v20 = vmul.f32 %v489_v30, %v1466_v16  ;;  %v969_v1 = vpop.f32.mrb[4].mxu0  ;;  %v475_v27 = vmul.f32 0.5, %v1463_v18  ;;  %v473_v30 = vmul.f32 0.5, %v1466_v16 }
 0x221   :  { %v538_v38 = vadd.f32 %v522_v32, %v418_v12  ;;  %v523_v39 = vmul.f32 %v507_v33, %v1463_v18  ;;  %v1474_v40 = vadd.f32 %v969_v1, %v1458_v8  ;;  %v425_v41 = vpop.f32.mrb[5].mxu0 }
 0x222   :  { %v521_v10 = vmul.f32 %v505_v20, %v1466_v16  ;;  %v426_v36 = vadd.f32 %v1458_v8, %v425_v41  ;;  %v970_v42 = vpop.f32.mrb[6].mxu0  ;;  %v536_v43 = vadd.f32 %v520_v34, %v410_v55 }
 0x223   :  { %v554_v24 = vmul.f32 0.7978846, %v538_v38  ;;  %v539_v48 = vadd.f32 %v523_v39, %v1463_v18  ;;  %v494_v11 = vmul.f32 0.044715, %v1474_v40  ;;  %v1481_v49 = vadd.f32 %v970_v42, %v1458_v8  ;;  %v428_v50 = vpop.f32.mrb[7].mxu0 }
 0x224   :  { %v492_v51 = vmul.f32 0.044715, %v426_v36  ;;  %v1484_v44 = vadd.f32 %v1458_v8, %v428_v50  ;;  %v537_v23 = vadd.f32 %v521_v10, %v1466_v16  ;;  %v552_v52 = vmul.f32 0.7978846, %v536_v43 }
 0x225   :  { %1070 = vtanh.f32 %v554_v24  ;;  %v555_v28 = vmul.f32 0.7978846, %v539_v48  ;;  %v510_v37 = vmul.f32 %v494_v11, %v1474_v40  ;;  %v495_v17 = vmul.f32 0.044715, %v1481_v49 }
 0x226   :  { %v493_v29 = vmul.f32 0.044715, %v1484_v44  ;;  %v553_v53 = vmul.f32 0.7978846, %v537_v23  ;;  %1072 = vtanh.f32 %v552_v52  ;;  %v508_v58 = vmul.f32 %v492_v51, %v426_v36 }
 0x227   :  { %1074 = vtanh.f32 %v555_v28  ;;  %v526_v56 = vmul.f32 %v510_v37, %v1474_v40  ;;  %v511_v57 = vmul.f32 %v495_v17, %v1481_v49  ;;  %v1518_v32 = vmul.f32 0.5, %v426_v36 }
 0x228   :  { %v973_v35 = vpop.f32.mrb[8].mxu0  ;;  %1076 = vtanh.f32 %v553_v53  ;;  %v509_v59 = vmul.f32 %v493_v29, %v1484_v44  ;;  %v524_v25 = vmul.f32 %v508_v58, %v426_v36 }
 0x229   :  { %v527_v60 = vmul.f32 %v511_v57, %v1481_v49  ;;  %v1495_v61 = vadd.f32 %v973_v35, %v1458_v8  ;;  %v441_v62 = vpop.f32.mrb[9].mxu0  ;;  %v542_v45 = vadd.f32 %v526_v56, %v1474_v40 }
 0x22a   :  { %v1499_v47 = vadd.f32 %v1458_v8, %v441_v62  ;;  %v974_v63 = vpop.f32.mrb[10].mxu0  ;;  %v525_v31 = vmul.f32 %v509_v59, %v1484_v44  ;;  %v540_v9 = vadd.f32 %v524_v25, %v426_v36 }
 0x22b   :  { %v498_v46 = vmul.f32 0.044715, %v1495_v61  ;;  %v1504_v3 = vadd.f32 %v974_v63, %v1458_v8  ;;  %v444_v4 = vpop.f32.mrb[11].mxu0  ;;  %v543_v5 = vadd.f32 %v527_v60, %v1481_v49  ;;  %v558_v54 = vmul.f32 0.7978846, %v542_v45 }
 0x22c   :  { %v496_v6 = vmul.f32 0.044715, %v1499_v47  ;;  %v1509_v7 = vadd.f32 %v1458_v8, %v444_v4  ;;  %v541_v12 = vadd.f32 %v525_v31, %v1484_v44  ;;  %v556_v22 = vmul.f32 0.7978846, %v540_v9 }
 0x22d   :  { %v514_v13 = vmul.f32 %v498_v46, %v1495_v61  ;;  %v499_v55 = vmul.f32 0.044715, %v1504_v3  ;;  %v559_v14 = vmul.f32 0.7978846, %v543_v5  ;;  %1078 = vtanh.f32 %v558_v54 }
 0x22e   :  { %v512_v15 = vmul.f32 %v496_v6, %v1499_v47  ;;  %v497_v19 = vmul.f32 0.044715, %v1509_v7  ;;  %v557_v0 = vmul.f32 0.7978846, %v541_v12  ;;  %v477_v6 = vmul.f32 0.5, %v1484_v44 }
 0x22f   :  { %v1071_v26 = vpop.eup %1070  ;;  %1080 = vtanh.f32 %v559_v14  ;;  %v530_v34 = vmul.f32 %v514_v13, %v1495_v61  ;;  %v515_v36 = vmul.f32 %v499_v55, %v1504_v3  ;;  %v478_v9 = vmul.f32 0.5, %v1474_v40 }
 0x230   :  { %v1073_v33 = vpop.eup %1072  ;;  %v513_v20 = vmul.f32 %v497_v19, %v1509_v7  ;;  %v977_v1 = vpop.f32.mrb[12].mxu0  ;;  %v586_v38 = vadd.f32 1.0, %v1071_v26  ;;  %1082 = vtanh.f32 %v556_v22  ;;  %v528_v41 = vmul.f32 %v512_v15, %v1499_v47 }
 0x231   :  { %v1075_v39 = vpop.eup %1074  ;;  %v1524_v10 = vadd.f32 %v977_v1, %v1458_v8  ;;  %v457_v18 = vpop.f32.mrb[13].mxu0  ;;  %v584_v42 = vadd.f32 1.0, %v1073_v33  ;;  %1084 = vtanh.f32 %v557_v0  ;;  %v479_v12 = vmul.f32 0.5, %v1481_v49 }
 0x232   :  { %v1077_v16 = vpop.eup %1076  ;;  %v529_v43 = vmul.f32 %v513_v20, %v1509_v7  ;;  %v1529_v24 = vadd.f32 %v1458_v8, %v457_v18  ;;  %v978_v48 = vpop.f32.mrb[14].mxu0  ;;  %v587_v11 = vadd.f32 1.0, %v1075_v39  ;;  %v602_v28 = vmul.f32 %v586_v38, %v474_v21 }
 0x233   :  { %v502_v50 = vmul.f32 0.044715, %v1524_v10  ;;  %v1533_v51 = vadd.f32 %v978_v48, %v1458_v8  ;;  %v460_v23 = vpop.f32.mrb[15].mxu0  ;;  %v585_v52 = vadd.f32 1.0, %v1077_v16  ;;  %v600_v29 = vmul.f32 %v584_v42, %v472_v2 }
 0x234   :  { %v500_v37 = vmul.f32 0.044715, %v1529_v24  ;;  %v1537_v17 = vadd.f32 %v1458_v8, %v460_v23  ;;  %v603_v53 = vmul.f32 %v587_v11, %v475_v27  ;;  %v544_v58 = vadd.f32 %v528_v41, %v1499_v47 }
 0x235   :  { %v518_v56 = vmul.f32 %v502_v50, %v1524_v10  ;;  %v503_v57 = vmul.f32 0.044715, %v1533_v51  ;;  %v601_v35 = vmul.f32 %v585_v52, %v473_v30  ;;  %v545_v21 = vadd.f32 %v529_v43, %v1509_v7 }
 0x236   :  { %v516_v59 = vmul.f32 %v500_v37, %v1529_v24  ;;  %v501_v60 = vmul.f32 0.044715, %v1537_v17  ;;  %v633_v62 = vpack.c.bf16 %v603_v53, %v602_v28  ;;  %v531_v8 = vmul.f32 %v515_v36, %v1504_v3 }
 0x237   :  { %v1079_v45 = vpop.eup %1078  ;;  %v519_v63 = vmul.f32 %v503_v57, %v1533_v51  ;;  %v632_v2 = vpack.c.bf16 %v601_v35, %v600_v29  ;;  %v560_v25 = vmul.f32 0.7978846, %v544_v58  ;;  %v561_v5 = vmul.f32 0.7978846, %v545_v21 }
 0x238   :  { %v532_v31 = vmul.f32 %v516_v59, %v1529_v24  ;;  %v517_v46 = vmul.f32 %v501_v60, %v1537_v17  ;;  %v590_v4 = vadd.f32 1.0, %v1079_v45  ;;  %v534_v55 = vmul.f32 %v518_v56, %v1524_v10 }
 0x239   :  { %v1081_v54 = vpop.eup %1080  ;;  %995 = vmatprep.mubr.bf16.mxu0 %v632_v2  ;;  %1086 = vtanh.f32 %v560_v25  ;;  %v535_v22 = vmul.f32 %v519_v63, %v1533_v51  ;;  %v546_v26 = vadd.f32 %v530_v34, %v1495_v61  ;;  %v547_v44 = vadd.f32 %v531_v8, %v1504_v3 }
 0x23a   :  { %v1083_v13 = vpop.eup %1082  ;;  %v533_v14 = vmul.f32 %v517_v46, %v1537_v17  ;;  %996 = vmatmul.mubr.bf16.vlgmr.msra.gmra.mrb[16].mxu0 %v633_v62  ;;  %v591_v15 = vadd.f32 1.0, %v1081_v54  ;;  %1088 = vtanh.f32 %v561_v5  ;;  %v606_v27 = vmul.f32 %v590_v4, %v478_v9 }
 0x23b   :  { %v1085_v19 = vpop.eup %1084  ;;  %v588_v0 = vadd.f32 1.0, %v1083_v13  ;;  %v548_v30 = vadd.f32 %v532_v31, %v1529_v24  ;;  %v562_v33 = vmul.f32 0.7978846, %v546_v26  ;;  %v563_v20 = vmul.f32 0.7978846, %v547_v44 }
 0x23c   :  { %v589_v40 = vadd.f32 1.0, %v1085_v19  ;;  %v607_v49 = vmul.f32 %v591_v15, %v479_v12  ;;  %v549_v1 = vadd.f32 %v533_v14, %v1537_v17  ;;  %v550_v34 = vadd.f32 %v534_v55, %v1524_v10  ;;  %v618_v55 = vld [vmem:[#allocation2 + $0x10] sm:$0xff]  ;;  %v619_v15 = vld [vmem:[#allocation2 + $0x18] sm:$0xff] }
 0x23d   :  { %v604_v38 = vmul.f32 %v588_v0, %v1518_v32  ;;  %v564_v18 = vmul.f32 0.7978846, %v548_v30  ;;  %1090 = vtanh.f32 %v562_v33  ;;  %v551_v36 = vadd.f32 %v535_v22, %v1533_v51  ;;  %v617_v22 = vld [vmem:[#allocation2 + $0x8] sm:$0xff]  ;;  %v623_v33 = vld [vmem:[#allocation2 + $0x38] sm:$0xff] }
 0x23e   :  { %v605_v39 = vmul.f32 %v589_v40, %v477_v6  ;;  %v635_v41 = vpack.c.bf16 %v607_v49, %v606_v27  ;;  %v565_v42 = vmul.f32 0.7978846, %v549_v1  ;;  %1092 = vtanh.f32 %v563_v20  ;;  %v622_v27 = vld [vmem:[#allocation2 + $0x30] sm:$0xff]  ;;  %v620_v49 = vld [vmem:[#allocation2 + $0x20] sm:$0xff] }
 0x23f   :  { %1094 = vtanh.f32 %v564_v18  ;;  %v566_v43 = vmul.f32 0.7978846, %v550_v34  ;;  %v567_v48 = vmul.f32 0.7978846, %v551_v36  ;;  %v480_v23 = vmul.f32 0.5, %v1499_v47  ;;  %v1102_v18 = vld [vmem:[%s1719_s0 + $0x10] sm:$0xff] }
 0x240   :  { %v634_v16 = vpack.c.bf16 %v605_v39, %v604_v38  ;;  %1096 = vtanh.f32 %v565_v42  ;;  %v481_v52 = vmul.f32 0.5, %v1509_v7  ;;  %v482_v59 = vmul.f32 0.5, %v1495_v61  ;;  %v1577_v1 = vld [vmem:[%s1725_s6] ss:$0 sm:$0xff] }
 0x241   :  { %1098 = vtanh.f32 %v566_v43  ;;  %v483_v60 = vmul.f32 0.5, %v1504_v3  ;;  %v484_v45 = vmul.f32 0.5, %v1529_v24  ;;  %v485_v2 = vmul.f32 0.5, %v1537_v17  ;;  %v616_v17 = vld [vmem:[#allocation2] sm:$0xff] }
 0x242   :  { %999 = vmatprep.mubr.bf16.mxu1 %v634_v16  ;;  %1100 = vtanh.f32 %v567_v48  ;;  %v486_v46 = vmul.f32 0.5, %v1524_v10  ;;  %v487_v4 = vmul.f32 0.5, %v1533_v51  ;;  %v1103_v43 = vld [vmem:[%s1719_s0] sm:$0xff] }
 0x243   :  { %v1087_v11 = vpop.eup %1086  ;;  %1000 = vmatmul.mubr.bf16.vlgmr.msra.gmra.mrb[0].mxu1 %v635_v41  ;;  %v621_v41 = vld [vmem:[#allocation2 + $0x28] sm:$0xff] }
 0x244   :  { %v1089_v32 = vpop.eup %1088  ;;  %v592_v50 = vadd.f32 1.0, %v1087_v11 }
 0x245   :  { %v593_v28 = vadd.f32 1.0, %v1089_v32 }
 0x246   :  { %v608_v37 = vmul.f32 %v592_v50, %v480_v23 }
 0x247   :  { %v609_v29 = vmul.f32 %v593_v28, %v481_v52  ;;  %v1091_v53 = vpop.eup %1090  ;;  %v1104_v52 = vld [vmem:[%s1719_s0 + $0x18] sm:$0xff] }
 0x248   :  { %v1093_v57 = vpop.eup %1092  ;;  %v594_v35 = vadd.f32 1.0, %v1091_v53 }
 0x249   :  { %v636_v56 = vpack.c.bf16 %v609_v29, %v608_v37  ;;  %v1095_v58 = vpop.eup %1094  ;;  %v595_v62 = vadd.f32 1.0, %v1093_v57 }
 0x24a   :  { %v1097_v21 = vpop.eup %1096  ;;  %v596_v47 = vadd.f32 1.0, %v1095_v58  ;;  %v610_v7 = vmul.f32 %v594_v35, %v482_v59 }
 0x24b   :  { %1003 = vmatprep.mubr.bf16.mxu1 %v636_v56  ;;  %v1099_v8 = vpop.eup %1098  ;;  %v611_v63 = vmul.f32 %v595_v62, %v483_v60  ;;  %v597_v25 = vadd.f32 1.0, %v1097_v21  ;;  %v1105_v56 = vld [vmem:[%s1719_s0 + $0x8] sm:$0xff]  ;;  %v1106_v60 = vld [vmem:[%s1719_s0 + $0x30] sm:$0xff] }
 0x24c   :  { %v1101_v31 = vpop.eup %1100  ;;  %v598_v5 = vadd.f32 1.0, %v1099_v8  ;;  %v612_v54 = vmul.f32 %v596_v47, %v484_v45  ;;  %v1107_v45 = vld [vmem:[%s1719_s0 + $0x20] sm:$0xff] }
 0x24d   :  { %v637_v61 = vpack.c.bf16 %v611_v63, %v610_v7  ;;  %v613_v3 = vmul.f32 %v597_v25, %v485_v2  ;;  %v599_v6 = vadd.f32 1.0, %v1101_v31  ;;  %v626_v7 = vld [vmem:[#allocation2 + $0x50] sm:$0xff]  ;;  %v1108_v2 = vld [vmem:[%s1719_s0 + $0x38] sm:$0xff] }
 0x24e   :  { %v614_v24 = vmul.f32 %v598_v5, %v486_v46  ;;  %v624_v46 = vld [vmem:[#allocation2 + $0x40] sm:$0xff]  ;;  %v1109_v5 = vld [vmem:[%s1719_s0 + $0x28] sm:$0xff] }
 0x24f   :  { %1004 = vmatmul.mubr.bf16.gmra.mrb[4].mxu1 %v637_v61  ;;  %v638_v9 = vpack.c.bf16 %v613_v3, %v612_v54  ;;  %v615_v12 = vmul.f32 %v599_v6, %v487_v4  ;;  %v627_v3 = vld [vmem:[#allocation2 + $0x58] sm:$0xff] }
 0x251   :  { %1007 = vmatprep.mubr.bf16.mxu1 %v638_v9  ;;  %v639_v13 = vpack.c.bf16 %v615_v12, %v614_v24  ;;  %v625_v12 = vld [vmem:[#allocation2 + $0x48] sm:$0xff] }
 0x257   :  { %1008 = vmatmul.mubr.bf16.gmra.mrb[8].mxu1 %v639_v13 }
 0x30d   :  { %v997_v14 = vpop.f32.mrb[16].mxu0 }
 0x30e   :  { %v803_v19 = vadd.f32 %v997_v14, %v618_v55  ;;  %v738_v10 = vpop.f32.mrb[17].mxu0 }
 0x30f   :  { %v801_v51 = vadd.f32 %v738_v10, %v616_v17  ;;  %v998_v0 = vpop.f32.mrb[18].mxu0  ;;  %v630_v10 = vld [vmem:[#allocation2 + $0x70] sm:$0xff] }
 0x310   :  { %819 = vst.msk [vmem:[#allocation2 + $0x10] sm:$0xff] %vm31_vm0, %v803_v19  ;;  %v804_v26 = vadd.f32 %v998_v0, %v619_v15  ;;  %v741_v44 = vpop.f32.mrb[19].mxu0  ;;  %v631_v0 = vld [vmem:[#allocation2 + $0x78] sm:$0xff] }
 0x311   :  { %817 = vst.msk [vmem:[#allocation2] sm:$0xff] %vm31_vm0, %v801_v51  ;;  %v802_v40 = vadd.f32 %v741_v44, %v617_v22  ;;  %v628_v22 = vld [vmem:[#allocation2 + $0x60] sm:$0xff] }
 0x312   :  { %820 = vst.msk [vmem:[#allocation2 + $0x18] sm:$0xff] %vm31_vm0, %v804_v26 }
 0x313   :  { %818 = vst.msk [vmem:[#allocation2 + $0x8] sm:$0xff] %vm31_vm0, %v802_v40  ;;  %v629_v40 = vld [vmem:[#allocation2 + $0x68] sm:$0xff] }
 0x316   :  { %v1001_v30 = vpop.f32.mrb[0].mxu1 }
 0x317   :  { %v838_v20 = vld [vmem:[#allocation2 + $0x10] sm:$0xff]  ;;  %v807_v38 = vadd.f32 %v1001_v30, %v622_v27  ;;  %v754_v39 = vpop.f32.mrb[1].mxu1 }
 0x318   :  { %v854_v42 = vadd.f32 %v1102_v18, %v838_v20  ;;  %v836_v34 = vld [vmem:[#allocation2] sm:$0xff]  ;;  %v805_v16 = vadd.f32 %v754_v39, %v620_v49  ;;  %v1002_v36 = vpop.f32.mrb[2].mxu1 }
 0x319   :  { %v852_v48 = vadd.f32 %v1103_v43, %v836_v34  ;;  %v839_v11 = vld [vmem:[#allocation2 + $0x18] sm:$0xff]  ;;  %823 = vst.msk [vmem:[#allocation2 + $0x30] sm:$0xff] %vm31_vm0, %v807_v38  ;;  %v808_v32 = vadd.f32 %v1002_v36, %v623_v33  ;;  %v757_v50 = vpop.f32.mrb[3].mxu1  ;;  %v1110_v33 = vld [vmem:[%s1719_s0 + $0x50] sm:$0xff]  ;;  %v1111_v18 = vld [vmem:[%s1719_s0 + $0x40] sm:$0xff] }
 0x31a   :  { %v877_v23 = vadd.f32 %v1577_v1, %v854_v42  ;;  %v855_v28 = vadd.f32 %v1104_v52, %v839_v11  ;;  %v837_v37 = vld [vmem:[#allocation2 + $0x8] sm:$0xff]  ;;  %821 = vst.msk [vmem:[#allocation2 + $0x20] sm:$0xff] %vm31_vm0, %v805_v16  ;;  %v806_v29 = vadd.f32 %v757_v50, %v621_v41  ;;  %v1112_v43 = vld [vmem:[%s1719_s0 + $0x58] sm:$0xff] }
 0x31b   :  { %v875_v53 = vadd.f32 %v1577_v1, %v852_v48  ;;  %v853_v57 = vadd.f32 %v1105_v56, %v837_v37  ;;  %824 = vst.msk [vmem:[#allocation2 + $0x38] sm:$0xff] %vm31_vm0, %v808_v32  ;;  %v1113_v50 = vld [vmem:[%s1719_s0 + $0x48] sm:$0xff] }
 0x31c   :  { %893 = vst.msk [vmem:[%s1726_s7 + $0x10] sm:$0xff] %vm31_vm0, %v877_v23  ;;  %v878_v35 = vadd.f32 %v1577_v1, %v855_v28  ;;  %822 = vst.msk [vmem:[#allocation2 + $0x28] sm:$0xff] %vm31_vm0, %v806_v29  ;;  %v1114_v29 = vld [vmem:[%s1719_s0 + $0x70] sm:$0xff] }
 0x31d   :  { %891 = vst.msk [vmem:[%s1726_s7] sm:$0xff] %vm31_vm0, %v875_v53  ;;  %v876_v58 = vadd.f32 %v1577_v1, %v853_v57  ;;  %v1115_v57 = vld [vmem:[%s1719_s0 + $0x60] sm:$0xff] }
 0x31e   :  { %894 = vst.msk [vmem:[%s1726_s7 + $0x18] sm:$0xff] %vm31_vm0, %v878_v35 }
 0x31f   :  { %892 = vst.msk [vmem:[%s1726_s7 + $0x8] sm:$0xff] %vm31_vm0, %v876_v58 }
 0x320   :  { %v842_v59 = vld [vmem:[#allocation2 + $0x30] sm:$0xff] }
 0x321   :  { %v858_v62 = vadd.f32 %v1106_v60, %v842_v59  ;;  %v840_v21 = vld [vmem:[#allocation2 + $0x20] sm:$0xff]  ;;  %v1116_v60 = vld [vmem:[%s1719_s0 + $0x78] sm:$0xff] }
 0x322   :  { %v856_v47 = vadd.f32 %v1107_v45, %v840_v21  ;;  %v843_v8 = vld [vmem:[#allocation2 + $0x38] sm:$0xff]  ;;  %v1005_v54 = vpop.f32.mrb[4].mxu1 }
 0x323   :  { %v881_v63 = vadd.f32 %v1577_v1, %v858_v62  ;;  %v859_v25 = vadd.f32 %v1108_v2, %v843_v8  ;;  %v841_v31 = vld [vmem:[#allocation2 + $0x28] sm:$0xff]  ;;  %v811_v9 = vadd.f32 %v1005_v54, %v626_v7  ;;  %v770_v24 = vpop.f32.mrb[5].mxu1 }
 0x324   :  { %v879_v4 = vadd.f32 %v1577_v1, %v856_v47  ;;  %v857_v61 = vadd.f32 %v1109_v5, %v841_v31  ;;  %v809_v55 = vadd.f32 %v770_v24, %v624_v46  ;;  %v1006_v17 = vpop.f32.mrb[6].mxu1  ;;  %v1117_v47 = vld [vmem:[%s1719_s0 + $0x68] sm:$0xff] }
 0x325   :  { %897 = vst.msk [vmem:[%s1726_s7 + $0x30] sm:$0xff] %vm31_vm0, %v881_v63  ;;  %v882_v6 = vadd.f32 %v1577_v1, %v859_v25  ;;  %827 = vst.msk [vmem:[#allocation2 + $0x50] sm:$0xff] %vm31_vm0, %v811_v9  ;;  %v812_v14 = vadd.f32 %v1006_v17, %v627_v3  ;;  %v773_v15 = vpop.f32.mrb[7].mxu1 }
 0x326   :  { %895 = vst.msk [vmem:[%s1726_s7 + $0x20] sm:$0xff] %vm31_vm0, %v879_v4  ;;  %v880_v13 = vadd.f32 %v1577_v1, %v857_v61  ;;  %825 = vst.msk [vmem:[#allocation2 + $0x40] sm:$0xff] %vm31_vm0, %v809_v55  ;;  %v810_v19 = vadd.f32 %v773_v15, %v625_v12 }
 0x327   :  { %898 = vst.msk [vmem:[%s1726_s7 + $0x38] sm:$0xff] %vm31_vm0, %v882_v6  ;;  %828 = vst.msk [vmem:[#allocation2 + $0x58] sm:$0xff] %vm31_vm0, %v812_v14 }
 0x328   :  { %896 = vst.msk [vmem:[%s1726_s7 + $0x28] sm:$0xff] %vm31_vm0, %v880_v13  ;;  %826 = vst.msk [vmem:[#allocation2 + $0x48] sm:$0xff] %vm31_vm0, %v810_v19 }
 0x32a   :  { %v1009_v51 = vpop.f32.mrb[8].mxu1 }
 0x32b   :  { %v815_v26 = vadd.f32 %v1009_v51, %v630_v10  ;;  %v786_v44 = vpop.f32.mrb[9].mxu1 }
 0x32c   :  { %v846_v27 = vld [vmem:[#allocation2 + $0x50] sm:$0xff]  ;;  %v813_v49 = vadd.f32 %v786_v44, %v628_v22  ;;  %v1010_v30 = vpop.f32.mrb[10].mxu1 }
 0x32d   :  { %v862_v20 = vadd.f32 %v1110_v33, %v846_v27  ;;  %v844_v38 = vld [vmem:[#allocation2 + $0x40] sm:$0xff]  ;;  %831 = vst.msk [vmem:[#allocation2 + $0x70] sm:$0xff] %vm31_vm0, %v815_v26  ;;  %v816_v39 = vadd.f32 %v1010_v30, %v631_v0  ;;  %v789_v41 = vpop.f32.mrb[11].mxu1 }
 0x32e   :  { %v860_v42 = vadd.f32 %v1111_v18, %v844_v38  ;;  %v847_v34 = vld [vmem:[#allocation2 + $0x58] sm:$0xff]  ;;  %829 = vst.msk [vmem:[#allocation2 + $0x60] sm:$0xff] %vm31_vm0, %v813_v49  ;;  %v814_v16 = vadd.f32 %v789_v41, %v629_v40 }
 0x32f   :  { %v885_v36 = vadd.f32 %v1577_v1, %v862_v20  ;;  %v863_v48 = vadd.f32 %v1112_v43, %v847_v34  ;;  %v845_v11 = vld [vmem:[#allocation2 + $0x48] sm:$0xff]  ;;  %832 = vst.msk [vmem:[#allocation2 + $0x78] sm:$0xff] %vm31_vm0, %v816_v39 }
 0x330   :  { %v883_v32 = vadd.f32 %v1577_v1, %v860_v42  ;;  %v861_v23 = vadd.f32 %v1113_v50, %v845_v11  ;;  %830 = vst.msk [vmem:[#allocation2 + $0x68] sm:$0xff] %vm31_vm0, %v814_v16 }
 0x331   :  { %901 = vst.msk [vmem:[%s1726_s7 + $0x50] sm:$0xff] %vm31_vm0, %v885_v36  ;;  %v886_v52 = vadd.f32 %v1577_v1, %v863_v48 }
 0x332   :  { %899 = vst.msk [vmem:[%s1726_s7 + $0x40] sm:$0xff] %vm31_vm0, %v883_v32  ;;  %v884_v28 = vadd.f32 %v1577_v1, %v861_v23 }
 0x333   :  { %902 = vst.msk [vmem:[%s1726_s7 + $0x58] sm:$0xff] %vm31_vm0, %v886_v52 }
 0x334   :  { %900 = vst.msk [vmem:[%s1726_s7 + $0x48] sm:$0xff] %vm31_vm0, %v884_v28  ;;  %v850_v37 = vld [vmem:[#allocation2 + $0x70] sm:$0xff] }
 0x335   :  { %v866_v53 = vadd.f32 %v1114_v29, %v850_v37  ;;  %v848_v56 = vld [vmem:[#allocation2 + $0x60] sm:$0xff] }
 0x336   :  { %v864_v35 = vadd.f32 %v1115_v57, %v848_v56  ;;  %v851_v58 = vld [vmem:[#allocation2 + $0x78] sm:$0xff] }
 0x337   :  { %v889_v59 = vadd.f32 %v1577_v1, %v866_v53  ;;  %v867_v62 = vadd.f32 %v1116_v60, %v851_v58  ;;  %v849_v21 = vld [vmem:[#allocation2 + $0x68] sm:$0xff] }
 0x338   :  { %v887_v45 = vadd.f32 %v1577_v1, %v864_v35  ;;  %v865_v8 = vadd.f32 %v1117_v47, %v849_v21 }
 0x339   :  { %905 = vst.msk [vmem:[%s1726_s7 + $0x70] sm:$0xff] %vm31_vm0, %v889_v59  ;;  %v890_v7 = vadd.f32 %v1577_v1, %v867_v62 }
 0x33a   :  { %903 = vst.msk [vmem:[%s1726_s7 + $0x60] sm:$0xff] %vm31_vm0, %v887_v45  ;;  %v888_v63 = vadd.f32 %v1577_v1, %v865_v8 }
 0x33b   :  { %906 = vst.msk [vmem:[%s1726_s7 + $0x78] sm:$0xff] %vm31_vm0, %v890_v7 }
 0x33c   :  { %904 = vst.msk [vmem:[%s1726_s7 + $0x68] sm:$0xff] %vm31_vm0, %v888_v63 }

// kernel: vss_decoder_layer.21
= control target key start
LH: loop header
LB: loop body
LE: loop exit
PB: predicated region body
PF: predicated region fallthrough
CT: control target
= control target key end

     0   :  { %s6245_s30 = smov 0   ;;  %s6247_s10 = smov 0   ;;  %s8328_s0 = inlined_call_operand.vmem [shape: f32[2,2,64,64], index: 0, kind: input, shape index: {}]   ;;  %s8329_s1 = inlined_call_operand.vmem [shape: bf16[4,64,130], index: 1, kind: input, shape index: {}, may-alias: {1,2}]   ;;  %s8330_s2 = inlined_call_operand.vmem [shape: bf16[4,64,130], index: 2, kind: input, shape index: {}, may-alias: {1,2}]   ;;  %s8331_s3 = inlined_call_operand.vmem [shape: bf16[4,2,64], index: 3, kind: input, shape index: {}, may-alias: {3,4}]   ;;  %s8332_s4 = inlined_call_operand.vmem [shape: bf16[4,2,64], index: 4, kind: input, shape index: {}, may-alias: {3,4}]   ;;  %s8333_s5 = inlined_call_operand.vmem [shape: f32[4,3,2], index: 5, kind: input, shape index: {}, may-alias: {5,6}]   ;;  %s8334_s6 = inlined_call_operand.vmem [shape: f32[4,3,2], index: 6, kind: input, shape index: {}, may-alias: {5,6}]   ;;  %s8335_s7 = inlined_call_operand.vmem [shape: f32[4,2,2], index: 7, kind: input, shape index: {}, may-alias: {7,8}]   ;;  %s8336_s8 = inlined_call_operand.vmem [shape: f32[4,2,2], index: 8, kind: input, shape index: {}, may-alias: {7,8}]   ;;  %s8337_s9 = inlined_call_operand.vmem [shape: f32[2,2,64,64], index: 9, kind: output, shape index: {}]  }
   0x1   :  { %s6249_s11 = smov 0   ;;  %s6251_s12 = smov 0  }
   0x2   :  { %s6253_s13 = smov 0  }
   0x3 LB: > { %s28_s14 = sadd.s32 1, %s6175_s11  ;;  %s31_s15 = sadd.s32 1, %s6179_s12  ;;  %s6183_s13 = sphi %s6253_s13, %s19_s13   ;;  %s6179_s12 = sphi %s6251_s12, %s8533_s12   ;;  %s6175_s11 = sphi %s6249_s11, %s8532_s11   ;;  %s6171_s10 = sphi %s6247_s10, %s8531_s10   ;;  %s6167_s30 = sphi %s6245_s30, %s8530_s30  }
   0x4   : > { %p29_p0 = scmp.ge.s32.totalorder %s28_s14, 2  ;;  %p4687_p1 = scmp.ge.s32.totalorder %s6183_s13, 1 }
   0x5   : > { %p395_p2 = scmp.lt.s32.totalorder %s6183_s13, 5 }
   0x6   : > { %s8535_s14 = smov (%p29_p0, %s28_s14), 0  ;;  %s8537_s15 = smov (!%p29_p0, %s31_s15), %s6179_s12 }
   0x7   : > { %p396_p3 = pnand %p4687_p1, %p395_p2  ;;  %p33_p4 = scmp.ge.s32.totalorder %s8537_s15, 2 }
   0x9   : > { %s8539_s15 = smov (%p33_p4, %s8537_s15), 0  ;;  %399 = sbr.rel (%p396_p3) target bundleno = 1772 (0x6ec), region = 56 }
  0x10   : > { %p484_p5 = scmp.lt.s32.totalorder %s6167_s30, 3  ;;  %p475_p6 = scmp.lt.s32.totalorder %s6171_s10, 1  ;;  %vm595_vm0 = vcmask 523264   ;;  %v8353_v0 = vmov 0   ;;  %v8355_v1 = vmov 0.0   ;;  %vm8338_vm1 = vmmov 0  }
  0x11   : > { %708 = vmatprep.mubr.bf16.mxu0 %v8353_v0  ;;  %p477_p7 = scmp.lt.s32.totalorder %s6167_s30, 1  ;;  %5098 = vmatprep.subr.bf16.mxu1 %v8355_v1  ;;  %596 = vst.msk [vmem:[#allocation2] sm:$0xff] %vm595_vm0, %v8355_v1  ;;  %597 = vst.msk [vmem:[#allocation2 + $0x8] sm:$0xff] %vm595_vm0, %v8355_v1  ;;  %v8351_v2 = vmov 1   ;;  %v534_v29 = vlaneseq  ;;  %v8412_v42 = vmov 0  ;;  %v8415_v43 = vmov 0 }
  0x12   : > { %598 = vst.msk [vmem:[#allocation2 + $0x10] sm:$0xff] %vm595_vm0, %v8355_v1  ;;  %599 = vst.msk [vmem:[#allocation2 + $0x18] sm:$0xff] %vm595_vm0, %v8355_v1  ;;  %s6303_s16 = scalar_select %p484_p5, %s6167_s30, 3  ;;  %5106 = vmatprep.mubr.msk.bf16.mxu1 %vm8338_vm1, %v8355_v1  ;;  %5786 = vset.pattern.permute.xlu0 %v8353_v0  ;;  %v8348_v44 = vmov 0.0|0.0   ;;  %v8346_v45 = vmov 1.0|1.0  }
  0x13   : > { %600 = vst.msk [vmem:[#allocation2 + $0x20] sm:$0xff] %vm595_vm0, %v8355_v1  ;;  %601 = vst.msk [vmem:[#allocation2 + $0x28] sm:$0xff] %vm595_vm0, %v8355_v1  ;;  %s8541_s10 = smov (!%p475_p6, %s6171_s10), 1  ;;  %5788 = vset.pattern.permute.xlu1 %v8351_v2  ;;  %v6397_v30 = vand.u32 127, %v534_v29  ;;  %v6399_v31 = vshrl.u32 %v534_v29, 7  ;;  %s6191_s28 = smov 64  }
  0x14   : > { %602 = vst.msk [vmem:[#allocation2 + $0x30] sm:$0xff] %vm595_vm0, %v8355_v1  ;;  %603 = vst.msk [vmem:[#allocation2 + $0x38] sm:$0xff] %vm595_vm0, %v8355_v1  ;;  %s4876_s17 = sshll.u32 %s6303_s16, 6  ;;  %s4689_s22 = sshll.u32 %s8541_s10, 4 }
  0x15   : > { %s6316_s20 = scalar_lea.vmem %s8329_s1, %s4876_s17  ;;  %s4697_s25 = sshll.u32 %s6303_s16, 1  ;;  %8400 = vst [vmem:[#allocation3_spill] sm:$0xff] %v6399_v31  ;;  %v6402_v32 = vadd.s32 8, %v6399_v31  ;;  %vm545_vm2 = vcmp.le.s32.totalorder %v6397_v30, %v6399_v31  ;;  %v6414_v34 = vadd.s32 16, %v6399_v31  ;;  %v6417_v35 = vadd.s32 24, %v6399_v31 }
  0x16   : > { %s478_s21 = scalar_select %p477_p7, %s6167_s30, 1  ;;  %v5871_v3 = vld [vmem:[%s6316_s20 + $0x4] ss:$8 sps:$4 sm:$0xff]   ;;  %v5873_v4 = vld [vmem:[%s6316_s20] ss:$8 sps:$4 sm:$0xff]   ;;  %v6409_v33 = vsel %vm545_vm2, 1.0, %v8355_v1  ;;  %vm8343_vm14 = vcmp.ge.s32.totalorder %v6397_v30, %v6399_v31 }
  0x17   : > { %v5874_v5 = vld [vmem:[%s6316_s20 + $0x14] ss:$8 sps:$4 sm:$0xff]   ;;  %676 = vmatprep.subr.bf16.mxu0 %v5871_v3  ;;  %v5876_v6 = vld [vmem:[%s6316_s20 + $0x10] ss:$8 sps:$4 sm:$0xff]   ;;  %v5877_v7 = vld [vmem:[%s6316_s20 + $0x24] ss:$8 sps:$4 sm:$0xff]   ;;  %s517_s18 = scalar_lea.vmem %s8335_s7, %s4697_s25  ;;  %vm546_vm3 = vcmp.le.s32.totalorder %v6397_v30, %v6402_v32  ;;  %vm547_vm4 = vcmp.le.s32.totalorder %v6397_v30, %v6414_v34  ;;  %vm548_vm5 = vcmp.le.s32.totalorder %v6397_v30, %v6417_v35  ;;  %vm8342_vm15 = vcmp.ge.s32.totalorder %v6397_v30, %v6402_v32 }
  0x18   : > { %s4688_s23 = sshll.u32 %s478_s21, 3  ;;  %677 = vmatpush1.bf16.msra.mxu0 %v5873_v4  ;;  %v5879_v11 = vld [vmem:[%s6316_s20 + $0x20] ss:$8 sps:$4 sm:$0xff]   ;;  %v5880_v13 = vld [vmem:[%s6316_s20 + $0x34] ss:$8 sps:$4 sm:$0xff]   ;;  %s498_s21 = scalar_lea.vmem %s8331_s3, %s6303_s16  ;;  %8401 = vst [vmem:[#allocation4_spill] sm:$0xff] %v6402_v32  ;;  %vm6436_vm8 = vmpackc.low %vm546_vm3, %vm545_vm2 }
  0x19   : > { %s6324_s24 = sadd.s32 %s4689_s22, %s4688_s23  ;;  %678 = vmatprep.subr.bf16.mxu0 %v5874_v5  ;;  %v594_v12 = vld [vmem:[%s517_s18] sm:$0x3]  ;;  %v5882_v17 = vld [vmem:[%s6316_s20 + $0x30] ss:$8 sps:$4 sm:$0xff]   ;;  %8402 = vst [vmem:[#allocation5_spill] sm:$0xff] %v6414_v34  ;;  %8403 = vst [vmem:[#allocation6_spill] sm:$0xff] %v6417_v35 }
  0x1a   : > { %s4690_s26 = sshll.u32 %s6324_s24, 3  ;;  %840 = vperm.xlu0 %5786, %v594_v12   ;;  %v837_v28 = vld [vmem:[%s498_s21] sm:$0x1]  ;;  %v6424_v36 = vadd.s32 32, %v6399_v31  ;;  %v6427_v37 = vadd.s32 40, %v6399_v31  ;;  %v6441_v39 = vadd.s32 48, %v6399_v31  ;;  %vm6449_vm9 = vmpackc.low %vm548_vm5, %vm547_vm4 }
  0x1b   : > { %s6335_s29 = scalar_lea.vmem %s8328_s0, %s4690_s26  ;;  %v6454_v41 = vadd.s32 56, %v6399_v31  ;;  %vm5513_vm2 = vmpackc.low %vm8342_vm15, %vm8343_vm14  ;;  %v1284_v46 = vld [vmem:[#allocation2] sm:$0xff]  ;;  %v1285_v47 = vld [vmem:[#allocation2 + $0x8] sm:$0xff]  ;;  %s4695_s22 = sshll.u32 %s6303_s16, 2  ;;  %v6538_v49 = vsub.s32 0, %v6399_v31 }
  0x1c   : > { %v6341_v8 = vld [vmem:[%s6335_s29] sm:$0xff]  ;;  %v6344_v9 = vld [vmem:[%s6335_s29 + $0x8] sm:$0xff]  ;;  %679 = vmatpush1.bf16.msra.mxu0 %v5876_v6  ;;  %v6352_v15 = vld [vmem:[%s6335_s29 + $0x10] sm:$0xff]  ;;  %8404 = vst [vmem:[#allocation7_spill] sm:$0xff] %v6424_v36  ;;  %vm549_vm6 = vcmp.le.s32.totalorder %v6397_v30, %v6424_v36  ;;  %vm550_vm7 = vcmp.le.s32.totalorder %v6397_v30, %v6427_v37  ;;  %vm8341_vm11 = vcmp.le.s32.totalorder %v6397_v30, %v6441_v39  ;;  %s6535_s27 = scalar_lea.vmem %s8333_s5, %s4695_s22  ;;  %s6192_s16 = smov 96  }
  0x1d   : > { %v612_v10 = vpack.c.bf16 %v6344_v9, %v6341_v8  ;;  %680 = vmatprep.subr.bf16.mxu0 %v5877_v7  ;;  %v6355_v16 = vld [vmem:[%s6335_s29 + $0x18] sm:$0xff]  ;;  %v6364_v20 = vld [vmem:[%s6335_s29 + $0x20] sm:$0xff]  ;;  %v6367_v21 = vld [vmem:[%s6335_s29 + $0x28] sm:$0xff]  ;;  %8405 = vst [vmem:[#allocation8_spill] sm:$0xff] %v6427_v37  ;;  %vm8340_vm12 = vcmp.le.s32.totalorder %v6397_v30, %v6454_v41  ;;  %vm573_vm15 = vcmp.ge.s32.totalorder %v6397_v30, %v6424_v36  ;;  %s489_s10 = sadd.s32 2, %s6167_s30 }
  0x1e   : > { %v613_v18 = vpack.c.bf16 %v6355_v16, %v6352_v15  ;;  %5787 = vset.pattern.permute.xlu0 %v8351_v2  ;;  %v614_v22 = vpack.c.bf16 %v6367_v21, %v6364_v20  ;;  %v6376_v24 = vld [vmem:[%s6335_s29 + $0x30] sm:$0xff]  ;;  %v6379_v25 = vld [vmem:[%s6335_s29 + $0x38] sm:$0xff]  ;;  %8408 = vst [vmem:[#allocation9_spill] sm:$0xff] %v6441_v39  ;;  %8411 = vst [vmem:[#allocation10_spill] sm:$0xff] %v6454_v41  ;;  %v6527_v48 = vpack.c.bf16 %v1285_v47, %v1284_v46  ;;  %p490_p8 = scmp.lt.s32.totalorder %s489_s10, 3 }
  0x1f   : > { %v665_v14 = vsel %vm595_vm0, %v612_v10, 0  ;;  %895 = vperm.xlu0 %5787, %v594_v12   ;;  %v615_v26 = vpack.c.bf16 %v6379_v25, %v6376_v24  ;;  %vm6462_vm10 = vmpackc.low %vm550_vm7, %vm549_vm6  ;;  %v6541_v50 = vld [vmem:[%s6535_s27] sm:$0x7] }
  0x20   : > { %5099 = vmatpush3.bf16.xpose.msra.mxu1 %v665_v14  ;;  %681 = vmatpush1.bf16.msra.mxu0 %v5879_v11  ;;  %v668_v19 = vsel %vm595_vm0, %v613_v18, 0  ;;  %v671_v23 = vsel %vm595_vm0, %v614_v22, 0  ;;  %v8413_v42 = vsel %vm6462_vm10, 4294967295, %v8412_v42  ;;  %vm6476_vm13 = vmpackc.low %vm8340_vm12, %vm8341_vm11  ;;  %vm8344_vm12 = vcmp.ge.s32.totalorder %v6397_v30, %v6417_v35  ;;  %s8543_s10 = smov (!%p490_p8, %s489_s10), 3 }
  0x21   : > { %5100 = vmatprep.subr.bf16.mxu1 %v8355_v1  ;;  %682 = vmatprep.subr.bf16.mxu0 %v5880_v13  ;;  %v674_v27 = vsel %vm595_vm0, %v615_v26, 0  ;;  %8414 = vst [vmem:[#allocation11_spill] sm:$0xff] %v8413_v42  ;;  %v8416_v43 = vsel %vm6476_vm13, 4294967295, %v8415_v43  ;;  %v6545_v51 = vrot.slane %v6541_v50, %v6538_v49  ;;  %v1289_v42 = vld [vmem:[#allocation2 + $0x28] sm:$0xff]  ;;  %s4877_s17 = sshll.u32 %s8543_s10, 6  ;;  %s4698_s30 = sshll.u32 %s8543_s10, 1 }
  0x22   : > { %8417 = vst [vmem:[#allocation12_spill] sm:$0xff] %v8416_v43  ;;  %s6867_s20 = scalar_lea.vmem %s8330_s2, %s4877_s17  ;;  %s522_s23 = scalar_lea.vmem %s8336_s8, %s4698_s30 }
  0x23   : > { %s502_s17 = scalar_lea.vmem %s8332_s4, %s8543_s10  ;;  %s4696_s18 = sshll.u32 %s8543_s10, 2 }
  0x24   : > { %683 = vmatpush1.bf16.msra.mxu0 %v5882_v17  ;;  %s7224_s30 = scalar_lea.vmem %s8334_s6, %s4696_s18 }
  0x27   : > { %4726 = vmatmul.mubr.msk.bf16.vlgmr.msra.gmra.mrb[0].mxu0 %vm595_vm0, %v612_v10 }
  0x28   : > { %5101 = vmatpush3.bf16.xpose.msra.mxu1 %v668_v19  ;;  %718 = vmatprep.mubr.bf16.mxu0 %v8353_v0 }
  0x29   : > { %5102 = vmatprep.subr.bf16.mxu1 %v8355_v1 }
  0x2f   : > { %4727 = vmatmul.mubr.msk.bf16.gmra.mrb[4].mxu0 %vm595_vm0, %v613_v18 }
  0x30   : > { %5103 = vmatpush3.bf16.xpose.msra.mxu1 %v671_v23  ;;  %728 = vmatprep.mubr.bf16.mxu0 %v8353_v0 }
  0x31   : > { %5104 = vmatprep.subr.bf16.mxu1 %v8355_v1 }
  0x37   : > { %4728 = vmatmul.mubr.msk.bf16.gmra.mrb[8].mxu0 %vm595_vm0, %v614_v22 }
  0x38   : > { %5105 = vmatpush3.bf16.xpose.msra.mxu1 %v674_v27  ;;  %738 = vmatprep.mubr.bf16.mxu0 %v8353_v0 }
  0x39   : > { %5512 = vmatprep.subr.bf16.mxu1 %v8348_v44 }
  0x3f   : > { %5107 = vmatmul.mubr.msk.bf16.vlgmr.msra.gmra.mrb[0].mxu1 %vm595_vm0, %v837_v28  ;;  %4729 = vmatmul.mubr.msk.bf16.gmra.mrb[12].mxu0 %vm595_vm0, %v615_v26 }
  0x40   : > { %5154 = vmatprep.mubr.msk.f32.mxu1 %vm8338_vm1, %v8355_v1  ;;  %5126 = vmatprep.mubr.msk.f32.mxu0 %vm595_vm0, %v6409_v33  ;;  %vm8345_vm1 = vcmp.ge.s32.totalorder %v6397_v30, %v6414_v34 }
  0x41   : > { %5514 = vmatpush3.bf16.msk.msra.mxu1 %vm5513_vm2, %v8346_v45  ;;  %vm5516_vm11 = vmpackc.low %vm8344_vm12, %vm8345_vm1  ;;  %vm574_vm2 = vcmp.ge.s32.totalorder %v6397_v30, %v6427_v37  ;;  %vm8360_vm12 = vcmp.ge.s32.totalorder %v6397_v30, %v6441_v39  ;;  %vm8350_vm1 = vcmp.ge.s32.totalorder %v6397_v30, %v6454_v41 }
  0x42   : > { %5515 = vmatprep.subr.bf16.mxu1 %v8348_v44  ;;  %vm5519_vm14 = vmpackc.low %vm574_vm2, %vm573_vm15 }
  0x45   : > { %5517 = vmatpush3.bf16.msk.msra.mxu1 %vm5516_vm11, %v8346_v45  ;;  %vm5522_vm11 = vmpackc.low %vm8350_vm1, %vm8360_vm12  ;;  %vm1101_vm1 = vcmask 15360  }
  0x46   : > { %5518 = vmatprep.subr.bf16.mxu1 %v8348_v44 }
  0x49   : > { %5520 = vmatpush3.bf16.msk.msra.mxu1 %vm5519_vm14, %v8346_v45 }
  0x4a   : > { %5521 = vmatprep.subr.bf16.mxu1 %v8348_v44 }
  0x4d   : > { %5523 = vmatpush3.bf16.msk.msra.mxu1 %vm5522_vm11, %v8346_v45 }
  0x4e   : > { %5549 = vmatprep.subr.bf16.mxu1 %v6527_v48 }
  0xfa   : > { %v6547_v52 = vpop.f32.mrb[0].mxu0 }
  0xfb   : > { %1131 = vrot.lane.b32.xlu1 %v6547_v52, %s6191_s28  ;;  %v712_v53 = vpop.f32.mrb[1].mxu0 }
  0xfc   : > { %v6552_v54 = vadd.f32 %v6545_v51, %v712_v53  ;;  %v6554_v55 = vpop.f32.mrb[2].mxu0  ;;  %v841_v53 = vpop.permute.xlu0 %840 }
  0xfd   : > { %v6558_v56 = vpack.c.bf16 %v6554_v55, %v6547_v52  ;;  %v716_v57 = vpop.f32.mrb[3].mxu0 }
  0xfe   : > { %v769_v58 = vmin.f32 %v6552_v54, 20.0  ;;  %v6562_v59 = vadd.f32 %v6545_v51, %v716_v57  ;;  %vm761_vm14 = vcmp.gt.f32.partialorder %v6552_v54, 20.0 }
  0xff   : > { %1133 = vrot.lane.b32.xlu1 %v6554_v55, %s6191_s28 }
 0x100   : > { %v777_v60 = vmul.f32 1.442695, %v769_v58  ;;  %v770_v61 = vmin.f32 %v6562_v59, 20.0  ;;  %vm762_vm11 = vcmp.gt.f32.partialorder %v6562_v59, 20.0 }
 0x102   : > { %5895 = vpow2.f32 %v777_v60  ;;  %v779_v62 = vmul.f32 1.442695, %v770_v61  ;;  %v6567_v63 = vpop.f32.mrb[4].mxu0 }
 0x103   : > { %1135 = vrot.lane.b32.xlu1 %v6567_v63, %s6191_s28  ;;  %v722_v3 = vpop.f32.mrb[5].mxu0 }
 0x104   : > { %5897 = vpow2.f32 %v779_v62  ;;  %v6572_v4 = vadd.f32 %v6545_v51, %v722_v3  ;;  %v6574_v5 = vpop.f32.mrb[6].mxu0 }
 0x105   : > { %v6578_v6 = vpack.c.bf16 %v6574_v5, %v6567_v63  ;;  %1137 = vrot.lane.b32.xlu0 %v6574_v5, %s6191_s28  ;;  %v726_v7 = vpop.f32.mrb[7].mxu0 }
 0x106   : > { %v771_v10 = vmin.f32 %v6572_v4, 20.0  ;;  %v6584_v11 = vadd.f32 %v6545_v51, %v726_v7 }
 0x108   : > { %v781_v12 = vmul.f32 1.442695, %v771_v10  ;;  %v772_v13 = vmin.f32 %v6584_v11, 20.0 }
 0x10a   : > { %5899 = vpow2.f32 %v781_v12  ;;  %v783_v14 = vmul.f32 1.442695, %v772_v13  ;;  %v6587_v17 = vpop.f32.mrb[8].mxu0 }
 0x10b   : > { %1139 = vrot.lane.b32.xlu1 %v6587_v17, %s6191_s28  ;;  %v732_v18 = vpop.f32.mrb[9].mxu0 }
 0x10c   : > { %v5896_v19 = vpop.eup %5895  ;;  %5901 = vpow2.f32 %v783_v14  ;;  %v6592_v22 = vadd.f32 %v6545_v51, %v732_v18  ;;  %v6594_v23 = vpop.f32.mrb[10].mxu0 }
 0x10d   : > { %v793_v26 = vadd.f32 1.0, %v5896_v19  ;;  %v6598_v27 = vpack.c.bf16 %v6594_v23, %v6587_v17  ;;  %1141 = vrot.lane.b32.xlu0 %v6594_v23, %s6191_s28  ;;  %v736_v28 = vpop.f32.mrb[11].mxu0 }
 0x10e   : > { %v5898_v29 = vpop.eup %5897  ;;  %v773_v46 = vmin.f32 %v6592_v22, 20.0  ;;  %v6604_v47 = vadd.f32 %v6545_v51, %v736_v28 }
 0x10f   : > { %5903 = vlog2.f32 %v793_v26  ;;  %v794_v57 = vadd.f32 1.0, %v5898_v29  ;;  %v6620_v29 = vsub.s32 1, %v6399_v31 }
 0x110   : > { %v785_v58 = vmul.f32 1.442695, %v773_v46  ;;  %v774_v60 = vmin.f32 %v6604_v47, 20.0 }
 0x111   : > { %5905 = vlog2.f32 %v794_v57  ;;  %8418 = vst [vmem:[#allocation13_spill] sm:$0xff] %v6620_v29 }
 0x112   : > { %v880_v61 = vpop.f32.mrb[0].mxu1  ;;  %5907 = vpow2.f32 %v785_v58  ;;  %v787_v7 = vmul.f32 1.442695, %v774_v60  ;;  %v6609_v10 = vpop.f32.mrb[12].mxu0 }
 0x113   : > { %v6607_v62 = vadd.f32 %v880_v61, %v841_v53  ;;  %v5108_v3 = vpop.f32.mrb[1].mxu1  ;;  %1143 = vrot.lane.b32.xlu1 %v6609_v10, %s6191_s28  ;;  %v742_v13 = vpop.f32.mrb[13].mxu0 }
 0x114   : > { %v883_v12 = vpop.f32.mrb[2].mxu1  ;;  %v5900_v19 = vpop.eup %5899  ;;  %5909 = vpow2.f32 %v787_v7  ;;  %v6615_v26 = vadd.f32 %v6545_v51, %v742_v13 }
 0x115   : > { %v887_v14 = vmin.f32 %v6607_v62, 20.0  ;;  %v5109_v18 = vpop.f32.mrb[3].mxu1  ;;  %v6617_v28 = vpop.f32.mrb[14].mxu0  ;;  %v795_v46 = vadd.f32 1.0, %v5900_v19  ;;  %v6635_v19 = vrot.slane %v6541_v50, %v6620_v29 }
 0x116   : > { %v6624_v53 = vpack.c.bf16 %v6617_v28, %v6609_v10  ;;  %1145 = vrot.lane.b32.xlu0 %v6617_v28, %s6191_s28  ;;  %v746_v57 = vpop.f32.mrb[15].mxu0  ;;  %v5902_v60 = vpop.eup %5901  ;;  %v775_v61 = vmin.f32 %v6615_v26, 20.0 }
 0x117   : > { %v888_v58 = vmul.f32 1.442695, %v887_v14  ;;  %v6630_v3 = vadd.f32 %v6545_v51, %v746_v57  ;;  %5911 = vlog2.f32 %v795_v46  ;;  %v796_v7 = vadd.f32 1.0, %v5902_v60 }
 0x118   : > { %v789_v12 = vmul.f32 1.442695, %v775_v61 }
 0x119   : > { %v776_v13 = vmin.f32 %v6630_v3, 20.0  ;;  %5913 = vpow2.f32 %v888_v58  ;;  %v5904_v18 = vpop.eup %5903  ;;  %vm768_vm12 = vcmp.gt.f32.partialorder %v6630_v3, 20.0 }
 0x11a   : > { %5915 = vlog2.f32 %v796_v7  ;;  %v802_v45 = vmul.f32 0.6931472, %v5904_v18 }
 0x11b   : > { %5917 = vpow2.f32 %v789_v12  ;;  %v791_v14 = vmul.f32 1.442695, %v776_v13  ;;  %v5906_v44 = vpop.eup %5905 }
 0x11c   : > { %v5908_v51 = vpop.eup %5907  ;;  %v6639_v46 = vsel %vm761_vm14, %v6552_v54, %v802_v45  ;;  %v804_v57 = vmul.f32 0.6931472, %v5906_v44  ;;  %vm763_vm14 = vcmp.gt.f32.partialorder %v6572_v4, 20.0 }
 0x11d   : > { %5919 = vpow2.f32 %v791_v14  ;;  %v797_v58 = vadd.f32 1.0, %v5908_v51  ;;  %1923 = vperm.xlu1 %5788, %v6639_v46   ;;  %v829_v50 = vmul.f32 %v6635_v19, %v6639_v46 }
 0x11e   : > { %v5910_v60 = vpop.eup %5909  ;;  %v6646_v61 = vsel %vm762_vm11, %v6562_v59, %v804_v57  ;;  %vm764_vm11 = vcmp.gt.f32.partialorder %v6584_v11, 20.0 }
 0x11f   : > { %5921 = vlog2.f32 %v797_v58  ;;  %v798_v7 = vadd.f32 1.0, %v5910_v60  ;;  %1927 = vperm.xlu0 %5787, %v6646_v61   ;;  %v830_v44 = vmul.f32 %v6635_v19, %v6646_v61  ;;  %v1102_v12 = vsel %vm1101_vm1, %v829_v50, 0.0 }
 0x121   : > { %v5912_v45 = vpop.eup %5911  ;;  %5923 = vlog2.f32 %v798_v7  ;;  %v5496_v54 = vpack.c.bf16 %v830_v44, %v829_v50  ;;  %v1103_v13 = vsel %vm1101_vm1, %v830_v44, 0.0 }
 0x122   : > { %v1104_v14 = vadd.f32 %v1103_v13, %v1102_v12  ;;  %v806_v51 = vmul.f32 0.6931472, %v5912_v45 }
 0x123   : > { %v5914_v18 = vpop.eup %5913  ;;  %5497 = vmatprep.subr.bf16.mxu0 %v5496_v54 }
 0x124   : > { %v5916_v59 = vpop.eup %5915  ;;  %v890_v57 = vadd.f32 1.0, %v5914_v18  ;;  %5499 = vmatpush3.bf16.msra.mxu0 %v5496_v54  ;;  %v6655_v60 = vsel %vm763_vm14, %v6572_v4, %v806_v51  ;;  %vm765_vm14 = vcmp.gt.f32.partialorder %v6592_v22, 20.0 }
 0x125   : > { %v5918_v58 = vpop.eup %5917  ;;  %v808_v2 = vmul.f32 0.6931472, %v5916_v59  ;;  %1931 = vperm.xlu1 %5788, %v6655_v60   ;;  %v831_v50 = vmul.f32 %v6635_v19, %v6655_v60 }
 0x126   : > { %v799_v7 = vadd.f32 1.0, %v5918_v58  ;;  %5925 = vlog2.f32 %v890_v57 }
 0x127   : > { %v5920_v44 = vpop.eup %5919  ;;  %v6662_v45 = vsel %vm764_vm11, %v6584_v11, %v808_v2  ;;  %v1105_v54 = vsel %vm1101_vm1, %v831_v50, 0.0  ;;  %vm766_vm11 = vcmp.gt.f32.partialorder %v6604_v47, 20.0 }
 0x128   : > { %5927 = vlog2.f32 %v799_v7  ;;  %v800_v12 = vadd.f32 1.0, %v5920_v44  ;;  %1935 = vperm.xlu0 %5787, %v6662_v45   ;;  %v832_v4 = vmul.f32 %v6635_v19, %v6662_v45  ;;  %v1106_v13 = vadd.f32 %v1105_v54, %v1104_v14  ;;  %v1286_v54 = vld [vmem:[#allocation2 + $0x10] sm:$0xff] }
 0x129   : > { %v5922_v18 = vpop.eup %5921 }
 0x12a   : > { %5929 = vlog2.f32 %v800_v12  ;;  %v5500_v51 = vpack.c.bf16 %v832_v4, %v831_v50  ;;  %v1107_v59 = vsel %vm1101_vm1, %v832_v4, 0.0  ;;  %v810_v58 = vmul.f32 0.6931472, %v5922_v18  ;;  %v896_v12 = vpop.permute.xlu0 %895 }
 0x12b   : > { %v1108_v57 = vadd.f32 %v1107_v59, %v1106_v13  ;;  %v5924_v0 = vpop.eup %5923  ;;  %v1287_v13 = vld [vmem:[#allocation2 + $0x18] sm:$0xff] }
 0x12c   : > { %5501 = vmatprep.subr.bf16.mxu0 %v5500_v51  ;;  %v6671_v2 = vsel %vm765_vm14, %v6592_v22, %v810_v58  ;;  %v812_v11 = vmul.f32 0.6931472, %v5924_v0  ;;  %vm886_vm14 = vcmp.gt.f32.partialorder %v6607_v62, 20.0  ;;  %v5552_v43 = vpack.c.bf16 %v1287_v13, %v1286_v54 }
 0x12d   : > { %5503 = vmatpush3.bf16.msra.mxu0 %v5500_v51  ;;  %1939 = vperm.xlu1 %5788, %v6671_v2   ;;  %v833_v14 = vmul.f32 %v6635_v19, %v6671_v2 }
 0x12e   : > { %v6678_v7 = vsel %vm766_vm11, %v6604_v47, %v812_v11  ;;  %vm767_vm11 = vcmp.gt.f32.partialorder %v6615_v26, 20.0 }
 0x12f   : > { %1943 = vperm.xlu0 %5787, %v6678_v7   ;;  %v834_v44 = vmul.f32 %v6635_v19, %v6678_v7  ;;  %v1109_v22 = vsel %vm1101_vm1, %v833_v14, 0.0 }
 0x130   : > { %v5926_v50 = vpop.eup %5925  ;;  %v1110_v0 = vadd.f32 %v1109_v22, %v1108_v57  ;;  %v1288_v22 = vld [vmem:[#allocation2 + $0x20] sm:$0xff] }
 0x131   : > { %v892_v4 = vmul.f32 0.6931472, %v5926_v50  ;;  %v5504_v51 = vpack.c.bf16 %v834_v44, %v833_v14  ;;  %v1111_v47 = vsel %vm1101_vm1, %v834_v44, 0.0  ;;  %v5556_v44 = vpack.c.bf16 %v1289_v42, %v1288_v22 }
 0x132   : > { %v5928_v18 = vpop.eup %5927  ;;  %v1112_v59 = vadd.f32 %v1111_v47, %v1110_v0  ;;  %v8422_v42 = vmov 0.0  }
 0x133   : > { %v814_v58 = vmul.f32 0.6931472, %v5928_v18  ;;  %v893_v11 = vsel %vm886_vm14, %v6607_v62, %v892_v4  ;;  %5505 = vmatprep.subr.bf16.mxu0 %v5504_v51  ;;  %v1291_v4 = vld [vmem:[#allocation2 + $0x38] sm:$0xff]  ;;  %v6726_v18 = vsel %vm547_vm4, 1.0, %v8422_v42  ;;  %v6752_v47 = vsel %vm550_vm7, 1.0, %v8422_v42 }
 0x134   : > { %v5930_v1 = vpop.eup %5929  ;;  %v898_v31 = vmul.f32 %v896_v12, %v893_v11  ;;  %5507 = vmatpush3.bf16.msra.mxu0 %v5504_v51  ;;  %v1290_v12 = vld [vmem:[#allocation2 + $0x30] sm:$0xff]  ;;  %v6742_v51 = vsel %vm549_vm6, 1.0, %v8422_v42  ;;  %vm8424_vm4 = vcmp.le.s32.totalorder %v6397_v30, %v6454_v41  ;;  %vm8435_vm6 = vmmov 0  }
 0x135   : > { %v6689_v57 = vsel %vm767_vm11, %v6615_v26, %v814_v58  ;;  %v816_v50 = vmul.f32 0.6931472, %v5930_v1 }
 0x136   : > { %1947 = vperm.xlu1 %5788, %v6689_v57   ;;  %v835_v62 = vmul.f32 %v6635_v19, %v6689_v57  ;;  %5155 = vmatmul.mubr.msk.f32.vlgmr.msra.gmra.mrb[4].mxu1 %vm595_vm0, %v898_v31 }
 0x137   : > { %v6697_v14 = vsel %vm768_vm12, %v6630_v3, %v816_v50  ;;  %5551 = vmatpush3.bf16.msra.mxu1 %v6527_v48  ;;  %vm6709_vm12 = vmpackc.low %vm595_vm0, %vm595_vm0  ;;  %v8419_v48 = vmov 0  ;;  %v5560_v3 = vpack.c.bf16 %v1291_v4, %v1290_v12 }
 0x138   : > { %1951 = vperm.xlu0 %5787, %v6697_v14   ;;  %v836_v1 = vmul.f32 %v6635_v19, %v6697_v14  ;;  %v1113_v26 = vsel %vm1101_vm1, %v835_v62, 0.0  ;;  %5553 = vmatprep.subr.bf16.mxu1 %v5552_v43  ;;  %v8420_v48 = vsel %vm6709_vm12, 4294967295, %v8419_v48  ;;  %v6717_v19 = vsel %vm546_vm3, 1.0, %v8422_v42 }
 0x139   : > { %v1114_v0 = vadd.f32 %v1113_v26, %v1112_v59  ;;  %8421 = vst [vmem:[#allocation14_spill] sm:$0xff] %v8420_v48  ;;  %vm8423_vm3 = vcmp.le.s32.totalorder %v6397_v30, %v6441_v39 }
 0x13a   : > { %v5508_v54 = vpack.c.bf16 %v836_v1, %v835_v62  ;;  %v1115_v31 = vsel %vm1101_vm1, %v836_v1, 0.0  ;;  %v6761_v59 = vsel %vm8423_vm3, 1.0, %v8422_v42 }
 0x13b   : > { %v6705_v13 = vadd.f32 %v1115_v31, %v1114_v0  ;;  %5555 = vmatpush3.bf16.msra.mxu1 %v5552_v43  ;;  %v6736_v43 = vsel %vm548_vm5, 1.0, %v8422_v42  ;;  %vm2324_vm5 = vcmask 261120  }
 0x13c   : > { %5509 = vmatprep.subr.bf16.mxu0 %v5508_v54  ;;  %5557 = vmatprep.subr.bf16.mxu1 %v5556_v44 }
 0x13d   : > { %5511 = vmatpush3.bf16.msra.mxu0 %v5508_v54 }
 0x13e   : > { %5526 = vmatprep.subr.msk.bf16.mxu0 %vm6709_vm12, %v6558_v56 }
 0x13f   : > { %5559 = vmatpush3.bf16.msra.mxu1 %v5556_v44 }
 0x140   : > { %5127 = vmatmul.mubr.msk.f32.vlgmr.msra.gmra.mrb[16].mxu0 %vm595_vm0, %v6717_v19  ;;  %5561 = vmatprep.subr.bf16.mxu1 %v5560_v3 }
 0x141   : > { %5129 = vmatprep.mubr.msk.f32.mxu0 %vm595_vm0, %v6726_v18 }
 0x143   : > { %5563 = vmatpush3.bf16.msra.mxu1 %v5560_v3 }
 0x144   : > { %5130 = vmatmul.mubr.msk.f32.gmra.mrb[18].mxu0 %vm595_vm0, %v6736_v43 }
 0x145   : > { %5132 = vmatprep.mubr.msk.f32.mxu0 %vm595_vm0, %v6742_v51 }
 0x146   : > { %5529 = vmatpush3.bf16.xpose.msk.msra.mxu0 %vm6709_vm12, %v6558_v56  ;;  %v6774_v56 = vsel %vm8424_vm4, 1.0, %v8422_v42 }
 0x147   : > { %5532 = vmatprep.subr.msk.bf16.mxu0 %vm6709_vm12, %v6578_v6 }
 0x148   : > { %5133 = vmatmul.mubr.msk.f32.gmra.mrb[20].mxu0 %vm595_vm0, %v6752_v47 }
 0x149   : > { %5135 = vmatprep.mubr.msk.f32.mxu0 %vm595_vm0, %v6761_v59 }
 0x14c   : > { %5136 = vmatmul.mubr.msk.f32.gmra.mrb[22].mxu0 %vm595_vm0, %v6774_v56 }
 0x14e   : > { %5535 = vmatpush3.bf16.xpose.msk.msra.mxu0 %vm6709_vm12, %v6578_v6 }
 0x14f   : > { %5538 = vmatprep.subr.msk.bf16.mxu0 %vm6709_vm12, %v6598_v27 }
 0x156   : > { %5541 = vmatpush3.bf16.xpose.msk.msra.mxu0 %vm6709_vm12, %v6598_v27 }
 0x157   : > { %5544 = vmatprep.subr.msk.bf16.mxu0 %vm6709_vm12, %v6624_v53 }
 0x15e   : > { %5547 = vmatpush3.bf16.xpose.msk.msra.mxu0 %vm6709_vm12, %v6624_v53 }
 0x16d   : > { %v1132_v58 = vpop.permute.xlu1 %1131 }
 0x16e   : > { %5173 = vmatprep.mubr.msk.f32.mxu0 %vm595_vm0, %v1132_v58  ;;  %5201 = vmatprep.mubr.msk.f32.mxu1 %vm595_vm0, %v1132_v58 }
 0x171   : > { %v1134_v6 = vpop.permute.xlu1 %1133 }
 0x172   : > { %5174 = vmatmul.mubr.msk.f32.vlgmr.msra.gmra.mrb[24].mxu0 %vm595_vm0, %v1134_v6  ;;  %5202 = vmatmul.mubr.msk.f32.vlgmr.msra.gmra.mrb[6].mxu1 %vm595_vm0, %v1134_v6 }
 0x175   : > { %v1136_v11 = vpop.permute.xlu1 %1135 }
 0x176   : > { %5176 = vmatprep.mubr.msk.f32.mxu0 %vm595_vm0, %v1136_v11  ;;  %5204 = vmatprep.mubr.msk.f32.mxu1 %vm595_vm0, %v1136_v11 }
 0x177   : > { %v1138_v27 = vpop.permute.xlu0 %1137 }
 0x178   : > { %5177 = vmatmul.mubr.msk.f32.gmra.mrb[26].mxu0 %vm595_vm0, %v1138_v27  ;;  %5205 = vmatmul.mubr.msk.f32.gmra.mrb[8].mxu1 %vm595_vm0, %v1138_v27 }
 0x17d   : > { %v1140_v53 = vpop.permute.xlu1 %1139 }
 0x17e   : > { %5179 = vmatprep.mubr.msk.f32.mxu0 %vm595_vm0, %v1140_v53  ;;  %5207 = vmatprep.mubr.msk.f32.mxu1 %vm595_vm0, %v1140_v53 }
 0x17f   : > { %v1142_v50 = vpop.permute.xlu0 %1141 }
 0x180   : > { %5180 = vmatmul.mubr.msk.f32.gmra.mrb[28].mxu0 %vm595_vm0, %v1142_v50  ;;  %5208 = vmatmul.mubr.msk.f32.gmra.mrb[10].mxu1 %vm595_vm0, %v1142_v50 }
 0x185   : > { %v1144_v22 = vpop.permute.xlu1 %1143 }
 0x186   : > { %5182 = vmatprep.mubr.msk.f32.mxu0 %vm595_vm0, %v1144_v22  ;;  %5210 = vmatprep.mubr.msk.f32.mxu1 %vm595_vm0, %v1144_v22 }
 0x188   : > { %v1146_v62 = vpop.permute.xlu0 %1145 }
 0x189   : > { %5183 = vmatmul.mubr.msk.f32.gmra.mrb[30].mxu0 %vm595_vm0, %v1146_v62  ;;  %5211 = vmatmul.mubr.msk.f32.gmra.mrb[12].mxu1 %vm595_vm0, %v1146_v62 }
 0x19c   : > { %v1924_v1 = vpop.permute.xlu1 %1923 }
 0x19d   : > { %v1954_v44 = vmul.f32 %v1924_v1, %v6341_v8 }
 0x19e   : > { %v1928_v26 = vpop.permute.xlu0 %1927 }
 0x19f   : > { %v1955_v0 = vmul.f32 %v1928_v26, %v6344_v9  ;;  %v1117_v26 = vrot.slane %v6705_v13, 4 }
 0x1a1   : > { %v5789_v12 = vpack.i.bf16 %v1955_v0, %v1954_v44 }
 0x1a3   : > { %5790 = vrot.lane.b32.xlu1 %v5789_v12, %s6192_s16 }
 0x1a4   : > { %v1932_v54 = vpop.permute.xlu1 %1931 }
 0x1a5   : > { %v1956_v39 = vmul.f32 %v1932_v54, %v6352_v15 }
 0x1a7   : > { %v1936_v50 = vpop.permute.xlu0 %1935 }
 0x1a8   : > { %v1957_v12 = vmul.f32 %v1936_v50, %v6355_v16 }
 0x1aa   : > { %v5794_v37 = vpack.i.bf16 %v1957_v12, %v1956_v39 }
 0x1ac   : > { %v1940_v3 = vpop.permute.xlu1 %1939 }
 0x1ae   : > { %v1944_v44 = vpop.permute.xlu0 %1943 }
 0x1b5   : > { %v1948_v58 = vpop.permute.xlu1 %1947 }
 0x209   : > { %v6812_v4 = vpop.f32.mrb[4].mxu1 }
 0x20a   : > { %v5156_v31 = vpop.f32.mrb[5].mxu1 }
 0x20b   : > { %v1959_v31 = vmul.f32 %v1944_v44, %v6367_v21  ;;  %v1960_v44 = vmul.f32 %v1948_v58, %v6376_v24 }
 0x213   : > { %v6814_v6 = vpop.f32.mrb[16].mxu0 }
 0x214   : > { %1843 = vperm.xlu0 %5787, %v6814_v6   ;;  %v6817_v11 = vpop.f32.mrb[17].mxu0 }
 0x215   : > { %1839 = vperm.xlu1 %5788, %v6817_v11   ;;  %v5791_v8 = vpop.permute.xlu1 %5790 }
 0x216   : > { %v5793_v9 = vunpack.i.h.bf16 %v5791_v8  ;;  %v5792_v27 = vunpack.i.l.bf16 %v5791_v8 }
 0x217   : > { %v6820_v53 = vpop.f32.mrb[18].mxu0 }
 0x218   : > { %1851 = vperm.xlu0 %5787, %v6820_v53   ;;  %v6823_v22 = vpop.f32.mrb[19].mxu0  ;;  %v5580_v62 = vpack.c.bf16 %v5793_v9, %v5792_v27  ;;  %v1118_v9 = vadd.f32 %v1117_v26, %v6705_v13  ;;  %v1952_v27 = vpop.permute.xlu0 %1951  ;;  %v8425_v13 = vmov 0  }
 0x219   : > { %1847 = vperm.xlu1 %5788, %v6823_v22   ;;  %v1961_v21 = vmul.f32 %v1952_v27, %v6379_v25 }
 0x21a   : > { %5581 = vmatprep.subr.bf16.mxu0 %v5580_v62  ;;  %v1119_v50 = vrot.slane %v1118_v9, 2 }
 0x21b   : > { %v6826_v1 = vpop.f32.mrb[20].mxu0  ;;  %5583 = vmatpush3.bf16.msra.mxu0 %v5580_v62  ;;  %v1958_v62 = vmul.f32 %v1940_v3, %v6364_v20  ;;  %v5804_v15 = vpack.i.bf16 %v1961_v21, %v1960_v44 }
 0x21c   : > { %1859 = vperm.xlu0 %5787, %v6826_v1   ;;  %v6830_v0 = vpop.f32.mrb[21].mxu0  ;;  %v1120_v20 = vadd.f32 %v1119_v50, %v1118_v9 }
 0x21d   : > { %1855 = vperm.xlu1 %5788, %v6830_v0   ;;  %v5799_v16 = vpack.i.bf16 %v1959_v31, %v1958_v62 }
 0x21e   : > { %v1121_v39 = vrot.slane %v1120_v20, 1 }
 0x21f   : > { %v6835_v8 = vpop.f32.mrb[22].mxu0 }
 0x220   : > { %v6838_v41 = vpop.f32.mrb[23].mxu0  ;;  %v6855_v24 = vadd.f32 %v1121_v39, %v1120_v20 }
 0x221   : > { %1867 = vperm.xlu1 %5788, %v6835_v8   ;;  %1863 = vperm.xlu0 %5787, %v6838_v41  }
 0x222   : > { %v1413_v25 = vsub.f32 %v6855_v24, %v6817_v11  ;;  %v1415_v58 = vsub.f32 %v6855_v24, %v6823_v22  ;;  %v1416_v26 = vsub.f32 %v6855_v24, %v6820_v53  ;;  %v1418_v31 = vsub.f32 %v6855_v24, %v6826_v1 }
 0x224   : > { %v1421_v54 = vmul.f32 1.442695, %v1413_v25  ;;  %v1425_v12 = vmul.f32 1.442695, %v1415_v58  ;;  %v1427_v9 = vmul.f32 1.442695, %v1416_v26 }
 0x225   : > { %5800 = vrot.lane.b32.xlu1 %v5799_v16, %s6192_s16  ;;  %5795 = vrot.lane.b32.xlu0 %v5794_v37, %s6192_s16  ;;  %v1414_v37 = vsub.f32 %v6855_v24, %v6814_v6  ;;  %v1431_v62 = vmul.f32 1.442695, %v1418_v31  ;;  %v1419_v16 = vsub.f32 %v6855_v24, %v6838_v41  ;;  %v8429_v26 = vmov 1  }
 0x226   : > { %5809 = vset.pattern.permute.xlu1 %v8425_v13  ;;  %5810 = vset.pattern.permute.xlu0 %v8425_v13  ;;  %5931 = vpow2.f32 %v1421_v54 }
 0x227   : > { %v1423_v3 = vmul.f32 1.442695, %v1414_v37  ;;  %v1433_v25 = vmul.f32 1.442695, %v1419_v16 }
 0x229   : > { %1449 = vperm.xlu1 %5809, %v6817_v11   ;;  %5805 = vrot.lane.b32.xlu0 %v5804_v15, %s6192_s16  ;;  %5933 = vpow2.f32 %v1423_v3 }
 0x22a   : > { %5935 = vpow2.f32 %v1425_v12 }
 0x22b   : > { %5937 = vpow2.f32 %v1427_v9 }
 0x22c   : > { %5939 = vpow2.f32 %v1431_v62 }
 0x22d   : > { %1541 = vperm.xlu1 %5809, %v6639_v46   ;;  %1454 = vperm.xlu0 %5810, %v6814_v6   ;;  %5941 = vpow2.f32 %v1433_v25 }
 0x230   : > { %v5932_v27 = vpop.eup %5931 }
 0x231   : > { %1546 = vperm.xlu1 %5809, %v6646_v61   ;;  %1551 = vperm.xlu0 %5810, %v6655_v60   ;;  %v1437_v20 = vmul.f32 %v5932_v27, %v6639_v46  ;;  %v1417_v27 = vsub.f32 %v6855_v24, %v6830_v0 }
 0x233   : > { %v5934_v39 = vpop.eup %5933 }
 0x234   : > { %v1438_v37 = vmul.f32 %v5934_v39, %v6646_v61  ;;  %v5936_v58 = vpop.eup %5935 }
 0x235   : > { %1556 = vperm.xlu1 %5809, %v6662_v45   ;;  %1459 = vperm.xlu0 %5810, %v6823_v22   ;;  %v1439_v31 = vmul.f32 %v5936_v58, %v6655_v60  ;;  %v5938_v9 = vpop.eup %5937 }
 0x236   : > { %v5940_v61 = vpop.eup %5939 }
 0x237   : > { %v1442_v60 = vmul.f32 %v5940_v61, %v6678_v7  ;;  %v5942_v58 = vpop.eup %5941  ;;  %v1420_v61 = vsub.f32 %v6855_v24, %v6835_v8 }
 0x239   : > { %1561 = vperm.xlu1 %5809, %v6671_v2   ;;  %1566 = vperm.xlu0 %5810, %v6678_v7  }
 0x23d   : > { %1464 = vperm.xlu1 %5809, %v6820_v53   ;;  %1469 = vperm.xlu0 %5810, %v6830_v0  }
 0x241   : > { %1571 = vperm.xlu1 %5809, %v6689_v57   ;;  %1576 = vperm.xlu0 %5810, %v6697_v14  }
 0x245   : > { %1474 = vperm.xlu1 %5809, %v6826_v1   ;;  %1484 = vperm.xlu0 %5810, %v6835_v8   ;;  %v6889_v21 = vpop.f32.mrb[24].mxu0  ;;  %v6891_v50 = vpop.f32.mrb[6].mxu1 }
 0x246   : > { %8426 = vst [vmem:[#allocation15_spill] sm:$0xff] %v6891_v50  ;;  %v6893_v44 = vpop.f32.mrb[25].mxu0  ;;  %v6895_v15 = vpop.f32.mrb[7].mxu1 }
 0x247   : > { %8427 = vst [vmem:[#allocation16_spill] sm:$0xff] %v6895_v15 }
 0x249   : > { %1479 = vperm.xlu1 %5809, %v6838_v41   ;;  %1787 = vperm.xlu0 %5810, %v1437_v20  }
 0x24b   : > { %v6900_v54 = vpop.f32.mrb[26].mxu0  ;;  %v6902_v3 = vpop.f32.mrb[8].mxu1 }
 0x24c   : > { %8428 = vst [vmem:[#allocation17_spill] sm:$0xff] %v6902_v3  ;;  %v6905_v12 = vpop.f32.mrb[27].mxu0  ;;  %v6907_v46 = vpop.f32.mrb[9].mxu1  ;;  %v1443_v3 = vmul.f32 %v5942_v58, %v6689_v57  ;;  %v1435_v57 = vmul.f32 1.442695, %v1420_v61 }
 0x24d   : > { %1792 = vperm.xlu1 %5809, %v1438_v37   ;;  %5812 = vset.pattern.permute.xlu0 %v8429_v26  ;;  %8430 = vst [vmem:[#allocation18_spill] sm:$0xff] %v6907_v46 }
 0x24e   : > { %2249 = vperm.xlu0 %5812, %v1437_v20   ;;  %v1440_v20 = vmul.f32 %v5938_v9, %v6662_v45 }
 0x251   : > { %5811 = vset.pattern.permute.xlu1 %v8429_v26 }
 0x252   : > { %2253 = vperm.xlu1 %5811, %v1438_v37   ;;  %2257 = vperm.xlu0 %5812, %v1439_v31   ;;  %v1429_v37 = vmul.f32 1.442695, %v1417_v27 }
 0x253   : > { %v6913_v62 = vpop.f32.mrb[28].mxu0  ;;  %v6915_v16 = vpop.f32.mrb[10].mxu1 }
 0x254   : > { %8431 = vst [vmem:[#allocation19_spill] sm:$0xff] %v6915_v16  ;;  %v6917_v39 = vpop.f32.mrb[29].mxu0  ;;  %v6919_v25 = vpop.f32.mrb[11].mxu1  ;;  %5943 = vpow2.f32 %v1429_v37 }
 0x255   : > { %8432 = vst [vmem:[#allocation20_spill] sm:$0xff] %v6919_v25  ;;  %5945 = vpow2.f32 %v1435_v57 }
 0x256   : > { %5813 = vset.pattern.permute.xlu1 %v8425_v13  ;;  %5816 = vset.pattern.permute.xlu0 %v8425_v13 }
 0x257   : > { %1802 = vperm.xlu1 %5813, %v1440_v20   ;;  %1812 = vperm.xlu0 %5816, %v1442_v60  }
 0x25b   : > { %5814 = vset.pattern.permute.xlu1 %v8429_v26  ;;  %1817 = vperm.xlu0 %5816, %v1443_v3  }
 0x25c   : > { %2261 = vperm.xlu1 %5814, %v1440_v20   ;;  %v6927_v16 = vpop.f32.mrb[30].mxu0  ;;  %v6929_v45 = vpop.f32.mrb[12].mxu1 }
 0x25d   : > { %8433 = vst [vmem:[#allocation21_spill] sm:$0xff] %v6929_v45  ;;  %v6931_v7 = vpop.f32.mrb[31].mxu0  ;;  %v6933_v9 = vpop.f32.mrb[13].mxu1 }
 0x25e   : > { %8434 = vst [vmem:[#allocation22_spill] sm:$0xff] %v6933_v9  ;;  %v5944_v27 = vpop.eup %5943 }
 0x25f   : > { %5821 = vset.pattern.permute.xlu0 %v8429_v26  ;;  %v1441_v20 = vmul.f32 %v5944_v27, %v6671_v2  ;;  %v5946_v58 = vpop.eup %5945 }
 0x260   : > { %5815 = vset.pattern.permute.xlu1 %v8425_v13  ;;  %2273 = vperm.xlu0 %5821, %v1443_v3   ;;  %v1444_v3 = vmul.f32 %v5946_v58, %v6697_v14 }
 0x261   : > { %1797 = vperm.xlu1 %5815, %v1439_v31   ;;  %v1873_v31 = vrot.slane %v6812_v4, %v6620_v29 }
 0x264   : > { %5823 = vset.pattern.permute.xlu0 %v8425_v13 }
 0x265   : > { %5817 = vset.pattern.permute.xlu1 %v8429_v26 }
 0x266   : > { %2269 = vperm.xlu1 %5817, %v1442_v60  }
 0x26a   : > { %5818 = vset.pattern.permute.xlu1 %v8425_v13 }
 0x26b   : > { %1807 = vperm.xlu1 %5818, %v1441_v20  }
 0x26f   : > { %5819 = vset.pattern.permute.xlu1 %v8429_v26 }
 0x270   : > { %2265 = vperm.xlu1 %5819, %v1441_v20  }
 0x274   : > { %5820 = vset.pattern.permute.xlu1 %v8425_v13 }
 0x275   : > { %1822 = vperm.xlu1 %5820, %v1444_v3  }
 0x279   : > { %5822 = vset.pattern.permute.xlu1 %v8429_v26 }
 0x27a   : > { %2277 = vperm.xlu1 %5822, %v1444_v3  }
 0x293   : > { %v1844_v60 = vpop.permute.xlu0 %1843 }
 0x294   : > { %v1875_v2 = vsub.f32 %v1844_v60, %v1873_v31  ;;  %v1840_v37 = vpop.permute.xlu1 %1839 }
 0x295   : > { %v1874_v61 = vsub.f32 %v1840_v37, %v1873_v31 }
 0x296   : > { %v1883_v57 = vmin.f32 %v1875_v2, 0.0 }
 0x297   : > { %v1882_v27 = vmin.f32 %v1874_v61, 0.0  ;;  %v1852_v45 = vpop.permute.xlu0 %1851 }
 0x298   : > { %v1892_v9 = vmul.f32 1.442695, %v1883_v57  ;;  %v1877_v20 = vsub.f32 %v1852_v45, %v1873_v31  ;;  %v1848_v46 = vpop.permute.xlu1 %1847 }
 0x299   : > { %v1890_v14 = vmul.f32 1.442695, %v1882_v27  ;;  %v1876_v58 = vsub.f32 %v1848_v46, %v1873_v31 }
 0x29a   : > { %5947 = vpow2.f32 %v1892_v9  ;;  %v1885_v50 = vmin.f32 %v1877_v20, 0.0 }
 0x29b   : > { %5949 = vpow2.f32 %v1890_v14  ;;  %v1884_v15 = vmin.f32 %v1876_v58, 0.0  ;;  %v1860_v3 = vpop.permute.xlu0 %1859 }
 0x29c   : > { %v1896_v36 = vmul.f32 1.442695, %v1885_v50  ;;  %v1879_v35 = vsub.f32 %v1860_v3, %v1873_v31  ;;  %v1856_v34 = vpop.permute.xlu1 %1855 }
 0x29d   : > { %v1894_v48 = vmul.f32 1.442695, %v1884_v15  ;;  %v1878_v60 = vsub.f32 %v1856_v34, %v1873_v31 }
 0x29e   : > { %5951 = vpow2.f32 %v1896_v36  ;;  %v1887_v37 = vmin.f32 %v1879_v35, 0.0 }
 0x29f   : > { %5953 = vpow2.f32 %v1894_v48  ;;  %v1886_v2 = vmin.f32 %v1878_v60, 0.0 }
 0x2a0   : > { %v1900_v61 = vmul.f32 1.442695, %v1887_v37  ;;  %v1868_v57 = vpop.permute.xlu1 %1867  ;;  %v1864_v45 = vpop.permute.xlu0 %1863 }
 0x2a1   : > { %v1898_v32 = vmul.f32 1.442695, %v1886_v2  ;;  %v1881_v27 = vsub.f32 %v1868_v57, %v1873_v31  ;;  %v1880_v46 = vsub.f32 %v1864_v45, %v1873_v31 }
 0x2a2   : > { %5955 = vpow2.f32 %v1900_v61 }
 0x2a3   : > { %5957 = vpow2.f32 %v1898_v32  ;;  %v1889_v9 = vmin.f32 %v1881_v27, 0.0  ;;  %v1888_v20 = vmin.f32 %v1880_v46, 0.0  ;;  %2354 = vxpose.xlu1.b32.start [1/8] (short) (narrow) %v6547_v52, 64  ;;  %v6954_v32 = vrot.slane %v6812_v4, %v6538_v49 }
 0x2a4   : > { %v5948_v50 = vpop.eup %5947  ;;  %v5801_v14 = vpop.permute.xlu1 %5800 }
 0x2a5   : > { %v5796_v15 = vpop.permute.xlu0 %5795  ;;  %v5950_v34 = vpop.eup %5949  ;;  %v1907_v35 = vmul.f32 %v5948_v50, %v6717_v19  ;;  %v1904_v36 = vmul.f32 1.442695, %v1889_v9  ;;  %v1902_v48 = vmul.f32 1.442695, %v1888_v20  ;;  %v5803_v58 = vunpack.i.h.bf16 %v5801_v14 }
 0x2a6   : > { %v5802_v3 = vunpack.i.l.bf16 %v5801_v14  ;;  %v5798_v60 = vunpack.i.h.bf16 %v5796_v15  ;;  %v5797_v37 = vunpack.i.l.bf16 %v5796_v15  ;;  %v1906_v31 = vmul.f32 %v5950_v34, %v6409_v33 }
 0x2a7   : > { %v6957_v52 = vmul.f32 %v6889_v21, %v1907_v35  ;;  %5959 = vpow2.f32 %v1904_v36  ;;  %2355 = vxpose.xlu1.b32.cont [2/8] (short) (narrow) %v6554_v55, 64 }
 0x2a8   : > { %v5952_v2 = vpop.eup %5951  ;;  %5961 = vpow2.f32 %v1902_v48  ;;  %v1450_v61 = vpop.permute.xlu1 %1449  ;;  %v5584_v45 = vpack.c.bf16 %v5798_v60, %v5797_v37  ;;  %v1914_v27 = vmul.f32 %v1906_v31, %v6893_v44  ;;  %v5588_v14 = vpack.c.bf16 %v5803_v58, %v5802_v3 }
 0x2a9   : > { %v5806_v57 = vpop.permute.xlu0 %5805  ;;  %v5954_v46 = vpop.eup %5953  ;;  %v1491_v9 = vsub.f32 %v1450_v61, %v6954_v32  ;;  %v1909_v20 = vmul.f32 %v5952_v2, %v6736_v43 }
 0x2aa   : > { %v5808_v4 = vunpack.i.h.bf16 %v5806_v57  ;;  %v5807_v50 = vunpack.i.l.bf16 %v5806_v57  ;;  %5585 = vmatprep.subr.bf16.mxu0 %v5584_v45  ;;  %5257 = vmatprep.mubr.msk.f32.mxu0 %vm595_vm0, %v1914_v27  ;;  %v1908_v55 = vmul.f32 %v5954_v46, %v6726_v18  ;;  %v5885_v46 = vld [vmem:[%s6867_s20 + $0x4] ss:$8 sps:$4 sm:$0xff]  }
 0x2ab   : > { %v1499_v15 = vmin.f32 %v1491_v9, 0.0  ;;  %5587 = vmatpush3.bf16.msra.mxu0 %v5584_v45  ;;  %2356 = vxpose.xlu1.b32.cont [3/8] (short) (narrow) %v6567_v63, 64  ;;  %v6967_v34 = vmul.f32 %v6900_v54, %v1909_v20 }
 0x2ac   : > { %v5956_v35 = vpop.eup %5955  ;;  %5589 = vmatprep.subr.bf16.mxu0 %v5588_v14  ;;  %v1542_v36 = vpop.permute.xlu1 %1541  ;;  %v1916_v60 = vmul.f32 %v1908_v55, %v6905_v12  ;;  %v5592_v2 = vpack.c.bf16 %v5808_v4, %v5807_v50  ;;  %v6980_v4 = vld [vmem:[%s6335_s29] sm:$0xff] }
 0x2ad   : > { %v1455_v48 = vpop.permute.xlu0 %1454  ;;  %v5958_v37 = vpop.eup %5957  ;;  %v1507_v31 = vmul.f32 1.442695, %v1499_v15  ;;  %v1911_v3 = vmul.f32 %v5956_v35, %v6752_v47  ;;  %v1579_v50 = vmul.f32 %v6980_v4, %v1542_v36 }
 0x2ae   : > { %v1492_v58 = vsub.f32 %v1455_v48, %v6954_v32  ;;  %v1910_v63 = vmul.f32 %v5958_v37, %v6742_v51  ;;  %v5883_v37 = vld [vmem:[%s6867_s20] ss:$8 sps:$4 sm:$0xff]  }
 0x2af   : > { %5963 = vpow2.f32 %v1507_v31  ;;  %5591 = vmatpush3.bf16.msra.mxu0 %v5588_v14  ;;  %2357 = vxpose.xlu1.b32.cont [4/8] (short) (narrow) %v6574_v5, 64  ;;  %v6975_v57 = vmul.f32 %v6913_v62, %v1911_v3  ;;  %v6984_v14 = vld [vmem:[%s6335_s29 + $0x8] sm:$0xff]  ;;  %v5888_v3 = vld [vmem:[%s6867_s20 + $0x14] ss:$8 sps:$4 sm:$0xff]  }
 0x2b0   : > { %v1500_v61 = vmin.f32 %v1492_v58, 0.0  ;;  %5593 = vmatprep.subr.bf16.mxu0 %v5592_v2  ;;  %v1547_v45 = vpop.permute.xlu1 %1546  ;;  %v1918_v9 = vmul.f32 %v1910_v63, %v6917_v39 }
 0x2b1   : > { %v1552_v27 = vpop.permute.xlu0 %1551  ;;  %v5960_v20 = vpop.eup %5959  ;;  %v1580_v5 = vmul.f32 %v6984_v14, %v1547_v45 }
 0x2b2   : > { %v1509_v55 = vmul.f32 1.442695, %v1500_v61  ;;  %v5962_v15 = vpop.eup %5961  ;;  %v1913_v35 = vmul.f32 %v5960_v20, %v6774_v56  ;;  %v6996_v61 = vld [vmem:[%s6335_s29 + $0x10] sm:$0xff]  ;;  %v7000_v20 = vld [vmem:[%s6335_s29 + $0x18] sm:$0xff] }
 0x2b3   : > { %v5564_v48 = vpack.c.bf16 %v1580_v5, %v1579_v50  ;;  %5595 = vmatpush3.bf16.msra.mxu0 %v5592_v2  ;;  %2358 = vxpose.xlu1.b32.cont [5/8] (short) (narrow) %v6587_v17, 64  ;;  %v1912_v31 = vmul.f32 %v5962_v15, %v6761_v59  ;;  %v1581_v45 = vmul.f32 %v6996_v61, %v1552_v27  ;;  %v5886_v27 = vld [vmem:[%s6867_s20 + $0x10] ss:$8 sps:$4 sm:$0xff]  }
 0x2b4   : > { %5965 = vpow2.f32 %v1509_v55  ;;  %v1557_v58 = vpop.permute.xlu1 %1556  ;;  %2621 = vmatprep.subr.bf16.mxu0 %v5885_v46  ;;  %v6993_v63 = vmul.f32 %v6927_v16, %v1913_v35  ;;  %v5891_v35 = vld [vmem:[%s6867_s20 + $0x24] ss:$8 sps:$4 sm:$0xff]  }
 0x2b5   : > { %v1460_v36 = vpop.permute.xlu0 %1459  ;;  %v1582_v17 = vmul.f32 %v7000_v20, %v1557_v58  ;;  %5565 = vmatprep.subr.bf16.mxu1 %v5564_v48  ;;  %v1920_v46 = vmul.f32 %v1912_v31, %v6931_v7  ;;  %v7012_v31 = vld [vmem:[%s6335_s29 + $0x20] sm:$0xff] }
 0x2b6   : > { %v1493_v2 = vsub.f32 %v1460_v36, %v6954_v32  ;;  %5258 = vmatmul.mubr.msk.f32.vlgmr.msra.gmra.mrb[32].mxu0 %vm595_vm0, %v6957_v52  ;;  %5567 = vmatpush3.bf16.msra.mxu1 %v5564_v48  ;;  %v7016_v48 = vld [vmem:[%s6335_s29 + $0x28] sm:$0xff] }
 0x2b7   : > { %v5568_v50 = vpack.c.bf16 %v1582_v17, %v1581_v45  ;;  %5260 = vmatprep.mubr.msk.f32.mxu0 %vm595_vm0, %v1916_v60  ;;  %2622 = vmatpush1.bf16.msra.mxu0 %v5883_v37  ;;  %v5889_v17 = vld [vmem:[%s6867_s20 + $0x20] ss:$8 sps:$4 sm:$0xff]  }
 0x2b8   : > { %v1501_v55 = vmin.f32 %v1493_v2, 0.0  ;;  %2359 = vxpose.xlu1.b32.cont [6/8] (short) (narrow) %v6594_v23, 64  ;;  %v1562_v5 = vpop.permute.xlu1 %1561  ;;  %2623 = vmatprep.subr.bf16.mxu0 %v5888_v3 }
 0x2b9   : > { %v1567_v15 = vpop.permute.xlu0 %1566  ;;  %v5964_v58 = vpop.eup %5963  ;;  %v1583_v52 = vmul.f32 %v7012_v31, %v1562_v5  ;;  %5569 = vmatprep.subr.bf16.mxu1 %v5568_v50 }
 0x2ba   : > { %v1511_v36 = vmul.f32 1.442695, %v1501_v55  ;;  %v1584_v45 = vmul.f32 %v7016_v48, %v1567_v15  ;;  %5261 = vmatmul.mubr.msk.f32.gmra.mrb[34].mxu0 %vm595_vm0, %v6967_v34  ;;  %5571 = vmatpush3.bf16.msra.mxu1 %v5568_v50  ;;  %v1523_v23 = vmul.f32 %v5964_v58, %v6409_v33  ;;  %v5894_v33 = vld [vmem:[%s6867_s20 + $0x34] ss:$8 sps:$4 sm:$0xff]   ;;  %v2550_v58 = vld [vmem:[%s6335_s29 + $0x8] sm:$0xff] }
 0x2bb   : > { %5263 = vmatprep.mubr.msk.f32.mxu0 %vm595_vm0, %v1918_v9  ;;  %2624 = vmatpush1.bf16.msra.mxu0 %v5886_v27 }
 0x2bc   : > { %5967 = vpow2.f32 %v1511_v36  ;;  %v5572_v60 = vpack.c.bf16 %v1584_v45, %v1583_v52  ;;  %2360 = vxpose.xlu1.b32.cont [7/8] (short) (narrow) %v6609_v10, 64  ;;  %v1465_v37 = vpop.permute.xlu1 %1464  ;;  %2625 = vmatprep.subr.bf16.mxu0 %v5891_v35  ;;  %v1531_v2 = vmul.f32 %v1523_v23, %v6893_v44  ;;  %v2549_v35 = vld [vmem:[%s6335_s29] sm:$0xff]  ;;  %v7040_v52 = vld [vmem:[%s6335_s29 + $0x30] sm:$0xff]  ;;  %v7044_v23 = vld [vmem:[%s6335_s29 + $0x38] sm:$0xff] }
 0x2bd   : > { %v1470_v3 = vpop.permute.xlu0 %1469  ;;  %v1494_v34 = vsub.f32 %v1465_v37, %v6954_v32 }
 0x2be   : > { %v5966_v55 = vpop.eup %5965  ;;  %v1495_v50 = vsub.f32 %v1470_v3, %v6954_v32  ;;  %5573 = vmatprep.subr.bf16.mxu1 %v5572_v60  ;;  %5264 = vmatmul.mubr.msk.f32.gmra.mrb[36].mxu0 %vm595_vm0, %v6975_v57 }
 0x2bf   : > { %v1524_v9 = vmul.f32 %v5966_v55, %v6717_v19  ;;  %5575 = vmatpush3.bf16.msra.mxu1 %v5572_v60  ;;  %v1502_v10 = vmin.f32 %v1494_v34, 0.0  ;;  %5229 = vmatprep.mubr.msk.f32.mxu1 %vm595_vm0, %v1531_v2  ;;  %v5892_v19 = vld [vmem:[%s6867_s20 + $0x30] ss:$8 sps:$4 sm:$0xff]  }
 0x2c0   : > { %v1503_v44 = vmin.f32 %v1495_v50, 0.0  ;;  %5266 = vmatprep.mubr.msk.f32.mxu0 %vm595_vm0, %v1920_v46  ;;  %2626 = vmatpush1.bf16.msra.mxu0 %v5889_v17  ;;  %v1572_v5 = vpop.permute.xlu1 %1571 }
 0x2c1   : > { %v1532_v27 = vmul.f32 %v6889_v21, %v1524_v9  ;;  %2361 = vxpose.xlu1.b32.end [8/8] (short) (narrow) %v6617_v28, 64  ;;  %v1577_v15 = vpop.permute.xlu0 %1576  ;;  %v1513_v57 = vmul.f32 1.442695, %v1502_v10  ;;  %v1585_v45 = vmul.f32 %v7040_v52, %v1572_v5  ;;  %2627 = vmatprep.subr.bf16.mxu0 %v5894_v33  ;;  %v7050_v21 = vpack.c.bf16 %v2550_v58, %v2549_v35  ;;  %v2551_v10 = vld [vmem:[%s6335_s29 + $0x10] sm:$0xff] }
 0x2c2   : > { %v1515_v36 = vmul.f32 1.442695, %v1503_v44  ;;  %v1586_v46 = vmul.f32 %v7044_v23, %v1577_v15  ;;  %5267 = vmatmul.mubr.msk.f32.gmra.mrb[38].mxu0 %vm595_vm0, %v6993_v63  ;;  %v2552_v44 = vld [vmem:[%s6335_s29 + $0x18] sm:$0xff] }
 0x2c3   : > { %5969 = vpow2.f32 %v1513_v57  ;;  %2653 = vmatprep.mubr.bf16.mxu0 %v8425_v13  ;;  %v7064_v35 = vpack.c.bf16 %v2552_v44, %v2551_v10  ;;  %v7100_v44 = vld [vmem:[%s6335_s29 + $0x30] sm:$0xff] }
 0x2c4   : > { %v5576_v28 = vpack.c.bf16 %v1586_v46, %v1585_v45  ;;  %5971 = vpow2.f32 %v1515_v36  ;;  %2628 = vmatpush1.bf16.msra.mxu0 %v5892_v19  ;;  %v1475_v60 = vpop.permute.xlu1 %1474 }
 0x2c5   : > { %v1485_v37 = vpop.permute.xlu0 %1484  ;;  %v1496_v17 = vsub.f32 %v1475_v60, %v6954_v32 }
 0x2c6   : > { %v5968_v3 = vpop.eup %5967  ;;  %v1498_v2 = vsub.f32 %v1485_v37, %v6954_v32  ;;  %5577 = vmatprep.subr.bf16.mxu1 %v5576_v28  ;;  %v7075_v37 = vld [vmem:[%s6335_s29 + $0x20] sm:$0xff] }
 0x2c7   : > { %5579 = vmatpush3.bf16.msra.mxu1 %v5576_v28  ;;  %v1525_v63 = vmul.f32 %v5968_v3, %v6726_v18  ;;  %v1504_v55 = vmin.f32 %v1496_v17, 0.0  ;;  %4804 = vmatmul.mubr.msk.bf16.vlgmr.msra.gmra.mrb[40].mxu0 %vm595_vm0, %v7050_v21  ;;  %v7078_v3 = vld [vmem:[%s6335_s29 + $0x28] sm:$0xff] }
 0x2c8   : > { %v1506_v34 = vmin.f32 %v1498_v2, 0.0  ;;  %v1480_v50 = vpop.permute.xlu1 %1479  ;;  %2663 = vmatprep.mubr.bf16.mxu0 %v8425_v13 }
 0x2c9   : > { %v1788_v33 = vpop.permute.xlu0 %1787  ;;  %v1533_v9 = vmul.f32 %v1525_v63, %v6905_v12  ;;  %v1517_v5 = vmul.f32 1.442695, %v1504_v55  ;;  %v1497_v19 = vsub.f32 %v1480_v50, %v6954_v32  ;;  %v1399_v55 = vmul.f32 1.442695, %v6814_v6 }
 0x2ca   : > { %v1521_v15 = vmul.f32 1.442695, %v1506_v34  ;;  %5230 = vmatmul.mubr.msk.f32.vlgmr.msra.gmra.mrb[14].mxu1 %vm595_vm0, %v1532_v27  ;;  %v1405_v27 = vmul.f32 1.442695, %v6830_v0  ;;  %v1825_v2 = vmul.f32 %v6980_v4, %v1788_v33 }
 0x2cb   : > { %5232 = vmatprep.mubr.msk.f32.mxu1 %vm595_vm0, %v1533_v9  ;;  %5973 = vpow2.f32 %v1517_v5  ;;  %v1505_v18 = vmin.f32 %v1497_v19, 0.0  ;;  %v7103_v5 = vld [vmem:[%s6335_s29 + $0x38] sm:$0xff] }
 0x2cc   : > { %5975 = vpow2.f32 %v1521_v15  ;;  %v1793_v12 = vpop.permute.xlu1 %1792 }
 0x2cd   : > { %v5970_v58 = vpop.eup %5969  ;;  %v1519_v57 = vmul.f32 1.442695, %v1505_v18  ;;  %v2250_v36 = vpop.permute.xlu0 %2249 }
 0x2ce   : > { %v5972_v45 = vpop.eup %5971  ;;  %v1526_v46 = vmul.f32 %v5970_v58, %v6736_v43  ;;  %v2280_v28 = vmul.f32 %v6980_v4, %v2250_v36 }
 0x2cf   : > { %5977 = vpow2.f32 %v1519_v57  ;;  %4805 = vmatmul.mubr.msk.bf16.gmra.mrb[44].mxu0 %vm595_vm0, %v7064_v35  ;;  %v1527_v32 = vmul.f32 %v5972_v45, %v6742_v51  ;;  %v1826_v51 = vmul.f32 %v6984_v14, %v1793_v12 }
 0x2d0   : > { %v1534_v60 = vmul.f32 %v6900_v54, %v1526_v46  ;;  %2673 = vmatprep.mubr.bf16.mxu0 %v8425_v13  ;;  %v7088_v54 = vpack.c.bf16 %v7078_v3, %v7075_v37  ;;  %5979 = vpow2.f32 %v1405_v27  ;;  %v7132_v27 = vld [vmem:[%s6535_s27] sm:$0x7]  ;;  %s8232_s27 = scalar_lea.vmem %s8337_s9, %s4690_s26 }
 0x2d1   : > { %v2254_v17 = vpop.permute.xlu1 %2253  ;;  %v1535_v43 = vmul.f32 %v1527_v32, %v6917_v39  ;;  %v2333_v39 = vsel %vm2324_vm5, %v1825_v2, %v2280_v28  ;;  %5981 = vpow2.f32 %v1399_v55  ;;  %v2258_v12 = vpop.permute.xlu0 %2257  ;;  %v8377_v28 = vrot.slane %v7132_v27, 2 }
 0x2d2   : > { %v2281_v0 = vmul.f32 %v6984_v14, %v2254_v17  ;;  %5233 = vmatmul.mubr.msk.f32.gmra.mrb[16].mxu1 %vm595_vm0, %v1534_v60 }
 0x2d3   : > { %5235 = vmatprep.mubr.msk.f32.mxu1 %vm595_vm0, %v1535_v43  ;;  %5728 = vpush %v8377_v28 }
 0x2d4   : > { %v2334_v63 = vsel %vm2324_vm5, %v1826_v51, %v2281_v0 }
 0x2d5   : > { %v5974_v4 = vpop.eup %5973  ;;  %v5596_v34 = vpack.c.bf16 %v2334_v63, %v2333_v39 }
 0x2d6   : > { %v5976_v14 = vpop.eup %5975  ;;  %v1803_v50 = vpop.permute.xlu1 %1802  ;;  %v1528_v33 = vmul.f32 %v5974_v4, %v6752_v47 }
 0x2d7   : > { %4806 = vmatmul.mubr.msk.bf16.gmra.mrb[48].mxu0 %vm595_vm0, %v7088_v54  ;;  %5597 = vmatprep.subr.bf16.mxu1 %v5596_v34  ;;  %v1530_v9 = vmul.f32 %v5976_v14, %v6774_v56  ;;  %v7110_v56 = vpack.c.bf16 %v7103_v5, %v7100_v44  ;;  %v1828_v58 = vmul.f32 %v7000_v20, %v1803_v50 }
 0x2d8   : > { %5599 = vmatpush3.bf16.msra.mxu1 %v5596_v34  ;;  %v1536_v10 = vmul.f32 %v6913_v62, %v1528_v33  ;;  %2683 = vmatprep.mubr.bf16.mxu0 %v8425_v13 }
 0x2d9   : > { %v5978_v6 = vpop.eup %5977  ;;  %v1538_v15 = vmul.f32 %v6927_v16, %v1530_v9 }
 0x2da   : > { %5236 = vmatmul.mubr.msk.f32.gmra.mrb[18].mxu1 %vm595_vm0, %v1536_v10  ;;  %v1529_v47 = vmul.f32 %v5978_v6, %v6761_v59  ;;  %v7113_v18 = vpop.eup %5979 }
 0x2db   : > { %v2262_v19 = vpop.permute.xlu1 %2261  ;;  %v7125_v36 = vpop.eup %5981 }
 0x2dc   : > { %v1537_v62 = vmul.f32 %v1529_v47, %v6931_v7  ;;  %v2283_v16 = vmul.f32 %v7000_v20, %v2262_v19  ;;  %v2282_v7 = vmul.f32 %v6996_v61, %v2258_v12  ;;  %v1813_v20 = vpop.permute.xlu0 %1812  ;;  %v2613_v12 = vsel %vm595_vm0, %v7064_v35, 0 }
 0x2dd   : > { %v1830_v0 = vmul.f32 %v7016_v48, %v1813_v20 }
 0x2de   : > { %5238 = vmatprep.mubr.msk.f32.mxu1 %vm595_vm0, %v1537_v62  ;;  %v2336_v46 = vsel %vm2324_vm5, %v1828_v58, %v2283_v16  ;;  %v2610_v62 = vsel %vm595_vm0, %v7050_v21, 0  ;;  %v2619_v58 = vsel %vm595_vm0, %v7110_v56, 0 }
 0x2df   : > { %5826 = vset.pattern.permute.xlu1 %v8425_v13  ;;  %4807 = vmatmul.mubr.msk.bf16.gmra.mrb[52].mxu0 %vm595_vm0, %v7110_v56 }
 0x2e0   : > { %1609 = vperm.xlu1 %5826, %v7113_v18   ;;  %5239 = vmatmul.mubr.msk.f32.gmra.mrb[20].mxu1 %vm595_vm0, %v1538_v15  ;;  %v1798_v59 = vpop.permute.xlu1 %1797  ;;  %v1818_v2 = vpop.permute.xlu0 %1817 }
 0x2e1   : > { %v1827_v57 = vmul.f32 %v6996_v61, %v1798_v59  ;;  %v2540_v61 = vld [vmem:[%s522_s23] sm:$0x3]  ;;  %v2616_v59 = vsel %vm595_vm0, %v7088_v54, 0  ;;  %v8436_v54 = vmov 0.0|0.0  }
 0x2e2   : > { %2785 = vperm.xlu0 %5823, %v2540_v61  }
 0x2e3   : > { %v2335_v45 = vsel %vm2324_vm5, %v1827_v57, %v2282_v7 }
 0x2e4   : > { %5827 = vset.pattern.permute.xlu1 %v8429_v26  ;;  %v5600_v32 = vpack.c.bf16 %v2336_v46, %v2335_v45  ;;  %v2274_v50 = vpop.permute.xlu0 %2273  ;;  %v2782_v45 = vld [vmem:[%s502_s17] sm:$0x1]  ;;  %v8437_v46 = vmov 1.0|1.0  }
 0x2e5   : > { %1967 = vperm.xlu1 %5827, %v7125_v36   ;;  %v2270_v60 = vpop.permute.xlu1 %2269  ;;  %v2286_v33 = vmul.f32 %v7040_v52, %v2274_v50 }
 0x2e6   : > { %5601 = vmatprep.subr.bf16.mxu1 %v5600_v32  ;;  %5824 = vset.pattern.permute.xlu0 %v8429_v26  ;;  %v2285_v43 = vmul.f32 %v7016_v48, %v2270_v60  ;;  %v1831_v48 = vmul.f32 %v7040_v52, %v1818_v2 }
 0x2e7   : > { %5603 = vmatpush3.bf16.msra.mxu1 %v5600_v32  ;;  %2840 = vperm.xlu0 %5824, %v2540_v61   ;;  %v8440_v32 = vld [vmem:[#allocation3_spill] sm:$0xff] }
 0x2e8   : > { %v2338_v55 = vsel %vm2324_vm5, %v1830_v0, %v2285_v43  ;;  %v2339_v6 = vsel %vm2324_vm5, %v1831_v48, %v2286_v33  ;;  %vm8441_vm7 = vcmp.ge.s32.totalorder %v6397_v30, %v8440_v32  ;;  %v7229_v0 = vld [vmem:[%s7224_s30] sm:$0x7]  ;;  %v1397_v32 = vmul.f32 1.442695, %v6817_v11 }
 0x2e9   : > { %v7204_v60 = vsel %vm8441_vm7, 1.0, %v8422_v42 }
 0x2ea   : > { %v1808_v17 = vpop.permute.xlu1 %1807  ;;  %8442 = vst [vmem:[#allocation11_spill] sm:$0xff] %v7204_v60  ;;  %5325 = vmatprep.mubr.msk.f32.mxu0 %vm595_vm0, %v7204_v60 }
 0x2eb   : > { %v1829_v39 = vmul.f32 %v7012_v31, %v1808_v17  ;;  %5825 = vset.pattern.permute.xlu0 %v8425_v13 }
 0x2ef   : > { %v2266_v51 = vpop.permute.xlu1 %2265 }
 0x2f0   : > { %v2284_v63 = vmul.f32 %v7012_v31, %v2266_v51 }
 0x2f2   : > { %v2337_v4 = vsel %vm2324_vm5, %v1829_v39, %v2284_v63  ;;  %v7235_v63 = vrot.slane %v7229_v0, %v6538_v49 }
 0x2f3   : > { %v5604_v34 = vpack.c.bf16 %v2338_v55, %v2337_v4 }
 0x2f4   : > { %v1823_v14 = vpop.permute.xlu1 %1822 }
 0x2f5   : > { %5605 = vmatprep.subr.bf16.mxu1 %v5604_v34  ;;  %v1832_v10 = vmul.f32 %v7044_v23, %v1823_v14 }
 0x2f6   : > { %5607 = vmatpush3.bf16.msra.mxu1 %v5604_v34 }
 0x2f9   : > { %v2278_v9 = vpop.permute.xlu1 %2277 }
 0x2fa   : > { %v2287_v31 = vmul.f32 %v7044_v23, %v2278_v9 }
 0x2fc   : > { %v2340_v15 = vsel %vm2324_vm5, %v1832_v10, %v2287_v31 }
 0x2fd   : > { %v5608_v47 = vpack.c.bf16 %v2340_v15, %v2339_v6 }
 0x2ff   : > { %5609 = vmatprep.subr.bf16.mxu1 %v5608_v47 }
 0x300   : > { %5611 = vmatpush3.bf16.msra.mxu1 %v5608_v47 }
 0x301   : > { %5297 = vmatprep.subr.bf16.mxu1 %v8422_v42 }
 0x304   : > { %s8005_s10 = spop %5728 }
 0x325   : > { %v2370_v19 = vpop.trf.xlu1 }
 0x326   : > { %5285 = vmatprep.mubr.msk.f32.mxu1 %vm595_vm0, %v2370_v19 }
 0x329   : > { %v2371_v52 = vpop.trf.xlu1 }
 0x32a   : > { %5286 = vmatmul.mubr.msk.f32.vlgmr.msra.gmra.mrb[22].mxu1 %vm595_vm0, %v2371_v52 }
 0x32b   : > { %5298 = vmatpush3.bf16.xpose.msra.mxu1 %v2610_v62 }
 0x32c   : > { %5299 = vmatprep.subr.bf16.mxu1 %v8422_v42 }
 0x32d   : > { %v2372_v23 = vpop.trf.xlu1 }
 0x32e   : > { %5288 = vmatprep.mubr.msk.f32.mxu1 %vm595_vm0, %v2372_v23 }
 0x331   : > { %v2373_v16 = vpop.trf.xlu1 }
 0x332   : > { %5289 = vmatmul.mubr.msk.f32.gmra.mrb[24].mxu1 %vm595_vm0, %v2373_v16 }
 0x333   : > { %5300 = vmatpush3.bf16.xpose.msra.mxu1 %v2613_v12 }
 0x334   : > { %5301 = vmatprep.subr.bf16.mxu1 %v8422_v42 }
 0x335   : > { %v2374_v21 = vpop.trf.xlu1 }
 0x336   : > { %5291 = vmatprep.mubr.msk.f32.mxu1 %vm595_vm0, %v2374_v21 }
 0x339   : > { %v2375_v7 = vpop.trf.xlu1 }
 0x33a   : > { %5292 = vmatmul.mubr.msk.f32.gmra.mrb[26].mxu1 %vm595_vm0, %v2375_v7 }
 0x33b   : > { %5302 = vmatpush3.bf16.xpose.msra.mxu1 %v2616_v59 }
 0x33c   : > { %5303 = vmatprep.subr.bf16.mxu1 %v8422_v42 }
 0x33d   : > { %v2376_v35 = vpop.trf.xlu1 }
 0x33e   : > { %5294 = vmatprep.mubr.msk.f32.mxu1 %vm595_vm0, %v2376_v35 }
 0x341   : > { %v2377_v57 = vpop.trf.xlu1 }
 0x342   : > { %5295 = vmatmul.mubr.msk.f32.gmra.mrb[28].mxu1 %vm595_vm0, %v2377_v57 }
 0x343   : > { %5304 = vmatpush3.bf16.xpose.msra.mxu1 %v2619_v58  ;;  %5305 = vmatprep.mubr.msk.bf16.mxu1 %vm8435_vm6, %v8422_v42 }
 0x344   : > { %5628 = vmatprep.subr.bf16.mxu1 %v8436_v54 }
 0x34a   : > { %5306 = vmatmul.mubr.msk.bf16.vlgmr.msra.gmra.mrb[32].mxu1 %vm595_vm0, %v2782_v45 }
 0x34b   : > { %5630 = vmatpush3.bf16.msk.msra.mxu1 %vm6436_vm8, %v8437_v46  ;;  %5353 = vmatprep.mubr.msk.f32.mxu1 %vm8435_vm6, %v8422_v42 }
 0x34c   : > { %5631 = vmatprep.subr.bf16.mxu1 %v8436_v54 }
 0x34f   : > { %5633 = vmatpush3.bf16.msk.msra.mxu1 %vm6449_vm9, %v8437_v46 }
 0x350   : > { %5634 = vmatprep.subr.bf16.mxu1 %v8436_v54 }
 0x353   : > { %5636 = vmatpush3.bf16.msk.msra.mxu1 %vm6462_vm10, %v8437_v46 }
 0x354   : > { %5637 = vmatprep.subr.bf16.mxu1 %v8436_v54 }
 0x357   : > { %5639 = vmatpush3.bf16.msk.msra.mxu1 %vm6476_vm13, %v8437_v46 }
 0x35f   : > { %v1610_v54 = vpop.permute.xlu1 %1609 }
 0x389   : > { %v7208_v40 = vpop.f32.mrb[32].mxu0 }
 0x38a   : > { %8443 = vst [vmem:[#allocation12_spill] sm:$0xff] %v7208_v40  ;;  %v7210_v61 = vpop.f32.mrb[33].mxu0 }
 0x38b   : > { %8444 = vst [vmem:[#allocation3_spill] sm:$0xff] %v7210_v61 }
 0x38d   : > { %v7212_v20 = vpop.f32.mrb[34].mxu0 }
 0x38e   : > { %8445 = vst [vmem:[#allocation23_spill] sm:$0xff] %v7212_v20  ;;  %v7214_v17 = vpop.f32.mrb[35].mxu0 }
 0x38f   : > { %8446 = vst [vmem:[#allocation24_spill] sm:$0xff] %v7214_v17 }
 0x391   : > { %v7217_v43 = vpop.f32.mrb[36].mxu0 }
 0x392   : > { %8447 = vst [vmem:[#allocation25_spill] sm:$0xff] %v7217_v43  ;;  %v7219_v2 = vpop.f32.mrb[37].mxu0 }
 0x393   : > { %8448 = vst [vmem:[#allocation26_spill] sm:$0xff] %v7219_v2  ;;  %v7339_v2 = vrot.slane %v7229_v0, %v6620_v29 }
 0x395   : > { %v7226_v51 = vpop.f32.mrb[38].mxu0 }
 0x396   : > { %8449 = vst [vmem:[#allocation27_spill] sm:$0xff] %v7226_v51  ;;  %v7231_v39 = vpop.f32.mrb[39].mxu0  ;;  %v1401_v51 = vmul.f32 1.442695, %v6823_v22  ;;  %v1403_v22 = vmul.f32 1.442695, %v6820_v53 }
 0x397   : > { %8450 = vst [vmem:[#allocation28_spill] sm:$0xff] %v7231_v39 }
 0x39a   : > { %v7237_v4 = vpop.f32.mrb[40].mxu0 }
 0x39b   : > { %3075 = vrot.lane.b32.xlu0 %v7237_v4, %s6191_s28  ;;  %v2657_v55 = vpop.f32.mrb[41].mxu0 }
 0x39c   : > { %v7242_v34 = vadd.f32 %v7235_v63, %v2657_v55  ;;  %v7244_v14 = vpop.f32.mrb[42].mxu0 }
 0x39d   : > { %v7246_v50 = vpop.f32.mrb[14].mxu1  ;;  %v7250_v33 = vpack.c.bf16 %v7244_v14, %v7237_v4  ;;  %v2661_v9 = vpop.f32.mrb[43].mxu0 }
 0x39e   : > { %v7252_v48 = vpop.f32.mrb[15].mxu1  ;;  %v2714_v10 = vmin.f32 %v7242_v34, 20.0  ;;  %v7256_v31 = vadd.f32 %v7235_v63, %v2661_v9  ;;  %vm2706_vm8 = vcmp.gt.f32.partialorder %v7242_v34, 20.0 }
 0x39f   : > { %3077 = vrot.lane.b32.xlu0 %v7244_v14, %s6191_s28 }
 0x3a0   : > { %v2722_v6 = vmul.f32 1.442695, %v2714_v10  ;;  %v2715_v15 = vmin.f32 %v7256_v31, 20.0  ;;  %v1631_v10 = vmul.f32 %v1610_v54, %v6919_v25  ;;  %vm2707_vm9 = vcmp.gt.f32.partialorder %v7256_v31, 20.0 }
 0x3a2   : > { %5983 = vpow2.f32 %v2722_v6  ;;  %v2724_v47 = vmul.f32 1.442695, %v2715_v15  ;;  %v7261_v19 = vpop.f32.mrb[44].mxu0 }
 0x3a3   : > { %3079 = vrot.lane.b32.xlu0 %v7261_v19, %s6191_s28  ;;  %v2667_v62 = vpop.f32.mrb[45].mxu0 }
 0x3a4   : > { %5985 = vpow2.f32 %v2724_v47  ;;  %v7266_v52 = vadd.f32 %v7235_v63, %v2667_v62  ;;  %v7268_v23 = vpop.f32.mrb[46].mxu0 }
 0x3a5   : > { %v7272_v12 = vpack.c.bf16 %v7268_v23, %v7261_v19  ;;  %v2671_v16 = vpop.f32.mrb[47].mxu0  ;;  %v7274_v21 = vpop.f32.mrb[16].mxu1 }
 0x3a6   : > { %v2716_v59 = vmin.f32 %v7266_v52, 20.0  ;;  %v7278_v7 = vadd.f32 %v7235_v63, %v2671_v16  ;;  %v7280_v35 = vpop.f32.mrb[17].mxu1  ;;  %vm2708_vm10 = vcmp.gt.f32.partialorder %v7266_v52, 20.0 }
 0x3a7   : > { %3081 = vrot.lane.b32.xlu0 %v7268_v23, %s6191_s28 }
 0x3a8   : > { %v2726_v58 = vmul.f32 1.442695, %v2716_v59  ;;  %v2717_v57 = vmin.f32 %v7278_v7, 20.0  ;;  %vm2709_vm13 = vcmp.gt.f32.partialorder %v7278_v7, 20.0 }
 0x3aa   : > { %5987 = vpow2.f32 %v2726_v58  ;;  %v2728_v45 = vmul.f32 1.442695, %v2717_v57  ;;  %v7285_v46 = vpop.f32.mrb[48].mxu0 }
 0x3ab   : > { %3083 = vrot.lane.b32.xlu0 %v7285_v46, %s6191_s28  ;;  %v2677_v56 = vpop.f32.mrb[49].mxu0 }
 0x3ac   : > { %v5984_v38 = vpop.eup %5983  ;;  %5989 = vpow2.f32 %v2728_v45  ;;  %v7291_v55 = vadd.f32 %v7235_v63, %v2677_v56  ;;  %v7293_v9 = vpop.f32.mrb[50].mxu0 }
 0x3ad   : > { %v2738_v6 = vadd.f32 1.0, %v5984_v38  ;;  %v7298_v15 = vpack.c.bf16 %v7293_v9, %v7285_v46  ;;  %v2681_v47 = vpop.f32.mrb[51].mxu0  ;;  %v7300_v62 = vpop.f32.mrb[18].mxu1 }
 0x3ae   : > { %v5986_v16 = vpop.eup %5985  ;;  %v2718_v59 = vmin.f32 %v7291_v55, 20.0  ;;  %v7304_v11 = vadd.f32 %v7235_v63, %v2681_v47  ;;  %v1745_v58 = vpop.f32.mrb[19].mxu1  ;;  %vm2710_vm14 = vcmp.gt.f32.partialorder %v7291_v55, 20.0 }
 0x3af   : > { %5991 = vlog2.f32 %v2738_v6  ;;  %v2739_v57 = vadd.f32 1.0, %v5986_v16  ;;  %3085 = vrot.lane.b32.xlu0 %v7293_v9, %s6191_s28  ;;  %v7308_v54 = vadd.f32 %v1745_v58, %v1631_v10 }
 0x3b0   : > { %5993 = vpow2.f32 %v1397_v32  ;;  %v2730_v45 = vmul.f32 1.442695, %v2718_v59  ;;  %v2719_v56 = vmin.f32 %v7304_v11, 20.0  ;;  %vm2711_vm11 = vcmp.gt.f32.partialorder %v7304_v11, 20.0 }
 0x3b1   : > { %8451 = vst [vmem:[#allocation29_spill] sm:$0xff] %v7308_v54  ;;  %5995 = vlog2.f32 %v2739_v57 }
 0x3b2   : > { %5997 = vpow2.f32 %v2730_v45  ;;  %v2732_v38 = vmul.f32 1.442695, %v2719_v56  ;;  %v7311_v28 = vpop.f32.mrb[52].mxu0 }
 0x3b3   : > { %8452 = vst [vmem:[#allocation30_spill] sm:$0xff] %v7311_v28  ;;  %3087 = vrot.lane.b32.xlu0 %v7311_v28, %s6191_s28  ;;  %v2687_v47 = vpop.f32.mrb[53].mxu0  ;;  %v7315_v6 = vpop.f32.mrb[20].mxu1 }
 0x3b4   : > { %v5988_v16 = vpop.eup %5987  ;;  %5999 = vpow2.f32 %v2732_v38  ;;  %v7319_v32 = vadd.f32 %v7235_v63, %v2687_v47  ;;  %v7321_v10 = vpop.f32.mrb[54].mxu0 }
 0x3b5   : > { %8453 = vst [vmem:[#allocation31_spill] sm:$0xff] %v7321_v10  ;;  %v7323_v59 = vpop.f32.mrb[21].mxu1  ;;  %v2740_v58 = vadd.f32 1.0, %v5988_v16  ;;  %v7327_v57 = vpack.c.bf16 %v7321_v10, %v7311_v28  ;;  %v2691_v45 = vpop.f32.mrb[55].mxu0  ;;  %v6115_v28 = vld [vmem:[#allocation2 + $0x38] sm:$0xff] }
 0x3b6   : > { %v5990_v56 = vpop.eup %5989  ;;  %v2720_v54 = vmin.f32 %v7319_v32, 20.0  ;;  %v7331_v39 = vadd.f32 %v7235_v63, %v2691_v45  ;;  %vm2712_vm3 = vcmp.gt.f32.partialorder %v7319_v32, 20.0 }
 0x3b7   : > { %6001 = vlog2.f32 %v2740_v58  ;;  %v2741_v38 = vadd.f32 1.0, %v5990_v56  ;;  %3089 = vrot.lane.b32.xlu0 %v7321_v10, %s6191_s28  ;;  %s6193_s28 = smov 127  }
 0x3b8   : > { %6003 = vpow2.f32 %v1401_v51  ;;  %v2734_v47 = vmul.f32 1.442695, %v2720_v54  ;;  %v2721_v16 = vmin.f32 %v7331_v39, 20.0  ;;  %v1407_v54 = vmul.f32 1.442695, %v6826_v1 }
 0x3b9   : > { %v5992_v43 = vpop.eup %5991  ;;  %6005 = vlog2.f32 %v2741_v38  ;;  %vm2713_vm4 = vcmp.gt.f32.partialorder %v7331_v39, 20.0 }
 0x3ba   : > { %v7341_v20 = vpop.eup %5993  ;;  %v2747_v63 = vmul.f32 0.6931472, %v5992_v43  ;;  %6007 = vpow2.f32 %v2734_v47  ;;  %v2736_v53 = vmul.f32 1.442695, %v2721_v16 }
 0x3bb   : > { %v5996_v58 = vpop.eup %5995  ;;  %6009 = vpow2.f32 %v1403_v22  ;;  %1589 = vperm.xlu0 %5825, %v7341_v20  }
 0x3bc   : > { %v5998_v51 = vpop.eup %5997  ;;  %v7347_v45 = vsel %vm2706_vm8, %v7242_v34, %v2747_v63  ;;  %6011 = vpow2.f32 %v2736_v53  ;;  %v2749_v0 = vmul.f32 0.6931472, %v5996_v58  ;;  %v1409_v34 = vmul.f32 1.442695, %v6838_v41 }
 0x3bd   : > { %v2742_v56 = vadd.f32 1.0, %v5998_v51  ;;  %v2774_v43 = vmul.f32 %v7339_v2, %v7347_v45  ;;  %v1411_v41 = vmul.f32 1.442695, %v6835_v8 }
 0x3be   : > { %v6000_v38 = vpop.eup %5999  ;;  %v7353_v22 = vsel %vm2707_vm9, %v7256_v31, %v2749_v0 }
 0x3bf   : > { %6013 = vlog2.f32 %v2742_v56  ;;  %v2743_v47 = vadd.f32 1.0, %v6000_v38  ;;  %3871 = vperm.xlu1 %5827, %v7353_v22   ;;  %1594 = vperm.xlu0 %5825, %v7125_v36   ;;  %v2775_v1 = vmul.f32 %v7339_v2, %v7353_v22  ;;  %v3046_v53 = vsel %vm1101_vm1, %v2774_v43, 0.0 }
 0x3c0   : > { %6015 = vpow2.f32 %v1407_v54 }
 0x3c1   : > { %v6002_v16 = vpop.eup %6001  ;;  %6017 = vlog2.f32 %v2743_v47  ;;  %v5612_v63 = vpack.c.bf16 %v2775_v1, %v2774_v43  ;;  %v3047_v31 = vsel %vm1101_vm1, %v2775_v1, 0.0 }
 0x3c2   : > { %v7362_v58 = vpop.eup %6003  ;;  %v2751_v51 = vmul.f32 0.6931472, %v6002_v16  ;;  %v3048_v0 = vadd.f32 %v3047_v31, %v3046_v53  ;;  %6019 = vpow2.f32 %v1409_v34  ;;  %v1445_v31 = vmul.f32 1.442695, %v6855_v24 }
 0x3c3   : > { %v6006_v56 = vpop.eup %6005  ;;  %5613 = vmatprep.subr.bf16.mxu0 %v5612_v63  ;;  %1599 = vperm.xlu0 %5825, %v7362_v58  }
 0x3c4   : > { %v6008_v36 = vpop.eup %6007  ;;  %v7368_v54 = vsel %vm2708_vm10, %v7266_v52, %v2751_v51  ;;  %5615 = vmatpush3.bf16.msra.mxu0 %v5612_v63  ;;  %v2753_v43 = vmul.f32 0.6931472, %v6006_v56 }
 0x3c5   : > { %v7370_v38 = vpop.eup %6009  ;;  %v2744_v47 = vadd.f32 1.0, %v6008_v36  ;;  %v2776_v1 = vmul.f32 %v7339_v2, %v7368_v54 }
 0x3c6   : > { %v6012_v16 = vpop.eup %6011  ;;  %v7376_v53 = vsel %vm2709_vm13, %v7278_v7, %v2753_v43 }
 0x3c7   : > { %6021 = vlog2.f32 %v2744_v47  ;;  %v2745_v8 = vadd.f32 1.0, %v6012_v16  ;;  %3879 = vperm.xlu1 %5827, %v7376_v53   ;;  %1604 = vperm.xlu0 %5825, %v7370_v38   ;;  %v2777_v52 = vmul.f32 %v7339_v2, %v7376_v53  ;;  %v3049_v34 = vsel %vm1101_vm1, %v2776_v1, 0.0 }
 0x3c8   : > { %6023 = vpow2.f32 %v1411_v41  ;;  %v3050_v63 = vadd.f32 %v3049_v34, %v3048_v0 }
 0x3c9   : > { %v6014_v51 = vpop.eup %6013  ;;  %6025 = vlog2.f32 %v2745_v8  ;;  %v5616_v56 = vpack.c.bf16 %v2777_v52, %v2776_v1  ;;  %v3051_v7 = vsel %vm1101_vm1, %v2777_v52, 0.0 }
 0x3ca   : > { %v6016_v36 = vpop.eup %6015  ;;  %v2755_v43 = vmul.f32 0.6931472, %v6014_v51  ;;  %v3052_v47 = vadd.f32 %v3051_v7, %v3050_v63  ;;  %6027 = vpow2.f32 %v1445_v31 }
 0x3cb   : > { %v6018_v16 = vpop.eup %6017  ;;  %5617 = vmatprep.subr.bf16.mxu0 %v5616_v56  ;;  %1614 = vperm.xlu0 %5825, %v6016_v36  }
 0x3cc   : > { %v7387_v17 = vsel %vm2710_vm14, %v7291_v55, %v2755_v43  ;;  %5619 = vmatpush3.bf16.msra.mxu0 %v5616_v56  ;;  %v2757_v0 = vmul.f32 0.6931472, %v6018_v16  ;;  %v7392_v41 = vpop.eup %6019 }
 0x3cd   : > { %v2778_v24 = vmul.f32 %v7339_v2, %v7387_v17 }
 0x3ce   : > { %v7395_v1 = vsel %vm2711_vm11, %v7304_v11, %v2757_v0 }
 0x3cf   : > { %3887 = vperm.xlu1 %5827, %v7395_v1   ;;  %1619 = vperm.xlu0 %5825, %v7392_v41   ;;  %v2779_v55 = vmul.f32 %v7339_v2, %v7395_v1  ;;  %v3053_v8 = vsel %vm1101_vm1, %v2778_v24, 0.0 }
 0x3d0   : > { %v3054_v52 = vadd.f32 %v3053_v8, %v3052_v47 }
 0x3d1   : > { %v6022_v34 = vpop.eup %6021  ;;  %v5620_v63 = vpack.c.bf16 %v2779_v55, %v2778_v24  ;;  %v3055_v31 = vsel %vm1101_vm1, %v2779_v55, 0.0 }
 0x3d2   : > { %v6024_v51 = vpop.eup %6023  ;;  %v2759_v56 = vmul.f32 0.6931472, %v6022_v34  ;;  %v3056_v7 = vadd.f32 %v3055_v31, %v3054_v52 }
 0x3d3   : > { %v6026_v43 = vpop.eup %6025  ;;  %5621 = vmatprep.subr.bf16.mxu0 %v5620_v63  ;;  %1624 = vperm.xlu0 %5825, %v6024_v51  }
 0x3d4   : > { %v7405_v11 = vsel %vm2712_vm3, %v7319_v32, %v2759_v56  ;;  %5623 = vmatpush3.bf16.msra.mxu0 %v5620_v63  ;;  %v2761_v16 = vmul.f32 0.6931472, %v6026_v43  ;;  %v6028_v0 = vpop.eup %6027  ;;  %v8458_v56 = vld [vmem:[#allocation5_spill] sm:$0xff] }
 0x3d5   : > { %v2780_v47 = vmul.f32 %v7339_v2, %v7405_v11 }
 0x3d6   : > { %v7411_v24 = vsel %vm2713_vm4, %v7331_v39, %v2761_v16  ;;  %v8454_v39 = vld [vmem:[#allocation4_spill] sm:$0xff] }
 0x3d7   : > { %1835 = vperm.xlu0 %5825, %v6028_v0   ;;  %3895 = vperm.xlu1 %5827, %v7411_v24   ;;  %v2781_v55 = vmul.f32 %v7339_v2, %v7411_v24  ;;  %v3057_v32 = vsel %vm1101_vm1, %v2780_v47, 0.0  ;;  %vm8455_vm6 = vcmp.ge.s32.totalorder %v6397_v30, %v8454_v39 }
 0x3d8   : > { %v3058_v8 = vadd.f32 %v3057_v32, %v3056_v7  ;;  %v7426_v31 = vsel %vm8455_vm6, 1.0, %v8422_v42  ;;  %v2786_v32 = vpop.permute.xlu0 %2785 }
 0x3d9   : > { %v5624_v52 = vpack.c.bf16 %v2781_v55, %v2780_v47  ;;  %v3059_v34 = vsel %vm1101_vm1, %v2781_v55, 0.0  ;;  %8456 = vst [vmem:[#allocation4_spill] sm:$0xff] %v7426_v31  ;;  %vm8459_vm1 = vcmp.ge.s32.totalorder %v6397_v30, %v8458_v56  ;;  %v7452_v47 = vsel %vm573_vm15, 1.0, %v8422_v42 }
 0x3da   : > { %v7418_v63 = vadd.f32 %v3059_v34, %v3058_v8  ;;  %v7435_v7 = vsel %vm8459_vm1, 1.0, %v8422_v42 }
 0x3db   : > { %3490 = vperm.xlu0 %5825, %v7353_v22   ;;  %1975 = vperm.xlu1 %5827, %v7370_v38   ;;  %8460 = vst [vmem:[#allocation14_spill] sm:$0xff] %v7435_v7  ;;  %v8461_v38 = vld [vmem:[#allocation6_spill] sm:$0xff] }
 0x3dc   : > { %5625 = vmatprep.subr.bf16.mxu0 %v5624_v52  ;;  %vm8462_vm7 = vcmp.ge.s32.totalorder %v6397_v30, %v8461_v38  ;;  %8465 = vst [vmem:[#allocation6_spill] sm:$0xff] %v7452_v47 }
 0x3dd   : > { %5627 = vmatpush3.bf16.msra.mxu0 %v5624_v52  ;;  %v7446_v43 = vsel %vm8462_vm7, 1.0, %v8422_v42  ;;  %v2841_v52 = vpop.permute.xlu0 %2840 }
 0x3de   : > { %5642 = vmatprep.subr.msk.bf16.mxu0 %vm6709_vm12, %v7250_v33  ;;  %8463 = vst [vmem:[#allocation5_spill] sm:$0xff] %v7446_v43 }
 0x3df   : > { %5829 = vset.pattern.permute.xlu0 %v8429_v26  ;;  %1983 = vperm.xlu1 %5827, %v6016_v36  }
 0x3e0   : > { %5326 = vmatmul.mubr.msk.f32.vlgmr.msra.gmra.mrb[56].mxu0 %vm595_vm0, %v7426_v31  ;;  %2289 = vperm.xlu0 %5829, %v6028_v0   ;;  %v7463_v0 = vsel %vm574_vm2, 1.0, %v8422_v42  ;;  %v8476_v31 = vld [vmem:[#allocation15_spill] sm:$0xff] }
 0x3e1   : > { %5328 = vmatprep.mubr.msk.f32.mxu0 %vm595_vm0, %v7435_v7  ;;  %8467 = vst [vmem:[#allocation7_spill] sm:$0xff] %v7463_v0 }
 0x3e3   : > { %1991 = vperm.xlu1 %5827, %v6024_v51   ;;  %v8468_v51 = vld [vmem:[#allocation9_spill] sm:$0xff] }
 0x3e4   : > { %5329 = vmatmul.mubr.msk.f32.gmra.mrb[58].mxu0 %vm595_vm0, %v7446_v43  ;;  %1963 = vperm.xlu0 %5829, %v7341_v20   ;;  %vm8469_vm15 = vcmp.ge.s32.totalorder %v6397_v30, %v8468_v51  ;;  %v8471_v20 = vld [vmem:[#allocation10_spill] sm:$0xff] }
 0x3e5   : > { %5331 = vmatprep.mubr.msk.f32.mxu0 %vm595_vm0, %v7452_v47  ;;  %v7472_v55 = vsel %vm8469_vm15, 1.0, %v8422_v42  ;;  %vm8472_vm2 = vcmp.ge.s32.totalorder %v6397_v30, %v8471_v20  ;;  %v8474_v47 = vld [vmem:[#allocation16_spill] sm:$0xff] }
 0x3e6   : > { %5645 = vmatpush3.bf16.xpose.msk.msra.mxu0 %vm6709_vm12, %v7250_v33  ;;  %8470 = vst [vmem:[#allocation8_spill] sm:$0xff] %v7472_v55  ;;  %v7488_v33 = vsel %vm8472_vm2, 1.0, %v8422_v42 }
 0x3e7   : > { %5648 = vmatprep.subr.msk.bf16.mxu0 %vm6709_vm12, %v7272_v12  ;;  %5828 = vset.pattern.permute.xlu1 %v8425_v13  ;;  %8473 = vst [vmem:[#allocation9_spill] sm:$0xff] %v7488_v33 }
 0x3e8   : > { %5332 = vmatmul.mubr.msk.f32.gmra.mrb[60].mxu0 %vm595_vm0, %v7463_v0  ;;  %3867 = vperm.xlu0 %5829, %v7347_v45  }
 0x3e9   : > { %3485 = vperm.xlu1 %5828, %v7347_v45   ;;  %5334 = vmatprep.mubr.msk.f32.mxu0 %vm595_vm0, %v7472_v55 }
 0x3ec   : > { %5335 = vmatmul.mubr.msk.f32.gmra.mrb[62].mxu0 %vm595_vm0, %v7488_v33  ;;  %3875 = vperm.xlu0 %5829, %v7368_v54  }
 0x3ed   : > { %5850 = vset.pattern.permute.xlu1 %v8429_v26 }
 0x3ee   : > { %5651 = vmatpush3.bf16.xpose.msk.msra.mxu0 %vm6709_vm12, %v7272_v12 }
 0x3ef   : > { %5654 = vmatprep.subr.msk.bf16.mxu0 %vm6709_vm12, %v7298_v15 }
 0x3f0   : > { %3883 = vperm.xlu0 %5829, %v7387_v17  }
 0x3f4   : > { %3891 = vperm.xlu0 %5829, %v7405_v11  }
 0x3f6   : > { %5657 = vmatpush3.bf16.xpose.msk.msra.mxu0 %vm6709_vm12, %v7298_v15 }
 0x3f7   : > { %5660 = vmatprep.subr.msk.bf16.mxu0 %vm6709_vm12, %v7327_v57 }
 0x3f8   : > { %1971 = vperm.xlu0 %5829, %v7362_v58  }
 0x3fc   : > { %1979 = vperm.xlu0 %5829, %v7113_v18  }
 0x3fd   : > { %v7510_v30 = vpop.f32.mrb[22].mxu1 }
 0x3fe   : > { %v7512_v12 = vpop.f32.mrb[23].mxu1  ;;  %5663 = vmatpush3.bf16.xpose.msk.msra.mxu0 %vm6709_vm12, %v7327_v57 }
 0x400   : > { %1987 = vperm.xlu0 %5829, %v7392_v41  }
 0x405   : > { %v7518_v15 = vpop.f32.mrb[24].mxu1 }
 0x406   : > { %v7520_v8 = vpop.f32.mrb[25].mxu1 }
 0x40d   : > { %v7522_v34 = vpop.f32.mrb[26].mxu1  ;;  %v3076_v58 = vpop.permute.xlu0 %3075 }
 0x40e   : > { %v7524_v18 = vpop.f32.mrb[27].mxu1  ;;  %5372 = vmatprep.mubr.msk.f32.mxu0 %vm595_vm0, %v3076_v58 }
 0x411   : > { %v7527_v39 = vpop.permute.xlu0 %3077 }
 0x412   : > { %5373 = vmatmul.mubr.msk.f32.vlgmr.msra.gmra.mrb[64].mxu0 %vm595_vm0, %v7527_v39 }
 0x415   : > { %v7531_v57 = vpop.f32.mrb[28].mxu1  ;;  %v7533_v41 = vpop.permute.xlu0 %3079 }
 0x416   : > { %v7535_v2 = vpop.f32.mrb[29].mxu1  ;;  %5375 = vmatprep.mubr.msk.f32.mxu0 %vm595_vm0, %v7533_v41 }
 0x419   : > { %v7539_v56 = vpop.permute.xlu0 %3081 }
 0x41a   : > { %5376 = vmatmul.mubr.msk.f32.gmra.mrb[66].mxu0 %vm595_vm0, %v7539_v56 }
 0x41d   : > { %v2825_v38 = vpop.f32.mrb[32].mxu1  ;;  %v7543_v36 = vpop.permute.xlu0 %3083 }
 0x41e   : > { %v2826_v16 = vadd.f32 %v2825_v38, %v2786_v32  ;;  %v5307_v51 = vpop.f32.mrb[33].mxu1  ;;  %5378 = vmatprep.mubr.msk.f32.mxu0 %vm595_vm0, %v7543_v36 }
 0x41f   : > { %v2828_v20 = vpop.f32.mrb[34].mxu1 }
 0x420   : > { %v2832_v40 = vmin.f32 %v2826_v16, 20.0  ;;  %v5308_v61 = vpop.f32.mrb[35].mxu1  ;;  %vm2831_vm12 = vcmp.gt.f32.partialorder %v2826_v16, 20.0 }
 0x421   : > { %v7547_v33 = vpop.permute.xlu0 %3085 }
 0x422   : > { %v2833_v25 = vmul.f32 1.442695, %v2832_v40  ;;  %5379 = vmatmul.mubr.msk.f32.gmra.mrb[68].mxu0 %vm595_vm0, %v7547_v33 }
 0x424   : > { %6029 = vpow2.f32 %v2833_v25 }
 0x425   : > { %v7551_v55 = vpop.permute.xlu0 %3087 }
 0x426   : > { %5381 = vmatprep.mubr.msk.f32.mxu0 %vm595_vm0, %v7551_v55 }
 0x429   : > { %v7555_v32 = vpop.permute.xlu0 %3089 }
 0x42a   : > { %5382 = vmatmul.mubr.msk.f32.gmra.mrb[70].mxu0 %vm595_vm0, %v7555_v32 }
 0x42e   : > { %v6030_v38 = vpop.eup %6029 }
 0x42f   : > { %v2835_v51 = vadd.f32 1.0, %v6030_v38 }
 0x431   : > { %6031 = vlog2.f32 %v2835_v51  ;;  %v8478_v51 = vld [vmem:[#allocation18_spill] sm:$0xff] }
 0x43a   : > { %v1590_v61 = vpop.permute.xlu0 %1589 }
 0x43b   : > { %v6032_v40 = vpop.eup %6031  ;;  %v1627_v0 = vmul.f32 %v1590_v61, %v8474_v47 }
 0x43c   : > { %v2837_v20 = vmul.f32 0.6931472, %v6032_v40 }
 0x43d   : > { %v7561_v7 = vadd.f32 %v7252_v48, %v1627_v0  ;;  %v8480_v48 = vld [vmem:[#allocation17_spill] sm:$0xff] }
 0x43e   : > { %v2838_v25 = vsel %vm2831_vm12, %v2826_v16, %v2837_v20  ;;  %v1595_v60 = vpop.permute.xlu0 %1594  ;;  %v8482_v20 = vld [vmem:[#allocation19_spill] sm:$0xff] }
 0x43f   : > { %8475 = vst [vmem:[#allocation10_spill] sm:$0xff] %v7561_v7  ;;  %v2843_v43 = vmul.f32 %v2841_v52, %v2838_v25  ;;  %v1628_v10 = vmul.f32 %v8476_v31, %v1595_v60  ;;  %v8485_v25 = vld [vmem:[#allocation22_spill] sm:$0xff]  ;;  %v6109_v7 = vld [vmem:[#allocation2 + $0x8] sm:$0xff] }
 0x441   : > { %5354 = vmatmul.mubr.msk.f32.vlgmr.msra.gmra.mrb[30].mxu1 %vm595_vm0, %v2843_v43  ;;  %v7566_v29 = vadd.f32 %v7246_v50, %v1628_v10 }
 0x442   : > { %5400 = vmatprep.mubr.msk.f32.mxu1 %vm595_vm0, %v3076_v58  ;;  %v1600_v38 = vpop.permute.xlu0 %1599  ;;  %v7581_v58 = vpop.permute.xlu1 %1967 }
 0x443   : > { %8477 = vst [vmem:[#allocation32_spill] sm:$0xff] %v7566_v29  ;;  %v1629_v40 = vmul.f32 %v1600_v38, %v8478_v51  ;;  %8484 = vst [vmem:[#allocation36_spill] sm:$0xff] %v7581_v58  ;;  %v6113_v51 = vld [vmem:[#allocation2 + $0x28] sm:$0xff]  ;;  %v6114_v58 = vld [vmem:[#allocation2 + $0x30] sm:$0xff] }
 0x445   : > { %v7571_v61 = vadd.f32 %v7280_v35, %v1629_v40 }
 0x446   : > { %v1605_v16 = vpop.permute.xlu0 %1604 }
 0x447   : > { %8479 = vst [vmem:[#allocation33_spill] sm:$0xff] %v7571_v61  ;;  %v1630_v0 = vmul.f32 %v8480_v48, %v1605_v16  ;;  %v3872_v61 = vpop.permute.xlu1 %3871  ;;  %v8487_v16 = vld [vmem:[#allocation21_spill] sm:$0xff] }
 0x449   : > { %v7575_v52 = vadd.f32 %v7274_v21, %v1630_v0 }
 0x44a   : > { %v1615_v60 = vpop.permute.xlu0 %1614 }
 0x44b   : > { %8481 = vst [vmem:[#allocation34_spill] sm:$0xff] %v7575_v52  ;;  %v1632_v43 = vmul.f32 %v8482_v20, %v1615_v60  ;;  %v3880_v60 = vpop.permute.xlu1 %3879  ;;  %v6112_v20 = vld [vmem:[#allocation2 + $0x20] sm:$0xff] }
 0x44d   : > { %v7579_v50 = vadd.f32 %v7300_v62, %v1632_v43 }
 0x44e   : > { %v1620_v10 = vpop.permute.xlu0 %1619 }
 0x44f   : > { %8483 = vst [vmem:[#allocation35_spill] sm:$0xff] %v7579_v50  ;;  %v1633_v38 = vmul.f32 %v1620_v10, %v8485_v25  ;;  %v7593_v62 = vpop.permute.xlu1 %3887 }
 0x451   : > { %v7585_v35 = vadd.f32 %v7323_v59, %v1633_v38  ;;  %v6108_v38 = vld [vmem:[#allocation2] sm:$0xff] }
 0x452   : > { %v1625_v40 = vpop.permute.xlu0 %1624 }
 0x453   : > { %8486 = vst [vmem:[#allocation37_spill] sm:$0xff] %v7585_v35  ;;  %v1634_v29 = vmul.f32 %v8487_v16, %v1625_v40  ;;  %v6110_v16 = vld [vmem:[#allocation2 + $0x10] sm:$0xff] }
 0x455   : > { %v7589_v21 = vadd.f32 %v7315_v6, %v1634_v29  ;;  %v6111_v6 = vld [vmem:[#allocation2 + $0x18] sm:$0xff] }
 0x456   : > { %v1836_v0 = vpop.permute.xlu0 %1835  ;;  %v7595_v43 = vpop.permute.xlu1 %3895 }
 0x457   : > { %8488 = vst [vmem:[#allocation38_spill] sm:$0xff] %v7589_v21 }
 0x45a   : > { %v7591_v52 = vpop.permute.xlu0 %3490 }
 0x45f   : > { %v2290_v50 = vpop.permute.xlu0 %2289 }
 0x460   : > { %v2341_v10 = vsel %vm2324_vm5, %v1836_v0, %v2290_v50  ;;  %v7601_v0 = vpop.permute.xlu1 %1975 }
 0x461   : > { %v2345_v59 = vrot.slane %v2341_v10, %v6538_v49 }
 0x463   : > { %v2346_v35 = vmul.f32 %v6108_v38, %v2345_v59  ;;  %v2347_v40 = vmul.f32 %v6109_v7, %v2345_v59  ;;  %v2348_v29 = vmul.f32 %v6110_v16, %v2345_v59  ;;  %v2349_v21 = vmul.f32 %v6111_v6, %v2345_v59  ;;  %v7599_v25 = vpop.permute.xlu0 %1963 }
 0x464   : > { %v2350_v48 = vmul.f32 %v6112_v20, %v2345_v59  ;;  %v2351_v31 = vmul.f32 %v6113_v51, %v2345_v59  ;;  %v2352_v47 = vmul.f32 %v6114_v58, %v2345_v59  ;;  %v2353_v50 = vmul.f32 %v6115_v28, %v2345_v59 }
 0x465   : > { %v2515_v10 = vadd.f32 %v7512_v12, %v2346_v35  ;;  %v2516_v7 = vadd.f32 %v7510_v30, %v2347_v40  ;;  %v2517_v16 = vadd.f32 %v7520_v8, %v2348_v29  ;;  %v2518_v38 = vadd.f32 %v7518_v15, %v2349_v21  ;;  %v7616_v30 = vld [vmem:[%s6335_s29 + $0x8] sm:$0xff]  ;;  %v7643_v8 = vpop.permute.xlu1 %1983 }
 0x466   : > { %v2519_v6 = vadd.f32 %v7524_v18, %v2350_v48  ;;  %v2520_v20 = vadd.f32 %v7522_v34, %v2351_v31  ;;  %v2521_v51 = vadd.f32 %v7535_v2, %v2352_v47  ;;  %v2522_v58 = vadd.f32 %v7531_v57, %v2353_v50  ;;  %v7632_v31 = vld [vmem:[%s6335_s29] sm:$0xff]  ;;  %v7646_v18 = vld [vmem:[%s6335_s29 + $0x18] sm:$0xff]  ;;  %v7650_v2 = vld [vmem:[%s6335_s29 + $0x10] sm:$0xff] }
 0x467   : > { %2523 = vst.msk [vmem:[#allocation2] sm:$0xff] %vm595_vm0, %v2515_v10  ;;  %2524 = vst.msk [vmem:[#allocation2 + $0x8] sm:$0xff] %vm595_vm0, %v2516_v7  ;;  %v3868_v28 = vpop.permute.xlu0 %3867  ;;  %v3899_v12 = vmul.f32 %v7616_v30, %v3872_v61  ;;  %v3901_v57 = vmul.f32 %v7646_v18, %v3880_v60 }
 0x468   : > { %2525 = vst.msk [vmem:[#allocation2 + $0x10] sm:$0xff] %vm595_vm0, %v2517_v16  ;;  %2526 = vst.msk [vmem:[#allocation2 + $0x18] sm:$0xff] %vm595_vm0, %v2518_v38  ;;  %v3898_v47 = vmul.f32 %v7632_v31, %v3868_v28 }
 0x469   : > { %2527 = vst.msk [vmem:[#allocation2 + $0x20] sm:$0xff] %vm595_vm0, %v2519_v6  ;;  %2528 = vst.msk [vmem:[#allocation2 + $0x28] sm:$0xff] %vm595_vm0, %v2520_v20  ;;  %v7658_v10 = vpop.permute.xlu1 %1991 }
 0x46a   : > { %2529 = vst.msk [vmem:[#allocation2 + $0x30] sm:$0xff] %vm595_vm0, %v2521_v51  ;;  %2530 = vst.msk [vmem:[#allocation2 + $0x38] sm:$0xff] %vm595_vm0, %v2522_v58  ;;  %v5830_v15 = vpack.i.bf16 %v3899_v12, %v3898_v47  ;;  %v3905_v51 = vmul.f32 %v7595_v43, %v7103_v5  ;;  %v3524_v5 = vmul.f32 %v7616_v30, %v7591_v52 }
 0x46b   : > { %2541 = vst.msk [vmem:[#allocation2] sm:$0xff] %vm595_vm0, %v8422_v42  ;;  %2542 = vst.msk [vmem:[#allocation2 + $0x8] sm:$0xff] %vm595_vm0, %v8422_v42  ;;  %v3876_v34 = vpop.permute.xlu0 %3875 }
 0x46c   : > { %2543 = vst.msk [vmem:[#allocation2 + $0x10] sm:$0xff] %vm595_vm0, %v8422_v42  ;;  %2544 = vst.msk [vmem:[#allocation2 + $0x18] sm:$0xff] %vm595_vm0, %v8422_v42  ;;  %v3900_v61 = vmul.f32 %v7650_v2, %v3876_v34  ;;  %5831 = vrot.lane.b32.xlu0 %v5830_v15, %s6192_s16 }
 0x46d   : > { %2545 = vst.msk [vmem:[#allocation2 + $0x20] sm:$0xff] %vm595_vm0, %v8422_v42  ;;  %2546 = vst.msk [vmem:[#allocation2 + $0x28] sm:$0xff] %vm595_vm0, %v8422_v42  ;;  %v3486_v12 = vpop.permute.xlu1 %3485 }
 0x46e   : > { %2547 = vst.msk [vmem:[#allocation2 + $0x30] sm:$0xff] %vm595_vm0, %v8422_v42  ;;  %2548 = vst.msk [vmem:[#allocation2 + $0x38] sm:$0xff] %vm595_vm0, %v8422_v42  ;;  %v5835_v48 = vpack.i.bf16 %v3901_v57, %v3900_v61  ;;  %v3903_v42 = vmul.f32 %v7593_v62, %v7078_v3  ;;  %v3523_v15 = vmul.f32 %v7632_v31, %v3486_v12 }
 0x46f   : > { %v3884_v35 = vpop.permute.xlu0 %3883 }
 0x470   : > { %v3902_v29 = vmul.f32 %v3884_v35, %v7075_v37  ;;  %5836 = vrot.lane.b32.xlu1 %v5835_v48, %s6192_s16 }
 0x472   : > { %v3228_v21 = vld [vmem:[#allocation2] sm:$0xff]  ;;  %v3229_v59 = vld [vmem:[#allocation2 + $0x8] sm:$0xff]  ;;  %v5840_v6 = vpack.i.bf16 %v3903_v42, %v3902_v29 }
 0x473   : > { %v3230_v40 = vld [vmem:[#allocation2 + $0x10] sm:$0xff]  ;;  %v5664_v50 = vpack.c.bf16 %v3229_v59, %v3228_v21  ;;  %v3231_v60 = vld [vmem:[#allocation2 + $0x18] sm:$0xff]  ;;  %v3892_v20 = vpop.permute.xlu0 %3891 }
 0x474   : > { %v5668_v7 = vpack.c.bf16 %v3231_v60, %v3230_v40  ;;  %v3232_v16 = vld [vmem:[#allocation2 + $0x20] sm:$0xff]  ;;  %v3233_v38 = vld [vmem:[#allocation2 + $0x28] sm:$0xff]  ;;  %v3904_v3 = vmul.f32 %v3892_v20, %v7100_v44  ;;  %5841 = vrot.lane.b32.xlu0 %v5840_v6, %s6192_s16  ;;  %v5680_v44 = vpack.c.bf16 %v3524_v5, %v3523_v15 }
 0x475   : > { %5665 = vmatprep.subr.bf16.mxu1 %v5664_v50  ;;  %v5672_v37 = vpack.c.bf16 %v3233_v38, %v3232_v16  ;;  %v3234_v62 = vld [vmem:[#allocation2 + $0x30] sm:$0xff]  ;;  %v3235_v58 = vld [vmem:[#allocation2 + $0x38] sm:$0xff] }
 0x476   : > { %5667 = vmatpush3.bf16.msra.mxu1 %v5664_v50  ;;  %v5845_v28 = vpack.i.bf16 %v3905_v51, %v3904_v3  ;;  %v5676_v47 = vpack.c.bf16 %v3235_v58, %v3234_v62 }
 0x477   : > { %5669 = vmatprep.subr.bf16.mxu1 %v5668_v7  ;;  %v7724_v59 = vpop.permute.xlu0 %1971 }
 0x478   : > { %5846 = vrot.lane.b32.xlu1 %v5845_v28, %s6192_s16 }
 0x47a   : > { %5671 = vmatpush3.bf16.msra.mxu1 %v5668_v7 }
 0x47b   : > { %5673 = vmatprep.subr.bf16.mxu1 %v5672_v37  ;;  %v7729_v29 = vpop.permute.xlu0 %1979 }
 0x47e   : > { %5675 = vmatpush3.bf16.msra.mxu1 %v5672_v37 }
 0x47f   : > { %5677 = vmatprep.subr.bf16.mxu1 %v5676_v47  ;;  %v7738_v7 = vpop.permute.xlu0 %1987 }
 0x482   : > { %5679 = vmatpush3.bf16.msra.mxu1 %v5676_v47 }
 0x483   : > { %5681 = vmatprep.subr.bf16.mxu1 %v5680_v44 }
 0x485   : > { %5401 = vmatmul.mubr.msk.f32.vlgmr.msra.gmra.mrb[36].mxu1 %vm595_vm0, %v7527_v39 }
 0x486   : > { %5403 = vmatprep.mubr.msk.f32.mxu1 %vm595_vm0, %v7533_v41  ;;  %5683 = vmatpush3.bf16.msra.mxu1 %v5680_v44 }
 0x489   : > { %5404 = vmatmul.mubr.msk.f32.gmra.mrb[38].mxu1 %vm595_vm0, %v7539_v56  ;;  %v3061_v56 = vrot.slane %v7418_v63, 4 }
 0x48a   : > { %5406 = vmatprep.mubr.msk.f32.mxu1 %vm595_vm0, %v7543_v36 }
 0x48d   : > { %5407 = vmatmul.mubr.msk.f32.gmra.mrb[40].mxu1 %vm595_vm0, %v7547_v33 }
 0x48e   : > { %5409 = vmatprep.mubr.msk.f32.mxu1 %vm595_vm0, %v7551_v55  ;;  %v3062_v55 = vadd.f32 %v3061_v56, %v7418_v63 }
 0x490   : > { %v3063_v43 = vrot.slane %v3062_v55, 2 }
 0x491   : > { %5410 = vmatmul.mubr.msk.f32.gmra.mrb[42].mxu1 %vm595_vm0, %v7555_v32 }
 0x492   : > { %v3064_v63 = vadd.f32 %v3063_v43, %v3062_v55 }
 0x494   : > { %v3065_v61 = vrot.slane %v3064_v63, 1 }
 0x496   : > { %v7714_v48 = vadd.f32 %v3065_v61, %v3064_v63 }
 0x4b3   : > { %v7682_v39 = vpop.f32.mrb[56].mxu0 }
 0x4b4   : > { %3787 = vperm.xlu1 %5850, %v7682_v39   ;;  %v7685_v41 = vpop.f32.mrb[57].mxu0  ;;  %v3358_v21 = vsub.f32 %v7714_v48, %v7682_v39 }
 0x4b5   : > { %3783 = vperm.xlu0 %5829, %v7685_v41   ;;  %v3357_v35 = vsub.f32 %v7714_v48, %v7685_v41 }
 0x4b6   : > { %v3367_v42 = vmul.f32 1.442695, %v3358_v21 }
 0x4b7   : > { %v7689_v36 = vpop.f32.mrb[58].mxu0  ;;  %v3365_v40 = vmul.f32 1.442695, %v3357_v35 }
 0x4b8   : > { %5851 = vset.pattern.permute.xlu1 %v8425_v13  ;;  %v7692_v33 = vpop.f32.mrb[59].mxu0  ;;  %v3360_v60 = vsub.f32 %v7714_v48, %v7689_v36 }
 0x4b9   : > { %3398 = vperm.xlu1 %5851, %v7682_v39   ;;  %5852 = vset.pattern.permute.xlu0 %v8425_v13  ;;  %6033 = vpow2.f32 %v3365_v40  ;;  %v3359_v50 = vsub.f32 %v7714_v48, %v7692_v33 }
 0x4ba   : > { %3393 = vperm.xlu0 %5852, %v7685_v41   ;;  %6035 = vpow2.f32 %v3367_v42  ;;  %v3371_v6 = vmul.f32 1.442695, %v3360_v60 }
 0x4bb   : > { %v7698_v32 = vpop.f32.mrb[60].mxu0  ;;  %v3369_v16 = vmul.f32 1.442695, %v3359_v50 }
 0x4bc   : > { %v7700_v52 = vpop.f32.mrb[61].mxu0  ;;  %v3362_v38 = vsub.f32 %v7714_v48, %v7698_v32 }
 0x4bd   : > { %5853 = vset.pattern.permute.xlu1 %v8429_v26  ;;  %6037 = vpow2.f32 %v3369_v16  ;;  %v3361_v62 = vsub.f32 %v7714_v48, %v7700_v52 }
 0x4be   : > { %5854 = vset.pattern.permute.xlu0 %v8429_v26  ;;  %3795 = vperm.xlu1 %5853, %v7689_v36   ;;  %v3375_v51 = vmul.f32 1.442695, %v3362_v38  ;;  %6039 = vpow2.f32 %v3371_v6 }
 0x4bf   : > { %3791 = vperm.xlu0 %5854, %v7692_v33   ;;  %v7706_v34 = vpop.f32.mrb[62].mxu0  ;;  %v3373_v44 = vmul.f32 1.442695, %v3361_v62 }
 0x4c0   : > { %v7708_v57 = vpop.f32.mrb[63].mxu0  ;;  %6041 = vpow2.f32 %v3375_v51 }
 0x4c1   : > { %v3363_v43 = vsub.f32 %v7714_v48, %v7708_v57  ;;  %6043 = vpow2.f32 %v3373_v44 }
 0x4c2   : > { %3803 = vperm.xlu1 %5853, %v7698_v32  }
 0x4c3   : > { %3799 = vperm.xlu0 %5854, %v7700_v52   ;;  %v6034_v20 = vpop.eup %6033  ;;  %v3377_v42 = vmul.f32 1.442695, %v3363_v43 }
 0x4c4   : > { %v6036_v37 = vpop.eup %6035  ;;  %v3381_v47 = vmul.f32 %v6034_v20, %v7347_v45 }
 0x4c5   : > { %v3382_v5 = vmul.f32 %v6036_v37, %v7353_v22  ;;  %6045 = vpow2.f32 %v3377_v42 }
 0x4c6   : > { %3807 = vperm.xlu1 %5853, %v7708_v57  }
 0x4c7   : > { %3811 = vperm.xlu0 %5854, %v7706_v34   ;;  %v6038_v22 = vpop.eup %6037 }
 0x4c8   : > { %v6040_v50 = vpop.eup %6039  ;;  %v3383_v20 = vmul.f32 %v6038_v22, %v7368_v54  ;;  %v3345_v22 = vmul.f32 1.442695, %v7692_v33 }
 0x4ca   : > { %5855 = vset.pattern.permute.xlu1 %v8425_v13  ;;  %v6042_v51 = vpop.eup %6041 }
 0x4cb   : > { %5856 = vset.pattern.permute.xlu0 %v8425_v13  ;;  %3403 = vperm.xlu1 %5855, %v7692_v33   ;;  %v3351_v33 = vmul.f32 1.442695, %v7698_v32 }
 0x4cc   : > { %3408 = vperm.xlu0 %5856, %v7689_v36  }
 0x4cf   : > { %3495 = vperm.xlu1 %5855, %v7368_v54   ;;  %v3386_v54 = vmul.f32 %v6042_v51, %v7395_v1 }
 0x4d0   : > { %3500 = vperm.xlu0 %5856, %v7376_v53  }
 0x4d3   : > { %3413 = vperm.xlu1 %5855, %v7700_v52  }
 0x4d4   : > { %3418 = vperm.xlu0 %5856, %v7698_v32  }
 0x4d7   : > { %3505 = vperm.xlu1 %5855, %v7387_v17  }
 0x4d8   : > { %3510 = vperm.xlu0 %5856, %v7395_v1  }
 0x4db   : > { %3515 = vperm.xlu1 %5855, %v7405_v11  }
 0x4dc   : > { %3428 = vperm.xlu0 %5856, %v7706_v34  }
 0x4de   : > { %v5832_v3 = vpop.permute.xlu0 %5831 }
 0x4df   : > { %v5834_v58 = vunpack.i.h.bf16 %v5832_v3  ;;  %v5833_v28 = vunpack.i.l.bf16 %v5832_v3  ;;  %3423 = vperm.xlu1 %5855, %v7708_v57   ;;  %v3384_v3 = vmul.f32 %v6040_v50, %v7376_v53 }
 0x4e0   : > { %3520 = vperm.xlu0 %5856, %v7411_v24  }
 0x4e1   : > { %v5696_v12 = vpack.c.bf16 %v5834_v58, %v5833_v28  ;;  %v3364_v28 = vsub.f32 %v7714_v48, %v7706_v34 }
 0x4e2   : > { %v5837_v15 = vpop.permute.xlu1 %5836 }
 0x4e3   : > { %v5839_v56 = vunpack.i.h.bf16 %v5837_v15  ;;  %v5838_v55 = vunpack.i.l.bf16 %v5837_v15  ;;  %3731 = vperm.xlu1 %5855, %v3381_v47   ;;  %5697 = vmatprep.subr.bf16.mxu0 %v5696_v12  ;;  %v3379_v53 = vmul.f32 1.442695, %v3364_v28 }
 0x4e4   : > { %3736 = vperm.xlu0 %5856, %v3382_v5   ;;  %5699 = vmatpush3.bf16.msra.mxu0 %v5696_v12  ;;  %v6044_v12 = vpop.eup %6043 }
 0x4e5   : > { %v7752_v63 = vpop.f32.mrb[64].mxu0  ;;  %v5700_v61 = vpack.c.bf16 %v5839_v56, %v5838_v55  ;;  %6047 = vpow2.f32 %v3379_v53 }
 0x4e6   : > { %v5842_v35 = vpop.permute.xlu0 %5841  ;;  %v7754_v21 = vpop.f32.mrb[65].mxu0 }
 0x4e7   : > { %v5844_v45 = vunpack.i.h.bf16 %v5842_v35  ;;  %v5843_v40 = vunpack.i.l.bf16 %v5842_v35  ;;  %5858 = vset.pattern.permute.xlu1 %v8429_v26  ;;  %5701 = vmatprep.subr.bf16.mxu0 %v5700_v61  ;;  %v8489_v35 = vrot.slane %v7132_v27, 2  ;;  %v3349_v27 = vmul.f32 1.442695, %v7700_v52 }
 0x4e8   : > { %5857 = vset.pattern.permute.xlu0 %v8429_v26  ;;  %4193 = vperm.xlu1 %5858, %v3381_v47   ;;  %v3385_v47 = vmul.f32 %v6044_v12, %v7387_v17  ;;  %v8493_v12 = vld [vmem:[#allocation16_spill] sm:$0xff] }
 0x4e9   : > { %v5704_v60 = vpack.c.bf16 %v5844_v45, %v5843_v40  ;;  %5703 = vmatpush3.bf16.msra.mxu0 %v5700_v61  ;;  %4197 = vperm.xlu0 %5857, %v3382_v5   ;;  %v6046_v5 = vpop.eup %6045  ;;  %v3343_v61 = vmul.f32 1.442695, %v7682_v39  ;;  %v7791_v45 = vld [vmem:[%s7224_s30] sm:$0x7]  ;;  %v1994_v53 = vmul.f32 %v7599_v25, %v8493_v12  ;;  %v8497_v12 = vld [vmem:[#allocation17_spill] sm:$0xff] }
 0x4ea   : > { %v5847_v16 = vpop.permute.xlu1 %5846  ;;  %v3387_v1 = vmul.f32 %v6046_v5, %v7405_v11  ;;  %v3341_v11 = vmul.f32 1.442695, %v7685_v41  ;;  %v3347_v41 = vmul.f32 1.442695, %v7689_v36 }
 0x4eb   : > { %v5849_v38 = vunpack.i.h.bf16 %v5847_v16  ;;  %v5848_v6 = vunpack.i.l.bf16 %v5847_v16  ;;  %5705 = vmatprep.subr.bf16.mxu0 %v5704_v60 }
 0x4ec   : > { %5859 = vset.pattern.permute.xlu1 %v8425_v13  ;;  %6049 = vpow2.f32 %v3341_v11 }
 0x4ed   : > { %5707 = vmatpush3.bf16.msra.mxu0 %v5704_v60  ;;  %4201 = vperm.xlu0 %5857, %v3383_v20   ;;  %v7761_v37 = vpop.f32.mrb[66].mxu0  ;;  %v5708_v62 = vpack.c.bf16 %v5849_v38, %v5848_v6  ;;  %6051 = vpow2.f32 %v3343_v61  ;;  %v8491_v60 = vld [vmem:[#allocation13_spill] sm:$0xff]  ;;  %v8494_v61 = vld [vmem:[#allocation36_spill] sm:$0xff] }
 0x4ee   : > { %3746 = vperm.xlu1 %5859, %v3384_v3   ;;  %v7763_v58 = vpop.f32.mrb[67].mxu0  ;;  %6053 = vpow2.f32 %v3345_v22 }
 0x4ef   : > { %5709 = vmatprep.subr.bf16.mxu0 %v5708_v62  ;;  %v6048_v55 = vpop.eup %6047  ;;  %6055 = vpow2.f32 %v3347_v41 }
 0x4f0   : > { %v3388_v43 = vmul.f32 %v6048_v55, %v7411_v24  ;;  %v3709_v24 = vrot.slane %v7791_v45, 2  ;;  %6057 = vpow2.f32 %v3349_v27 }
 0x4f1   : > { %5711 = vmatpush3.bf16.msra.mxu0 %v5708_v62  ;;  %4213 = vperm.xlu0 %5857, %v3386_v54   ;;  %6059 = vpow2.f32 %v3351_v33 }
 0x4f2   : > { %5860 = vset.pattern.permute.xlu1 %v8429_v26 }
 0x4f3   : > { %4205 = vperm.xlu1 %5860, %v3384_v3  }
 0x4f5   : > { %5862 = vset.pattern.permute.xlu0 %v8425_v13  ;;  %v7771_v15 = vpop.f32.mrb[68].mxu0 }
 0x4f6   : > { %3751 = vperm.xlu0 %5862, %v3385_v47   ;;  %v7773_v44 = vpop.f32.mrb[69].mxu0  ;;  %v7799_v39 = vpop.eup %6049 }
 0x4f7   : > { %5861 = vset.pattern.permute.xlu1 %v8425_v13  ;;  %v7804_v50 = vpop.eup %6051 }
 0x4f8   : > { %3741 = vperm.xlu1 %5861, %v3383_v20   ;;  %v7809_v36 = vpop.eup %6053 }
 0x4f9   : > { %v7814_v52 = vpop.eup %6055 }
 0x4fa   : > { %5866 = vset.pattern.permute.xlu0 %v8429_v26  ;;  %v7819_v32 = vpop.eup %6057 }
 0x4fb   : > { %4217 = vperm.xlu0 %5866, %v3387_v1  }
 0x4fc   : > { %3756 = vperm.xlu1 %5861, %v3386_v54  }
 0x4fd   : > { %v7778_v56 = vpop.f32.mrb[70].mxu0 }
 0x4fe   : > { %v7780_v17 = vpop.f32.mrb[71].mxu0 }
 0x500   : > { %5863 = vset.pattern.permute.xlu1 %v8429_v26 }
 0x501   : > { %4209 = vperm.xlu1 %5863, %v3385_v47  }
 0x505   : > { %5864 = vset.pattern.permute.xlu1 %v8425_v13 }
 0x506   : > { %3766 = vperm.xlu1 %5864, %v3388_v43  }
 0x50a   : > { %3761 = vperm.xlu1 %5864, %v3387_v1  }
 0x50e   : > { %5865 = vset.pattern.permute.xlu1 %v8429_v26 }
 0x50f   : > { %4221 = vperm.xlu1 %5865, %v3388_v43  }
 0x513   : > { %2195 = vrot.lane.b32.xlu1 %v8489_v35, %s6193_s28  ;;  %v8495_v35 = vld [vmem:[#allocation15_spill] sm:$0xff] }
 0x514   : > { %v3042_v40 = vpop.f32.mrb[30].mxu1 }
 0x515   : > { %v5355_v42 = vpop.f32.mrb[31].mxu1  ;;  %v7839_v3 = vrot.slane %v3042_v40, %v6538_v49 }
 0x517   : > { %4139 = vrot.lane.b32.xlu1 %v3709_v24, %s6193_s28 }
 0x519   : > { %4297 = vxpose.xlu0.b32.start [1/8] (short) (narrow) %v7237_v4, 64  ;;  %v3353_v4 = vmul.f32 1.442695, %v7708_v57 }
 0x51b   : > { %3907 = vperm.xlu1 %5865, %v7799_v39   ;;  %6061 = vpow2.f32 %v3353_v4 }
 0x51d   : > { %4298 = vxpose.xlu0.b32.cont [2/8] (short) (narrow) %v7244_v14, 64  ;;  %v3355_v14 = vmul.f32 1.442695, %v7706_v34  ;;  %v7830_v34 = vrot.slane %v3042_v40, %v8491_v60  ;;  %v1995_v40 = vmul.f32 %v8495_v35, %v8494_v61  ;;  %v8499_v61 = vld [vmem:[#allocation11_spill] sm:$0xff] }
 0x51f   : > { %3911 = vperm.xlu1 %5865, %v7804_v50   ;;  %6063 = vpow2.f32 %v3355_v14  ;;  %v8496_v14 = vld [vmem:[#allocation18_spill] sm:$0xff] }
 0x521   : > { %4299 = vxpose.xlu0.b32.cont [3/8] (short) (narrow) %v7261_v19, 64  ;;  %v7823_v19 = vpop.eup %6059 }
 0x523   : > { %3915 = vperm.xlu1 %5865, %v7809_v36  }
 0x525   : > { %4300 = vxpose.xlu0.b32.cont [4/8] (short) (narrow) %v7268_v23, 64  ;;  %v8490_v23 = vld [vmem:[#allocation30_spill] sm:$0xff]  ;;  %v7827_v57 = vpop.eup %6061 }
 0x527   : > { %3919 = vperm.xlu1 %5865, %v7814_v52  }
 0x529   : > { %4301 = vxpose.xlu0.b32.cont [5/8] (short) (narrow) %v7285_v46, 64  ;;  %v7836_v20 = vpop.eup %6063 }
 0x52b   : > { %3923 = vperm.xlu1 %5865, %v7819_v32  }
 0x52d   : > { %4302 = vxpose.xlu0.b32.cont [6/8] (short) (narrow) %v7293_v9, 64  ;;  %v8492_v9 = vld [vmem:[#allocation31_spill] sm:$0xff] }
 0x52f   : > { %3927 = vperm.xlu1 %5865, %v7823_v19  }
 0x531   : > { %4303 = vxpose.xlu0.b32.cont [7/8] (short) (narrow) %v8490_v23, 64  ;;  %v1996_v23 = vmul.f32 %v7724_v59, %v8496_v14 }
 0x533   : > { %3931 = vperm.xlu1 %5865, %v7827_v57   ;;  %v3788_v46 = vpop.permute.xlu1 %3787 }
 0x534   : > { %v3819_v16 = vsub.f32 %v3788_v46, %v7830_v34  ;;  %v3784_v38 = vpop.permute.xlu0 %3783 }
 0x535   : > { %v3818_v6 = vsub.f32 %v3784_v38, %v7830_v34  ;;  %4304 = vxpose.xlu0.b32.end [8/8] (short) (narrow) %v8492_v9, 64 }
 0x536   : > { %v3827_v51 = vmin.f32 %v3819_v16, 0.0 }
 0x537   : > { %v3826_v62 = vmin.f32 %v3818_v6, 0.0  ;;  %3935 = vperm.xlu1 %5865, %v7836_v20  }
 0x538   : > { %v3836_v28 = vmul.f32 1.442695, %v3827_v51  ;;  %v3399_v54 = vpop.permute.xlu1 %3398 }
 0x539   : > { %v3834_v47 = vmul.f32 1.442695, %v3826_v62  ;;  %v3436_v5 = vsub.f32 %v3399_v54, %v7839_v3  ;;  %v3394_v1 = vpop.permute.xlu0 %3393 }
 0x53a   : > { %6065 = vpow2.f32 %v3836_v28  ;;  %v3435_v55 = vsub.f32 %v3394_v1, %v7839_v3 }
 0x53b   : > { %6067 = vpow2.f32 %v3834_v47  ;;  %v3444_v43 = vmin.f32 %v3436_v5, 0.0  ;;  %2042 = vrot.lane.b32.xlu1 %v1994_v53, %s6192_s16  ;;  %v1997_v53 = vmul.f32 %v8497_v12, %v7601_v0  ;;  %v8498_v47 = vld [vmem:[#allocation4_spill] sm:$0xff] }
 0x53c   : > { %v3443_v11 = vmin.f32 %v3435_v55, 0.0  ;;  %5867 = vset.pattern.permute.xlu1 %v8425_v13 }
 0x53d   : > { %v3453_v22 = vmul.f32 1.442695, %v3444_v43  ;;  %v3796_v42 = vpop.permute.xlu1 %3795 }
 0x53e   : > { %v3451_v25 = vmul.f32 1.442695, %v3443_v11  ;;  %v3821_v41 = vsub.f32 %v3796_v42, %v7830_v34  ;;  %v3792_v27 = vpop.permute.xlu0 %3791 }
 0x53f   : > { %6069 = vpow2.f32 %v3453_v22  ;;  %v3820_v33 = vsub.f32 %v3792_v27, %v7830_v34  ;;  %2044 = vrot.lane.b32.xlu1 %v1995_v40, %s6192_s16  ;;  %v8500_v27 = vld [vmem:[#allocation19_spill] sm:$0xff] }
 0x540   : > { %6071 = vpow2.f32 %v3451_v25  ;;  %v3829_v4 = vmin.f32 %v3821_v41, 0.0 }
 0x541   : > { %v3828_v60 = vmin.f32 %v3820_v33, 0.0  ;;  %v3804_v46 = vpop.permute.xlu1 %3803  ;;  %v1999_v33 = vmul.f32 %v8500_v27, %v7643_v8 }
 0x542   : > { %v3840_v16 = vmul.f32 1.442695, %v3829_v4  ;;  %v3823_v38 = vsub.f32 %v3804_v46, %v7830_v34  ;;  %v3800_v6 = vpop.permute.xlu0 %3799 }
 0x543   : > { %v3838_v9 = vmul.f32 1.442695, %v3828_v60  ;;  %v3822_v51 = vsub.f32 %v3800_v6, %v7830_v34  ;;  %2046 = vrot.lane.b32.xlu1 %v1996_v23, %s6192_s16 }
 0x544   : > { %v6066_v62 = vpop.eup %6065  ;;  %6073 = vpow2.f32 %v3840_v16  ;;  %v3831_v28 = vmin.f32 %v3823_v38, 0.0 }
 0x545   : > { %v6068_v54 = vpop.eup %6067  ;;  %v3851_v59 = vmul.f32 %v6066_v62, %v8498_v47  ;;  %6075 = vpow2.f32 %v3838_v9  ;;  %v3830_v5 = vmin.f32 %v3822_v51, 0.0  ;;  %v3808_v1 = vpop.permute.xlu1 %3807  ;;  %v8501_v51 = vld [vmem:[#allocation22_spill] sm:$0xff] }
 0x546   : > { %v3844_v55 = vmul.f32 1.442695, %v3831_v28  ;;  %v3824_v43 = vsub.f32 %v3808_v1, %v7830_v34  ;;  %v3812_v11 = vpop.permute.xlu0 %3811  ;;  %v3850_v35 = vmul.f32 %v6068_v54, %v8499_v61  ;;  %v2000_v62 = vmul.f32 %v7738_v7, %v8501_v51 }
 0x547   : > { %v3859_v40 = vmul.f32 %v7752_v63, %v3851_v59  ;;  %v3842_v22 = vmul.f32 1.442695, %v3830_v5  ;;  %v3825_v42 = vsub.f32 %v3812_v11, %v7830_v34  ;;  %2048 = vrot.lane.b32.xlu1 %v1997_v53, %s6192_s16 }
 0x548   : > { %6077 = vpow2.f32 %v3844_v55  ;;  %v3832_v0 = vmin.f32 %v3824_v43, 0.0  ;;  %v3858_v25 = vmul.f32 %v3850_v35, %v7754_v21  ;;  %v8502_v55 = vld [vmem:[#allocation5_spill] sm:$0xff] }
 0x549   : > { %v6070_v41 = vpop.eup %6069  ;;  %6079 = vpow2.f32 %v3842_v22  ;;  %v3833_v4 = vmin.f32 %v3825_v42, 0.0 }
 0x54a   : > { %v6072_v14 = vpop.eup %6071  ;;  %v3468_v23 = vmul.f32 %v6070_v41, %v8498_v47  ;;  %v3846_v60 = vmul.f32 1.442695, %v3832_v0  ;;  %v3404_v46 = vpop.permute.xlu1 %3403  ;;  %5456 = vmatprep.mubr.msk.f32.mxu0 %vm595_vm0, %v3858_v25 }
 0x54b   : > { %v3848_v34 = vmul.f32 1.442695, %v3833_v4  ;;  %v3437_v16 = vsub.f32 %v3404_v46, %v7839_v3  ;;  %2052 = vrot.lane.b32.xlu1 %v1999_v33, %s6192_s16  ;;  %v3409_v38 = vpop.permute.xlu0 %3408  ;;  %5457 = vmatmul.mubr.msk.f32.vlgmr.msra.gmra.mrb[72].mxu0 %vm595_vm0, %v3859_v40  ;;  %v3467_v6 = vmul.f32 %v6072_v14, %v8499_v61  ;;  %v8503_v61 = vld [vmem:[#allocation14_spill] sm:$0xff]  ;;  %v8505_v14 = vld [vmem:[#allocation7_spill] sm:$0xff] }
 0x54c   : > { %v7876_v8 = vmul.f32 %v7752_v63, %v3468_v23  ;;  %6081 = vpow2.f32 %v3846_v60  ;;  %v3438_v9 = vsub.f32 %v3409_v38, %v7839_v3 }
 0x54d   : > { %6083 = vpow2.f32 %v3848_v34  ;;  %v3445_v28 = vmin.f32 %v3437_v16, 0.0  ;;  %v3475_v54 = vmul.f32 %v3467_v6, %v7754_v21  ;;  %v8504_v21 = vld [vmem:[#allocation21_spill] sm:$0xff] }
 0x54e   : > { %v6074_v12 = vpop.eup %6073  ;;  %v3446_v53 = vmin.f32 %v3438_v9, 0.0  ;;  %v3496_v47 = vpop.permute.xlu1 %3495  ;;  %v2001_v40 = vmul.f32 %v8504_v21, %v7658_v10  ;;  %v8506_v10 = vld [vmem:[#allocation6_spill] sm:$0xff] }
 0x54f   : > { %v6076_v59 = vpop.eup %6075  ;;  %v3455_v5 = vmul.f32 1.442695, %v3445_v28  ;;  %v3525_v1 = vmul.f32 %v7650_v2, %v3496_v47  ;;  %2054 = vrot.lane.b32.xlu1 %v2000_v62, %s6192_s16  ;;  %v3501_v63 = vpop.permute.xlu0 %3500  ;;  %5428 = vmatprep.mubr.msk.f32.mxu1 %vm595_vm0, %v3475_v54  ;;  %v3853_v43 = vmul.f32 %v6074_v12, %v8502_v55 }
 0x550   : > { %v3457_v11 = vmul.f32 1.442695, %v3446_v53  ;;  %v3526_v7 = vmul.f32 %v7646_v18, %v3501_v63  ;;  %v3852_v35 = vmul.f32 %v6076_v59, %v8503_v61  ;;  %v7906_v53 = vld [vmem:[%s6335_s29 + $0x20] sm:$0xff] }
 0x551   : > { %6085 = vpow2.f32 %v3455_v5  ;;  %v3861_v22 = vmul.f32 %v7761_v37, %v3853_v43  ;;  %v8507_v5 = vld [vmem:[#allocation8_spill] sm:$0xff] }
 0x552   : > { %v6078_v42 = vpop.eup %6077  ;;  %6087 = vpow2.f32 %v3457_v11  ;;  %v5684_v0 = vpack.c.bf16 %v3526_v7, %v3525_v1  ;;  %v3414_v25 = vpop.permute.xlu1 %3413  ;;  %v3860_v41 = vmul.f32 %v3852_v35, %v7763_v58  ;;  %v7911_v43 = vld [vmem:[%s6335_s29 + $0x28] sm:$0xff]  ;;  %v8508_v7 = vld [vmem:[#allocation9_spill] sm:$0xff] }
 0x553   : > { %v6080_v27 = vpop.eup %6079  ;;  %v3439_v33 = vsub.f32 %v3414_v25, %v7839_v3  ;;  %2056 = vrot.lane.b32.xlu1 %v2001_v40, %s6192_s16  ;;  %v3419_v4 = vpop.permute.xlu0 %3418  ;;  %v3855_v23 = vmul.f32 %v6078_v42, %v8505_v14 }
 0x554   : > { %v3440_v60 = vsub.f32 %v3419_v4, %v7839_v3  ;;  %5685 = vmatprep.subr.bf16.mxu1 %v5684_v0  ;;  %5459 = vmatprep.mubr.msk.f32.mxu0 %vm595_vm0, %v3860_v41  ;;  %v3854_v46 = vmul.f32 %v6080_v27, %v8506_v10  ;;  %v8509_v4 = vld [vmem:[#allocation20_spill] sm:$0xff] }
 0x555   : > { %v3447_v34 = vmin.f32 %v3439_v33, 0.0  ;;  %5687 = vmatpush3.bf16.msra.mxu1 %v5684_v0  ;;  %5460 = vmatmul.mubr.msk.f32.gmra.mrb[74].mxu0 %vm595_vm0, %v3861_v22  ;;  %v3863_v38 = vmul.f32 %v7771_v15, %v3855_v23  ;;  %v1998_v23 = vmul.f32 %v7729_v29, %v8509_v4 }
 0x556   : > { %v6082_v6 = vpop.eup %6081  ;;  %v3448_v9 = vmin.f32 %v3440_v60, 0.0  ;;  %v3506_v51 = vpop.permute.xlu1 %3505  ;;  %v3862_v28 = vmul.f32 %v3854_v46, %v7773_v44 }
 0x557   : > { %v6084_v54 = vpop.eup %6083  ;;  %v3459_v12 = vmul.f32 1.442695, %v3447_v34  ;;  %v3527_v47 = vmul.f32 %v7906_v53, %v3506_v51  ;;  %v3511_v59 = vpop.permute.xlu0 %3510  ;;  %v3856_v1 = vmul.f32 %v6082_v6, %v8507_v5 }
 0x558   : > { %v7899_v16 = vpop.f32.mrb[36].mxu1  ;;  %v3461_v63 = vmul.f32 1.442695, %v3448_v9  ;;  %v3528_v11 = vmul.f32 %v7911_v43, %v3511_v59  ;;  %5462 = vmatprep.mubr.msk.f32.mxu0 %vm595_vm0, %v3862_v28  ;;  %v3857_v35 = vmul.f32 %v6084_v54, %v8508_v7  ;;  %v7944_v59 = vld [vmem:[%s6335_s29 + $0x38] sm:$0xff] }
 0x559   : > { %v7902_v62 = vpop.f32.mrb[37].mxu1  ;;  %6089 = vpow2.f32 %v3459_v12  ;;  %5463 = vmatmul.mubr.msk.f32.gmra.mrb[76].mxu0 %vm595_vm0, %v3863_v38  ;;  %v3864_v40 = vmul.f32 %v3856_v1, %v7780_v17  ;;  %v7940_v12 = vld [vmem:[%s6335_s29 + $0x30] sm:$0xff] }
 0x55a   : > { %6091 = vpow2.f32 %v3461_v63  ;;  %v5688_v22 = vpack.c.bf16 %v3528_v11, %v3527_v47  ;;  %v3516_v42 = vpop.permute.xlu1 %3515  ;;  %v3865_v25 = vmul.f32 %v7778_v56, %v3857_v35 }
 0x55b   : > { %v6086_v41 = vpop.eup %6085  ;;  %v3429_v27 = vpop.permute.xlu0 %3428  ;;  %5465 = vmatprep.mubr.msk.f32.mxu0 %vm595_vm0, %v3864_v40  ;;  %v3529_v47 = vmul.f32 %v7940_v12, %v3516_v42 }
 0x55c   : > { %v7917_v21 = vpop.f32.mrb[38].mxu1  ;;  %v6088_v33 = vpop.eup %6087  ;;  %v3442_v60 = vsub.f32 %v3429_v27, %v7839_v3  ;;  %5689 = vmatprep.subr.bf16.mxu1 %v5688_v22  ;;  %v3469_v46 = vmul.f32 %v6086_v41, %v8503_v61 }
 0x55d   : > { %v7920_v0 = vpop.f32.mrb[39].mxu1  ;;  %5691 = vmatpush3.bf16.msra.mxu1 %v5688_v22  ;;  %5466 = vmatmul.mubr.msk.f32.gmra.mrb[78].mxu0 %vm595_vm0, %v3865_v25  ;;  %v3470_v38 = vmul.f32 %v6088_v33, %v8502_v55 }
 0x55e   : > { %v3450_v6 = vmin.f32 %v3442_v60, 0.0  ;;  %v3424_v9 = vpop.permute.xlu1 %3423  ;;  %2050 = vrot.lane.b32.xlu0 %v1998_v23, %s6192_s16  ;;  %v3477_v29 = vmul.f32 %v3469_v46, %v7763_v58 }
 0x55f   : > { %v3441_v28 = vsub.f32 %v3424_v9, %v7839_v3  ;;  %v3521_v54 = vpop.permute.xlu0 %3520  ;;  %v3478_v61 = vmul.f32 %v7761_v37, %v3470_v38  ;;  %5868 = vset.pattern.permute.xlu0 %v8425_v13 }
 0x560   : > { %v7929_v34 = vpop.f32.mrb[40].mxu1  ;;  %v3465_v55 = vmul.f32 1.442695, %v3450_v6  ;;  %v3530_v1 = vmul.f32 %v7944_v59, %v3521_v54 }
 0x561   : > { %v7933_v51 = vpop.f32.mrb[41].mxu1  ;;  %v3449_v63 = vmin.f32 %v3441_v28, 0.0 }
 0x562   : > { %6093 = vpow2.f32 %v3465_v55  ;;  %v5692_v58 = vpack.c.bf16 %v3530_v1, %v3529_v47  ;;  %v3732_v3 = vpop.permute.xlu1 %3731 }
 0x563   : > { %v6090_v37 = vpop.eup %6089  ;;  %v3463_v40 = vmul.f32 1.442695, %v3449_v63  ;;  %v3737_v13 = vpop.permute.xlu0 %3736  ;;  %v3769_v4 = vmul.f32 %v7632_v31, %v3732_v3 }
 0x564   : > { %v7947_v11 = vpop.f32.mrb[42].mxu1  ;;  %v6092_v22 = vpop.eup %6091  ;;  %5693 = vmatprep.subr.bf16.mxu1 %v5692_v58  ;;  %v3471_v42 = vmul.f32 %v6090_v37, %v8506_v10  ;;  %v3770_v46 = vmul.f32 %v7616_v30, %v3737_v13 }
 0x565   : > { %v7949_v35 = vpop.f32.mrb[43].mxu1  ;;  %6095 = vpow2.f32 %v3463_v40  ;;  %5695 = vmatpush3.bf16.msra.mxu1 %v5692_v58  ;;  %v3472_v25 = vmul.f32 %v6092_v22, %v8505_v14 }
 0x566   : > { %v3479_v41 = vmul.f32 %v3471_v42, %v7773_v44 }
 0x567   : > { %v4194_v27 = vpop.permute.xlu1 %4193  ;;  %v3480_v33 = vmul.f32 %v7771_v15, %v3472_v25 }
 0x568   : > { %v4224_v23 = vmul.f32 %v7632_v31, %v4194_v27  ;;  %v4198_v60 = vpop.permute.xlu0 %4197  ;;  %5429 = vmatmul.mubr.msk.f32.vlgmr.msra.gmra.mrb[44].mxu1 %vm595_vm0, %v7876_v8 }
 0x569   : > { %v4225_v10 = vmul.f32 %v7616_v30, %v4198_v60  ;;  %5431 = vmatprep.mubr.msk.f32.mxu1 %vm595_vm0, %v3477_v29 }
 0x56a   : > { %v4276_v14 = vsel %vm2324_vm5, %v3769_v4, %v4224_v23 }
 0x56b   : > { %v4277_v44 = vsel %vm2324_vm5, %v3770_v46, %v4225_v10 }
 0x56c   : > { %v6094_v38 = vpop.eup %6093  ;;  %5432 = vmatmul.mubr.msk.f32.gmra.mrb[46].mxu1 %vm595_vm0, %v3478_v61  ;;  %v5712_v15 = vpack.c.bf16 %v4277_v44, %v4276_v14  ;;  %v4202_v29 = vpop.permute.xlu0 %4201 }
 0x56d   : > { %v3747_v6 = vpop.permute.xlu1 %3746  ;;  %5434 = vmatprep.mubr.msk.f32.mxu1 %vm595_vm0, %v3479_v41  ;;  %v3474_v31 = vmul.f32 %v6094_v38, %v8508_v7  ;;  %v4226_v47 = vmul.f32 %v7650_v2, %v4202_v29 }
 0x56e   : > { %5713 = vmatprep.subr.bf16.mxu1 %v5712_v15  ;;  %v3772_v55 = vmul.f32 %v7646_v18, %v3747_v6 }
 0x56f   : > { %v6096_v8 = vpop.eup %6095  ;;  %5715 = vmatpush3.bf16.msra.mxu1 %v5712_v15  ;;  %v3482_v30 = vmul.f32 %v7778_v56, %v3474_v31 }
 0x570   : > { %5435 = vmatmul.mubr.msk.f32.gmra.mrb[48].mxu1 %vm595_vm0, %v3480_v33  ;;  %v3473_v9 = vmul.f32 %v6096_v8, %v8507_v5  ;;  %v4214_v56 = vpop.permute.xlu0 %4213 }
 0x571   : > { %v4229_v13 = vmul.f32 %v7911_v43, %v4214_v56 }
 0x572   : > { %v4206_v28 = vpop.permute.xlu1 %4205  ;;  %v3481_v54 = vmul.f32 %v3473_v9, %v7780_v17 }
 0x573   : > { %v4227_v61 = vmul.f32 %v7646_v18, %v4206_v28 }
 0x574   : > { %5437 = vmatprep.mubr.msk.f32.mxu1 %vm595_vm0, %v3481_v54 }
 0x575   : > { %5438 = vmatmul.mubr.msk.f32.gmra.mrb[50].mxu1 %vm595_vm0, %v3482_v30  ;;  %v4279_v63 = vsel %vm2324_vm5, %v3772_v55, %v4227_v61  ;;  %v3752_v3 = vpop.permute.xlu0 %3751  ;;  %v8010_v55 = vld [vmem:[%s6335_s29 + $0x38] sm:$0xff] }
 0x576   : > { %v3773_v22 = vmul.f32 %v7906_v53, %v3752_v3  ;;  %8510 = vst [vmem:[#allocation30_spill] sm:$0xff] %v8010_v55 }
 0x577   : > { %v3742_v7 = vpop.permute.xlu1 %3741 }
 0x578   : > { %v3771_v1 = vmul.f32 %v7650_v2, %v3742_v7 }
 0x57a   : > { %v4278_v5 = vsel %vm2324_vm5, %v3771_v1, %v4226_v47  ;;  %v4218_v33 = vpop.permute.xlu0 %4217  ;;  %v8014_v1 = vld [vmem:[%s6335_s29] sm:$0xff] }
 0x57b   : > { %v3757_v58 = vpop.permute.xlu1 %3756  ;;  %v5716_v17 = vpack.c.bf16 %v4279_v63, %v4278_v5  ;;  %v4230_v60 = vmul.f32 %v7940_v12, %v4218_v33 }
 0x57c   : > { %v3774_v37 = vmul.f32 %v7911_v43, %v3757_v58 }
 0x57d   : > { %5717 = vmatprep.subr.bf16.mxu1 %v5716_v17 }
 0x57e   : > { %5719 = vmatpush3.bf16.msra.mxu1 %v5716_v17  ;;  %v4281_v42 = vsel %vm2324_vm5, %v3774_v37, %v4229_v13  ;;  %v8022_v17 = vld [vmem:[%s6335_s29 + $0x8] sm:$0xff]  ;;  %v8033_v13 = vld [vmem:[%s6335_s29 + $0x18] sm:$0xff] }
 0x57f   : > { %v8027_v37 = vld [vmem:[%s6335_s29 + $0x8] sm:$0xff] }
 0x580   : > { %v4210_v40 = vpop.permute.xlu1 %4209 }
 0x581   : > { %v4228_v18 = vmul.f32 %v7906_v53, %v4210_v40 }
 0x583   : > { %v4280_v2 = vsel %vm2324_vm5, %v3773_v22, %v4228_v18 }
 0x584   : > { %v5720_v25 = vpack.c.bf16 %v4281_v42, %v4280_v2  ;;  %v8038_v2 = vld [vmem:[%s6335_s29 + $0x10] sm:$0xff] }
 0x585   : > { %v3767_v41 = vpop.permute.xlu1 %3766 }
 0x586   : > { %5721 = vmatprep.subr.bf16.mxu1 %v5720_v25  ;;  %v3776_v46 = vmul.f32 %v7944_v59, %v3767_v41  ;;  %v8046_v41 = vld [vmem:[%s6335_s29 + $0x18] sm:$0xff] }
 0x587   : > { %5723 = vmatpush3.bf16.msra.mxu1 %v5720_v25 }
 0x589   : > { %v3762_v27 = vpop.permute.xlu1 %3761 }
 0x58a   : > { %v3775_v4 = vmul.f32 %v7940_v12, %v3762_v27 }
 0x58c   : > { %v4282_v14 = vsel %vm2324_vm5, %v3775_v4, %v4230_v60 }
 0x58e   : > { %v4222_v23 = vpop.permute.xlu1 %4221 }
 0x58f   : > { %v4231_v10 = vmul.f32 %v7944_v59, %v4222_v23  ;;  %v8053_v23 = vld [vmem:[%s6335_s29 + $0x20] sm:$0xff] }
 0x591   : > { %v4283_v44 = vsel %vm2324_vm5, %v3776_v46, %v4231_v10 }
 0x592   : > { %v2196_v38 = vpop.permute.xlu1 %2195  ;;  %v5724_v15 = vpack.c.bf16 %v4283_v44, %v4282_v14  ;;  %v8060_v14 = vld [vmem:[%s6335_s29 + $0x28] sm:$0xff] }
 0x593   : > { %5730 = vpush %v2196_v38 }
 0x594   : > { %5725 = vmatprep.subr.bf16.mxu1 %v5724_v15  ;;  %5732 = vpush %v3709_v24 }
 0x595   : > { %5727 = vmatpush3.bf16.msra.mxu1 %v5724_v15  ;;  %v8067_v15 = vld [vmem:[%s6335_s29 + $0x30] sm:$0xff] }
 0x596   : > { %v4140_v6 = vpop.permute.xlu1 %4139  ;;  %8511 = vst [vmem:[#allocation13_spill] sm:$0xff] %v8067_v15 }
 0x597   : > { %5734 = vpush %v4140_v6 }
 0x599   : > { %v4313_v31 = vpop.trf.xlu0 }
 0x59a   : > { %5484 = vmatprep.mubr.msk.f32.mxu1 %vm595_vm0, %v4313_v31  ;;  %v8000_v28 = vpop.permute.xlu1 %3907 }
 0x59d   : > { %v4314_v8 = vpop.trf.xlu0 }
 0x59e   : > { %5485 = vmatmul.mubr.msk.f32.vlgmr.msra.gmra.mrb[52].mxu1 %vm595_vm0, %v4314_v8  ;;  %v3912_v61 = vpop.permute.xlu1 %3911  ;;  %v8073_v8 = vld [vmem:[%s6335_s29] sm:$0xff] }
 0x59f   : > { %v3939_v4 = vmul.f32 %v7899_v16, %v3912_v61 }
 0x5a1   : > { %v4315_v30 = vpop.trf.xlu0 }
 0x5a2   : > { %5487 = vmatprep.mubr.msk.f32.mxu1 %vm595_vm0, %v4315_v30  ;;  %v8003_v7 = vpop.permute.xlu1 %3915 }
 0x5a5   : > { %v4316_v9 = vpop.trf.xlu0 }
 0x5a6   : > { %5488 = vmatmul.mubr.msk.f32.gmra.mrb[54].mxu1 %vm595_vm0, %v4316_v9  ;;  %v3920_v63 = vpop.permute.xlu1 %3919 }
 0x5a7   : > { %v3941_v10 = vmul.f32 %v7917_v21, %v3920_v63 }
 0x5a9   : > { %v4317_v29 = vpop.trf.xlu0 }
 0x5aa   : > { %5490 = vmatprep.mubr.msk.f32.mxu1 %vm595_vm0, %v4317_v29  ;;  %v3924_v18 = vpop.permute.xlu1 %3923  ;;  %v8081_v29 = vld [vmem:[%s6335_s29 + $0x10] sm:$0xff]  ;;  %s6194_s29 = smov 32  }
 0x5ad   : > { %v4318_v45 = vpop.trf.xlu0 }
 0x5ae   : > { %5491 = vmatmul.mubr.msk.f32.gmra.mrb[56].mxu1 %vm595_vm0, %v4318_v45  ;;  %v3928_v33 = vpop.permute.xlu1 %3927 }
 0x5af   : > { %v3943_v38 = vmul.f32 %v7929_v34, %v3928_v33 }
 0x5b1   : > { %v4319_v24 = vpop.trf.xlu0 }
 0x5b2   : > { %5493 = vmatprep.mubr.msk.f32.mxu1 %vm595_vm0, %v4319_v24  ;;  %v3932_v46 = vpop.permute.xlu1 %3931 }
 0x5b5   : > { %v4320_v54 = vpop.trf.xlu0 }
 0x5b6   : > { %5494 = vmatmul.mubr.msk.f32.gmra.mrb[58].mxu1 %vm595_vm0, %v4320_v54  ;;  %v3936_v31 = vpop.permute.xlu1 %3935  ;;  %v3389_v54 = vmul.f32 1.442695, %v7714_v48  ;;  %v3942_v48 = vmul.f32 %v3924_v18, %v7933_v51 }
 0x5b7   : > { %v3945_v9 = vmul.f32 %v7947_v11, %v3936_v31 }
 0x5b8   : > { %6097 = vpow2.f32 %v3389_v54 }
 0x5c4   : > { %s5731_s21 = spop %5730 }
 0x5c5   : > { %v2198_v47 = vstv %s5731_s21  ;;  %s8007_s22 = spop %5732 }
 0x5c6   : > { %v2207_v56 = vmul.f32 %v8010_v55, %v2198_v47  ;;  %v2200_v5 = vmul.f32 %v8014_v1, %v2198_v47  ;;  %v2201_v40 = vmul.f32 %v8027_v37, %v2198_v47  ;;  %v2202_v42 = vmul.f32 %v8038_v2, %v2198_v47 }
 0x5c7   : > { %v2203_v27 = vmul.f32 %v8046_v41, %v2198_v47  ;;  %v2204_v60 = vmul.f32 %v8053_v23, %v2198_v47  ;;  %v2205_v44 = vmul.f32 %v8060_v14, %v2198_v47  ;;  %v2206_v6 = vmul.f32 %v8067_v15, %v2198_v47 }
 0x5c8   : > { %s5735_s23 = spop %5734  ;;  %2230 = vrot.lane.b32.xlu0 %v2207_v56, %s6192_s16  ;;  %2216 = vrot.lane.b32.xlu1 %v2200_v5, %s6192_s16  ;;  %v3938_v47 = vmul.f32 %v8000_v28, %v7902_v62  ;;  %v3940_v56 = vmul.f32 %v8003_v7, %v7920_v0  ;;  %v6098_v5 = vpop.eup %6097 }
 0x5c9   : > { %v8019_v58 = vstv %s5735_s23 }
 0x5ca   : > { %v4145_v3 = vmul.f32 %v8022_v17, %v8019_v58  ;;  %v4147_v22 = vmul.f32 %v8033_v13, %v8019_v58  ;;  %v4149_v25 = vmul.f32 %v7911_v43, %v8019_v58  ;;  %v4144_v30 = vmul.f32 %v8073_v8, %v8019_v58 }
 0x5cb   : > { %v4146_v45 = vmul.f32 %v8081_v29, %v8019_v58  ;;  %v4151_v24 = vmul.f32 %v7944_v59, %v8019_v58  ;;  %v4148_v61 = vmul.f32 %v7906_v53, %v8019_v58 }
 0x5cc   : > { %4162 = vrot.lane.b32.xlu0 %v4145_v3, %s6192_s16  ;;  %2218 = vrot.lane.b32.xlu1 %v2201_v40, %s6192_s16 }
 0x5d0   : > { %4166 = vrot.lane.b32.xlu0 %v4147_v22, %s6192_s16  ;;  %2220 = vrot.lane.b32.xlu1 %v2202_v42, %s6192_s16  ;;  %v2051_v42 = vpop.permute.xlu0 %2050 }
 0x5d4   : > { %4170 = vrot.lane.b32.xlu0 %v4149_v25, %s6192_s16  ;;  %2222 = vrot.lane.b32.xlu1 %v2203_v27, %s6192_s16  ;;  %v8512_v25 = vld [vmem:[#allocation3_spill] sm:$0xff] }
 0x5d8   : > { %2224 = vrot.lane.b32.xlu1 %v2204_v60, %s6192_s16  ;;  %3988 = vrot.lane.b32.xlu0 %v3939_v4, %s6192_s16 }
 0x5dc   : > { %2226 = vrot.lane.b32.xlu1 %v2205_v44, %s6192_s16  ;;  %3992 = vrot.lane.b32.xlu0 %v3941_v10, %s6192_s16  ;;  %v8513_v44 = vld [vmem:[#allocation12_spill] sm:$0xff] }
 0x5e0   : > { %2228 = vrot.lane.b32.xlu1 %v2206_v6, %s6192_s16  ;;  %3996 = vrot.lane.b32.xlu0 %v3943_v38, %s6192_s16 }
 0x5e4   : > { %4160 = vrot.lane.b32.xlu1 %v4144_v30, %s6192_s16  ;;  %4000 = vrot.lane.b32.xlu0 %v3945_v9, %s6192_s16 }
 0x5e8   : > { %4164 = vrot.lane.b32.xlu1 %v4146_v45, %s6192_s16  ;;  %4174 = vrot.lane.b32.xlu0 %v4151_v24, %s6192_s16  ;;  %v8514_v24 = vld [vmem:[#allocation24_spill] sm:$0xff] }
 0x5ec   : > { %4168 = vrot.lane.b32.xlu1 %v4148_v61, %s6192_s16  ;;  %3538 = vperm.xlu0 %5868, %v7804_v50   ;;  %v3944_v50 = vmul.f32 %v3932_v46, %v7949_v35 }
 0x5f0   : > { %3986 = vrot.lane.b32.xlu1 %v3938_v47, %s6192_s16  ;;  %3553 = vperm.xlu0 %5868, %v7819_v32   ;;  %v4150_v32 = vmul.f32 %v7940_v12, %v8019_v58 }
 0x5f4   : > { %3990 = vrot.lane.b32.xlu1 %v3940_v56, %s6192_s16  ;;  %3563 = vperm.xlu0 %5868, %v7827_v57   ;;  %v2043_v57 = vpop.permute.xlu1 %2042 }
 0x5f5   : > { %v2157_v27 = vadd.f32 %v8512_v25, %v2043_v57 }
 0x5f8   : > { %3994 = vrot.lane.b32.xlu1 %v3942_v48, %s6192_s16  ;;  %3779 = vperm.xlu0 %5868, %v6098_v5   ;;  %v2045_v28 = vpop.permute.xlu1 %2044 }
 0x5f9   : > { %v2162_v38 = vadd.f32 %v8513_v44, %v2045_v28 }
 0x5fc   : > { %3998 = vrot.lane.b32.xlu1 %v3944_v50, %s6192_s16  ;;  %5870 = vset.pattern.permute.xlu0 %v8429_v26  ;;  %v2047_v7 = vpop.permute.xlu1 %2046  ;;  %v8515_v50 = vld [vmem:[#allocation23_spill] sm:$0xff] }
 0x5fd   : > { %v2167_v54 = vadd.f32 %v8514_v24, %v2047_v7 }
 0x600   : > { %4172 = vrot.lane.b32.xlu1 %v4150_v32, %s6192_s16  ;;  %v2049_v3 = vpop.permute.xlu1 %2048 }
 0x601   : > { %v2172_v32 = vadd.f32 %v8515_v50, %v2049_v3 }
 0x604   : > { %3533 = vperm.xlu1 %5867, %v7799_v39  }
 0x608   : > { %3543 = vperm.xlu1 %5867, %v7809_v36   ;;  %v2053_v36 = vpop.permute.xlu1 %2052 }
 0x60c   : > { %3548 = vperm.xlu1 %5867, %v7814_v52  }
 0x610   : > { %3558 = vperm.xlu1 %5867, %v7823_v19   ;;  %v2055_v19 = vpop.permute.xlu1 %2054 }
 0x614   : > { %3568 = vperm.xlu1 %5867, %v7836_v20  }
 0x618   : > { %5869 = vset.pattern.permute.xlu1 %v8429_v26  ;;  %v2057_v26 = vpop.permute.xlu1 %2056 }
 0x619   : > { %4233 = vperm.xlu1 %5869, %v6098_v5  }
 0x61e   : > { %v5458_v63 = vpop.f32.mrb[72].mxu0 }
 0x61f   : > { %v8116_v58 = vpop.f32.mrb[73].mxu0 }
 0x628   : > { %v5461_v40 = vpop.f32.mrb[74].mxu0 }
 0x629   : > { %v8118_v39 = vpop.f32.mrb[75].mxu0 }
 0x62c   : > { %v5464_v22 = vpop.f32.mrb[76].mxu0 }
 0x62d   : > { %v8120_v52 = vpop.f32.mrb[77].mxu0 }
 0x630   : > { %v8122_v18 = vpop.f32.mrb[78].mxu0 }
 0x631   : > { %v8124_v20 = vpop.f32.mrb[79].mxu0 }
 0x63a   : > { %v2231_v33 = vpop.permute.xlu0 %2230  ;;  %v2217_v4 = vpop.permute.xlu1 %2216 }
 0x63b   : > { %v2240_v60 = vadd.f32 %v2217_v4, %v2157_v27  ;;  %v8127_v46 = vpop.f32.mrb[44].mxu1  ;;  %v8516_v4 = vld [vmem:[#allocation26_spill] sm:$0xff] }
 0x63c   : > { %v8129_v10 = vpop.f32.mrb[45].mxu1  ;;  %v2177_v7 = vadd.f32 %v8516_v4, %v2051_v42 }
 0x63d   : > { %2300 = vrot.lane.b32.xlu0 %v2240_v60, %s6194_s29 }
 0x63e   : > { %v4163_v6 = vpop.permute.xlu0 %4162  ;;  %v2219_v31 = vpop.permute.xlu1 %2218 }
 0x63f   : > { %v2241_v30 = vadd.f32 %v2219_v31, %v2162_v38  ;;  %v8133_v9 = vpop.f32.mrb[46].mxu1 }
 0x640   : > { %v8135_v45 = vpop.f32.mrb[47].mxu1 }
 0x641   : > { %2302 = vrot.lane.b32.xlu1 %v2241_v30, %s6194_s29  ;;  %v8517_v30 = vld [vmem:[#allocation25_spill] sm:$0xff] }
 0x642   : > { %v4167_v61 = vpop.permute.xlu0 %4166  ;;  %v2221_v47 = vpop.permute.xlu1 %2220  ;;  %v2182_v24 = vadd.f32 %v8517_v30, %v2053_v36 }
 0x643   : > { %v2242_v56 = vadd.f32 %v2221_v47, %v2167_v54  ;;  %v8139_v48 = vpop.f32.mrb[48].mxu1 }
 0x644   : > { %v8141_v5 = vpop.f32.mrb[49].mxu1 }
 0x645   : > { %2304 = vrot.lane.b32.xlu0 %v2242_v56, %s6194_s29  ;;  %v8518_v56 = vld [vmem:[#allocation28_spill] sm:$0xff] }
 0x646   : > { %v4171_v57 = vpop.permute.xlu0 %4170  ;;  %v2223_v28 = vpop.permute.xlu1 %2222  ;;  %v2187_v50 = vadd.f32 %v8518_v56, %v2055_v19 }
 0x647   : > { %v2243_v25 = vadd.f32 %v2223_v28, %v2172_v32  ;;  %v8519_v32 = vld [vmem:[#allocation27_spill] sm:$0xff] }
 0x648   : > { %v8145_v27 = vpop.f32.mrb[50].mxu1  ;;  %v2192_v28 = vadd.f32 %v8519_v32, %v2057_v26 }
 0x649   : > { %2306 = vrot.lane.b32.xlu1 %v2243_v25, %s6194_s29  ;;  %v8149_v60 = vpop.f32.mrb[51].mxu1 }
 0x64a   : > { %v2225_v44 = vpop.permute.xlu1 %2224  ;;  %v3989_v38 = vpop.permute.xlu0 %3988  ;;  %v2247_v25 = vadd.f32 %v2231_v33, %v2192_v28 }
 0x64b   : > { %v2244_v31 = vadd.f32 %v2225_v44, %v2177_v7  ;;  %v4106_v4 = vadd.f32 %v5458_v63, %v3989_v38 }
 0x64d   : > { %2308 = vrot.lane.b32.xlu0 %v2244_v31, %s6194_s29  ;;  %v4185_v7 = vadd.f32 %v4163_v6, %v4106_v4 }
 0x64e   : > { %v2227_v3 = vpop.permute.xlu1 %2226  ;;  %v3993_v54 = vpop.permute.xlu0 %3992 }
 0x64f   : > { %v2245_v47 = vadd.f32 %v2227_v3, %v2182_v24  ;;  %v4116_v44 = vadd.f32 %v5461_v40, %v3993_v54 }
 0x651   : > { %2310 = vrot.lane.b32.xlu1 %v2245_v47, %s6194_s29  ;;  %v4187_v30 = vadd.f32 %v4167_v61, %v4116_v44 }
 0x652   : > { %v2229_v42 = vpop.permute.xlu1 %2228  ;;  %v3997_v15 = vpop.permute.xlu0 %3996 }
 0x653   : > { %v2246_v55 = vadd.f32 %v2229_v42, %v2187_v50  ;;  %v4126_v26 = vadd.f32 %v5464_v22, %v3997_v15 }
 0x655   : > { %2312 = vrot.lane.b32.xlu0 %v2246_v55, %s6194_s29  ;;  %2314 = vrot.lane.b32.xlu1 %v2247_v25, %s6194_s29  ;;  %v4189_v63 = vadd.f32 %v4171_v57, %v4126_v26  ;;  %v3711_v57 = vstv %s8007_s22 }
 0x656   : > { %v4161_v36 = vpop.permute.xlu1 %4160  ;;  %v4001_v31 = vpop.permute.xlu0 %4000 }
 0x657   : > { %v4136_v24 = vadd.f32 %v8122_v18, %v4001_v31 }
 0x659   : > { %4246 = vrot.lane.b32.xlu1 %v4185_v7, %s6194_s29 }
 0x65a   : > { %v4165_v19 = vpop.permute.xlu1 %4164  ;;  %v4175_v38 = vpop.permute.xlu0 %4174 }
 0x65b   : > { %v4191_v3 = vadd.f32 %v4175_v38, %v4136_v24  ;;  %v3713_v24 = vmul.f32 %v8073_v8, %v3711_v57  ;;  %v3716_v8 = vmul.f32 %v8033_v13, %v3711_v57 }
 0x65d   : > { %4250 = vrot.lane.b32.xlu1 %v4187_v30, %s6194_s29 }
 0x65e   : > { %v4169_v33 = vpop.permute.xlu1 %4168 }
 0x661   : > { %4254 = vrot.lane.b32.xlu1 %v4189_v63, %s6194_s29 }
 0x662   : > { %v3987_v55 = vpop.permute.xlu1 %3986 }
 0x663   : > { %v4101_v40 = vadd.f32 %v8116_v58, %v3987_v55  ;;  %v3714_v58 = vmul.f32 %v8022_v17, %v3711_v57 }
 0x665   : > { %v4184_v6 = vadd.f32 %v4161_v36, %v4101_v40  ;;  %4258 = vrot.lane.b32.xlu1 %v4191_v3, %s6194_s29  ;;  %v3717_v36 = vmul.f32 %v7906_v53, %v3711_v57 }
 0x666   : > { %v3991_v54 = vpop.permute.xlu1 %3990 }
 0x667   : > { %v4111_v15 = vadd.f32 %v8118_v39, %v3991_v54  ;;  %4244 = vrot.lane.b32.xlu0 %v4184_v6, %s6194_s29 }
 0x669   : > { %v4186_v22 = vadd.f32 %v4165_v19, %v4111_v15 }
 0x66a   : > { %v3995_v61 = vpop.permute.xlu1 %3994 }
 0x66b   : > { %v4121_v47 = vadd.f32 %v8120_v52, %v3995_v61  ;;  %4248 = vrot.lane.b32.xlu0 %v4186_v22, %s6194_s29  ;;  %v3539_v18 = vpop.permute.xlu0 %3538 }
 0x66c   : > { %v3572_v56 = vmul.f32 %v7899_v16, %v3539_v18  ;;  %v3718_v18 = vmul.f32 %v7911_v43, %v3711_v57  ;;  %v6137_v43 = vld [vmem:[#allocation2] sm:$0xff] }
 0x66d   : > { %v4188_v50 = vadd.f32 %v4169_v33, %v4121_v47 }
 0x66e   : > { %v3675_v32 = vadd.f32 %v8127_v46, %v3572_v56  ;;  %v3999_v28 = vpop.permute.xlu1 %3998 }
 0x66f   : > { %4252 = vrot.lane.b32.xlu0 %v4188_v50, %s6194_s29  ;;  %v3554_v39 = vpop.permute.xlu0 %3553  ;;  %v4131_v52 = vadd.f32 %v8124_v20, %v3999_v28 }
 0x670   : > { %v8173_v42 = vadd.f32 %v3714_v58, %v3675_v32  ;;  %v3575_v25 = vmul.f32 %v3554_v39, %v7933_v51  ;;  %v3719_v51 = vmul.f32 %v7940_v12, %v3711_v57 }
 0x671   : > { %v8177_v4 = vpop.f32.mrb[52].mxu1 }
 0x672   : > { %v3690_v16 = vadd.f32 %v8141_v5, %v3575_v25  ;;  %v4173_v7 = vpop.permute.xlu1 %4172  ;;  %v4419_v17 = vpop.f32.mrb[53].mxu1 }
 0x673   : > { %v4190_v44 = vadd.f32 %v4173_v7, %v4131_v52  ;;  %v3564_v46 = vpop.permute.xlu0 %3563  ;;  %v6139_v52 = vld [vmem:[#allocation2 + $0x18] sm:$0xff]  ;;  %v6141_v7 = vld [vmem:[#allocation2 + $0x28] sm:$0xff] }
 0x674   : > { %v8181_v31 = vadd.f32 %v3717_v36, %v3690_v16  ;;  %v3577_v19 = vmul.f32 %v3564_v46, %v7949_v35  ;;  %v6140_v16 = vld [vmem:[#allocation2 + $0x10] sm:$0xff] }
 0x675   : > { %4256 = vrot.lane.b32.xlu0 %v4190_v44, %s6194_s29  ;;  %v6143_v44 = vld [vmem:[#allocation2 + $0x38] sm:$0xff] }
 0x676   : > { %v3700_v20 = vadd.f32 %v8149_v60, %v3577_v19  ;;  %v3715_v60 = vmul.f32 %v8081_v29, %v3711_v57  ;;  %v6144_v19 = vld [vmem:[#allocation2 + $0x30] sm:$0xff] }
 0x677   : > { %v3780_v58 = vpop.permute.xlu0 %3779 }
 0x678   : > { %v8187_v30 = vadd.f32 %v3719_v51, %v3700_v20 }
 0x679   : > { %v5489_v26 = vpop.f32.mrb[54].mxu1 }
 0x67a   : > { %v4429_v53 = vpop.f32.mrb[55].mxu1 }
 0x681   : > { %v5492_v33 = vpop.f32.mrb[56].mxu1 }
 0x682   : > { %v4439_v5 = vpop.f32.mrb[57].mxu1 }
 0x683   : > { %v3534_v63 = vpop.permute.xlu1 %3533 }
 0x684   : > { %v3571_v38 = vmul.f32 %v3534_v63, %v7902_v62 }
 0x686   : > { %v3670_v55 = vadd.f32 %v8129_v10, %v3571_v38 }
 0x687   : > { %v3544_v35 = vpop.permute.xlu1 %3543 }
 0x688   : > { %v8192_v3 = vadd.f32 %v3713_v24, %v3670_v55  ;;  %v3573_v12 = vmul.f32 %v3544_v35, %v7920_v0 }
 0x689   : > { %v5495_v40 = vpop.f32.mrb[58].mxu1 }
 0x68a   : > { %v3680_v6 = vadd.f32 %v8135_v45, %v3573_v12  ;;  %v4449_v54 = vpop.f32.mrb[59].mxu1 }
 0x68b   : > { %v3549_v15 = vpop.permute.xlu1 %3548 }
 0x68c   : > { %v8197_v22 = vadd.f32 %v3715_v60, %v3680_v6  ;;  %v3574_v62 = vmul.f32 %v7917_v21, %v3549_v15  ;;  %v3720_v21 = vmul.f32 %v7944_v59, %v3711_v57  ;;  %v6142_v57 = vld [vmem:[#allocation2 + $0x20] sm:$0xff] }
 0x68e   : > { %v3685_v10 = vadd.f32 %v8133_v9, %v3574_v62  ;;  %v8522_v62 = vld [vmem:[#allocation33_spill] sm:$0xff] }
 0x68f   : > { %v3559_v61 = vpop.permute.xlu1 %3558 }
 0x690   : > { %v8202_v47 = vadd.f32 %v3716_v8, %v3685_v10  ;;  %v3576_v0 = vmul.f32 %v7929_v34, %v3559_v61 }
 0x692   : > { %v3695_v29 = vadd.f32 %v8139_v48, %v3576_v0  ;;  %v6138_v48 = vld [vmem:[#allocation2 + $0x8] sm:$0xff] }
 0x693   : > { %v3569_v45 = vpop.permute.xlu1 %3568 }
 0x694   : > { %v8207_v56 = vadd.f32 %v3718_v18, %v3695_v29  ;;  %v3578_v50 = vmul.f32 %v7947_v11, %v3569_v45  ;;  %v8523_v18 = vld [vmem:[#allocation34_spill] sm:$0xff] }
 0x696   : > { %v3705_v13 = vadd.f32 %v8145_v27, %v3578_v50  ;;  %v8524_v50 = vld [vmem:[#allocation29_spill] sm:$0xff] }
 0x698   : > { %v8212_v9 = vadd.f32 %v3720_v21, %v3705_v13  ;;  %v4234_v32 = vpop.permute.xlu1 %4233 }
 0x699   : > { %v4284_v28 = vsel %vm2324_vm5, %v3780_v58, %v4234_v32  ;;  %v8525_v32 = vld [vmem:[#allocation35_spill] sm:$0xff] }
 0x69a   : > { %v4288_v34 = vrot.slane %v4284_v28, %v6538_v49  ;;  %v8526_v28 = vld [vmem:[#allocation13_spill] sm:$0xff] }
 0x69c   : > { %v4289_v39 = vmul.f32 %v6137_v43, %v4288_v34  ;;  %v4290_v25 = vmul.f32 %v6138_v48, %v4288_v34  ;;  %v4292_v36 = vmul.f32 %v6139_v52, %v4288_v34  ;;  %v4291_v11 = vmul.f32 %v6140_v16, %v4288_v34  ;;  %v8527_v43 = vld [vmem:[#allocation30_spill] sm:$0xff] }
 0x69d   : > { %v4294_v59 = vmul.f32 %v6141_v7, %v4288_v34  ;;  %v4293_v27 = vmul.f32 %v6142_v57, %v4288_v34  ;;  %v4296_v46 = vmul.f32 %v6143_v44, %v4288_v34  ;;  %v4295_v51 = vmul.f32 %v6144_v19, %v4288_v34 }
 0x69e   : > { %v4458_v20 = vadd.f32 %v4419_v17, %v4289_v39  ;;  %v4459_v49 = vadd.f32 %v8177_v4, %v4290_v25  ;;  %v4461_v63 = vadd.f32 %v5489_v26, %v4292_v36  ;;  %v4460_v38 = vadd.f32 %v4429_v53, %v4291_v11  ;;  %v8520_v26 = vld [vmem:[#allocation10_spill] sm:$0xff] }
 0x69f   : > { %v4463_v24 = vadd.f32 %v5492_v33, %v4294_v59  ;;  %v4462_v55 = vadd.f32 %v4439_v5, %v4293_v27  ;;  %v4465_v35 = vadd.f32 %v5495_v40, %v4296_v46  ;;  %v4464_v12 = vadd.f32 %v4449_v54, %v4295_v51  ;;  %v8529_v36 = vld [vmem:[#allocation38_spill] sm:$0xff] }
 0x6a0   : > { %4466 = vst.msk [vmem:[#allocation2] sm:$0xff] %vm595_vm0, %v4458_v20  ;;  %4467 = vst.msk [vmem:[#allocation2 + $0x8] sm:$0xff] %vm595_vm0, %v4459_v49  ;;  %v1767_v4 = vstv %s8005_s10 }
 0x6a1   : > { %4469 = vst.msk [vmem:[#allocation2 + $0x18] sm:$0xff] %vm595_vm0, %v4461_v63  ;;  %4468 = vst.msk [vmem:[#allocation2 + $0x10] sm:$0xff] %vm595_vm0, %v4460_v38  ;;  %v1769_v17 = vmul.f32 %v8014_v1, %v1767_v4  ;;  %v1770_v33 = vmul.f32 %v8027_v37, %v1767_v4  ;;  %v8521_v1 = vld [vmem:[#allocation32_spill] sm:$0xff]  ;;  %v1771_v6 = vmul.f32 %v8038_v2, %v1767_v4 }
 0x6a2   : > { %4471 = vst.msk [vmem:[#allocation2 + $0x28] sm:$0xff] %vm595_vm0, %v4463_v24  ;;  %4470 = vst.msk [vmem:[#allocation2 + $0x20] sm:$0xff] %vm595_vm0, %v4462_v55  ;;  %v1772_v37 = vmul.f32 %v8046_v41, %v1767_v4  ;;  %v1773_v0 = vmul.f32 %v8053_v23, %v1767_v4  ;;  %v1774_v13 = vmul.f32 %v8060_v14, %v1767_v4  ;;  %v8528_v14 = vld [vmem:[#allocation37_spill] sm:$0xff] }
 0x6a3   : > { %4473 = vst.msk [vmem:[#allocation2 + $0x38] sm:$0xff] %vm595_vm0, %v4465_v35  ;;  %4472 = vst.msk [vmem:[#allocation2 + $0x30] sm:$0xff] %vm595_vm0, %v4464_v12  ;;  %v1777_v53 = vadd.f32 %v1769_v17, %v8520_v26  ;;  %v1778_v60 = vadd.f32 %v1770_v33, %v8521_v1  ;;  %v1779_v8 = vadd.f32 %v1771_v6, %v8522_v62 }
 0x6a4   : > { %v1780_v2 = vadd.f32 %v1772_v37, %v8523_v18  ;;  %v1781_v21 = vadd.f32 %v1773_v0, %v8524_v50  ;;  %v1782_v23 = vadd.f32 %v1774_v13, %v8525_v32  ;;  %v1775_v34 = vmul.f32 %v8526_v28, %v1767_v4 }
 0x6a5   : > { %v1776_v39 = vmul.f32 %v8527_v43, %v1767_v4 }
 0x6a6   : > { %v1783_v52 = vadd.f32 %v1775_v34, %v8528_v14 }
 0x6a7   : > { %v1784_v16 = vadd.f32 %v1776_v39, %v8529_v36 }
 0x6af   : > { %v2301_v5 = vpop.permute.xlu0 %2300 }
 0x6b0   : > { %v2325_v40 = vsel %vm2324_vm5, %v1777_v53, %v2301_v5 }
 0x6b1   : > { %2531 = vst.msk [vmem:[%s8232_s27] sm:$0xff] %vm595_vm0, %v2325_v40 }
 0x6b3   : > { %v2303_v54 = vpop.permute.xlu1 %2302 }
 0x6b4   : > { %v2326_v15 = vsel %vm2324_vm5, %v1778_v60, %v2303_v54 }
 0x6b5   : > { %2532 = vst.msk [vmem:[%s8232_s27 + $0x8] sm:$0xff] %vm595_vm0, %v2326_v15 }
 0x6b7   : > { %v2305_v10 = vpop.permute.xlu0 %2304 }
 0x6b8   : > { %v2327_v61 = vsel %vm2324_vm5, %v1779_v8, %v2305_v10  ;;  %v4474_v53 = vld [vmem:[%s8232_s27] sm:$0xff] }
 0x6b9   : > { %2533 = vst.msk [vmem:[%s8232_s27 + $0x10] sm:$0xff] %vm595_vm0, %v2327_v61 }
 0x6bb   : > { %v2307_v29 = vpop.permute.xlu1 %2306 }
 0x6bc   : > { %v2328_v45 = vsel %vm2324_vm5, %v1780_v2, %v2307_v29  ;;  %v4475_v44 = vld [vmem:[%s8232_s27 + $0x8] sm:$0xff] }
 0x6bd   : > { %2534 = vst.msk [vmem:[%s8232_s27 + $0x18] sm:$0xff] %vm595_vm0, %v2328_v45 }
 0x6bf   : > { %v2309_v41 = vpop.permute.xlu0 %2308 }
 0x6c0   : > { %v2329_v58 = vsel %vm2324_vm5, %v1781_v21, %v2309_v41  ;;  %v4476_v40 = vld [vmem:[%s8232_s27 + $0x10] sm:$0xff] }
 0x6c1   : > { %2535 = vst.msk [vmem:[%s8232_s27 + $0x20] sm:$0xff] %vm595_vm0, %v2329_v58 }
 0x6c3   : > { %v2311_v48 = vpop.permute.xlu1 %2310 }
 0x6c4   : > { %v2330_v25 = vsel %vm2324_vm5, %v1782_v23, %v2311_v48  ;;  %v4477_v20 = vld [vmem:[%s8232_s27 + $0x18] sm:$0xff] }
 0x6c5   : > { %2536 = vst.msk [vmem:[%s8232_s27 + $0x28] sm:$0xff] %vm595_vm0, %v2330_v25 }
 0x6c7   : > { %v2313_v11 = vpop.permute.xlu0 %2312  ;;  %v2315_v7 = vpop.permute.xlu1 %2314 }
 0x6c8   : > { %v2331_v59 = vsel %vm2324_vm5, %v1783_v52, %v2313_v11  ;;  %v2332_v57 = vsel %vm2324_vm5, %v1784_v16, %v2315_v7  ;;  %v4478_v60 = vld [vmem:[%s8232_s27 + $0x20] sm:$0xff] }
 0x6c9   : > { %2537 = vst.msk [vmem:[%s8232_s27 + $0x30] sm:$0xff] %vm595_vm0, %v2331_v59  ;;  %2538 = vst.msk [vmem:[%s8232_s27 + $0x38] sm:$0xff] %vm595_vm0, %v2332_v57 }
 0x6cb   : > { %v4247_v27 = vpop.permute.xlu1 %4246 }
 0x6cc   : > { %v4269_v46 = vsel %vm2324_vm5, %v8173_v42, %v4247_v27  ;;  %v4479_v24 = vld [vmem:[%s8232_s27 + $0x28] sm:$0xff] }
 0x6cd   : > { %v4483_v19 = vadd.f32 %v4475_v44, %v4269_v46 }
 0x6cf   : > { %4491 = vst.msk [vmem:[%s8232_s27 + $0x8] sm:$0xff] %vm595_vm0, %v4483_v19  ;;  %v4251_v51 = vpop.permute.xlu1 %4250 }
 0x6d0   : > { %v4271_v49 = vsel %vm2324_vm5, %v8202_v47, %v4251_v51  ;;  %v4481_v12 = vld [vmem:[%s8232_s27 + $0x38] sm:$0xff]  ;;  %v4480_v62 = vld [vmem:[%s8232_s27 + $0x30] sm:$0xff] }
 0x6d1   : > { %v4485_v63 = vadd.f32 %v4477_v20, %v4271_v49 }
 0x6d3   : > { %4493 = vst.msk [vmem:[%s8232_s27 + $0x18] sm:$0xff] %vm595_vm0, %v4485_v63  ;;  %v4255_v38 = vpop.permute.xlu1 %4254 }
 0x6d4   : > { %v4273_v42 = vsel %vm2324_vm5, %v8207_v56, %v4255_v38 }
 0x6d5   : > { %v4487_v55 = vadd.f32 %v4479_v24, %v4273_v42 }
 0x6d7   : > { %4495 = vst.msk [vmem:[%s8232_s27 + $0x28] sm:$0xff] %vm595_vm0, %v4487_v55  ;;  %v4259_v35 = vpop.permute.xlu1 %4258 }
 0x6d8   : > { %v4275_v47 = vsel %vm2324_vm5, %v8212_v9, %v4259_v35 }
 0x6d9   : > { %v4489_v4 = vadd.f32 %v4481_v12, %v4275_v47  ;;  %v4245_v17 = vpop.permute.xlu0 %4244 }
 0x6da   : > { %v4268_v26 = vsel %vm2324_vm5, %v8192_v3, %v4245_v17 }
 0x6db   : > { %4497 = vst.msk [vmem:[%s8232_s27 + $0x38] sm:$0xff] %vm595_vm0, %v4489_v4  ;;  %v4482_v56 = vadd.f32 %v4474_v53, %v4268_v26 }
 0x6dd   : > { %4490 = vst.msk [vmem:[%s8232_s27] sm:$0xff] %vm595_vm0, %v4482_v56  ;;  %v4249_v33 = vpop.permute.xlu0 %4248 }
 0x6de   : > { %v4270_v5 = vsel %vm2324_vm5, %v8197_v22, %v4249_v33 }
 0x6df   : > { %v4484_v9 = vadd.f32 %v4476_v40, %v4270_v5 }
 0x6e1   : > { %4492 = vst.msk [vmem:[%s8232_s27 + $0x10] sm:$0xff] %vm595_vm0, %v4484_v9  ;;  %v4253_v1 = vpop.permute.xlu0 %4252 }
 0x6e2   : > { %v4272_v3 = vsel %vm2324_vm5, %v8181_v31, %v4253_v1 }
 0x6e3   : > { %v4486_v6 = vadd.f32 %v4478_v60, %v4272_v3 }
 0x6e5   : > { %4494 = vst.msk [vmem:[%s8232_s27 + $0x20] sm:$0xff] %vm595_vm0, %v4486_v6 }
 0x6e7   : > { %v4257_v54 = vpop.permute.xlu0 %4256 }
 0x6e8   : > { %v4274_v15 = vsel %vm2324_vm5, %v8187_v30, %v4257_v54 }
 0x6e9   : > { %v4488_v8 = vadd.f32 %v4480_v62, %v4274_v15 }
 0x6eb   : > { %4496 = vst.msk [vmem:[%s8232_s27 + $0x30] sm:$0xff] %vm595_vm0, %v4488_v8 }
 0x6ec PF: > { %s19_s13 = sadd.s32 1, %s6183_s13   ;;  %s8530_s30 = smov %s6175_s11 }
 0x6ed   : > { %p16_p9 = scmp.ge.s32.totalorder %s19_s13, 6   ;;  %s8531_s10 = smov %s6179_s12 }
 0x6ee   : > { %s8532_s11 = smov %s8535_s14  ;;  %s8533_s12 = smov %s8539_s15 }
 0x6ef   :  { %18 = sbr.rel (!%p16_p9) target bundleno = 3 (0x3), region = 110 }

// kernel: vss_decoder_layer.25
= control target key start
LH: loop header
LB: loop body
LE: loop exit
PB: predicated region body
PF: predicated region fallthrough
CT: control target
= control target key end

     0   :  { %13 = vsyncpa [#allocation5], 0  ;;  %s2966_s27 = smov 0   ;;  %s2968_s28 = smov 0   ;;  %s4395_s0 = inlined_call_operand.vmem [shape: f32[128,32], index: 0, kind: input, shape index: {}]   ;;  %s4396_s1 = inlined_call_operand.vmem [shape: f32[128,32], index: 1, kind: input, shape index: {}]   ;;  %s4397_s2 = inlined_call_operand.vmem [shape: bf16[32,2048], index: 2, kind: input, shape index: {}]   ;;  %s4398_s3 = inlined_call_operand.vmem [shape: f32[1,2048], index: 3, kind: input, shape index: {}]   ;;  %s4399_s4 = inlined_call_operand.vmem [shape: bf16[2048,32], index: 4, kind: input, shape index: {}]   ;;  %s4400_s5 = inlined_call_operand.vmem [shape: f32[1,32], index: 5, kind: input, shape index: {}]   ;;  %s4401_s6 = inlined_call_operand.vmem [shape: f32[1,32], index: 6, kind: input, shape index: {}]   ;;  %s4402_s7 = inlined_call_operand.vmem [shape: f32[1,32], index: 7, kind: input, shape index: {}]   ;;  %s4403_s8 = inlined_call_operand.hbm [shape: f32[128,32], index: 8, kind: output, shape index: {}]  }
   0x1   :  { %s2970_s29 = smov 0   ;;  %s2972_s30 = smov 0  }
   0x2   :  { %s2974_s9 = smov 0  }
   0x3 LB: > { %s2384_s10 = sadd.s32 4294967295, %s2914_s9   ;;  %s28_s11 = sadd.s32 1, %s2910_s30  ;;  %s2914_s9 = sphi %s2974_s9, %s19_s9   ;;  %s2910_s30 = sphi %s2972_s30, %s4662_s30   ;;  %s2906_s29 = sphi %s2970_s29, %s4661_s29   ;;  %s2902_s28 = sphi %s2968_s28, %s4660_s28   ;;  %s2898_s27 = sphi %s2966_s27, %s4659_s27  }
   0x4   : > { %p29_p0 = scmp.ge.s32.totalorder %s28_s11, 4  ;;  %p97_p1 = scmp.ne.s32.totalorder %s2902_s28, %s2898_s27 }
   0x5   : > { %p98_p2 = scmp.eq.s32.totalorder %s2914_s9, 0  ;;  %s90_s13 = sadd.s32 1, %s2902_s28 }
   0x6   : > { %s4664_s11 = smov (%p29_p0, %s28_s11), 0  ;;  %p2388_p5 = scmp.ge.s32.totalorder %s2914_s9, 4 }
   0x7   : > { %p99_p3 = por %p98_p2, %p97_p1  ;;  %s87_s12 = ssub.s32 %s2910_s30, %s4664_s11 }
   0x8   : > { %p88_p4 = scmp.eq.s32.totalorder %s87_s12, 0  ;;  %291 = sbr.rel (%p2388_p5) target bundleno = 23 (0x17), region = 36 }
   0xa   : > { %s3002_s14 = scalar_select %p88_p4, %s2902_s28, %s90_s13  }
   0xf   : > { %294 = sbr.rel (!%p99_p3) target bundleno = 23 (0x17), region = 40  ;;  %s296_s15 = sand.u32 (%p99_p3), 1, %s2902_s28  }
  0x10   : > { %s2462_s16 = sshll.u32 (%p99_p3), %s2910_s30, 4  ;;  %s2389_s17 = sshll.u32 (%p99_p3), %s296_s15, 6 }
  0x11   : > { %s301_s20 = scalar_lea.vmem (%p99_p3), %s4397_s2, %s2462_s16  ;;  %s298_s21 = scalar_lea.vmem (%p99_p3), [#allocation3], %s2389_s17 }
  0x12   : > { %v314_v0 = vld [vmem:[%s301_s20] sm:$0xff] (%p99_p3)  ;;  %v316_v1 = vld [vmem:[%s301_s20 + $0x8] sm:$0xff] (%p99_p3) }
  0x13   : > { %v318_v2 = vld [vmem:[%s301_s20 + $0x40] sm:$0xff] (%p99_p3)  ;;  %315 = vst [vmem:[%s298_s21] sm:$0xff] (%p99_p3), %v314_v0  ;;  %317 = vst [vmem:[%s298_s21 + $0x8] sm:$0xff] (%p99_p3), %v316_v1  ;;  %v320_v3 = vld [vmem:[%s301_s20 + $0x48] sm:$0xff] (%p99_p3) }
  0x14   : > { %319 = vst [vmem:[%s298_s21 + $0x10] sm:$0xff] (%p99_p3), %v318_v2  ;;  %v322_v4 = vld [vmem:[%s301_s20 + $0x80] sm:$0xff] (%p99_p3)  ;;  %v324_v5 = vld [vmem:[%s301_s20 + $0x88] sm:$0xff] (%p99_p3)  ;;  %321 = vst [vmem:[%s298_s21 + $0x18] sm:$0xff] (%p99_p3), %v320_v3 }
  0x15   : > { %323 = vst [vmem:[%s298_s21 + $0x20] sm:$0xff] (%p99_p3), %v322_v4  ;;  %325 = vst [vmem:[%s298_s21 + $0x28] sm:$0xff] (%p99_p3), %v324_v5  ;;  %v326_v6 = vld [vmem:[%s301_s20 + $0xc0] sm:$0xff] (%p99_p3)  ;;  %v328_v7 = vld [vmem:[%s301_s20 + $0xc8] sm:$0xff] (%p99_p3) }
  0x16   : > { %327 = vst [vmem:[%s298_s21 + $0x30] sm:$0xff] %v326_v6  ;;  %329 = vst [vmem:[%s298_s21 + $0x38] sm:$0xff] %v328_v7 }
  0x17 PF: > { %p2392_p6 = scmp.ge.s32.totalorder %s2914_s9, 1  ;;  %p351_p7 = scmp.lt.s32.totalorder %s2914_s9, 5 }
  0x19   : > { %p352_p8 = pnand %p2392_p6, %p351_p7 }
  0x1b   : > { %355 = sbr.rel (%p352_p8) target bundleno = 1023 (0x3ff), region = 71 }
  0x22   : > { %s358_s22 = sand.u32 1, %s2898_s27   ;;  %s2394_s23 = sshll.u32 %s2906_s29, 2 }
  0x23   : > { %s2393_s24 = sshll.u32 %s358_s22, 6  ;;  %p419_p9 = scmp.lt.s32.totalorder %s2394_s23, 15 }
  0x24   : > { %s2395_s25 = sshll.u32 %s2906_s29, 6  ;;  %s3026_s27 = scalar_lea.vmem [#allocation3], %s2393_s24 }
  0x25   : > { %s4666_s23 = smov (!%p419_p9, %s2394_s23), 15  ;;  %p424_p10 = scmp.lt.s32.totalorder %s2395_s25, 255 }
  0x26   : > { %s421_s13 = scalar_lea.vmem %s4398_s3, %s4666_s23  ;;  %p2397_p11 = scmp.ne.s32.totalorder %s2906_s29, 0 }
  0x27   : > { %s4668_s25 = smov (!%p424_p10, %s2395_s25), 255  ;;  %vm435_vm0 = vcmask (!%p2397_p11), 261120   ;;  %v2916_v8 = vmov (!%p2397_p11), 0.0  }
  0x28   : > { %s2396_s15 = sshll.u32 %s4668_s25, 2  ;;  %434 = sbr.rel (%p2397_p11) target bundleno = 48 (0x30), region = 79  ;;  %436 = vst.msk [vmem:[#allocation2] sm:$0xff] (!%p2397_p11), %vm435_vm0, %v2916_v8  ;;  %437 = vst.msk [vmem:[#allocation2 + $0x8] sm:$0xff] (!%p2397_p11), %vm435_vm0, %v2916_v8 }
  0x29   : > { %s3024_s18 = scalar_lea.vmem %s4399_s4, %s2396_s15  ;;  %438 = vst.msk [vmem:[#allocation2 + $0x10] sm:$0xff] (!%p2397_p11), %vm435_vm0, %v2916_v8  ;;  %439 = vst.msk [vmem:[#allocation2 + $0x18] sm:$0xff] (!%p2397_p11), %vm435_vm0, %v2916_v8 }
  0x2a   : > { %440 = vst.msk [vmem:[#allocation2 + $0x20] sm:$0xff] (!%p2397_p11), %vm435_vm0, %v2916_v8  ;;  %441 = vst.msk [vmem:[#allocation2 + $0x28] sm:$0xff] (!%p2397_p11), %vm435_vm0, %v2916_v8 }
  0x2b   : > { %442 = vst.msk [vmem:[#allocation2 + $0x30] sm:$0xff] (!%p2397_p11), %vm435_vm0, %v2916_v8  ;;  %443 = vst.msk [vmem:[#allocation2 + $0x38] sm:$0xff] (!%p2397_p11), %vm435_vm0, %v2916_v8 }
  0x2c   : > { %444 = vst.msk [vmem:[#allocation2 + $0x40] sm:$0xff] (!%p2397_p11), %vm435_vm0, %v2916_v8  ;;  %445 = vst.msk [vmem:[#allocation2 + $0x48] sm:$0xff] (!%p2397_p11), %vm435_vm0, %v2916_v8 }
  0x2d   : > { %446 = vst.msk [vmem:[#allocation2 + $0x50] sm:$0xff] (!%p2397_p11), %vm435_vm0, %v2916_v8  ;;  %447 = vst.msk [vmem:[#allocation2 + $0x58] sm:$0xff] (!%p2397_p11), %vm435_vm0, %v2916_v8 }
  0x2e   : > { %448 = vst.msk [vmem:[#allocation2 + $0x60] sm:$0xff] (!%p2397_p11), %vm435_vm0, %v2916_v8  ;;  %449 = vst.msk [vmem:[#allocation2 + $0x68] sm:$0xff] (!%p2397_p11), %vm435_vm0, %v2916_v8 }
  0x2f   : > { %450 = vst.msk [vmem:[#allocation2 + $0x70] sm:$0xff] %vm435_vm0, %v2916_v8  ;;  %451 = vst.msk [vmem:[#allocation2 + $0x78] sm:$0xff] %vm435_vm0, %v2916_v8 }
  0x30 PF: > { %v2642_v9 = vld [vmem:[%s3026_s27 + $0x4] ss:$16 sps:$4 sm:$0xff]   ;;  %v2644_v10 = vld [vmem:[%s3026_s27 + $0xc] ss:$16 sps:$4 sm:$0xff]   ;;  %v2917_v11 = vmov 0   ;;  %vm578_vm1 = vcmask 261120  }
  0x31   : > { %635 = vmatprep.mubr.bf16.mxu0 %v2917_v11  ;;  %748 = vmatprep.mubr.bf16.mxu1 %v2917_v11  ;;  %v2646_v12 = vld [vmem:[%s3026_s27] ss:$16 sps:$4 sm:$0xff]   ;;  %v2647_v13 = vld [vmem:[%s3026_s27 + $0x8] ss:$16 sps:$4 sm:$0xff]   ;;  %v2648_v14 = vld [vmem:[%s3026_s27 + $0x24] ss:$16 sps:$4 sm:$0xff]  }
  0x32   : > { %603 = vmatprep.subr.bf16.mxu0 %v2642_v9  ;;  %716 = vmatprep.subr.bf16.mxu1 %v2644_v10  ;;  %v2650_v15 = vld [vmem:[%s3026_s27 + $0x2c] ss:$16 sps:$4 sm:$0xff]   ;;  %v2652_v16 = vld [vmem:[%s3026_s27 + $0x20] ss:$16 sps:$4 sm:$0xff]   ;;  %v2653_v17 = vld [vmem:[%s3026_s27 + $0x28] ss:$16 sps:$4 sm:$0xff]  }
  0x33   : > { %604 = vmatpush1.bf16.msra.mxu0 %v2646_v12  ;;  %717 = vmatpush1.bf16.msra.mxu1 %v2647_v13  ;;  %v452_v18 = vld [vmem:[%s4395_s0] sm:$0xff]  ;;  %v453_v19 = vld [vmem:[%s4395_s0 + $0x8] sm:$0xff]  ;;  %v454_v24 = vld [vmem:[%s4395_s0 + $0x10] sm:$0xff]  ;;  %p2454_p12 = scmp.ne.s32.totalorder %s2906_s29, 3 }
  0x34   : > { %605 = vmatprep.subr.bf16.mxu0 %v2648_v14  ;;  %718 = vmatprep.subr.bf16.mxu1 %v2650_v15  ;;  %v468_v20 = vld [vmem:[%s4396_s1] sm:$0xff]  ;;  %v469_v21 = vld [vmem:[%s4396_s1 + $0x8] sm:$0xff]  ;;  %v455_v25 = vld [vmem:[%s4395_s0 + $0x18] sm:$0xff] }
  0x35   : > { %v3067_v22 = vadd.f32 %v468_v20, %v452_v18  ;;  %v3069_v23 = vadd.f32 %v469_v21, %v453_v19  ;;  %v470_v26 = vld [vmem:[%s4396_s1 + $0x10] sm:$0xff]  ;;  %v471_v27 = vld [vmem:[%s4396_s1 + $0x18] sm:$0xff]  ;;  %v456_v31 = vld [vmem:[%s4395_s0 + $0x20] sm:$0xff] }
  0x36   : > { %v3087_v29 = vadd.f32 %v470_v26, %v454_v24  ;;  %v3089_v30 = vadd.f32 %v471_v27, %v455_v25  ;;  %v457_v33 = vld [vmem:[%s4395_s0 + $0x28] sm:$0xff]  ;;  %v472_v34 = vld [vmem:[%s4396_s1 + $0x20] sm:$0xff]  ;;  %v458_v44 = vld [vmem:[%s4395_s0 + $0x30] sm:$0xff] }
  0x37   : > { %4482 = vst [vmem:[#allocation7_spill] sm:$0xff] %v3067_v22  ;;  %4483 = vst [vmem:[#allocation8_spill] sm:$0xff] %v3069_v23  ;;  %606 = vmatpush1.bf16.msra.mxu0 %v2652_v16  ;;  %719 = vmatpush1.bf16.msra.mxu1 %v2653_v17  ;;  %v500_v28 = vpack.c.bf16 %v3069_v23, %v3067_v22  ;;  %v473_v35 = vld [vmem:[%s4396_s1 + $0x28] sm:$0xff]  ;;  %v2654_v36 = vld [vmem:[%s3024_s18 + $0x40] sm:$0xff]   ;;  %v3112_v39 = vadd.f32 %v472_v34, %v456_v31 }
  0x38   : > { %4484 = vst [vmem:[#allocation9_spill] sm:$0xff] %v3087_v29  ;;  %4485 = vst [vmem:[#allocation10_spill] sm:$0xff] %v3089_v30  ;;  %v501_v32 = vpack.c.bf16 %v3089_v30, %v3087_v29  ;;  %v2655_v37 = vld [vmem:[%s3024_s18 + $0xc0] sm:$0xff]   ;;  %2463 = vmatprep.subr.bf16.mxu0 %v2654_v36  ;;  %v3114_v40 = vadd.f32 %v473_v35, %v457_v33  ;;  %v2658_v42 = vld [vmem:[%s3024_s18 + $0x48] sm:$0xff]  }
  0x39   : > { %v2656_v38 = vld [vmem:[%s3024_s18] sm:$0xff]   ;;  %4486 = vst [vmem:[#allocation11_spill] sm:$0xff] %v3112_v39  ;;  %2527 = vmatprep.subr.bf16.mxu1 %v2655_v37  ;;  %v2659_v43 = vld [vmem:[%s3024_s18 + $0xc8] sm:$0xff]   ;;  %v459_v45 = vld [vmem:[%s4395_s0 + $0x38] sm:$0xff] }
  0x3a   : > { %2406 = vmatmul.mubr.msk.bf16.vlgmr.msra.gmra.mrb[0].mxu0 %vm578_vm1, %v500_v28  ;;  %2414 = vmatmul.mubr.msk.bf16.vlgmr.msra.gmra.mrb[0].mxu1 %vm578_vm1, %v500_v28  ;;  %4487 = vst [vmem:[#allocation12_spill] sm:$0xff] %v3114_v40  ;;  %v2657_v41 = vld [vmem:[%s3024_s18 + $0x80] sm:$0xff]   ;;  %v474_v46 = vld [vmem:[%s4396_s1 + $0x30] sm:$0xff]  ;;  %v475_v47 = vld [vmem:[%s4396_s1 + $0x38] sm:$0xff]  ;;  %v502_v49 = vpack.c.bf16 %v3114_v40, %v3112_v39 }
  0x3b   : > { %645 = vmatprep.mubr.bf16.mxu0 %v2917_v11  ;;  %758 = vmatprep.mubr.bf16.mxu1 %v2917_v11  ;;  %v2660_v48 = vld [vmem:[%s3024_s18 + $0x8] sm:$0xff]   ;;  %v2662_v51 = vld [vmem:[%s3024_s18 + $0x50] sm:$0xff]   ;;  %v3142_v54 = vadd.f32 %v474_v46, %v458_v44  ;;  %v3144_v55 = vadd.f32 %v475_v47, %v459_v45  ;;  %v2666_v57 = vld [vmem:[%s3024_s18 + $0x58] sm:$0xff]  }
  0x3c   : > { %2464 = vmatpush3.bf16.msra.mxu0 %v2656_v38  ;;  %2528 = vmatpush3.bf16.msra.mxu1 %v2657_v41  ;;  %v2661_v50 = vld [vmem:[%s3024_s18 + $0x88] sm:$0xff]   ;;  %v2663_v52 = vld [vmem:[%s3024_s18 + $0xd0] sm:$0xff]   ;;  %v2667_v58 = vld [vmem:[%s3024_s18 + $0xd8] sm:$0xff]  }
  0x3d   : > { %2465 = vmatprep.subr.bf16.mxu0 %v2658_v42  ;;  %2529 = vmatprep.subr.bf16.mxu1 %v2659_v43  ;;  %v2664_v53 = vld [vmem:[%s3024_s18 + $0x10] sm:$0xff]   ;;  %4488 = vst [vmem:[#allocation13_spill] sm:$0xff] %v3142_v54  ;;  %4489 = vst [vmem:[#allocation14_spill] sm:$0xff] %v3144_v55  ;;  %v460_v59 = vld [vmem:[%s4395_s0 + $0x40] sm:$0xff]  ;;  %v503_v63 = vpack.c.bf16 %v3144_v55, %v3142_v54 }
  0x3e   : > { %v2665_v56 = vld [vmem:[%s3024_s18 + $0x90] sm:$0xff]   ;;  %v461_v60 = vld [vmem:[%s4395_s0 + $0x48] sm:$0xff]  ;;  %v476_v61 = vld [vmem:[%s4396_s1 + $0x40] sm:$0xff] }
  0x3f   : > { %v2668_v62 = vld [vmem:[%s3024_s18 + $0x18] sm:$0xff]   ;;  %v477_v1 = vld [vmem:[%s4396_s1 + $0x48] sm:$0xff]  ;;  %v3169_v2 = vadd.f32 %v476_v61, %v460_v59  ;;  %v462_v4 = vld [vmem:[%s4395_s0 + $0x50] sm:$0xff] }
  0x40   : > { %2466 = vmatpush3.bf16.msra.mxu0 %v2660_v48  ;;  %2530 = vmatpush3.bf16.msra.mxu1 %v2661_v50  ;;  %v2669_v0 = vld [vmem:[%s3024_s18 + $0x98] sm:$0xff]   ;;  %v3171_v3 = vadd.f32 %v477_v1, %v461_v60  ;;  %v478_v6 = vld [vmem:[%s4396_s1 + $0x50] sm:$0xff]  ;;  %v464_v13 = vld [vmem:[%s4395_s0 + $0x60] sm:$0xff]  ;;  %v518_v48 = vlaneseq }
  0x41   : > { %2467 = vmatprep.subr.bf16.mxu0 %v2662_v51  ;;  %2531 = vmatprep.subr.bf16.mxu1 %v2663_v52  ;;  %4490 = vst [vmem:[#allocation15_spill] sm:$0xff] %v3169_v2  ;;  %v463_v5 = vld [vmem:[%s4395_s0 + $0x58] sm:$0xff]  ;;  %v3191_v9 = vadd.f32 %v478_v6, %v462_v4  ;;  %v465_v14 = vld [vmem:[%s4395_s0 + $0x68] sm:$0xff]  ;;  %v480_v15 = vld [vmem:[%s4396_s1 + $0x60] sm:$0xff] }
  0x42   : > { %2407 = vmatmul.mubr.msk.bf16.gmra.mrb[4].mxu0 %vm578_vm1, %v501_v32  ;;  %2415 = vmatmul.mubr.msk.bf16.gmra.mrb[4].mxu1 %vm578_vm1, %v501_v32  ;;  %4491 = vst [vmem:[#allocation16_spill] sm:$0xff] %v3171_v3  ;;  %v479_v7 = vld [vmem:[%s4396_s1 + $0x58] sm:$0xff]  ;;  %v504_v8 = vpack.c.bf16 %v3171_v3, %v3169_v2  ;;  %v481_v16 = vld [vmem:[%s4396_s1 + $0x68] sm:$0xff]  ;;  %v3213_v17 = vadd.f32 %v480_v15, %v464_v13  ;;  %v466_v20 = vld [vmem:[%s4395_s0 + $0x70] sm:$0xff] }
  0x43   : > { %655 = vmatprep.mubr.bf16.mxu0 %v2917_v11  ;;  %768 = vmatprep.mubr.bf16.mxu1 %v2917_v11  ;;  %4492 = vst [vmem:[#allocation17_spill] sm:$0xff] %v3191_v9  ;;  %v3193_v10 = vadd.f32 %v479_v7, %v463_v5  ;;  %v3215_v18 = vadd.f32 %v481_v16, %v465_v14  ;;  %v467_v21 = vld [vmem:[%s4395_s0 + $0x78] sm:$0xff]  ;;  %v482_v24 = vld [vmem:[%s4396_s1 + $0x70] sm:$0xff]  ;;  %v2670_v31 = vld [vmem:[%s3024_s18 + $0x60] sm:$0xff]  }
  0x44   : > { %2468 = vmatpush3.bf16.msra.mxu0 %v2664_v53  ;;  %2532 = vmatpush3.bf16.msra.mxu1 %v2665_v56  ;;  %4494 = vst [vmem:[#allocation19_spill] sm:$0xff] %v3213_v17  ;;  %v483_v25 = vld [vmem:[%s4396_s1 + $0x78] sm:$0xff]  ;;  %v3235_v26 = vadd.f32 %v482_v24, %v466_v20  ;;  %v2671_v32 = vld [vmem:[%s3024_s18 + $0xe0] sm:$0xff]   ;;  %v2675_v35 = vld [vmem:[%s3024_s18 + $0xe8] sm:$0xff]  }
  0x45   : > { %2469 = vmatprep.subr.bf16.mxu0 %v2666_v57  ;;  %2533 = vmatprep.subr.bf16.mxu1 %v2667_v58  ;;  %4493 = vst [vmem:[#allocation18_spill] sm:$0xff] %v3193_v10  ;;  %v505_v12 = vpack.c.bf16 %v3193_v10, %v3191_v9  ;;  %4495 = vst [vmem:[#allocation20_spill] sm:$0xff] %v3215_v18  ;;  %v506_v19 = vpack.c.bf16 %v3215_v18, %v3213_v17  ;;  %v2672_v33 = vld [vmem:[%s3024_s18 + $0x20] sm:$0xff]   ;;  %v2676_v36 = vld [vmem:[%s3024_s18 + $0x28] sm:$0xff]  }
  0x46   : > { %4496 = vst [vmem:[#allocation21_spill] sm:$0xff] %v3235_v26  ;;  %v3237_v27 = vadd.f32 %v483_v25, %v467_v21  ;;  %v2673_v34 = vld [vmem:[%s3024_s18 + $0xa0] sm:$0xff]   ;;  %v2677_v37 = vld [vmem:[%s3024_s18 + $0xa8] sm:$0xff]   ;;  %v2678_v38 = vld [vmem:[%s3024_s18 + $0x70] sm:$0xff]  }
  0x47   : > { %v2679_v41 = vld [vmem:[%s3024_s18 + $0xf0] sm:$0xff]   ;;  %v2682_v44 = vld [vmem:[%s3024_s18 + $0x78] sm:$0xff]   ;;  %v516_v52 = vld [vmem:[%s421_s13] sm:$0xf] }
  0x48   : > { %2470 = vmatpush3.bf16.msra.mxu0 %v2668_v62  ;;  %2534 = vmatpush3.bf16.msra.mxu1 %v2669_v0  ;;  %4497 = vst [vmem:[#allocation22_spill] sm:$0xff] %v3237_v27  ;;  %v507_v28 = vpack.c.bf16 %v3237_v27, %v3235_v26  ;;  %v2680_v42 = vld [vmem:[%s3024_s18 + $0x30] sm:$0xff]   ;;  %v2683_v45 = vld [vmem:[%s3024_s18 + $0xf8] sm:$0xff]  }
  0x49   : > { %2471 = vmatprep.subr.bf16.mxu0 %v2670_v31  ;;  %2535 = vmatprep.subr.bf16.mxu1 %v2671_v32  ;;  %v2681_v43 = vld [vmem:[%s3024_s18 + $0xb0] sm:$0xff]   ;;  %v2684_v46 = vld [vmem:[%s3024_s18 + $0x38] sm:$0xff]  }
  0x4a   : > { %2408 = vmatmul.mubr.msk.bf16.gmra.mrb[8].mxu0 %vm578_vm1, %v502_v49  ;;  %2416 = vmatmul.mubr.msk.bf16.gmra.mrb[8].mxu1 %vm578_vm1, %v502_v49  ;;  %v2685_v47 = vld [vmem:[%s3024_s18 + $0xb8] sm:$0xff]   ;;  %v519_v49 = vshrl.u32 %v518_v48, 7 }
  0x4b   : > { %665 = vmatprep.mubr.bf16.mxu0 %v2917_v11  ;;  %778 = vmatprep.mubr.bf16.mxu1 %v2917_v11 }
  0x4c   : > { %2472 = vmatpush3.bf16.msra.mxu0 %v2672_v33  ;;  %2536 = vmatpush3.bf16.msra.mxu1 %v2673_v34  ;;  %v520_v50 = vsub.s32 0, %v519_v49  ;;  %v528_v51 = vsub.s32 2, %v519_v49  ;;  %v524_v53 = vsub.s32 1, %v519_v49  ;;  %v532_v56 = vsub.s32 3, %v519_v49 }
  0x4d   : > { %2537 = vmatprep.subr.bf16.mxu1 %v2675_v35 }
  0x4e   : > { %v3266_v57 = vrot.slane %v516_v52, %v520_v50  ;;  %v3268_v58 = vrot.slane %v516_v52, %v528_v51  ;;  %v3270_v59 = vrot.slane %v516_v52, %v524_v53  ;;  %v3272_v60 = vrot.slane %v516_v52, %v532_v56 }
  0x50   : > { %2538 = vmatpush3.bf16.msra.mxu1 %v2677_v37 }
  0x51   : > { %2539 = vmatprep.subr.bf16.mxu1 %v2679_v41 }
  0x52   : > { %2409 = vmatmul.mubr.msk.bf16.gmra.mrb[12].mxu0 %vm578_vm1, %v503_v63  ;;  %2417 = vmatmul.mubr.msk.bf16.gmra.mrb[12].mxu1 %vm578_vm1, %v503_v63 }
  0x53   : > { %675 = vmatprep.mubr.bf16.mxu0 %v2917_v11  ;;  %788 = vmatprep.mubr.bf16.mxu1 %v2917_v11 }
  0x54   : > { %2540 = vmatpush3.bf16.msra.mxu1 %v2681_v43 }
  0x55   : > { %2541 = vmatprep.subr.bf16.mxu1 %v2683_v45 }
  0x58   : > { %2542 = vmatpush3.bf16.msra.mxu1 %v2685_v47 }
  0x5a   : > { %2410 = vmatmul.mubr.msk.bf16.gmra.mrb[16].mxu0 %vm578_vm1, %v504_v8  ;;  %2418 = vmatmul.mubr.msk.bf16.gmra.mrb[16].mxu1 %vm578_vm1, %v504_v8 }
  0x5b   : > { %685 = vmatprep.mubr.bf16.mxu0 %v2917_v11  ;;  %798 = vmatprep.mubr.bf16.mxu1 %v2917_v11 }
  0x62   : > { %2411 = vmatmul.mubr.msk.bf16.gmra.mrb[20].mxu0 %vm578_vm1, %v505_v12  ;;  %2419 = vmatmul.mubr.msk.bf16.gmra.mrb[20].mxu1 %vm578_vm1, %v505_v12 }
  0x63   : > { %695 = vmatprep.mubr.bf16.mxu0 %v2917_v11  ;;  %808 = vmatprep.mubr.bf16.mxu1 %v2917_v11 }
  0x6a   : > { %2412 = vmatmul.mubr.msk.bf16.gmra.mrb[24].mxu0 %vm578_vm1, %v506_v19  ;;  %2420 = vmatmul.mubr.msk.bf16.gmra.mrb[24].mxu1 %vm578_vm1, %v506_v19 }
  0x6b   : > { %705 = vmatprep.mubr.bf16.mxu0 %v2917_v11  ;;  %818 = vmatprep.mubr.bf16.mxu1 %v2917_v11  ;;  %v2674_v11 = vld [vmem:[%s3024_s18 + $0x68] sm:$0xff]  }
  0x6c   : > { %2473 = vmatprep.subr.bf16.mxu0 %v2674_v11 }
  0x6d   : > { %2474 = vmatpush3.bf16.msra.mxu0 %v2676_v36 }
  0x6e   : > { %2475 = vmatprep.subr.bf16.mxu0 %v2678_v38 }
  0x71   : > { %2476 = vmatpush3.bf16.msra.mxu0 %v2680_v42 }
  0x72   : > { %2413 = vmatmul.mubr.msk.bf16.gmra.mrb[28].mxu0 %vm578_vm1, %v507_v28  ;;  %2421 = vmatmul.mubr.msk.bf16.gmra.mrb[28].mxu1 %vm578_vm1, %v507_v28 }
  0x73   : > { %2477 = vmatprep.subr.bf16.mxu0 %v2682_v44 }
  0x75   : > { %2478 = vmatpush3.bf16.msra.mxu0 %v2684_v46 }
 0x10d   : > { %v637_v61 = vpop.f32.mrb[0].mxu0  ;;  %v750_v62 = vpop.f32.mrb[0].mxu1 }
 0x10e   : > { %v638_v63 = vadd.f32 %v637_v61, %v3266_v57  ;;  %v751_v0 = vadd.f32 %v750_v62, %v3268_v58  ;;  %v639_v1 = vpop.f32.mrb[1].mxu0  ;;  %v752_v4 = vpop.f32.mrb[1].mxu1 }
 0x10f   : > { %v3277_v5 = vadd.f32 %v639_v1, %v3270_v59  ;;  %v3280_v6 = vadd.f32 %v752_v4, %v3272_v60  ;;  %v641_v7 = vpop.f32.mrb[2].mxu0  ;;  %v754_v8 = vpop.f32.mrb[2].mxu1 }
 0x110   : > { %v893_v12 = vmul.f32 0.044715, %v638_v63  ;;  %v895_v13 = vmul.f32 0.044715, %v751_v0  ;;  %v642_v14 = vadd.f32 %v641_v7, %v3266_v57  ;;  %v755_v15 = vadd.f32 %v754_v8, %v3268_v58  ;;  %v643_v16 = vpop.f32.mrb[3].mxu0  ;;  %v756_v19 = vpop.f32.mrb[3].mxu1 }
 0x111   : > { %v894_v24 = vmul.f32 0.044715, %v3277_v5  ;;  %v896_v25 = vmul.f32 0.044715, %v3280_v6  ;;  %v3287_v34 = vadd.f32 %v643_v16, %v3270_v59  ;;  %v3290_v35 = vadd.f32 %v756_v19, %v3272_v60 }
 0x112   : > { %v957_v20 = vmul.f32 %v893_v12, %v638_v63  ;;  %v959_v21 = vmul.f32 %v895_v13, %v751_v0  ;;  %v897_v28 = vmul.f32 0.044715, %v642_v14  ;;  %v899_v33 = vmul.f32 0.044715, %v755_v15 }
 0x113   : > { %v958_v41 = vmul.f32 %v894_v24, %v3277_v5  ;;  %v960_v45 = vmul.f32 %v896_v25, %v3280_v6  ;;  %v3300_v51 = vmul.f32 0.5, %v638_v63  ;;  %v898_v56 = vmul.f32 0.044715, %v3287_v34 }
 0x114   : > { %v1021_v31 = vmul.f32 %v957_v20, %v638_v63  ;;  %v1023_v32 = vmul.f32 %v959_v21, %v751_v0  ;;  %v961_v11 = vmul.f32 %v897_v28, %v642_v14  ;;  %v963_v42 = vmul.f32 %v899_v33, %v755_v15 }
 0x115   : > { %v647_v36 = vpop.f32.mrb[4].mxu0  ;;  %v760_v37 = vpop.f32.mrb[4].mxu1  ;;  %v3303_v4 = vmul.f32 0.5, %v751_v0  ;;  %v900_v8 = vmul.f32 0.044715, %v3290_v35  ;;  %v3312_v19 = vmul.f32 %v958_v41, %v3277_v5  ;;  %v3315_v20 = vmul.f32 %v960_v45, %v3280_v6 }
 0x116   : > { %v1085_v38 = vadd.f32 %v1021_v31, %v638_v63  ;;  %v649_v43 = vpop.f32.mrb[5].mxu0  ;;  %v762_v44 = vpop.f32.mrb[5].mxu1  ;;  %v1025_v46 = vmul.f32 %v961_v11, %v642_v14  ;;  %v3295_v47 = vadd.f32 %v647_v36, %v3266_v57  ;;  %v3298_v48 = vadd.f32 %v760_v37, %v3268_v58 }
 0x117   : > { %v651_v49 = vpop.f32.mrb[6].mxu0  ;;  %v764_v50 = vpop.f32.mrb[6].mxu1  ;;  %v1087_v52 = vadd.f32 %v1023_v32, %v751_v0  ;;  %v1027_v53 = vmul.f32 %v963_v42, %v755_v15  ;;  %v3309_v63 = vadd.f32 %v649_v43, %v3270_v59  ;;  %v3317_v21 = vmul.f32 0.5, %v642_v14 }
 0x118   : > { %4498 = vst [vmem:[#allocation23_spill] sm:$0xff] %v3295_v47  ;;  %4499 = vst [vmem:[#allocation24_spill] sm:$0xff] %v3298_v48  ;;  %v653_v61 = vpop.f32.mrb[7].mxu0  ;;  %v766_v62 = vpop.f32.mrb[7].mxu1  ;;  %v1149_v1 = vmul.f32 0.7978846, %v1085_v38  ;;  %v1089_v7 = vadd.f32 %v1025_v46, %v642_v14  ;;  %v962_v25 = vmul.f32 %v898_v56, %v3287_v34  ;;  %v3323_v28 = vadd.f32 %v762_v44, %v3272_v60 }
 0x119   : > { %v1091_v12 = vadd.f32 %v1027_v53, %v755_v15  ;;  %v901_v13 = vmul.f32 0.044715, %v3295_v47  ;;  %v903_v16 = vmul.f32 0.044715, %v3298_v48  ;;  %v3319_v0 = vmul.f32 0.5, %v755_v15 }
 0x11a   : > { %v1151_v24 = vmul.f32 0.7978846, %v1087_v52  ;;  %4500 = vst [vmem:[#allocation25_spill] sm:$0xff] %v3323_v28  ;;  %v3326_v31 = vadd.f32 %v651_v49, %v3266_v57  ;;  %v1153_v32 = vmul.f32 0.7978846, %v1089_v7  ;;  %v964_v33 = vmul.f32 %v900_v8, %v3290_v35 }
 0x11b   : > { %v902_v11 = vmul.f32 0.044715, %v3309_v63  ;;  %v3331_v36 = vadd.f32 %v764_v50, %v3268_v58  ;;  %2686 = vtanh.f32 %v1149_v1  ;;  %v1155_v37 = vmul.f32 0.7978846, %v1091_v12 }
 0x11c   : > { %4501 = vst [vmem:[#allocation26_spill] sm:$0xff] %v3326_v31  ;;  %v965_v38 = vmul.f32 %v901_v13, %v3295_v47  ;;  %v967_v41 = vmul.f32 %v903_v16, %v3298_v48  ;;  %v904_v44 = vmul.f32 0.044715, %v3323_v28  ;;  %v3337_v45 = vadd.f32 %v653_v61, %v3270_v59 }
 0x11d   : > { %4502 = vst [vmem:[#allocation27_spill] sm:$0xff] %v3331_v36  ;;  %v657_v14 = vpop.f32.mrb[8].mxu0  ;;  %v770_v15 = vpop.f32.mrb[8].mxu1  ;;  %v3340_v46 = vadd.f32 %v766_v62, %v3272_v60  ;;  %2688 = vtanh.f32 %v1151_v24  ;;  %v905_v53 = vmul.f32 0.044715, %v3326_v31  ;;  %v3351_v61 = vmul.f32 %v962_v25, %v3287_v34 }
 0x11e   : > { %v659_v42 = vpop.f32.mrb[9].mxu0  ;;  %v772_v43 = vpop.f32.mrb[9].mxu1  ;;  %v3343_v49 = vadd.f32 %v657_v14, %v3266_v57  ;;  %v907_v56 = vmul.f32 0.044715, %v3331_v36  ;;  %v3348_v1 = vadd.f32 %v770_v15, %v3268_v58  ;;  %2690 = vtanh.f32 %v1153_v32 }
 0x11f   : > { %4503 = vst [vmem:[#allocation28_spill] sm:$0xff] %v3340_v46  ;;  %v661_v50 = vpop.f32.mrb[10].mxu0  ;;  %v774_v52 = vpop.f32.mrb[10].mxu1  ;;  %v966_v62 = vmul.f32 %v902_v11, %v3309_v63  ;;  %v906_v12 = vmul.f32 0.044715, %v3337_v45  ;;  %v3359_v14 = vadd.f32 %v659_v42, %v3270_v59  ;;  %2692 = vtanh.f32 %v1155_v37 }
 0x120   : > { %4504 = vst [vmem:[#allocation29_spill] sm:$0xff] %v3343_v49  ;;  %4505 = vst [vmem:[#allocation30_spill] sm:$0xff] %v3348_v1  ;;  %v663_v7 = vpop.f32.mrb[11].mxu0  ;;  %v776_v8 = vpop.f32.mrb[11].mxu1  ;;  %v908_v13 = vmul.f32 0.044715, %v3340_v46  ;;  %v3362_v15 = vmul.f32 %v964_v33, %v3290_v35  ;;  %v3365_v25 = vmul.f32 %v965_v38, %v3295_v47  ;;  %v3368_v32 = vmul.f32 %v967_v41, %v3298_v48 }
 0x121   : > { %v909_v16 = vmul.f32 0.044715, %v3343_v49  ;;  %v911_v24 = vmul.f32 0.044715, %v3348_v1  ;;  %4506 = vst [vmem:[#allocation31_spill] sm:$0xff] %v3359_v14  ;;  %v968_v11 = vmul.f32 %v904_v44, %v3323_v28  ;;  %v969_v27 = vmul.f32 %v905_v53, %v3326_v31 }
 0x122   : > { %4507 = vst [vmem:[#allocation32_spill] sm:$0xff] %v3365_v25  ;;  %4508 = vst [vmem:[#allocation33_spill] sm:$0xff] %v3368_v32  ;;  %v971_v26 = vmul.f32 %v907_v56, %v3331_v36  ;;  %v910_v18 = vmul.f32 0.044715, %v3359_v14  ;;  %v970_v42 = vmul.f32 %v906_v12, %v3337_v45  ;;  %v3376_v37 = vadd.f32 %v772_v43, %v3272_v60 }
 0x123   : > { %v3379_v33 = vadd.f32 %v661_v50, %v3266_v57  ;;  %v3382_v38 = vadd.f32 %v774_v52, %v3268_v58  ;;  %v3385_v44 = vmul.f32 %v966_v62, %v3309_v63  ;;  %v972_v53 = vmul.f32 %v908_v13, %v3340_v46 }
 0x124   : > { %4509 = vst [vmem:[#allocation34_spill] sm:$0xff] %v3376_v37  ;;  %v973_v56 = vmul.f32 %v909_v16, %v3343_v49  ;;  %v975_v12 = vmul.f32 %v911_v24, %v3348_v1  ;;  %v974_v9 = vmul.f32 %v910_v18, %v3359_v14  ;;  %v3392_v50 = vadd.f32 %v663_v7, %v3270_v59 }
 0x125   : > { %v667_v41 = vpop.f32.mrb[12].mxu0  ;;  %v780_v17 = vpop.f32.mrb[12].mxu1  ;;  %v3395_v52 = vadd.f32 %v776_v8, %v3272_v60  ;;  %v3403_v16 = vmul.f32 %v968_v11, %v3323_v28  ;;  %v3406_v24 = vmul.f32 %v969_v27, %v3326_v31  ;;  %v3409_v18 = vmul.f32 %v971_v26, %v3331_v36 }
 0x126   : > { %v669_v10 = vpop.f32.mrb[13].mxu0  ;;  %v782_v43 = vpop.f32.mrb[13].mxu1  ;;  %v3398_v3 = vadd.f32 %v667_v41, %v3266_v57  ;;  %v3412_v7 = vadd.f32 %v780_v17, %v3268_v58  ;;  %v3415_v41 = vmul.f32 %v970_v42, %v3337_v45  ;;  %v912_v54 = vmul.f32 0.044715, %v3376_v37 }
 0x127   : > { %v671_v62 = vpop.f32.mrb[14].mxu0  ;;  %v784_v2 = vpop.f32.mrb[14].mxu1  ;;  %4511 = vst [vmem:[#allocation36_spill] sm:$0xff] %v3403_v16  ;;  %4512 = vst [vmem:[#allocation37_spill] sm:$0xff] %v3406_v24  ;;  %v913_v40 = vmul.f32 0.044715, %v3379_v33  ;;  %v3423_v27 = vmul.f32 %v972_v53, %v3340_v46  ;;  %v3428_v30 = vadd.f32 %v669_v10, %v3270_v59  ;;  %v3433_v23 = vmul.f32 %v973_v56, %v3343_v49 }
 0x128   : > { %4510 = vst [vmem:[#allocation35_spill] sm:$0xff] %v3398_v3  ;;  %v3400_v13 = vpop.eup %2686  ;;  %4513 = vst [vmem:[#allocation38_spill] sm:$0xff] %v3409_v18  ;;  %v673_v8 = vpop.f32.mrb[15].mxu0  ;;  %v915_v11 = vmul.f32 0.044715, %v3382_v38  ;;  %v3436_v29 = vmul.f32 %v975_v12, %v3348_v1  ;;  %v3439_v22 = vmul.f32 %v974_v9, %v3359_v14  ;;  %v3445_v10 = vadd.f32 %v782_v43, %v3272_v60 }
 0x129   : > { %4514 = vst [vmem:[#allocation39_spill] sm:$0xff] %v3412_v7  ;;  %v786_v55 = vpop.f32.mrb[15].mxu1  ;;  %4515 = vst [vmem:[#allocation40_spill] sm:$0xff] %v3415_v41  ;;  %v3420_v39 = vpop.eup %2688  ;;  %v914_v26 = vmul.f32 0.044715, %v3392_v50  ;;  %v3448_v32 = vadd.f32 %v671_v62, %v3266_v57  ;;  %v976_v12 = vmul.f32 %v912_v54, %v3376_v37  ;;  %v3456_v1 = vadd.f32 %v784_v2, %v3268_v58 }
 0x12a   : > { %4516 = vst [vmem:[#allocation41_spill] sm:$0xff] %v3423_v27  ;;  %v916_v17 = vmul.f32 0.044715, %v3395_v52  ;;  %4517 = vst [vmem:[#allocation42_spill] sm:$0xff] %v3428_v30  ;;  %v3430_v42 = vpop.eup %2690  ;;  %v917_v53 = vmul.f32 0.044715, %v3398_v3  ;;  %v979_v9 = vmul.f32 %v915_v11, %v3382_v38  ;;  %v3467_v2 = vadd.f32 %v786_v55, %v3272_v60 }
 0x12b   : > { %4518 = vst [vmem:[#allocation43_spill] sm:$0xff] %v3433_v23  ;;  %4519 = vst [vmem:[#allocation44_spill] sm:$0xff] %v3436_v29  ;;  %v919_v18 = vmul.f32 0.044715, %v3412_v7  ;;  %v918_v36 = vmul.f32 0.044715, %v3428_v30  ;;  %v3450_v56 = vpop.eup %2692  ;;  %v977_v29 = vmul.f32 %v913_v40, %v3379_v33  ;;  %v3464_v40 = vadd.f32 %v673_v8, %v3270_v59 }
 0x12c   : > { %4520 = vst [vmem:[#allocation45_spill] sm:$0xff] %v3439_v22  ;;  %4521 = vst [vmem:[#allocation46_spill] sm:$0xff] %v3445_v10  ;;  %v978_v22 = vmul.f32 %v914_v26, %v3392_v50  ;;  %v980_v43 = vmul.f32 %v916_v17, %v3395_v52  ;;  %v920_v62 = vmul.f32 0.044715, %v3445_v10  ;;  %v921_v14 = vmul.f32 0.044715, %v3448_v32 }
 0x12d   : > { %4522 = vst [vmem:[#allocation47_spill] sm:$0xff] %v3448_v32  ;;  %4523 = vst [vmem:[#allocation48_spill] sm:$0xff] %v3456_v1  ;;  %v677_v23 = vpop.f32.mrb[16].mxu0  ;;  %v790_v49 = vpop.f32.mrb[16].mxu1  ;;  %v923_v54 = vmul.f32 0.044715, %v3456_v1  ;;  %v981_v17 = vmul.f32 %v917_v53, %v3398_v3  ;;  %v983_v25 = vmul.f32 %v919_v18, %v3412_v7  ;;  %v982_v47 = vmul.f32 %v918_v36, %v3428_v30 }
 0x12e   : > { %v679_v48 = vpop.f32.mrb[17].mxu0  ;;  %v792_v24 = vpop.f32.mrb[17].mxu1  ;;  %4524 = vst [vmem:[#allocation49_spill] sm:$0xff] %v3464_v40  ;;  %4525 = vst [vmem:[#allocation50_spill] sm:$0xff] %v3467_v2  ;;  %v3470_v11 = vadd.f32 %v677_v23, %v3266_v57  ;;  %v3476_v27 = vadd.f32 %v790_v49, %v3268_v58  ;;  %v984_v55 = vmul.f32 %v920_v62, %v3445_v10  ;;  %v922_v28 = vmul.f32 0.044715, %v3464_v40 }
 0x12f   : > { %v681_v26 = vpop.f32.mrb[18].mxu0  ;;  %v794_v31 = vpop.f32.mrb[18].mxu1  ;;  %v985_v23 = vmul.f32 %v921_v14, %v3448_v32  ;;  %v987_v16 = vmul.f32 %v923_v54, %v3456_v1  ;;  %v3487_v53 = vmul.f32 %v976_v12, %v3376_v37  ;;  %v924_v36 = vmul.f32 0.044715, %v3467_v2 }
 0x130   : > { %4526 = vst [vmem:[#allocation51_spill] sm:$0xff] %v3470_v11  ;;  %4527 = vst [vmem:[#allocation52_spill] sm:$0xff] %v3476_v27  ;;  %v3478_v46 = vpop.f32.mrb[19].mxu0  ;;  %v3480_v8 = vpop.f32.mrb[19].mxu1  ;;  %v925_v49 = vmul.f32 0.044715, %v3470_v11  ;;  %v3493_v41 = vmul.f32 %v977_v29, %v3379_v33  ;;  %v3496_v62 = vmul.f32 %v979_v9, %v3382_v38  ;;  %v3499_v14 = vmul.f32 %v978_v22, %v3392_v50 }
 0x131   : > { %4528 = vst [vmem:[#allocation53_spill] sm:$0xff] %v3487_v53  ;;  %v927_v18 = vmul.f32 0.044715, %v3476_v27  ;;  %v3502_v54 = vadd.f32 %v679_v48, %v3270_v59  ;;  %v3505_v12 = vmul.f32 %v980_v43, %v3395_v52  ;;  %v3508_v53 = vmul.f32 %v981_v17, %v3398_v3 }
 0x132   : > { %4529 = vst [vmem:[#allocation54_spill] sm:$0xff] %v3496_v62  ;;  %v3511_v37 = vmul.f32 %v983_v25, %v3412_v7  ;;  %v986_v29 = vmul.f32 %v922_v28, %v3464_v40  ;;  %v3515_v9 = vmul.f32 %v982_v47, %v3428_v30  ;;  %v3518_v22 = vmul.f32 %v984_v55, %v3445_v10 }
 0x133   : > { %4530 = vst [vmem:[#allocation55_spill] sm:$0xff] %v3502_v54  ;;  %4531 = vst [vmem:[#allocation56_spill] sm:$0xff] %v3508_v53  ;;  %v3521_v48 = vmul.f32 %v985_v23, %v3448_v32  ;;  %v3524_v43 = vmul.f32 %v987_v16, %v3456_v1  ;;  %v988_v53 = vmul.f32 %v924_v36, %v3467_v2  ;;  %v926_v23 = vmul.f32 0.044715, %v3502_v54 }
 0x134   : > { %4532 = vst [vmem:[#allocation57_spill] sm:$0xff] %v3511_v37  ;;  %4533 = vst [vmem:[#allocation58_spill] sm:$0xff] %v3515_v9  ;;  %v989_v25 = vmul.f32 %v925_v49, %v3470_v11  ;;  %v991_v28 = vmul.f32 %v927_v18, %v3476_v27  ;;  %v1086_v47 = vadd.f32 %v3312_v19, %v3277_v5 }
 0x135   : > { %4534 = vst [vmem:[#allocation59_spill] sm:$0xff] %v3518_v22  ;;  %4535 = vst [vmem:[#allocation60_spill] sm:$0xff] %v3521_v48  ;;  %v687_v62 = vpop.f32.mrb[20].mxu0  ;;  %v800_v17 = vpop.f32.mrb[20].mxu1  ;;  %v3535_v7 = vadd.f32 %v792_v24, %v3272_v60  ;;  %v1090_v16 = vadd.f32 %v3351_v61, %v3287_v34  ;;  %v1088_v36 = vadd.f32 %v3315_v20, %v3280_v6 }
 0x136   : > { %4536 = vst [vmem:[#allocation61_spill] sm:$0xff] %v3524_v43  ;;  %v689_v37 = vpop.f32.mrb[21].mxu0  ;;  %v3531_v55 = vpop.f32.mrb[21].mxu1  ;;  %v3546_v19 = vmul.f32 %v986_v29, %v3464_v40  ;;  %v3549_v43 = vmul.f32 0.5, %v3277_v5  ;;  %v1150_v1 = vmul.f32 0.7978846, %v1086_v47  ;;  %v1092_v24 = vadd.f32 %v3362_v15, %v3290_v35 }
 0x137   : > { %4537 = vst [vmem:[#allocation62_spill] sm:$0xff] %v3535_v7  ;;  %v3541_v49 = vpop.f32.mrb[22].mxu0  ;;  %v3543_v18 = vpop.f32.mrb[22].mxu1  ;;  %v1154_v32 = vmul.f32 0.7978846, %v1090_v16  ;;  %v3558_v3 = vadd.f32 %v681_v26, %v3266_v57  ;;  %v3561_v22 = vadd.f32 %v794_v31, %v3268_v58  ;;  %v3564_v29 = vmul.f32 %v988_v53, %v3467_v2 }
 0x138   : > { %4538 = vst [vmem:[#allocation63_spill] sm:$0xff] %v3546_v19  ;;  %v3553_v48 = vpop.f32.mrb[23].mxu0  ;;  %v3555_v61 = vpop.f32.mrb[23].mxu1  ;;  %v1152_v20 = vmul.f32 0.7978846, %v1088_v36  ;;  %2694 = vtanh.f32 %v1150_v1  ;;  %v1277_v47 = vadd.f32 1.0, %v3400_v13  ;;  %v990_v53 = vmul.f32 %v926_v23, %v3502_v54 }
 0x139   : > { %4539 = vst [vmem:[#allocation64_spill] sm:$0xff] %v3558_v3  ;;  %4540 = vst [vmem:[#allocation65_spill] sm:$0xff] %v3561_v22  ;;  %v1156_v5 = vmul.f32 0.7978846, %v1092_v24  ;;  %v928_v15 = vmul.f32 0.044715, %v3535_v7  ;;  %2696 = vtanh.f32 %v1154_v32 }
 0x13a   : > { %4541 = vst [vmem:[#allocation66_spill] sm:$0xff] %v3564_v29  ;;  %v929_v10 = vmul.f32 0.044715, %v3558_v3  ;;  %v1281_v16 = vadd.f32 1.0, %v3430_v42  ;;  %2698 = vtanh.f32 %v1152_v20  ;;  %v931_v26 = vmul.f32 0.044715, %v3561_v22 }
 0x13b   : > { %v1279_v31 = vadd.f32 1.0, %v3420_v39  ;;  %v1283_v36 = vadd.f32 1.0, %v3450_v56  ;;  %2700 = vtanh.f32 %v1156_v5  ;;  %v3575_v1 = vmul.f32 %v1277_v47, %v3300_v51 }
 0x13c   : > { %v3578_v13 = vmul.f32 %v1281_v16, %v3317_v21  ;;  %v3592_v56 = vadd.f32 %v3478_v46, %v3270_v59  ;;  %v3596_v51 = vadd.f32 %v3480_v8, %v3272_v60  ;;  %v3603_v20 = vmul.f32 %v989_v25, %v3470_v11 }
 0x13d   : > { %v3580_v32 = vpop.f32.mrb[24].mxu0  ;;  %v3582_v24 = vpop.f32.mrb[24].mxu1  ;;  %v3585_v42 = vmul.f32 %v1279_v31, %v3303_v4  ;;  %v3588_v39 = vmul.f32 %v1283_v36, %v3319_v0  ;;  %v992_v4 = vmul.f32 %v928_v15, %v3535_v7  ;;  %v3609_v5 = vadd.f32 %v687_v62, %v3266_v57 }
 0x13e   : > { %v3598_v21 = vpop.f32.mrb[25].mxu0  ;;  %v3600_v23 = vpop.f32.mrb[25].mxu1  ;;  %4542 = vst [vmem:[#allocation67_spill] sm:$0xff] %v3603_v20  ;;  %v993_v8 = vmul.f32 %v929_v10, %v3558_v3  ;;  %v995_v16 = vmul.f32 %v931_v26, %v3561_v22  ;;  %v3620_v31 = vadd.f32 %v800_v17, %v3268_v58  ;;  %v3627_v62 = vmul.f32 %v991_v28, %v3476_v27 }
 0x13f   : > { %4543 = vst [vmem:[#allocation68_spill] sm:$0xff] %v3609_v5  ;;  %v3611_v46 = vpop.f32.mrb[26].mxu0  ;;  %v3613_v47 = vpop.f32.mrb[26].mxu1  ;;  %v834_v0 = vmul.f32 0.5, %v3287_v34  ;;  %v930_v20 = vmul.f32 0.044715, %v3592_v56  ;;  %v3632_v10 = vadd.f32 %v689_v37, %v3270_v59  ;;  %v3635_v26 = vmul.f32 %v990_v53, %v3502_v54 }
 0x140   : > { %4544 = vst [vmem:[#allocation69_spill] sm:$0xff] %v3620_v31  ;;  %v3622_v15 = vpop.f32.mrb[27].mxu0  ;;  %v3624_v36 = vpop.f32.mrb[27].mxu1  ;;  %4545 = vst [vmem:[#allocation70_spill] sm:$0xff] %v3627_v62  ;;  %v832_v17 = vmul.f32 0.5, %v3280_v6  ;;  %v836_v25 = vmul.f32 0.5, %v3290_v35  ;;  %v3641_v29 = vmul.f32 %v992_v4, %v3535_v7  ;;  %v3646_v34 = vadd.f32 %v3531_v55, %v3272_v60 }
 0x141   : > { %4546 = vst [vmem:[#allocation71_spill] sm:$0xff] %v3635_v26  ;;  %v932_v11 = vmul.f32 0.044715, %v3596_v51  ;;  %v933_v28 = vmul.f32 0.044715, %v3609_v5  ;;  %v1094_v37 = vadd.f32 %v3385_v44, %v3309_v63  ;;  %v3651_v62 = vmul.f32 %v993_v8, %v3558_v3  ;;  %v4550_v4 = vld [vmem:[#allocation40_spill] sm:$0xff] }
 0x142   : > { %4547 = vst [vmem:[#allocation72_spill] sm:$0xff] %v3641_v29  ;;  %v2695_v53 = vpop.eup %2694  ;;  %v3654_v6 = vmul.f32 %v995_v16, %v3561_v22  ;;  %v935_v35 = vmul.f32 0.044715, %v3620_v31  ;;  %v1098_v27 = vadd.f32 %v4550_v4, %v3337_v45  ;;  %v994_v55 = vmul.f32 %v930_v20, %v3592_v56 }
 0x143   : > { %4548 = vst [vmem:[#allocation73_spill] sm:$0xff] %v3651_v62  ;;  %v2697_v29 = vpop.eup %2696  ;;  %v1278_v7 = vadd.f32 1.0, %v2695_v53  ;;  %v934_v26 = vmul.f32 0.044715, %v3632_v10  ;;  %v3662_v44 = vmul.f32 0.5, %v3309_v63  ;;  %v996_v22 = vmul.f32 %v932_v11, %v3596_v51 }
 0x144   : > { %4549 = vst [vmem:[#allocation74_spill] sm:$0xff] %v3654_v6  ;;  %v2699_v16 = vpop.eup %2698  ;;  %v1282_v6 = vadd.f32 1.0, %v2697_v29  ;;  %v1158_v62 = vmul.f32 0.7978846, %v1094_v37  ;;  %v1162_v3 = vmul.f32 0.7978846, %v1098_v27  ;;  %v997_v20 = vmul.f32 %v933_v28, %v3609_v5 }
 0x145   : > { %v3664_v54 = vpop.f32.mrb[28].mxu0  ;;  %v3666_v8 = vpop.f32.mrb[28].mxu1  ;;  %v1280_v2 = vadd.f32 1.0, %v2699_v16  ;;  %v936_v19 = vmul.f32 0.044715, %v3646_v34  ;;  %v3674_v63 = vmul.f32 0.5, %v3337_v45  ;;  %v1342_v29 = vmul.f32 %v1278_v7, %v3549_v43 }
 0x146   : > { %4551 = vst [vmem:[#allocation40_spill] sm:$0xff] %v3664_v54  ;;  %4552 = vst [vmem:[#allocation75_spill] sm:$0xff] %v3666_v8  ;;  %v3669_v4 = vpop.f32.mrb[29].mxu0  ;;  %v2701_v53 = vpop.eup %2700  ;;  %v1346_v11 = vmul.f32 %v1282_v6, %v834_v0  ;;  %2702 = vtanh.f32 %v1158_v62  ;;  %v999_v28 = vmul.f32 %v935_v35, %v3620_v31  ;;  %v998_v16 = vmul.f32 %v934_v26, %v3632_v10  ;;  %v4556_v45 = vld [vmem:[#allocation25_spill] sm:$0xff]  ;;  %v4558_v43 = vld [vmem:[#allocation28_spill] sm:$0xff] }
 0x147   : > { %4553 = vst [vmem:[#allocation76_spill] sm:$0xff] %v3669_v4  ;;  %v3676_v40 = vpop.f32.mrb[29].mxu1  ;;  %v3678_v9 = vpop.f32.mrb[30].mxu0  ;;  %v1284_v37 = vadd.f32 1.0, %v2701_v53  ;;  %2704 = vtanh.f32 %v1162_v3  ;;  %v4557_v4 = vld [vmem:[#allocation36_spill] sm:$0xff]  ;;  %v1344_v54 = vmul.f32 %v1280_v2, %v832_v17  ;;  %v4559_v0 = vld [vmem:[#allocation41_spill] sm:$0xff]  ;;  %v3694_v6 = vmul.f32 %v994_v55, %v3592_v56 }
 0x148   : > { %4554 = vst [vmem:[#allocation77_spill] sm:$0xff] %v3676_v40  ;;  %4555 = vst [vmem:[#allocation78_spill] sm:$0xff] %v3678_v9  ;;  %v3681_v27 = vpop.f32.mrb[30].mxu1  ;;  %v3683_v30 = vpop.f32.mrb[31].mxu0  ;;  %v1096_v8 = vadd.f32 %v4557_v4, %v4556_v45  ;;  %v1422_v9 = vpack.c.bf16 %v1346_v11, %v1342_v29  ;;  %v1100_v62 = vadd.f32 %v4559_v0, %v4558_v43  ;;  %v4563_v17 = vld [vmem:[#allocation32_spill] sm:$0xff] }
 0x149   : > { %v3689_v40 = vpop.f32.mrb[31].mxu1  ;;  %v1348_v7 = vmul.f32 %v1284_v37, %v836_v25  ;;  %v3697_v53 = vmul.f32 %v996_v22, %v3596_v51  ;;  %v3701_v3 = vadd.f32 %v3541_v49, %v3266_v57  ;;  %v3705_v2 = vadd.f32 %v3543_v18, %v3268_v58  ;;  %v4562_v25 = vld [vmem:[#allocation23_spill] sm:$0xff] }
 0x14a   : > { %v1160_v35 = vmul.f32 0.7978846, %v1096_v8  ;;  %1741 = vmatprep.mubr.bf16.mxu0 %v1422_v9  ;;  %v1164_v4 = vmul.f32 0.7978846, %v1100_v62  ;;  %v1093_v29 = vadd.f32 %v4563_v17, %v4562_v25  ;;  %v4564_v55 = vpack.c.bf16 %v3578_v13, %v3575_v1  ;;  %v4566_v9 = vld [vmem:[#allocation26_spill] sm:$0xff]  ;;  %v4572_v62 = vld [vmem:[#allocation27_spill] sm:$0xff] }
 0x14b   : > { %4560 = vst [vmem:[#allocation25_spill] sm:$0xff] %v3701_v3  ;;  %v1424_v26 = vpack.c.bf16 %v1348_v7, %v1344_v54  ;;  %4561 = vst [vmem:[#allocation36_spill] sm:$0xff] %v3705_v2  ;;  %v3713_v22 = vmul.f32 %v997_v20, %v3609_v5  ;;  %v1000_v49 = vmul.f32 %v936_v19, %v3646_v34  ;;  %v4567_v54 = vld [vmem:[#allocation37_spill] sm:$0xff]  ;;  %v937_v13 = vmul.f32 0.044715, %v3701_v3  ;;  %v4570_v20 = vld [vmem:[#allocation24_spill] sm:$0xff] }
 0x14c   : > { %1742 = vmatmul.mubr.bf16.vlgmr.msra.gmra.mrb[32].mxu0 %v4564_v55  ;;  %2706 = vtanh.f32 %v1160_v35  ;;  %v1097_v8 = vadd.f32 %v4567_v54, %v4566_v9  ;;  %v3719_v18 = vmul.f32 %v999_v28, %v3620_v31  ;;  %v3722_v11 = vmul.f32 %v998_v16, %v3632_v10  ;;  %v4571_v7 = vld [vmem:[#allocation33_spill] sm:$0xff]  ;;  %v4573_v35 = vld [vmem:[#allocation38_spill] sm:$0xff] }
 0x14d   : > { %4565 = vst [vmem:[#allocation28_spill] sm:$0xff] %v3713_v22  ;;  %1838 = vmatprep.mubr.bf16.mxu1 %v1424_v26  ;;  %2708 = vtanh.f32 %v1164_v4  ;;  %v1157_v37 = vmul.f32 0.7978846, %v1093_v29  ;;  %v4569_v1 = vpack.c.bf16 %v3588_v39, %v3585_v42  ;;  %v1095_v0 = vadd.f32 %v4571_v7, %v4570_v20 }
 0x14e   : > { %4568 = vst [vmem:[#allocation41_spill] sm:$0xff] %v3719_v18  ;;  %v1161_v19 = vmul.f32 0.7978846, %v1097_v8  ;;  %v1099_v26 = vadd.f32 %v4573_v35, %v4572_v62  ;;  %v939_v28 = vmul.f32 0.044715, %v3705_v2  ;;  %v3735_v16 = vadd.f32 %v3553_v48, %v3270_v59 }
 0x14f   : > { %1839 = vmatmul.mubr.bf16.vlgmr.msra.gmra.mrb[32].mxu1 %v4569_v1  ;;  %2710 = vtanh.f32 %v1157_v37  ;;  %v3739_v42 = vadd.f32 %v3555_v61, %v3272_v60  ;;  %v3742_v39 = vmul.f32 %v1000_v49, %v3646_v34  ;;  %v1159_v4 = vmul.f32 0.7978846, %v1095_v0 }
 0x150   : > { %2712 = vtanh.f32 %v1161_v19  ;;  %v1163_v17 = vmul.f32 0.7978846, %v1099_v26  ;;  %v2703_v29 = vpop.eup %2702  ;;  %v840_v55 = vmul.f32 0.5, %v4556_v45  ;;  %v938_v54 = vmul.f32 0.044715, %v3735_v16 }
 0x151   : > { %v940_v8 = vmul.f32 0.044715, %v3739_v42  ;;  %v3749_v48 = vadd.f32 %v3580_v32, %v3266_v57  ;;  %v2705_v37 = vpop.eup %2704  ;;  %v1286_v61 = vadd.f32 1.0, %v2703_v29  ;;  %v844_v1 = vmul.f32 0.5, %v4558_v43 }
 0x152   : > { %2714 = vtanh.f32 %v1159_v4  ;;  %v3754_v49 = vadd.f32 %v3582_v24, %v3268_v58  ;;  %v1290_v19 = vadd.f32 1.0, %v2705_v37  ;;  %v1001_v45 = vmul.f32 %v937_v13, %v3701_v3 }
 0x153   : > { %v1003_v7 = vmul.f32 %v939_v28, %v3705_v2  ;;  %2716 = vtanh.f32 %v1163_v17  ;;  %v837_v0 = vmul.f32 0.5, %v4562_v25  ;;  %v1002_v32 = vmul.f32 %v938_v54, %v3735_v16 }
 0x154   : > { %4574 = vst [vmem:[#allocation23_spill] sm:$0xff] %v3754_v49  ;;  %v1004_v35 = vmul.f32 %v940_v8, %v3739_v42  ;;  %v3763_v43 = vadd.f32 %v3598_v21, %v3270_v59  ;;  %v1350_v26 = vmul.f32 %v1286_v61, %v3662_v44  ;;  %v1354_v24 = vmul.f32 %v1290_v19, %v3674_v63 }
 0x155   : > { %v941_v4 = vmul.f32 0.044715, %v3749_v48  ;;  %v3770_v13 = vadd.f32 %v3600_v23, %v3272_v60  ;;  %v841_v25 = vmul.f32 0.5, %v4566_v9  ;;  %v839_v17 = vmul.f32 0.5, %v4570_v20 }
 0x156   : > { %v2707_v28 = vpop.eup %2706  ;;  %v843_v29 = vmul.f32 0.5, %v4572_v62  ;;  %v943_v21 = vmul.f32 0.044715, %v3754_v49  ;;  %v1426_v8 = vpack.c.bf16 %v1354_v24, %v1350_v26  ;;  %v3777_v63 = vmul.f32 %v1001_v45, %v3701_v3  ;;  %v4578_v45 = vld [vmem:[#allocation31_spill] sm:$0xff]  ;;  %v4579_v24 = vld [vmem:[#allocation45_spill] sm:$0xff] }
 0x157   : > { %v2709_v54 = vpop.eup %2708  ;;  %v1288_v44 = vadd.f32 1.0, %v2707_v28  ;;  %v3780_v37 = vmul.f32 %v1003_v7, %v3705_v2  ;;  %v3783_v61 = vmul.f32 %v1002_v32, %v3735_v16  ;;  %v3786_v9 = vmul.f32 %v1004_v35, %v3739_v42  ;;  %v4581_v3 = vld [vmem:[#allocation53_spill] sm:$0xff] }
 0x158   : > { %4575 = vst [vmem:[#allocation32_spill] sm:$0xff] %v3777_v63  ;;  %v1292_v23 = vadd.f32 1.0, %v2709_v54  ;;  %v942_v20 = vmul.f32 0.044715, %v3763_v43  ;;  %1749 = vmatprep.mubr.bf16.mxu0 %v1426_v8  ;;  %v1005_v19 = vmul.f32 %v941_v4, %v3749_v48  ;;  %v944_v26 = vmul.f32 0.044715, %v3770_v13 }
 0x159   : > { %4576 = vst [vmem:[#allocation26_spill] sm:$0xff] %v3780_v37  ;;  %4577 = vst [vmem:[#allocation37_spill] sm:$0xff] %v3786_v9  ;;  %v2711_v62 = vpop.eup %2710  ;;  %v1102_v28 = vadd.f32 %v4579_v24, %v4578_v45  ;;  %v1106_v7 = vadd.f32 %v3499_v14, %v3392_v50  ;;  %v1352_v32 = vmul.f32 %v1288_v44, %v840_v55  ;;  %v4580_v8 = vld [vmem:[#allocation34_spill] sm:$0xff] }
 0x15a   : > { %v2713_v54 = vpop.eup %2712  ;;  %v1356_v37 = vmul.f32 %v1292_v23, %v844_v1  ;;  %v1285_v2 = vadd.f32 1.0, %v2711_v62  ;;  %v1007_v35 = vmul.f32 %v943_v21, %v3754_v49  ;;  %v1104_v4 = vadd.f32 %v4581_v3, %v4580_v8 }
 0x15b   : > { %v1289_v18 = vadd.f32 1.0, %v2713_v54  ;;  %v1166_v31 = vmul.f32 0.7978846, %v1102_v28  ;;  %v1170_v63 = vmul.f32 0.7978846, %v1106_v7  ;;  %v1108_v24 = vadd.f32 %v3505_v12, %v3395_v52  ;;  %v4587_v28 = vld [vmem:[#allocation30_spill] sm:$0xff] }
 0x15c   : > { %v2715_v22 = vpop.eup %2714  ;;  %v1428_v5 = vpack.c.bf16 %v1356_v37, %v1352_v32  ;;  %v1349_v9 = vmul.f32 %v1285_v2, %v837_v0  ;;  %v3802_v14 = vadd.f32 %v3611_v46, %v3266_v57  ;;  %v1168_v21 = vmul.f32 0.7978846, %v1104_v4  ;;  %v4588_v7 = vld [vmem:[#allocation44_spill] sm:$0xff] }
 0x15d   : > { %v2717_v55 = vpop.eup %2716  ;;  %v1353_v1 = vmul.f32 %v1289_v18, %v841_v25  ;;  %v1287_v44 = vadd.f32 1.0, %v2715_v22  ;;  %2718 = vtanh.f32 %v1166_v31  ;;  %v1006_v62 = vmul.f32 %v942_v20, %v3763_v43  ;;  %v4584_v18 = vld [vmem:[#allocation29_spill] sm:$0xff]  ;;  %v4585_v25 = vld [vmem:[#allocation43_spill] sm:$0xff] }
 0x15e   : > { %4582 = vst [vmem:[#allocation24_spill] sm:$0xff] %v3802_v14  ;;  %1846 = vmatprep.mubr.bf16.mxu1 %v1428_v5  ;;  %v1291_v23 = vadd.f32 1.0, %v2717_v55  ;;  %2720 = vtanh.f32 %v1170_v63  ;;  %v1172_v3 = vmul.f32 0.7978846, %v1108_v24  ;;  %v1008_v2 = vmul.f32 %v944_v26, %v3770_v13 }
 0x15f   : > { %v1425_v37 = vpack.c.bf16 %v1353_v1, %v1349_v9  ;;  %v846_v12 = vmul.f32 0.5, %v4578_v45  ;;  %2722 = vtanh.f32 %v1168_v21  ;;  %v1351_v0 = vmul.f32 %v1287_v44, %v839_v17  ;;  %v4590_v21 = vld [vmem:[#allocation40_spill] sm:$0xff] }
 0x160   : > { %v1355_v46 = vmul.f32 %v1291_v23, %v843_v29  ;;  %2724 = vtanh.f32 %v1172_v3  ;;  %v3809_v22 = vadd.f32 %v3613_v47, %v3268_v58  ;;  %v850_v5 = vmul.f32 0.5, %v3392_v50 }
 0x161   : > { %1750 = vmatmul.mubr.bf16.gmra.mrb[36].mxu0 %v1425_v37  ;;  %v945_v31 = vmul.f32 0.044715, %v3802_v14  ;;  %v1101_v63 = vadd.f32 %v4585_v25, %v4584_v18  ;;  %v1105_v9 = vadd.f32 %v3493_v41, %v3379_v33  ;;  %v3818_v17 = vmul.f32 %v1005_v19, %v3749_v48  ;;  %v4589_v19 = vld [vmem:[#allocation54_spill] sm:$0xff] }
 0x162   : > { %4583 = vst [vmem:[#allocation33_spill] sm:$0xff] %v3809_v22  ;;  %v1427_v20 = vpack.c.bf16 %v1355_v46, %v1351_v0  ;;  %v3821_v29 = vmul.f32 %v1007_v35, %v3754_v49  ;;  %v3824_v47 = vmul.f32 %v1006_v62, %v3763_v43  ;;  %v3827_v50 = vmul.f32 %v1008_v2, %v3770_v13  ;;  %v4591_v62 = vld [vmem:[#allocation75_spill] sm:$0xff] }
 0x163   : > { %v1165_v26 = vmul.f32 0.7978846, %v1101_v63  ;;  %v1169_v45 = vmul.f32 0.7978846, %v1105_v9  ;;  %v1103_v54 = vadd.f32 %v4588_v7, %v4587_v28  ;;  %v947_v41 = vmul.f32 0.044715, %v3809_v22 }
 0x164   : > { %4586 = vst [vmem:[#allocation27_spill] sm:$0xff] %v3821_v29  ;;  %1847 = vmatmul.mubr.bf16.gmra.mrb[36].mxu1 %v1427_v20  ;;  %v1107_v32 = vadd.f32 %v4589_v19, %v3382_v38  ;;  %v3836_v35 = vadd.f32 %v3622_v15, %v3270_v59  ;;  %v3840_v4 = vadd.f32 %v3624_v36, %v3272_v60  ;;  %v848_v24 = vmul.f32 0.5, %v4580_v8 }
 0x165   : > { %v1009_v55 = vmul.f32 %v945_v31, %v3802_v14  ;;  %2726 = vtanh.f32 %v1165_v26  ;;  %v1167_v1 = vmul.f32 0.7978846, %v1103_v54  ;;  %v3846_v23 = vadd.f32 %v4590_v21, %v3266_v57  ;;  %v4593_v54 = vld [vmem:[#allocation76_spill] sm:$0xff]  ;;  %v4595_v21 = vld [vmem:[#allocation77_spill] sm:$0xff] }
 0x166   : > { %2728 = vtanh.f32 %v1169_v45  ;;  %v1171_v44 = vmul.f32 0.7978846, %v1107_v32  ;;  %v3850_v15 = vadd.f32 %v4591_v62, %v3268_v58  ;;  %v852_v36 = vmul.f32 0.5, %v3395_v52 }
 0x167   : > { %v2719_v3 = vpop.eup %2718  ;;  %v845_v37 = vmul.f32 0.5, %v4584_v18  ;;  %2730 = vtanh.f32 %v1167_v1  ;;  %v946_v8 = vmul.f32 0.044715, %v3836_v35  ;;  %v1011_v46 = vmul.f32 %v947_v41, %v3809_v22 }
 0x168   : > { %v2721_v2 = vpop.eup %2720  ;;  %v1294_v0 = vadd.f32 1.0, %v2719_v3  ;;  %2732 = vtanh.f32 %v1171_v44  ;;  %v948_v31 = vmul.f32 0.044715, %v3840_v4  ;;  %v3858_v9 = vmul.f32 %v1009_v55, %v3802_v14 }
 0x169   : > { %v2723_v25 = vpop.eup %2722  ;;  %v1298_v63 = vadd.f32 1.0, %v2721_v2  ;;  %v849_v20 = vmul.f32 0.5, %v3379_v33  ;;  %v847_v52 = vmul.f32 0.5, %v4587_v28  ;;  %v949_v45 = vmul.f32 0.044715, %v3846_v23 }
 0x16a   : > { %4592 = vst [vmem:[#allocation38_spill] sm:$0xff] %v3858_v9  ;;  %v2725_v18 = vpop.eup %2724  ;;  %v1296_v26 = vadd.f32 1.0, %v2723_v25  ;;  %v951_v7 = vmul.f32 0.044715, %v3850_v15  ;;  %v3866_v41 = vadd.f32 %v4593_v54, %v3270_v59  ;;  %v1358_v19 = vmul.f32 %v1294_v0, %v846_v12  ;;  %v4596_v54 = vld [vmem:[#allocation42_spill] sm:$0xff] }
 0x16b   : > { %v1362_v32 = vmul.f32 %v1298_v63, %v850_v5  ;;  %v1300_v1 = vadd.f32 1.0, %v2725_v18  ;;  %v1010_v55 = vmul.f32 %v946_v8, %v3836_v35  ;;  %v3870_v44 = vmul.f32 %v1011_v46, %v3809_v22  ;;  %v4597_v12 = vld [vmem:[#allocation58_spill] sm:$0xff]  ;;  %v4598_v63 = vld [vmem:[#allocation49_spill] sm:$0xff] }
 0x16c   : > { %v851_v33 = vmul.f32 0.5, %v3382_v38  ;;  %v1012_v28 = vmul.f32 %v948_v31, %v3840_v4  ;;  %v3876_v62 = vadd.f32 %v4595_v21, %v3272_v60  ;;  %v1360_v2 = vmul.f32 %v1296_v26, %v848_v24  ;;  %v4599_v38 = vld [vmem:[#allocation63_spill] sm:$0xff]  ;;  %v4603_v22 = vld [vmem:[#allocation66_spill] sm:$0xff] }
 0x16d   : > { %4594 = vst [vmem:[#allocation31_spill] sm:$0xff] %v3870_v44  ;;  %v1430_v3 = vpack.c.bf16 %v1362_v32, %v1358_v19  ;;  %v1364_v25 = vmul.f32 %v1300_v1, %v852_v36  ;;  %v1110_v5 = vadd.f32 %v4597_v12, %v4596_v54  ;;  %v1013_v0 = vmul.f32 %v949_v45, %v3846_v23  ;;  %v4600_v36 = vld [vmem:[#allocation46_spill] sm:$0xff]  ;;  %v4601_v26 = vld [vmem:[#allocation59_spill] sm:$0xff] }
 0x16e   : > { %v1015_v8 = vmul.f32 %v951_v7, %v3850_v15  ;;  %v950_v46 = vmul.f32 0.044715, %v3866_v41  ;;  %v1114_v18 = vadd.f32 %v4599_v38, %v4598_v63  ;;  %v3886_v21 = vmul.f32 %v1010_v55, %v3836_v35  ;;  %v4602_v12 = vld [vmem:[#allocation50_spill] sm:$0xff] }
 0x16f   : > { %v2727_v31 = vpop.eup %2726  ;;  %1757 = vmatprep.mubr.bf16.mxu0 %v1430_v3  ;;  %v1432_v44 = vpack.c.bf16 %v1364_v25, %v1360_v2  ;;  %v1174_v24 = vmul.f32 0.7978846, %v1110_v5  ;;  %v1112_v19 = vadd.f32 %v4601_v26, %v4600_v36  ;;  %v952_v45 = vmul.f32 0.044715, %v3876_v62 }
 0x170   : > { %v2729_v32 = vpop.eup %2728  ;;  %v1293_v1 = vadd.f32 1.0, %v2727_v31  ;;  %v1178_v7 = vmul.f32 0.7978846, %v1114_v18  ;;  %v1116_v29 = vadd.f32 %v4603_v22, %v4602_v12  ;;  %v3894_v3 = vmul.f32 %v1012_v28, %v3840_v4  ;;  %v4604_v31 = vld [vmem:[#allocation78_spill] sm:$0xff] }
 0x171   : > { %v2731_v49 = vpop.eup %2730  ;;  %1854 = vmatprep.mubr.bf16.mxu1 %v1432_v44  ;;  %v1297_v38 = vadd.f32 1.0, %v2729_v32  ;;  %2734 = vtanh.f32 %v1174_v24  ;;  %v1176_v55 = vmul.f32 0.7978846, %v1112_v19  ;;  %v3898_v26 = vadd.f32 %v4604_v31, %v3266_v57  ;;  %v4607_v32 = vld [vmem:[#allocation56_spill] sm:$0xff]  ;;  %v4613_v31 = vld [vmem:[#allocation61_spill] sm:$0xff] }
 0x172   : > { %v2733_v2 = vpop.eup %2732  ;;  %v1357_v25 = vmul.f32 %v1293_v1, %v845_v37  ;;  %v1295_v5 = vadd.f32 1.0, %v2731_v49  ;;  %2736 = vtanh.f32 %v1178_v7  ;;  %v1180_v14 = vmul.f32 0.7978846, %v1116_v29  ;;  %v4606_v29 = vld [vmem:[#allocation35_spill] sm:$0xff]  ;;  %v4609_v7 = vld [vmem:[#allocation60_spill] sm:$0xff] }
 0x173   : > { %v1361_v18 = vmul.f32 %v1297_v38, %v849_v20  ;;  %v1299_v9 = vadd.f32 1.0, %v2733_v2  ;;  %2738 = vtanh.f32 %v1176_v55  ;;  %v3901_v22 = vmul.f32 %v1013_v0, %v3846_v23  ;;  %v4608_v0 = vld [vmem:[#allocation47_spill] sm:$0xff] }
 0x174   : > { %v3904_v44 = vmul.f32 %v1015_v8, %v3850_v15  ;;  %v1014_v28 = vmul.f32 %v950_v46, %v3866_v41  ;;  %v1016_v37 = vmul.f32 %v952_v45, %v3876_v62  ;;  %v1359_v24 = vmul.f32 %v1295_v5, %v847_v52  ;;  %v4612_v5 = vld [vmem:[#allocation48_spill] sm:$0xff] }
 0x175   : > { %v1429_v49 = vpack.c.bf16 %v1361_v18, %v1357_v25  ;;  %v1363_v19 = vmul.f32 %v1299_v9, %v851_v33  ;;  %2740 = vtanh.f32 %v1180_v14  ;;  %v854_v57 = vmul.f32 0.5, %v4596_v54  ;;  %v4610_v9 = vld [vmem:[#allocation39_spill] sm:$0xff]  ;;  %v4611_v14 = vld [vmem:[#allocation57_spill] sm:$0xff] }
 0x176   : > { %4605 = vst [vmem:[#allocation45_spill] sm:$0xff] %v3904_v44  ;;  %v953_v20 = vmul.f32 0.044715, %v3898_v26  ;;  %v1109_v1 = vadd.f32 %v4607_v32, %v4606_v29  ;;  %v1113_v38 = vadd.f32 %v4609_v7, %v4608_v0  ;;  %v858_v46 = vmul.f32 0.5, %v4598_v63  ;;  %v4625_v44 = vld [vmem:[#allocation74_spill] sm:$0xff] }
 0x177   : > { %1758 = vmatmul.mubr.bf16.gmra.mrb[40].mxu0 %v1429_v49  ;;  %v1431_v8 = vpack.c.bf16 %v1363_v19, %v1359_v24  ;;  %v3917_v45 = vadd.f32 %v3681_v27, %v3268_v58  ;;  %v1111_v52 = vadd.f32 %v4611_v14, %v4610_v9  ;;  %v3922_v33 = vmul.f32 %v1014_v28, %v3866_v41 }
 0x178   : > { %v856_v54 = vmul.f32 0.5, %v4600_v36  ;;  %v1173_v55 = vmul.f32 0.7978846, %v1109_v1  ;;  %v1177_v2 = vmul.f32 0.7978846, %v1113_v38  ;;  %v3926_v25 = vmul.f32 %v1016_v37, %v3876_v62  ;;  %v4615_v1 = vld [vmem:[#allocation71_spill] sm:$0xff] }
 0x179   : > { %1855 = vmatmul.mubr.bf16.gmra.mrb[40].mxu1 %v1431_v8  ;;  %v860_v63 = vmul.f32 0.5, %v4602_v12  ;;  %v1115_v58 = vadd.f32 %v4613_v31, %v4612_v5  ;;  %v1175_v27 = vmul.f32 0.7978846, %v1111_v52  ;;  %v1017_v18 = vmul.f32 %v953_v20, %v3898_v26  ;;  %v4614_v20 = vld [vmem:[#allocation55_spill] sm:$0xff] }
 0x17a   : > { %v3933_v49 = vmul.f32 0.5, %v4606_v29  ;;  %v3936_v28 = vmul.f32 0.5, %v4608_v0  ;;  %2742 = vtanh.f32 %v1173_v55  ;;  %v955_v24 = vmul.f32 0.044715, %v3917_v45 }
 0x17b   : > { %v2735_v36 = vpop.eup %2734  ;;  %2744 = vtanh.f32 %v1177_v2  ;;  %v1179_v37 = vmul.f32 0.7978846, %v1115_v58  ;;  %v3941_v12 = vadd.f32 %v3683_v30, %v3270_v59  ;;  %v1118_v29 = vadd.f32 %v4615_v1, %v4614_v20  ;;  %v4618_v1 = vld [vmem:[#allocation51_spill] sm:$0xff] }
 0x17c   : > { %v2737_v19 = vpop.eup %2736  ;;  %v1302_v32 = vadd.f32 1.0, %v2735_v36  ;;  %2746 = vtanh.f32 %v1175_v27  ;;  %v1122_v0 = vadd.f32 %v3694_v6, %v3592_v56  ;;  %v855_v8 = vmul.f32 0.5, %v4610_v9 }
 0x17d   : > { %v2739_v7 = vpop.eup %2738  ;;  %v1306_v38 = vadd.f32 1.0, %v2737_v19  ;;  %v859_v14 = vmul.f32 0.5, %v4612_v5  ;;  %2748 = vtanh.f32 %v1179_v37  ;;  %v3951_v30 = vadd.f32 %v3689_v40, %v3272_v60  ;;  %v4616_v60 = vld [vmem:[#allocation62_spill] sm:$0xff]  ;;  %v4617_v40 = vld [vmem:[#allocation72_spill] sm:$0xff] }
 0x17e   : > { %v1304_v52 = vadd.f32 1.0, %v2739_v7  ;;  %v1182_v59 = vmul.f32 0.7978846, %v1118_v29  ;;  %v1186_v55 = vmul.f32 0.7978846, %v1122_v0  ;;  %v1366_v31 = vmul.f32 %v1302_v32, %v854_v57  ;;  %v4619_v29 = vld [vmem:[#allocation67_spill] sm:$0xff] }
 0x17f   : > { %v2741_v2 = vpop.eup %2740  ;;  %v1370_v58 = vmul.f32 %v1306_v38, %v858_v46  ;;  %v3954_v27 = vmul.f32 %v1017_v18, %v3898_v26  ;;  %v954_v6 = vmul.f32 0.044715, %v3941_v12  ;;  %v3958_v9 = vmul.f32 %v955_v24, %v3917_v45  ;;  %v4620_v38 = vld [vmem:[#allocation64_spill] sm:$0xff] }
 0x180   : > { %v1308_v36 = vadd.f32 1.0, %v2741_v2  ;;  %v862_v5 = vmul.f32 0.5, %v4614_v20  ;;  %2750 = vtanh.f32 %v1182_v59  ;;  %v1120_v19 = vadd.f32 %v4617_v40, %v4616_v60  ;;  %v4621_v59 = vld [vmem:[#allocation73_spill] sm:$0xff] }
 0x181   : > { %v1434_v37 = vpack.c.bf16 %v1370_v58, %v1366_v31  ;;  %2752 = vtanh.f32 %v1186_v55  ;;  %v1124_v57 = vadd.f32 %v3697_v53, %v3596_v51  ;;  %v1368_v46 = vmul.f32 %v1304_v52, %v856_v54  ;;  %v4622_v54 = vld [vmem:[#allocation52_spill] sm:$0xff] }
 0x182   : > { %v1372_v18 = vmul.f32 %v1308_v36, %v860_v63  ;;  %v956_v32 = vmul.f32 0.044715, %v3951_v30  ;;  %v1117_v0 = vadd.f32 %v4619_v29, %v4618_v1  ;;  %v1018_v24 = vmul.f32 %v954_v6, %v3941_v12  ;;  %v4623_v63 = vld [vmem:[#allocation70_spill] sm:$0xff] }
 0x183   : > { %1765 = vmatprep.mubr.bf16.mxu0 %v1434_v37  ;;  %v1184_v20 = vmul.f32 0.7978846, %v1120_v19  ;;  %v1188_v7 = vmul.f32 0.7978846, %v1124_v57  ;;  %v1121_v55 = vadd.f32 %v4621_v59, %v4620_v38  ;;  %v866_v58 = vmul.f32 0.5, %v3592_v56  ;;  %v4624_v37 = vld [vmem:[#allocation65_spill] sm:$0xff] }
 0x184   : > { %v2743_v2 = vpop.eup %2742  ;;  %v1436_v31 = vpack.c.bf16 %v1372_v18, %v1368_v46  ;;  %v1181_v53 = vmul.f32 0.7978846, %v1117_v0  ;;  %v1119_v52 = vadd.f32 %v4623_v63, %v4622_v54  ;;  %v1123_v6 = vadd.f32 %v4625_v44, %v4624_v37 }
 0x185   : > { %v2745_v36 = vpop.eup %2744  ;;  %v1301_v40 = vadd.f32 1.0, %v2743_v2  ;;  %2754 = vtanh.f32 %v1184_v20  ;;  %v1185_v29 = vmul.f32 0.7978846, %v1121_v55  ;;  %v3977_v59 = vmul.f32 %v956_v32, %v3951_v30 }
 0x186   : > { %v2747_v19 = vpop.eup %2746  ;;  %1862 = vmatprep.mubr.bf16.mxu1 %v1436_v31  ;;  %v1305_v57 = vadd.f32 1.0, %v2745_v36  ;;  %2756 = vtanh.f32 %v1188_v7  ;;  %v1183_v46 = vmul.f32 0.7978846, %v1119_v52  ;;  %v3980_v0 = vmul.f32 %v1018_v24, %v3941_v12 }
 0x187   : > { %v2749_v56 = vpop.eup %2748  ;;  %v1303_v18 = vadd.f32 1.0, %v2747_v19  ;;  %2758 = vtanh.f32 %v1181_v53  ;;  %v1187_v2 = vmul.f32 0.7978846, %v1123_v6  ;;  %v1365_v20 = vmul.f32 %v1301_v40, %v3933_v49  ;;  %v4626_v19 = vld [vmem:[#allocation37_spill] sm:$0xff] }
 0x188   : > { %v1369_v55 = vmul.f32 %v1305_v57, %v3936_v28  ;;  %v1307_v44 = vadd.f32 1.0, %v2749_v56  ;;  %2760 = vtanh.f32 %v1185_v29  ;;  %v864_v31 = vmul.f32 0.5, %v4616_v60 }
 0x189   : > { %2762 = vtanh.f32 %v1183_v46  ;;  %v1126_v32 = vadd.f32 %v3722_v11, %v3632_v10  ;;  %v1130_v7 = vadd.f32 %v3783_v61, %v3735_v16  ;;  %v1367_v52 = vmul.f32 %v1303_v18, %v855_v8 }
 0x18a   : > { %v2751_v63 = vpop.eup %2750  ;;  %v1433_v24 = vpack.c.bf16 %v1369_v55, %v1365_v20  ;;  %v1371_v53 = vmul.f32 %v1307_v44, %v859_v14  ;;  %2764 = vtanh.f32 %v1187_v2  ;;  %v868_v28 = vmul.f32 0.5, %v3596_v51  ;;  %v4628_v55 = vld [vmem:[#allocation28_spill] sm:$0xff] }
 0x18b   : > { %v2753_v36 = vpop.eup %2752  ;;  %v1310_v49 = vadd.f32 1.0, %v2751_v63  ;;  %v1190_v40 = vmul.f32 0.7978846, %v1126_v32  ;;  %v1194_v29 = vmul.f32 0.7978846, %v1130_v7  ;;  %v1128_v11 = vadd.f32 %v3742_v39, %v3646_v34  ;;  %v4627_v39 = vld [vmem:[#allocation68_spill] sm:$0xff] }
 0x18c   : > { %1766 = vmatmul.mubr.bf16.gmra.mrb[44].mxu0 %v1433_v24  ;;  %v1435_v60 = vpack.c.bf16 %v1371_v53, %v1367_v52  ;;  %v1314_v6 = vadd.f32 1.0, %v2753_v36  ;;  %v1132_v61 = vadd.f32 %v4626_v19, %v3739_v42  ;;  %v861_v8 = vmul.f32 0.5, %v4618_v1  ;;  %v4629_v32 = vld [vmem:[#allocation25_spill] sm:$0xff] }
 0x18d   : > { %v1374_v57 = vmul.f32 %v1310_v49, %v862_v5  ;;  %v865_v14 = vmul.f32 0.5, %v4620_v38  ;;  %2766 = vtanh.f32 %v1190_v40  ;;  %v1192_v51 = vmul.f32 0.7978846, %v1128_v11  ;;  %v4630_v5 = vld [vmem:[#allocation32_spill] sm:$0xff]  ;;  %v4631_v24 = vld [vmem:[#allocation69_spill] sm:$0xff] }
 0x18e   : > { %1863 = vmatmul.mubr.bf16.gmra.mrb[44].mxu1 %v1435_v60  ;;  %v1378_v46 = vmul.f32 %v1314_v6, %v866_v58  ;;  %2768 = vtanh.f32 %v1194_v29  ;;  %v1196_v56 = vmul.f32 0.7978846, %v1132_v61  ;;  %v863_v2 = vmul.f32 0.5, %v4622_v54  ;;  %v4632_v58 = vld [vmem:[#allocation41_spill] sm:$0xff]  ;;  %v4633_v60 = vld [vmem:[#allocation36_spill] sm:$0xff]  ;;  %v4634_v6 = vld [vmem:[#allocation26_spill] sm:$0xff] }
 0x18f   : > { %v2755_v18 = vpop.eup %2754  ;;  %v867_v20 = vmul.f32 0.5, %v4624_v37  ;;  %v1125_v44 = vadd.f32 %v4628_v55, %v4627_v39  ;;  %v1129_v7 = vadd.f32 %v4630_v5, %v4629_v32  ;;  %2770 = vtanh.f32 %v1192_v51 }
 0x190   : > { %v2757_v1 = vpop.eup %2756  ;;  %v1438_v63 = vpack.c.bf16 %v1378_v46, %v1374_v57  ;;  %v1312_v38 = vadd.f32 1.0, %v2755_v18  ;;  %v1127_v52 = vadd.f32 %v4632_v58, %v4631_v24  ;;  %2772 = vtanh.f32 %v1196_v56 }
 0x191   : > { %v2759_v53 = vpop.eup %2758  ;;  %v1316_v36 = vadd.f32 1.0, %v2757_v1  ;;  %v1189_v49 = vmul.f32 0.7978846, %v1125_v44  ;;  %v1193_v54 = vmul.f32 0.7978846, %v1129_v7  ;;  %v870_v29 = vmul.f32 0.5, %v3632_v10 }
 0x192   : > { %v2761_v40 = vpop.eup %2760  ;;  %1773 = vmatprep.mubr.bf16.mxu0 %v1438_v63  ;;  %v1309_v37 = vadd.f32 1.0, %v2759_v53  ;;  %v1131_v11 = vadd.f32 %v4634_v6, %v4633_v60  ;;  %v1191_v19 = vmul.f32 0.7978846, %v1127_v52  ;;  %v1376_v57 = vmul.f32 %v1312_v38, %v864_v31 }
 0x193   : > { %v2763_v61 = vpop.eup %2762  ;;  %v1380_v46 = vmul.f32 %v1316_v36, %v868_v28  ;;  %v1313_v51 = vadd.f32 1.0, %v2761_v40  ;;  %2774 = vtanh.f32 %v1189_v49  ;;  %v874_v10 = vmul.f32 0.5, %v3735_v16 }
 0x194   : > { %v2765_v18 = vpop.eup %2764  ;;  %v1373_v55 = vmul.f32 %v1309_v37, %v861_v8  ;;  %v1311_v5 = vadd.f32 1.0, %v2763_v61  ;;  %2776 = vtanh.f32 %v1193_v54  ;;  %v1195_v56 = vmul.f32 0.7978846, %v1131_v11 }
 0x195   : > { %v1440_v44 = vpack.c.bf16 %v1380_v46, %v1376_v57  ;;  %v1377_v7 = vmul.f32 %v1313_v51, %v865_v14  ;;  %v1315_v1 = vadd.f32 1.0, %v2765_v18  ;;  %2778 = vtanh.f32 %v1191_v19  ;;  %v4636_v51 = vld [vmem:[#allocation38_spill] sm:$0xff] }
 0x196   : > { %v872_v63 = vmul.f32 0.5, %v3646_v34  ;;  %2780 = vtanh.f32 %v1195_v56  ;;  %v1134_v31 = vadd.f32 %v3824_v47, %v3763_v43  ;;  %v1375_v58 = vmul.f32 %v1311_v5, %v863_v2 }
 0x197   : > { %v2767_v28 = vpop.eup %2766  ;;  %1870 = vmatprep.mubr.bf16.mxu1 %v1440_v44  ;;  %v1437_v38 = vpack.c.bf16 %v1377_v7, %v1373_v55  ;;  %v1379_v8 = vmul.f32 %v1315_v1, %v867_v20  ;;  %v1138_v52 = vadd.f32 %v3886_v21, %v3836_v35  ;;  %v876_v36 = vmul.f32 0.5, %v3739_v42 }
 0x198   : > { %v2769_v53 = vpop.eup %2768  ;;  %v1318_v14 = vadd.f32 1.0, %v2767_v28  ;;  %v1198_v49 = vmul.f32 0.7978846, %v1134_v31  ;;  %v1136_v34 = vadd.f32 %v3827_v50, %v3770_v13  ;;  %v1140_v40 = vadd.f32 %v3894_v3, %v3840_v4  ;;  %v4638_v28 = vld [vmem:[#allocation27_spill] sm:$0xff] }
 0x199   : > { %1774 = vmatmul.mubr.bf16.gmra.mrb[48].mxu0 %v1437_v38  ;;  %v1439_v16 = vpack.c.bf16 %v1379_v8, %v1375_v58  ;;  %v1322_v54 = vadd.f32 1.0, %v2769_v53  ;;  %v1202_v47 = vmul.f32 0.7978846, %v1138_v52  ;;  %v2771_v2 = vpop.eup %2770  ;;  %v869_v37 = vmul.f32 0.5, %v4627_v39  ;;  %v4635_v39 = vld [vmem:[#allocation24_spill] sm:$0xff] }
 0x19a   : > { %v1382_v20 = vmul.f32 %v1318_v14, %v870_v29  ;;  %2782 = vtanh.f32 %v1198_v49  ;;  %v1200_v21 = vmul.f32 0.7978846, %v1136_v34  ;;  %v2773_v6 = vpop.eup %2772  ;;  %v1320_v11 = vadd.f32 1.0, %v2771_v2 }
 0x19b   : > { %1871 = vmatmul.mubr.bf16.gmra.mrb[48].mxu1 %v1439_v16  ;;  %v1386_v42 = vmul.f32 %v1322_v54, %v874_v10  ;;  %2784 = vtanh.f32 %v1202_v47  ;;  %v1204_v19 = vmul.f32 0.7978846, %v1140_v40  ;;  %v1324_v50 = vadd.f32 1.0, %v2773_v6 }
 0x19c   : > { %v873_v61 = vmul.f32 0.5, %v4629_v32  ;;  %2786 = vtanh.f32 %v1200_v21  ;;  %v1133_v57 = vadd.f32 %v3818_v17, %v3749_v48  ;;  %v871_v29 = vmul.f32 0.5, %v4631_v24  ;;  %v4637_v17 = vld [vmem:[#allocation23_spill] sm:$0xff] }
 0x19d   : > { %v2775_v3 = vpop.eup %2774  ;;  %v1442_v46 = vpack.c.bf16 %v1386_v42, %v1382_v20  ;;  %2788 = vtanh.f32 %v1204_v19  ;;  %v1137_v18 = vadd.f32 %v4636_v51, %v4635_v39  ;;  %v1384_v5 = vmul.f32 %v1320_v11, %v872_v63  ;;  %v4639_v63 = vld [vmem:[#allocation33_spill] sm:$0xff] }
 0x19e   : > { %v2777_v55 = vpop.eup %2776  ;;  %v1388_v56 = vmul.f32 %v1324_v50, %v876_v36  ;;  %v1317_v44 = vadd.f32 1.0, %v2775_v3  ;;  %v1197_v7 = vmul.f32 0.7978846, %v1133_v57  ;;  %v875_v10 = vmul.f32 0.5, %v4633_v60  ;;  %v4640_v36 = vld [vmem:[#allocation31_spill] sm:$0xff] }
 0x19f   : > { %v2779_v1 = vpop.eup %2778  ;;  %1781 = vmatprep.mubr.bf16.mxu0 %v1442_v46  ;;  %v1321_v32 = vadd.f32 1.0, %v2777_v55  ;;  %v1201_v31 = vmul.f32 0.7978846, %v1137_v18  ;;  %v1135_v38 = vadd.f32 %v4638_v28, %v4637_v17  ;;  %v1139_v49 = vadd.f32 %v4640_v36, %v4639_v63 }
 0x1a0   : > { %v2781_v58 = vpop.eup %2780  ;;  %v1444_v24 = vpack.c.bf16 %v1388_v56, %v1384_v5  ;;  %v1381_v8 = vmul.f32 %v1317_v44, %v869_v37  ;;  %v1319_v52 = vadd.f32 1.0, %v2779_v1  ;;  %2790 = vtanh.f32 %v1197_v7 }
 0x1a1   : > { %v1385_v53 = vmul.f32 %v1321_v32, %v873_v61  ;;  %v1323_v14 = vadd.f32 1.0, %v2781_v58  ;;  %2792 = vtanh.f32 %v1201_v31  ;;  %v1084_v34 = vmul.f32 %v3977_v59, %v3951_v30 }
 0x1a2   : > { %1878 = vmatprep.mubr.bf16.mxu1 %v1444_v24  ;;  %v1383_v60 = vmul.f32 %v1319_v52, %v871_v29  ;;  %v878_v16 = vmul.f32 0.5, %v3763_v43  ;;  %v1199_v54 = vmul.f32 0.7978846, %v1135_v38  ;;  %v1203_v2 = vmul.f32 0.7978846, %v1139_v49 }
 0x1a3   : > { %v1441_v47 = vpack.c.bf16 %v1385_v53, %v1381_v8  ;;  %v1387_v40 = vmul.f32 %v1323_v14, %v875_v10  ;;  %v1142_v20 = vadd.f32 %v3922_v33, %v3866_v41  ;;  %v882_v21 = vmul.f32 0.5, %v3836_v35 }
 0x1a4   : > { %v2783_v37 = vpop.eup %2782  ;;  %v880_v6 = vmul.f32 0.5, %v3770_v13  ;;  %2794 = vtanh.f32 %v1199_v54  ;;  %v1146_v59 = vadd.f32 %v3980_v0, %v3941_v12  ;;  %v1144_v33 = vadd.f32 %v3926_v25, %v3876_v62 }
 0x1a5   : > { %v2785_v42 = vpop.eup %2784  ;;  %1782 = vmatmul.mubr.bf16.gmra.mrb[52].mxu0 %v1441_v47  ;;  %v1443_v11 = vpack.c.bf16 %v1387_v40, %v1383_v60  ;;  %v1326_v43 = vadd.f32 1.0, %v2783_v37  ;;  %2796 = vtanh.f32 %v1203_v2  ;;  %v1206_v19 = vmul.f32 0.7978846, %v1142_v20 }
 0x1a6   : > { %v2787_v50 = vpop.eup %2786  ;;  %v1330_v61 = vadd.f32 1.0, %v2785_v42  ;;  %v1210_v57 = vmul.f32 0.7978846, %v1146_v59  ;;  %v1148_v35 = vadd.f32 %v1084_v34, %v3951_v30  ;;  %v884_v46 = vmul.f32 0.5, %v3840_v4 }
 0x1a7   : > { %v2789_v3 = vpop.eup %2788  ;;  %1879 = vmatmul.mubr.bf16.gmra.mrb[52].mxu1 %v1443_v11  ;;  %v1390_v13 = vmul.f32 %v1326_v43, %v878_v16  ;;  %v1328_v0 = vadd.f32 1.0, %v2787_v50  ;;  %2798 = vtanh.f32 %v1206_v19  ;;  %v1208_v18 = vmul.f32 0.7978846, %v1144_v33 }
 0x1a8   : > { %v1394_v29 = vmul.f32 %v1330_v61, %v882_v21  ;;  %v1332_v51 = vadd.f32 1.0, %v2789_v3  ;;  %2800 = vtanh.f32 %v1210_v57  ;;  %v1083_v55 = vmul.f32 %v3958_v9, %v3917_v45 }
 0x1a9   : > { %v1392_v5 = vmul.f32 %v1328_v0, %v880_v6  ;;  %v1212_v56 = vmul.f32 0.7978846, %v1148_v35  ;;  %v1141_v25 = vadd.f32 %v3901_v22, %v3846_v23  ;;  %2802 = vtanh.f32 %v1208_v18  ;;  %v4641_v22 = vld [vmem:[#allocation45_spill] sm:$0xff] }
 0x1aa   : > { %v2791_v44 = vpop.eup %2790  ;;  %v1446_v7 = vpack.c.bf16 %v1394_v29, %v1390_v13  ;;  %v1396_v1 = vmul.f32 %v1332_v51, %v884_v46  ;;  %v1145_v4 = vadd.f32 %v3954_v27, %v3898_v26  ;;  %v877_v10 = vmul.f32 0.5, %v3749_v48 }
 0x1ab   : > { %v2793_v32 = vpop.eup %2792  ;;  %v1325_v31 = vadd.f32 1.0, %v2791_v44  ;;  %2804 = vtanh.f32 %v1212_v56  ;;  %v1205_v28 = vmul.f32 0.7978846, %v1141_v25  ;;  %v881_v38 = vmul.f32 0.5, %v4635_v39 }
 0x1ac   : > { %1789 = vmatprep.mubr.bf16.mxu0 %v1446_v7  ;;  %v1448_v9 = vpack.c.bf16 %v1396_v1, %v1392_v5  ;;  %v1329_v58 = vadd.f32 1.0, %v2793_v32  ;;  %v1209_v24 = vmul.f32 0.7978846, %v1145_v4  ;;  %v1143_v8 = vadd.f32 %v4641_v22, %v3850_v15 }
 0x1ad   : > { %2806 = vtanh.f32 %v1205_v28  ;;  %v1147_v52 = vadd.f32 %v1083_v55, %v3917_v45  ;;  %v1389_v27 = vmul.f32 %v1325_v31, %v877_v10  ;;  %v879_v39 = vmul.f32 0.5, %v4637_v17 }
 0x1ae   : > { %v2795_v53 = vpop.eup %2794  ;;  %1886 = vmatprep.mubr.bf16.mxu1 %v1448_v9  ;;  %v1393_v14 = vmul.f32 %v1329_v58, %v881_v38  ;;  %2808 = vtanh.f32 %v1209_v24  ;;  %v1207_v49 = vmul.f32 0.7978846, %v1143_v8  ;;  %v883_v16 = vmul.f32 0.5, %v4639_v63  ;;  %v1405_v8 = vld [vmem:[#allocation2] sm:$0xff] }
 0x1af   : > { %v2797_v48 = vpop.eup %2796  ;;  %v1327_v36 = vadd.f32 1.0, %v2795_v53  ;;  %v1211_v34 = vmul.f32 0.7978846, %v1147_v52  ;;  %v886_v21 = vmul.f32 0.5, %v3866_v41  ;;  %v890_v6 = vmul.f32 0.5, %v3941_v12  ;;  %v1406_v53 = vld [vmem:[#allocation2 + $0x8] sm:$0xff] }
 0x1b0   : > { %v1445_v60 = vpack.c.bf16 %v1393_v14, %v1389_v27  ;;  %v1331_v54 = vadd.f32 1.0, %v2797_v48  ;;  %2810 = vtanh.f32 %v1207_v49  ;;  %v888_v50 = vmul.f32 0.5, %v3876_v62 }
 0x1b1   : > { %v2799_v47 = vpop.eup %2798  ;;  %v1391_v2 = vmul.f32 %v1327_v36, %v879_v39  ;;  %2812 = vtanh.f32 %v1211_v34  ;;  %v892_v61 = vmul.f32 0.5, %v3951_v30  ;;  %v885_v12 = vmul.f32 0.5, %v3846_v23 }
 0x1b2   : > { %v2801_v40 = vpop.eup %2800  ;;  %1790 = vmatmul.mubr.bf16.gmra.mrb[56].mxu0 %v1445_v60  ;;  %v1395_v20 = vmul.f32 %v1331_v54, %v883_v16  ;;  %v1334_v37 = vadd.f32 1.0, %v2799_v47  ;;  %v889_v0 = vmul.f32 0.5, %v3898_v26  ;;  %v887_v25 = vmul.f32 0.5, %v3850_v15 }
 0x1b3   : > { %v1338_v59 = vadd.f32 1.0, %v2801_v40  ;;  %v2803_v42 = vpop.eup %2802  ;;  %v891_v44 = vmul.f32 0.5, %v3917_v45 }
 0x1b4   : > { %v1447_v11 = vpack.c.bf16 %v1395_v20, %v1391_v2  ;;  %v1398_v17 = vmul.f32 %v1334_v37, %v886_v21  ;;  %v1336_v63 = vadd.f32 1.0, %v2803_v42  ;;  %v1407_v20 = vld [vmem:[#allocation2 + $0x10] sm:$0xff] }
 0x1b5   : > { %v2805_v43 = vpop.eup %2804  ;;  %v1402_v19 = vmul.f32 %v1338_v59, %v890_v6  ;;  %v1408_v59 = vld [vmem:[#allocation2 + $0x18] sm:$0xff] }
 0x1b6   : > { %1887 = vmatmul.mubr.bf16.gmra.mrb[56].mxu1 %v1447_v11  ;;  %v1340_v57 = vadd.f32 1.0, %v2805_v43  ;;  %v1400_v13 = vmul.f32 %v1336_v63, %v888_v50 }
 0x1b7   : > { %v2807_v33 = vpop.eup %2806  ;;  %v1450_v35 = vpack.c.bf16 %v1402_v19, %v1398_v17 }
 0x1b8   : > { %v2809_v3 = vpop.eup %2808  ;;  %v1404_v41 = vmul.f32 %v1340_v57, %v892_v61  ;;  %v1333_v46 = vadd.f32 1.0, %v2807_v33 }
 0x1b9   : > { %1797 = vmatprep.mubr.bf16.mxu0 %v1450_v35  ;;  %v1337_v29 = vadd.f32 1.0, %v2809_v3 }
 0x1ba   : > { %v1452_v51 = vpack.c.bf16 %v1404_v41, %v1400_v13  ;;  %v2811_v18 = vpop.eup %2810  ;;  %v1397_v55 = vmul.f32 %v1333_v46, %v885_v12  ;;  %v1409_v41 = vld [vmem:[#allocation2 + $0x20] sm:$0xff] }
 0x1bb   : > { %v1401_v5 = vmul.f32 %v1337_v29, %v889_v0  ;;  %v2813_v62 = vpop.eup %2812  ;;  %v1335_v30 = vadd.f32 1.0, %v2811_v18  ;;  %v1410_v29 = vld [vmem:[#allocation2 + $0x28] sm:$0xff] }
 0x1bc   : > { %1894 = vmatprep.mubr.bf16.mxu1 %v1452_v51  ;;  %v1339_v7 = vadd.f32 1.0, %v2813_v62 }
 0x1bd   : > { %v1449_v56 = vpack.c.bf16 %v1401_v5, %v1397_v55  ;;  %v1399_v1 = vmul.f32 %v1335_v30, %v887_v25 }
 0x1be   : > { %v1403_v4 = vmul.f32 %v1339_v7, %v891_v44 }
 0x1bf   : > { %1798 = vmatmul.mubr.bf16.gmra.mrb[60].mxu0 %v1449_v56 }
 0x1c0   : > { %v1451_v23 = vpack.c.bf16 %v1403_v4, %v1399_v1 }
 0x1c2   : > { %1895 = vmatmul.mubr.bf16.gmra.mrb[60].mxu1 %v1451_v23 }
 0x21f   : > { %v2479_v26 = vpop.f32.mrb[32].mxu0 }
 0x220   : > { %v2480_v32 = vpop.f32.mrb[33].mxu0 }
 0x221   : > { %v2481_v31 = vadd.f32 %v2480_v32, %v2479_v26  ;;  %v2482_v28 = vpop.f32.mrb[34].mxu0  ;;  %v1411_v26 = vld [vmem:[#allocation2 + $0x30] sm:$0xff] }
 0x222   : > { %v2543_v10 = vpop.f32.mrb[32].mxu1  ;;  %v2483_v38 = vpop.f32.mrb[35].mxu0 }
 0x223   : > { %v2544_v9 = vpop.f32.mrb[33].mxu1  ;;  %v2484_v22 = vadd.f32 %v2483_v38, %v2482_v28  ;;  %v1412_v28 = vld [vmem:[#allocation2 + $0x38] sm:$0xff] }
 0x224   : > { %v2545_v58 = vadd.f32 %v2544_v9, %v2543_v10  ;;  %v2546_v24 = vpop.f32.mrb[34].mxu1 }
 0x225   : > { %v2547_v15 = vpop.f32.mrb[35].mxu1 }
 0x226   : > { %v1841_v52 = vadd.f32 %v2545_v58, %v2481_v31  ;;  %v2548_v45 = vadd.f32 %v2547_v15, %v2546_v24 }
 0x228   : > { %v1903_v27 = vadd.f32 %v1841_v52, %v1405_v8  ;;  %v1844_v14 = vadd.f32 %v2548_v45, %v2484_v22 }
 0x22a   : > { %1919 = vst.msk [vmem:[#allocation2] sm:$0xff] %vm578_vm1, %v1903_v27  ;;  %v1904_v48 = vadd.f32 %v1844_v14, %v1406_v53 }
 0x22c   : > { %1920 = vst.msk [vmem:[#allocation2 + $0x8] sm:$0xff] %vm578_vm1, %v1904_v48 }
 0x234   : > { %v2485_v36 = vpop.f32.mrb[36].mxu0 }
 0x235   : > { %v2486_v49 = vpop.f32.mrb[37].mxu0 }
 0x236   : > { %v2487_v34 = vadd.f32 %v2486_v49, %v2485_v36  ;;  %v2488_v60 = vpop.f32.mrb[38].mxu0  ;;  %v1413_v36 = vld [vmem:[#allocation2 + $0x40] sm:$0xff] }
 0x237   : > { %v2549_v39 = vpop.f32.mrb[36].mxu1  ;;  %v2489_v16 = vpop.f32.mrb[39].mxu0 }
 0x238   : > { %v2550_v54 = vpop.f32.mrb[37].mxu1  ;;  %v2490_v47 = vadd.f32 %v2489_v16, %v2488_v60 }
 0x239   : > { %v2551_v40 = vadd.f32 %v2550_v54, %v2549_v39  ;;  %v2552_v2 = vpop.f32.mrb[38].mxu1  ;;  %v1414_v39 = vld [vmem:[#allocation2 + $0x48] sm:$0xff] }
 0x23a   : > { %v2553_v37 = vpop.f32.mrb[39].mxu1 }
 0x23b   : > { %v1849_v21 = vadd.f32 %v2551_v40, %v2487_v34  ;;  %v2554_v6 = vadd.f32 %v2553_v37, %v2552_v2 }
 0x23d   : > { %v1905_v42 = vadd.f32 %v1849_v21, %v1407_v20  ;;  %v1852_v11 = vadd.f32 %v2554_v6, %v2490_v47 }
 0x23f   : > { %1921 = vst.msk [vmem:[#allocation2 + $0x10] sm:$0xff] %vm578_vm1, %v1905_v42  ;;  %v1906_v43 = vadd.f32 %v1852_v11, %v1408_v59 }
 0x241   : > { %1922 = vst.msk [vmem:[#allocation2 + $0x18] sm:$0xff] %vm578_vm1, %v1906_v43 }
 0x24a   : > { %v2491_v17 = vpop.f32.mrb[40].mxu0 }
 0x24b   : > { %v2492_v19 = vpop.f32.mrb[41].mxu0 }
 0x24c   : > { %v2555_v63 = vpop.f32.mrb[40].mxu1  ;;  %v2493_v50 = vadd.f32 %v2492_v19, %v2491_v17  ;;  %v2494_v61 = vpop.f32.mrb[42].mxu0  ;;  %v1415_v17 = vld [vmem:[#allocation2 + $0x50] sm:$0xff] }
 0x24d   : > { %v2556_v57 = vpop.f32.mrb[41].mxu1  ;;  %v2495_v33 = vpop.f32.mrb[43].mxu0 }
 0x24e   : > { %v2557_v35 = vadd.f32 %v2556_v57, %v2555_v63  ;;  %v2558_v3 = vpop.f32.mrb[42].mxu1  ;;  %v2496_v13 = vadd.f32 %v2495_v33, %v2494_v61  ;;  %v1416_v61 = vld [vmem:[#allocation2 + $0x58] sm:$0xff] }
 0x24f   : > { %v2559_v46 = vpop.f32.mrb[43].mxu1 }
 0x250   : > { %v1857_v12 = vadd.f32 %v2557_v35, %v2493_v50  ;;  %v2560_v0 = vadd.f32 %v2559_v46, %v2558_v3 }
 0x252   : > { %v1907_v51 = vadd.f32 %v1857_v12, %v1409_v41  ;;  %v1860_v18 = vadd.f32 %v2560_v0, %v2496_v13 }
 0x254   : > { %1923 = vst.msk [vmem:[#allocation2 + $0x20] sm:$0xff] %vm578_vm1, %v1907_v51  ;;  %v1908_v55 = vadd.f32 %v1860_v18, %v1410_v29 }
 0x256   : > { %1924 = vst.msk [vmem:[#allocation2 + $0x28] sm:$0xff] %vm578_vm1, %v1908_v55 }
 0x25f   : > { %v2497_v5 = vpop.f32.mrb[44].mxu0 }
 0x260   : > { %v2498_v62 = vpop.f32.mrb[45].mxu0 }
 0x261   : > { %v2561_v30 = vpop.f32.mrb[44].mxu1  ;;  %v2499_v56 = vadd.f32 %v2498_v62, %v2497_v5  ;;  %v2500_v25 = vpop.f32.mrb[46].mxu0  ;;  %v1417_v5 = vld [vmem:[#allocation2 + $0x60] sm:$0xff] }
 0x262   : > { %v2562_v44 = vpop.f32.mrb[45].mxu1  ;;  %v2501_v7 = vpop.f32.mrb[47].mxu0 }
 0x263   : > { %v2563_v1 = vadd.f32 %v2562_v44, %v2561_v30  ;;  %v2564_v4 = vpop.f32.mrb[46].mxu1  ;;  %v2502_v23 = vadd.f32 %v2501_v7, %v2500_v25  ;;  %v1418_v25 = vld [vmem:[#allocation2 + $0x68] sm:$0xff] }
 0x264   : > { %v2565_v32 = vpop.f32.mrb[47].mxu1 }
 0x265   : > { %v1865_v10 = vadd.f32 %v2563_v1, %v2499_v56  ;;  %v2566_v31 = vadd.f32 %v2565_v32, %v2564_v4 }
 0x267   : > { %v1909_v9 = vadd.f32 %v1865_v10, %v1411_v26  ;;  %v1868_v38 = vadd.f32 %v2566_v31, %v2502_v23 }
 0x269   : > { %1925 = vst.msk [vmem:[#allocation2 + $0x30] sm:$0xff] %vm578_vm1, %v1909_v9  ;;  %v1910_v58 = vadd.f32 %v1868_v38, %v1412_v28 }
 0x26b   : > { %1926 = vst.msk [vmem:[#allocation2 + $0x38] sm:$0xff] %vm578_vm1, %v1910_v58 }
 0x26c   : > { %v2503_v24 = vpop.f32.mrb[48].mxu0 }
 0x26d   : > { %v2504_v22 = vpop.f32.mrb[49].mxu0 }
 0x26e   : > { %v2567_v8 = vpop.f32.mrb[48].mxu1  ;;  %v2505_v15 = vadd.f32 %v2504_v22, %v2503_v24  ;;  %v2506_v52 = vpop.f32.mrb[50].mxu0  ;;  %v1419_v24 = vld [vmem:[#allocation2 + $0x70] sm:$0xff] }
 0x26f   : > { %v2568_v45 = vpop.f32.mrb[49].mxu1  ;;  %v2507_v53 = vpop.f32.mrb[51].mxu0 }
 0x270   : > { %v2569_v27 = vadd.f32 %v2568_v45, %v2567_v8  ;;  %v2570_v14 = vpop.f32.mrb[50].mxu1  ;;  %v2508_v48 = vadd.f32 %v2507_v53, %v2506_v52  ;;  %v1420_v52 = vld [vmem:[#allocation2 + $0x78] sm:$0xff] }
 0x271   : > { %v2571_v49 = vpop.f32.mrb[51].mxu1 }
 0x272   : > { %v1873_v34 = vadd.f32 %v2569_v27, %v2505_v15  ;;  %v2572_v60 = vadd.f32 %v2571_v49, %v2570_v14  ;;  %v1939_v14 = vld [vmem:[#allocation2] sm:$0xff] (!%p2454_p12) }
 0x273   : > { %v4642_v49 = vld [vmem:[#allocation7_spill] sm:$0xff] (!%p2454_p12) }
 0x274   : > { %v1911_v16 = vadd.f32 %v1873_v34, %v1413_v36  ;;  %v1876_v54 = vadd.f32 %v2572_v60, %v2508_v48  ;;  %v4084_v48 = vld [vmem:[%s4400_s5] ss:$0 sm:$0xff] (!%p2454_p12)  ;;  %v1941_v36 = vld [vmem:[#allocation2 + $0x10] sm:$0xff] (!%p2454_p12)  ;;  %v1955_v34 = vadd.f32 (!%p2454_p12), %v1939_v14, %v4642_v49 }
 0x275   : > { %v4643_v60 = vld [vmem:[#allocation9_spill] sm:$0xff] (!%p2454_p12) }
 0x276   : > { %1927 = vst.msk [vmem:[#allocation2 + $0x40] sm:$0xff] %vm578_vm1, %v1911_v16  ;;  %v1912_v47 = vadd.f32 %v1876_v54, %v1414_v39  ;;  %v1957_v39 = vadd.f32 (!%p2454_p12), %v1941_v36, %v4643_v60  ;;  %v1940_v16 = vld [vmem:[#allocation2 + $0x8] sm:$0xff] (!%p2454_p12)  ;;  %v1942_v54 = vld [vmem:[#allocation2 + $0x18] sm:$0xff] (!%p2454_p12)  ;;  %v4656_v60 = vld [vmem:[#allocation21_spill] sm:$0xff] (!%p2454_p12) }
 0x278   : > { %1928 = vst.msk [vmem:[#allocation2 + $0x48] sm:$0xff] %vm578_vm1, %v1912_v47  ;;  %v2509_v40 = vpop.f32.mrb[52].mxu0  ;;  %v1943_v47 = vld [vmem:[#allocation2 + $0x20] sm:$0xff] (!%p2454_p12) }
 0x279   : > { %v2510_v2 = vpop.f32.mrb[53].mxu0 }
 0x27a   : > { %v2573_v20 = vpop.f32.mrb[52].mxu1  ;;  %v2511_v37 = vadd.f32 %v2510_v2, %v2509_v40  ;;  %v2512_v21 = vpop.f32.mrb[54].mxu0  ;;  %v4644_v40 = vld [vmem:[#allocation8_spill] sm:$0xff] (!%p2454_p12) }
 0x27b   : > { %v2574_v6 = vpop.f32.mrb[53].mxu1  ;;  %v2513_v59 = vpop.f32.mrb[55].mxu0  ;;  %v1956_v2 = vadd.f32 (!%p2454_p12), %v1940_v16, %v4644_v40  ;;  %v4657_v40 = vld [vmem:[#allocation22_spill] sm:$0xff] (!%p2454_p12) }
 0x27c   : > { %v2575_v42 = vadd.f32 %v2574_v6, %v2573_v20  ;;  %v2576_v11 = vpop.f32.mrb[54].mxu1  ;;  %v2514_v43 = vadd.f32 %v2513_v59, %v2512_v21  ;;  %v4645_v20 = vld [vmem:[#allocation10_spill] sm:$0xff] (!%p2454_p12)  ;;  %v1944_v21 = vld [vmem:[#allocation2 + $0x28] sm:$0xff] (!%p2454_p12)  ;;  %v4091_v6 = vadd.f32 (!%p2454_p12), %v4084_v48, %v1955_v34  ;;  %v4094_v59 = vadd.f32 (!%p2454_p12), %v4084_v48, %v1957_v39 }
 0x27d   : > { %v2577_v19 = vpop.f32.mrb[55].mxu1 }
 0x27e   : > { %v1881_v63 = vadd.f32 %v2575_v42, %v2511_v37  ;;  %v2578_v50 = vadd.f32 %v2577_v19, %v2576_v11  ;;  %v1958_v37 = vadd.f32 (!%p2454_p12), %v1942_v54, %v4645_v20  ;;  %v4646_v42 = vld [vmem:[#allocation11_spill] sm:$0xff] (!%p2454_p12)  ;;  %v1945_v19 = vld [vmem:[#allocation2 + $0x30] sm:$0xff] (!%p2454_p12) }
 0x27f   : > { %v1959_v11 = vadd.f32 (!%p2454_p12), %v1943_v47, %v4646_v42 }
 0x280   : > { %v1913_v57 = vadd.f32 %v1881_v63, %v1415_v17  ;;  %v1884_v33 = vadd.f32 %v2578_v50, %v2514_v43  ;;  %v4647_v43 = vld [vmem:[#allocation12_spill] sm:$0xff] (!%p2454_p12)  ;;  %v1946_v63 = vld [vmem:[#allocation2 + $0x38] sm:$0xff] (!%p2454_p12)  ;;  %v4099_v50 = vadd.f32 (!%p2454_p12), %v4084_v48, %v1956_v2 }
 0x281   : > { %v1960_v17 = vadd.f32 (!%p2454_p12), %v1944_v21, %v4647_v43 }
 0x282   : > { %1929 = vst.msk [vmem:[#allocation2 + $0x50] sm:$0xff] %vm578_vm1, %v1913_v57  ;;  %v1914_v35 = vadd.f32 %v1884_v33, %v1416_v61  ;;  %v4102_v61 = vadd.f32 (!%p2454_p12), %v4084_v48, %v1958_v37  ;;  %v1996_v57 = vsel (!%p2454_p12), %vm578_vm1, %v4091_v6, 0.0  ;;  %v2002_v33 = vsel (!%p2454_p12), %vm578_vm1, %v4094_v59, 0.0 }
 0x283   : > { %1997 = vadd.xlane.f32.xlu0 (!%p2454_p12), %v1996_v57  ;;  %2003 = vadd.xlane.f32.xlu1 (!%p2454_p12), %v2002_v33 }
 0x284   : > { %1930 = vst.msk [vmem:[#allocation2 + $0x58] sm:$0xff] %vm578_vm1, %v1914_v35  ;;  %v4648_v35 = vld [vmem:[#allocation13_spill] sm:$0xff] (!%p2454_p12) }
 0x285   : > { %v2515_v3 = vpop.f32.mrb[56].mxu0 }
 0x286   : > { %v2516_v13 = vpop.f32.mrb[57].mxu0 }
 0x287   : > { %v2517_v41 = vadd.f32 %v2516_v13, %v2515_v3  ;;  %v2518_v46 = vpop.f32.mrb[58].mxu0  ;;  %v1961_v3 = vadd.f32 (!%p2454_p12), %v1945_v19, %v4648_v35  ;;  %v4649_v13 = vld [vmem:[#allocation14_spill] sm:$0xff] (!%p2454_p12) }
 0x288   : > { %v2519_v12 = vpop.f32.mrb[59].mxu0 }
 0x289   : > { %v2579_v0 = vpop.f32.mrb[56].mxu1  ;;  %v2520_v29 = vadd.f32 %v2519_v12, %v2518_v46  ;;  %v1999_v46 = vsel (!%p2454_p12), %vm578_vm1, %v4099_v50, 0.0  ;;  %v2005_v12 = vsel (!%p2454_p12), %vm578_vm1, %v4102_v61, 0.0 }
 0x28a   : > { %v2580_v51 = vpop.f32.mrb[57].mxu1  ;;  %2000 = vadd.xlane.f32.xlu0 (!%p2454_p12), %v1999_v46  ;;  %2006 = vadd.xlane.f32.xlu1 (!%p2454_p12), %v2005_v12 }
 0x28b   : > { %v2581_v18 = vadd.f32 %v2580_v51, %v2579_v0  ;;  %v2582_v55 = vpop.f32.mrb[58].mxu1  ;;  %v4115_v0 = vadd.f32 (!%p2454_p12), %v4084_v48, %v1959_v11  ;;  %v1947_v51 = vld [vmem:[#allocation2 + $0x40] sm:$0xff] (!%p2454_p12) }
 0x28c   : > { %v2583_v62 = vpop.f32.mrb[59].mxu1 }
 0x28d   : > { %v1889_v30 = vadd.f32 %v2581_v18, %v2517_v41  ;;  %v2584_v56 = vadd.f32 %v2583_v62, %v2582_v55  ;;  %v1962_v41 = vadd.f32 (!%p2454_p12), %v1946_v63, %v4649_v13  ;;  %v1948_v18 = vld [vmem:[#allocation2 + $0x48] sm:$0xff] (!%p2454_p12)  ;;  %v4121_v55 = vadd.f32 (!%p2454_p12), %v4084_v48, %v1961_v3 }
 0x28e   : > { %v2008_v62 = vsel (!%p2454_p12), %vm578_vm1, %v4115_v0, 0.0 }
 0x28f   : > { %v1915_v44 = vadd.f32 %v1889_v30, %v1417_v5  ;;  %v1892_v7 = vadd.f32 %v2584_v56, %v2520_v29  ;;  %v4118_v29 = vadd.f32 (!%p2454_p12), %v4084_v48, %v1960_v17  ;;  %v4124_v5 = vadd.f32 (!%p2454_p12), %v4084_v48, %v1962_v41  ;;  %v4650_v56 = vld [vmem:[#allocation15_spill] sm:$0xff] (!%p2454_p12)  ;;  %2009 = vadd.xlane.f32.xlu0 (!%p2454_p12), %v2008_v62 }
 0x291   : > { %1931 = vst.msk [vmem:[#allocation2 + $0x60] sm:$0xff] %vm578_vm1, %v1915_v44  ;;  %v1916_v1 = vadd.f32 %v1892_v7, %v1418_v25  ;;  %v2011_v30 = vsel (!%p2454_p12), %vm578_vm1, %v4118_v29, 0.0  ;;  %v1963_v25 = vadd.f32 (!%p2454_p12), %v1947_v51, %v4650_v56  ;;  %v4651_v44 = vld [vmem:[#allocation16_spill] sm:$0xff] (!%p2454_p12) }
 0x292   : > { %v2521_v4 = vpop.f32.mrb[60].mxu0  ;;  %v1964_v7 = vadd.f32 (!%p2454_p12), %v1948_v18, %v4651_v44  ;;  %2012 = vadd.xlane.f32.xlu1 (!%p2454_p12), %v2011_v30 }
 0x293   : > { %1932 = vst.msk [vmem:[#allocation2 + $0x68] sm:$0xff] %vm578_vm1, %v1916_v1  ;;  %v2522_v23 = vpop.f32.mrb[61].mxu0  ;;  %v1949_v1 = vld [vmem:[#allocation2 + $0x50] sm:$0xff] (!%p2454_p12) }
 0x294   : > { %v2523_v26 = vadd.f32 %v2522_v23, %v2521_v4  ;;  %v2524_v32 = vpop.f32.mrb[62].mxu0  ;;  %v1950_v4 = vld [vmem:[#allocation2 + $0x58] sm:$0xff] (!%p2454_p12)  ;;  %v2014_v23 = vsel (!%p2454_p12), %vm578_vm1, %v4121_v55, 0.0 }
 0x295   : > { %v2525_v10 = vpop.f32.mrb[63].mxu0  ;;  %v2585_v31 = vpop.f32.mrb[60].mxu1  ;;  %2015 = vadd.xlane.f32.xlu0 (!%p2454_p12), %v2014_v23 }
 0x296   : > { %v2526_v28 = vadd.f32 %v2525_v10, %v2524_v32  ;;  %v2586_v9 = vpop.f32.mrb[61].mxu1  ;;  %v4137_v32 = vadd.f32 (!%p2454_p12), %v4084_v48, %v1963_v25  ;;  %v4140_v10 = vadd.f32 (!%p2454_p12), %v4084_v48, %v1964_v7 }
 0x297   : > { %v2587_v38 = vadd.f32 %v2586_v9, %v2585_v31  ;;  %v2588_v58 = vpop.f32.mrb[62].mxu1  ;;  %v4652_v31 = vld [vmem:[#allocation17_spill] sm:$0xff] (!%p2454_p12)  ;;  %v4653_v9 = vld [vmem:[#allocation18_spill] sm:$0xff] (!%p2454_p12) }
 0x298   : > { %v2589_v22 = vpop.f32.mrb[63].mxu1 }
 0x299   : > { %v1897_v8 = vadd.f32 %v2587_v38, %v2523_v26  ;;  %v2590_v15 = vadd.f32 %v2589_v22, %v2588_v58  ;;  %1938 = sbr.rel (%p2454_p12) target bundleno = 997 (0x3e5), region = 83  ;;  %v2017_v26 = vsel (!%p2454_p12), %vm578_vm1, %v4124_v5, 0.0  ;;  %v1966_v38 = vadd.f32 (!%p2454_p12), %v1950_v4, %v4653_v9  ;;  %v1951_v58 = vld [vmem:[#allocation2 + $0x60] sm:$0xff] (!%p2454_p12) }
 0x29a   : > { %2018 = vadd.xlane.f32.xlu1 (!%p2454_p12), %v2017_v26  ;;  %v4654_v22 = vld [vmem:[#allocation19_spill] sm:$0xff] (!%p2454_p12) }
 0x29b   : > { %v1917_v45 = vadd.f32 %v1897_v8, %v1419_v24  ;;  %v1900_v53 = vadd.f32 %v2590_v15, %v2526_v28  ;;  %v1965_v28 = vadd.f32 (!%p2454_p12), %v1949_v1, %v4652_v31  ;;  %v1952_v24 = vld [vmem:[#allocation2 + $0x68] sm:$0xff] (!%p2454_p12)  ;;  %v1967_v8 = vadd.f32 (!%p2454_p12), %v1951_v58, %v4654_v22 }
 0x29c   : > { %v4655_v15 = vld [vmem:[#allocation20_spill] sm:$0xff] (!%p2454_p12)  ;;  %v4154_v14 = vadd.f32 (!%p2454_p12), %v4084_v48, %v1966_v38 }
 0x29d   : > { %1933 = vst.msk [vmem:[#allocation2 + $0x70] sm:$0xff] %vm578_vm1, %v1917_v45  ;;  %v1918_v27 = vadd.f32 %v1900_v53, %v1420_v52  ;;  %v1968_v52 = vadd.f32 (!%p2454_p12), %v1952_v24, %v4655_v15  ;;  %v2020_v45 = vsel (!%p2454_p12), %vm578_vm1, %v4137_v32, 0.0  ;;  %v2023_v53 = vsel (!%p2454_p12), %vm578_vm1, %v4140_v10, 0.0 }
 0x29e   : > { %2021 = vadd.xlane.f32.xlu0 (!%p2454_p12), %v2020_v45  ;;  %2024 = vadd.xlane.f32.xlu1 (!%p2454_p12), %v2023_v53  ;;  %v4157_v34 = vadd.f32 (!%p2454_p12), %v4084_v48, %v1967_v8  ;;  %v2029_v54 = vsel (!%p2454_p12), %vm578_vm1, %v4154_v14, 0.0 }
 0x29f   : > { %1934 = vst.msk [vmem:[#allocation2 + $0x78] sm:$0xff] %vm578_vm1, %v1918_v27  ;;  %v4151_v27 = vadd.f32 (!%p2454_p12), %v4084_v48, %v1965_v28  ;;  %v4165_v47 = vadd.f32 (!%p2454_p12), %v4084_v48, %v1968_v52 }
 0x2a0   : > { %v2032_v20 = vsel %vm578_vm1, %v4157_v34, 0.0 }
 0x2a1   : > { %v2026_v16 = vsel %vm578_vm1, %v4151_v27, 0.0  ;;  %v2035_v37 = vsel %vm578_vm1, %v4165_v47, 0.0 }
 0x2a2   : > { %2027 = vadd.xlane.f32.xlu0 %v2026_v16  ;;  %2030 = vadd.xlane.f32.xlu1 %v2029_v54 }
 0x2a4   : > { %v1953_v36 = vld [vmem:[#allocation2 + $0x70] sm:$0xff] }
 0x2a5   : > { %v1969_v39 = vadd.f32 %v1953_v36, %v4656_v60 }
 0x2a6   : > { %v1954_v49 = vld [vmem:[#allocation2 + $0x78] sm:$0xff]  ;;  %2033 = vadd.xlane.f32.xlu0 %v2032_v20  ;;  %2036 = vadd.xlane.f32.xlu1 %v2035_v37 }
 0x2a7   : > { %v1970_v2 = vadd.f32 %v1954_v49, %v4657_v40  ;;  %v4173_v21 = vadd.f32 %v4084_v48, %v1969_v39 }
 0x2a9   : > { %v4176_v42 = vadd.f32 %v4084_v48, %v1970_v2  ;;  %v2038_v11 = vsel %vm578_vm1, %v4173_v21, 0.0 }
 0x2aa   : > { %2039 = vadd.xlane.f32.xlu0 %v2038_v11 }
 0x2ab   : > { %v2041_v43 = vsel %vm578_vm1, %v4176_v42, 0.0 }
 0x2ac   : > { %2042 = vadd.xlane.f32.xlu1 %v2041_v43 }
 0x310   : > { %v1998_v17 = vpop.xlane.xlu0 %1997  ;;  %v2004_v19 = vpop.xlane.xlu1 %2003 }
 0x311   : > { %v2045_v63 = vmul.f32 0.03125, %v1998_v17  ;;  %v2047_v57 = vmul.f32 0.03125, %v2004_v19 }
 0x313   : > { %v4183_v33 = vsub.f32 %v4091_v6, %v2045_v63  ;;  %v4186_v48 = vsub.f32 %v4094_v59, %v2047_v57 }
 0x315   : > { %v2077_v46 = vmul.f32 %v4183_v33, %v4183_v33  ;;  %v2079_v12 = vmul.f32 %v4186_v48, %v4186_v48 }
 0x317   : > { %v2001_v35 = vpop.xlane.xlu0 %2000  ;;  %v2007_v3 = vpop.xlane.xlu1 %2006  ;;  %v2093_v6 = vsel %vm578_vm1, %v2077_v46, 0.0  ;;  %v2099_v30 = vsel %vm578_vm1, %v2079_v12, 0.0 }
 0x318   : > { %v2046_v13 = vmul.f32 0.03125, %v2001_v35  ;;  %v2048_v41 = vmul.f32 0.03125, %v2007_v3  ;;  %2094 = vadd.xlane.f32.xlu0 %v2093_v6 }
 0x31a   : > { %v4193_v51 = vsub.f32 %v4099_v50, %v2046_v13  ;;  %v4196_v18 = vsub.f32 %v4102_v61, %v2048_v41 }
 0x31c   : > { %v2010_v59 = vpop.xlane.xlu0 %2009  ;;  %v2078_v44 = vmul.f32 %v4193_v51, %v4193_v51  ;;  %v2080_v7 = vmul.f32 %v4196_v18, %v4196_v18  ;;  %2100 = vadd.xlane.f32.xlu0 %v2099_v30 }
 0x31d   : > { %v2049_v56 = vmul.f32 0.03125, %v2010_v59 }
 0x31e   : > { %v2096_v1 = vsel %vm578_vm1, %v2078_v44, 0.0  ;;  %v2102_v26 = vsel %vm578_vm1, %v2080_v7, 0.0 }
 0x31f   : > { %v2013_v62 = vpop.xlane.xlu1 %2012  ;;  %v4205_v50 = vsub.f32 %v4115_v0, %v2049_v56  ;;  %2097 = vadd.xlane.f32.xlu1 %v2096_v1 }
 0x320   : > { %v2050_v25 = vmul.f32 0.03125, %v2013_v62 }
 0x321   : > { %v2081_v9 = vmul.f32 %v4205_v50, %v4205_v50 }
 0x322   : > { %v4208_v61 = vsub.f32 %v4118_v29, %v2050_v25  ;;  %v2016_v4 = vpop.xlane.xlu0 %2015 }
 0x323   : > { %v2051_v31 = vmul.f32 0.03125, %v2016_v4  ;;  %v2105_v58 = vsel %vm578_vm1, %v2081_v9, 0.0  ;;  %2103 = vadd.xlane.f32.xlu1 %v2102_v26 }
 0x324   : > { %v2082_v0 = vmul.f32 %v4208_v61, %v4208_v61  ;;  %2106 = vadd.xlane.f32.xlu0 %v2105_v58 }
 0x325   : > { %v4217_v38 = vsub.f32 %v4121_v55, %v2051_v31 }
 0x326   : > { %v2108_v8 = vsel %vm578_vm1, %v2082_v0, 0.0 }
 0x327   : > { %v2019_v23 = vpop.xlane.xlu1 %2018  ;;  %v2083_v45 = vmul.f32 %v4217_v38, %v4217_v38  ;;  %2109 = vadd.xlane.f32.xlu1 %v2108_v8 }
 0x328   : > { %v2052_v28 = vmul.f32 0.03125, %v2019_v23 }
 0x329   : > { %v2111_v36 = vsel %vm578_vm1, %v2083_v45, 0.0 }
 0x32a   : > { %v4220_v29 = vsub.f32 %v4124_v5, %v2052_v28  ;;  %2112 = vadd.xlane.f32.xlu0 %v2111_v36 }
 0x32b   : > { %v2022_v24 = vpop.xlane.xlu0 %2021  ;;  %v2025_v22 = vpop.xlane.xlu1 %2024 }
 0x32c   : > { %v2053_v15 = vmul.f32 0.03125, %v2022_v24  ;;  %v2054_v52 = vmul.f32 0.03125, %v2025_v22  ;;  %v2084_v55 = vmul.f32 %v4220_v29, %v4220_v29 }
 0x32e   : > { %v4229_v53 = vsub.f32 %v4137_v32, %v2053_v15  ;;  %v4232_v5 = vsub.f32 %v4140_v10, %v2054_v52  ;;  %v2114_v39 = vsel %vm578_vm1, %v2084_v55, 0.0 }
 0x32f   : > { %v2028_v49 = vpop.xlane.xlu0 %2027  ;;  %v2031_v60 = vpop.xlane.xlu1 %2030  ;;  %2115 = vadd.xlane.f32.xlu1 %v2114_v39 }
 0x330   : > { %v2055_v16 = vmul.f32 0.03125, %v2028_v49  ;;  %v2056_v54 = vmul.f32 0.03125, %v2031_v60  ;;  %v2085_v40 = vmul.f32 %v4229_v53, %v4229_v53  ;;  %v2086_v32 = vmul.f32 %v4232_v5, %v4232_v5  ;;  %v4281_v60 = vld [vmem:[%s4401_s6] ss:$0 sm:$0xff] }
 0x332   : > { %v4241_v2 = vsub.f32 %v4151_v27, %v2055_v16  ;;  %v4244_v10 = vsub.f32 %v4154_v14, %v2056_v54  ;;  %v2117_v20 = vsel %vm578_vm1, %v2085_v40, 0.0  ;;  %v2120_v43 = vsel %vm578_vm1, %v2086_v32, 0.0 }
 0x333   : > { %2118 = vadd.xlane.f32.xlu0 %v2117_v20  ;;  %v2034_v37 = vpop.xlane.xlu0 %2033  ;;  %v2037_v11 = vpop.xlane.xlu1 %2036  ;;  %2121 = vadd.xlane.f32.xlu1 %v2120_v43  ;;  %v4287_v20 = vld [vmem:[%s4402_s7] ss:$0 sm:$0xff] }
 0x334   : > { %v2057_v17 = vmul.f32 0.03125, %v2034_v37  ;;  %v2058_v19 = vmul.f32 0.03125, %v2037_v11  ;;  %v2087_v63 = vmul.f32 %v4241_v2, %v4241_v2  ;;  %v2088_v27 = vmul.f32 %v4244_v10, %v4244_v10 }
 0x336   : > { %v4253_v57 = vsub.f32 %v4157_v34, %v2057_v17  ;;  %v4256_v14 = vsub.f32 %v4165_v47, %v2058_v19  ;;  %v2123_v35 = vsel %vm578_vm1, %v2087_v63, 0.0  ;;  %v2126_v41 = vsel %vm578_vm1, %v2088_v27, 0.0 }
 0x337   : > { %2124 = vadd.xlane.f32.xlu0 %v2123_v35  ;;  %v2040_v3 = vpop.xlane.xlu0 %2039  ;;  %2127 = vadd.xlane.f32.xlu1 %v2126_v41 }
 0x338   : > { %v2059_v46 = vmul.f32 0.03125, %v2040_v3  ;;  %v2089_v6 = vmul.f32 %v4253_v57, %v4253_v57  ;;  %v2090_v34 = vmul.f32 %v4256_v14, %v4256_v14 }
 0x339   : > { %v2043_v13 = vpop.xlane.xlu1 %2042 }
 0x33a   : > { %v2060_v12 = vmul.f32 0.03125, %v2043_v13  ;;  %v4265_v59 = vsub.f32 %v4173_v21, %v2059_v46  ;;  %v2129_v62 = vsel %vm578_vm1, %v2089_v6, 0.0  ;;  %v2132_v30 = vsel %vm578_vm1, %v2090_v34, 0.0 }
 0x33b   : > { %2130 = vadd.xlane.f32.xlu0 %v2129_v62  ;;  %2133 = vadd.xlane.f32.xlu1 %v2132_v30 }
 0x33c   : > { %v4268_v47 = vsub.f32 %v4176_v42, %v2060_v12  ;;  %v2091_v56 = vmul.f32 %v4265_v59, %v4265_v59 }
 0x33e   : > { %v2092_v25 = vmul.f32 %v4268_v47, %v4268_v47  ;;  %v2135_v44 = vsel %vm578_vm1, %v2091_v56, 0.0 }
 0x33f   : > { %2136 = vadd.xlane.f32.xlu0 %v2135_v44 }
 0x340   : > { %v2138_v21 = vsel %vm578_vm1, %v2092_v25, 0.0 }
 0x341   : > { %2139 = vadd.xlane.f32.xlu1 %v2138_v21 }
 0x3a5   : > { %v2095_v42 = vpop.xlane.xlu0 %2094 }
 0x3a6   : > { %v2141_v7 = vmul.f32 0.03125, %v2095_v42 }
 0x3a8   : > { %v2157_v1 = vadd.f32 1e-05, %v2141_v7 }
 0x3a9   : > { %v2101_v23 = vpop.xlane.xlu0 %2100 }
 0x3aa   : > { %2814 = vrsqrt.f32 %v2157_v1  ;;  %v2143_v31 = vmul.f32 0.03125, %v2101_v23 }
 0x3ac   : > { %v2098_v4 = vpop.xlane.xlu1 %2097  ;;  %v2159_v9 = vadd.f32 1e-05, %v2143_v31 }
 0x3ad   : > { %v2142_v26 = vmul.f32 0.03125, %v2098_v4 }
 0x3af   : > { %v2158_v28 = vadd.f32 1e-05, %v2142_v26 }
 0x3b0   : > { %v2104_v0 = vpop.xlane.xlu1 %2103 }
 0x3b1   : > { %v2107_v58 = vpop.xlane.xlu0 %2106  ;;  %2816 = vrsqrt.f32 %v2158_v28  ;;  %v2144_v24 = vmul.f32 0.03125, %v2104_v0 }
 0x3b2   : > { %v2145_v22 = vmul.f32 0.03125, %v2107_v58  ;;  %2818 = vrsqrt.f32 %v2159_v9 }
 0x3b3   : > { %v2160_v8 = vadd.f32 1e-05, %v2144_v24 }
 0x3b4   : > { %v2161_v15 = vadd.f32 1e-05, %v2145_v22  ;;  %v2110_v52 = vpop.xlane.xlu1 %2109  ;;  %v2815_v49 = vpop.eup %2814 }
 0x3b5   : > { %2820 = vrsqrt.f32 %v2160_v8  ;;  %v2146_v55 = vmul.f32 0.03125, %v2110_v52  ;;  %v2189_v54 = vmul.f32 %v2815_v49, %v4183_v33 }
 0x3b6   : > { %2822 = vrsqrt.f32 %v2161_v15 }
 0x3b7   : > { %v2113_v45 = vpop.xlane.xlu0 %2112  ;;  %v2162_v39 = vadd.f32 1e-05, %v2146_v55  ;;  %v2211_v43 = vmul.f32 %v4281_v60, %v2189_v54 }
 0x3b8   : > { %v2147_v36 = vmul.f32 0.03125, %v2113_v45 }
 0x3b9   : > { %2824 = vrsqrt.f32 %v2162_v39  ;;  %v2233_v35 = vadd.f32 %v4287_v20, %v2211_v43 }
 0x3ba   : > { %v2163_v16 = vadd.f32 1e-05, %v2147_v36 }
 0x3bb   : > { %v2817_v17 = vpop.eup %2816  ;;  %2249 = vst.msk [vmem:[#allocation4] sm:$0xff] %vm578_vm1, %v2233_v35 }
 0x3bc   : > { %v2116_v40 = vpop.xlane.xlu1 %2115  ;;  %2826 = vrsqrt.f32 %v2163_v16  ;;  %v2819_v27 = vpop.eup %2818  ;;  %v2190_v33 = vmul.f32 %v2817_v17, %v4193_v51 }
 0x3bd   : > { %v2148_v37 = vmul.f32 0.03125, %v2116_v40  ;;  %v2191_v41 = vmul.f32 %v2819_v27, %v4186_v48 }
 0x3be   : > { %v2212_v6 = vmul.f32 %v4281_v60, %v2190_v33 }
 0x3bf   : > { %v2164_v19 = vadd.f32 1e-05, %v2148_v37  ;;  %v2821_v34 = vpop.eup %2820  ;;  %v2213_v62 = vmul.f32 %v4281_v60, %v2191_v41 }
 0x3c0   : > { %v2119_v32 = vpop.xlane.xlu0 %2118  ;;  %v2122_v3 = vpop.xlane.xlu1 %2121  ;;  %v2234_v51 = vadd.f32 %v4287_v20, %v2212_v6  ;;  %v2192_v44 = vmul.f32 %v2821_v34, %v4196_v18 }
 0x3c1   : > { %v2149_v11 = vmul.f32 0.03125, %v2119_v32  ;;  %2828 = vrsqrt.f32 %v2164_v19  ;;  %v2150_v46 = vmul.f32 0.03125, %v2122_v3  ;;  %v2823_v25 = vpop.eup %2822  ;;  %v2235_v42 = vadd.f32 %v4287_v20, %v2213_v62 }
 0x3c2   : > { %v2193_v7 = vmul.f32 %v2823_v25, %v4205_v50  ;;  %2250 = vst.msk [vmem:[#allocation4 + $0x8] sm:$0xff] %vm578_vm1, %v2234_v51  ;;  %v2214_v4 = vmul.f32 %v4281_v60, %v2192_v44 }
 0x3c3   : > { %v2165_v63 = vadd.f32 1e-05, %v2149_v11  ;;  %v2166_v30 = vadd.f32 1e-05, %v2150_v46  ;;  %v2825_v26 = vpop.eup %2824  ;;  %2251 = vst.msk [vmem:[#allocation4 + $0x10] sm:$0xff] %vm578_vm1, %v2235_v42 }
 0x3c4   : > { %v2125_v13 = vpop.xlane.xlu0 %2124  ;;  %v2128_v21 = vpop.xlane.xlu1 %2127  ;;  %v2215_v31 = vmul.f32 %v4281_v60, %v2193_v7  ;;  %v2236_v9 = vadd.f32 %v4287_v20, %v2214_v4  ;;  %v2194_v0 = vmul.f32 %v2825_v26, %v4208_v61 }
 0x3c5   : > { %v2151_v12 = vmul.f32 0.03125, %v2125_v13  ;;  %2830 = vrsqrt.f32 %v2165_v63  ;;  %v2152_v1 = vmul.f32 0.03125, %v2128_v21 }
 0x3c6   : > { %2832 = vrsqrt.f32 %v2166_v30  ;;  %v2827_v28 = vpop.eup %2826  ;;  %v2237_v22 = vadd.f32 %v4287_v20, %v2215_v31  ;;  %2252 = vst.msk [vmem:[#allocation4 + $0x18] sm:$0xff] %vm578_vm1, %v2236_v9  ;;  %v2216_v52 = vmul.f32 %v4281_v60, %v2194_v0 }
 0x3c7   : > { %v2167_v56 = vadd.f32 1e-05, %v2151_v12  ;;  %v2168_v18 = vadd.f32 1e-05, %v2152_v1  ;;  %v2195_v8 = vmul.f32 %v2827_v28, %v4217_v38 }
 0x3c8   : > { %v2131_v48 = vpop.xlane.xlu0 %2130  ;;  %v2134_v58 = vpop.xlane.xlu1 %2133  ;;  %2253 = vst.msk [vmem:[#allocation4 + $0x20] sm:$0xff] %vm578_vm1, %v2237_v22  ;;  %v2238_v39 = vadd.f32 %v4287_v20, %v2216_v52 }
 0x3c9   : > { %2834 = vrsqrt.f32 %v2167_v56  ;;  %v2153_v23 = vmul.f32 0.03125, %v2131_v48  ;;  %v2154_v15 = vmul.f32 0.03125, %v2134_v58  ;;  %v2217_v61 = vmul.f32 %v4281_v60, %v2195_v8 }
 0x3ca   : > { %2836 = vrsqrt.f32 %v2168_v18  ;;  %2254 = vst.msk [vmem:[#allocation4 + $0x28] sm:$0xff] %vm578_vm1, %v2238_v39 }
 0x3cb   : > { %v2169_v50 = vadd.f32 1e-05, %v2153_v23  ;;  %v2829_v55 = vpop.eup %2828  ;;  %v2170_v36 = vadd.f32 1e-05, %v2154_v15  ;;  %v2239_v40 = vadd.f32 %v4287_v20, %v2217_v61 }
 0x3cc   : > { %v2137_v24 = vpop.xlane.xlu0 %2136  ;;  %v2196_v16 = vmul.f32 %v2829_v55, %v4220_v29 }
 0x3cd   : > { %2838 = vrsqrt.f32 %v2169_v50  ;;  %v2155_v45 = vmul.f32 0.03125, %v2137_v24  ;;  %2255 = vst.msk [vmem:[#allocation4 + $0x30] sm:$0xff] %vm578_vm1, %v2239_v40 }
 0x3ce   : > { %v2140_v54 = vpop.xlane.xlu1 %2139  ;;  %2840 = vrsqrt.f32 %v2170_v36  ;;  %v2218_v11 = vmul.f32 %v4281_v60, %v2196_v16 }
 0x3cf   : > { %v2831_v49 = vpop.eup %2830  ;;  %v2171_v38 = vadd.f32 1e-05, %v2155_v45  ;;  %v2156_v37 = vmul.f32 0.03125, %v2140_v54 }
 0x3d0   : > { %v2197_v32 = vmul.f32 %v2831_v49, %v4229_v53  ;;  %v2833_v43 = vpop.eup %2832  ;;  %v2240_v63 = vadd.f32 %v4287_v20, %v2218_v11 }
 0x3d1   : > { %2842 = vrsqrt.f32 %v2171_v38  ;;  %v2172_v19 = vadd.f32 1e-05, %v2156_v37  ;;  %v2198_v27 = vmul.f32 %v2833_v43, %v4232_v5 }
 0x3d2   : > { %v2219_v17 = vmul.f32 %v4281_v60, %v2197_v32  ;;  %2256 = vst.msk [vmem:[#allocation4 + $0x38] sm:$0xff] %vm578_vm1, %v2240_v63 }
 0x3d3   : > { %v2835_v29 = vpop.eup %2834  ;;  %2844 = vrsqrt.f32 %v2172_v19  ;;  %v2220_v33 = vmul.f32 %v4281_v60, %v2198_v27 }
 0x3d4   : > { %v2241_v53 = vadd.f32 %v4287_v20, %v2219_v17  ;;  %v2199_v35 = vmul.f32 %v2835_v29, %v4241_v2  ;;  %v2837_v3 = vpop.eup %2836 }
 0x3d5   : > { %v2242_v46 = vadd.f32 %v4287_v20, %v2220_v33  ;;  %v2200_v12 = vmul.f32 %v2837_v3, %v4244_v10 }
 0x3d6   : > { %2257 = vst.msk [vmem:[#allocation4 + $0x40] sm:$0xff] %vm578_vm1, %v2241_v53  ;;  %v2221_v13 = vmul.f32 %v4281_v60, %v2199_v35 }
 0x3d7   : > { %v2839_v41 = vpop.eup %2838  ;;  %2258 = vst.msk [vmem:[#allocation4 + $0x48] sm:$0xff] %vm578_vm1, %v2242_v46  ;;  %v2222_v2 = vmul.f32 %v4281_v60, %v2200_v12 }
 0x3d8   : > { %v2243_v5 = vadd.f32 %v4287_v20, %v2221_v13  ;;  %v2201_v6 = vmul.f32 %v2839_v41, %v4253_v57  ;;  %v2841_v34 = vpop.eup %2840 }
 0x3d9   : > { %v2244_v56 = vadd.f32 %v4287_v20, %v2222_v2  ;;  %v2202_v25 = vmul.f32 %v2841_v34, %v4256_v14 }
 0x3da   : > { %2259 = vst.msk [vmem:[#allocation4 + $0x50] sm:$0xff] %vm578_vm1, %v2243_v5  ;;  %v2223_v62 = vmul.f32 %v4281_v60, %v2201_v6 }
 0x3db   : > { %v2843_v30 = vpop.eup %2842  ;;  %2260 = vst.msk [vmem:[#allocation4 + $0x58] sm:$0xff] %vm578_vm1, %v2244_v56  ;;  %v2224_v57 = vmul.f32 %v4281_v60, %v2202_v25 }
 0x3dc   : > { %v2245_v10 = vadd.f32 %v4287_v20, %v2223_v62  ;;  %v2203_v51 = vmul.f32 %v2843_v30, %v4265_v59 }
 0x3dd   : > { %v2845_v44 = vpop.eup %2844  ;;  %v2246_v48 = vadd.f32 %v4287_v20, %v2224_v57 }
 0x3de   : > { %2261 = vst.msk [vmem:[#allocation4 + $0x60] sm:$0xff] %vm578_vm1, %v2245_v10  ;;  %v2225_v21 = vmul.f32 %v4281_v60, %v2203_v51  ;;  %v2204_v42 = vmul.f32 %v2845_v44, %v4268_v47 }
 0x3df   : > { %2262 = vst.msk [vmem:[#allocation4 + $0x68] sm:$0xff] %vm578_vm1, %v2246_v48 }
 0x3e0   : > { %v2247_v7 = vadd.f32 %v4287_v20, %v2225_v21  ;;  %v2226_v14 = vmul.f32 %v4281_v60, %v2204_v42 }
 0x3e2   : > { %2263 = vst.msk [vmem:[#allocation4 + $0x70] sm:$0xff] %vm578_vm1, %v2247_v7  ;;  %v2248_v59 = vadd.f32 %v4287_v20, %v2226_v14 }
 0x3e4   : > { %2264 = vst.msk [vmem:[#allocation4 + $0x78] sm:$0xff] %vm578_vm1, %v2248_v59 }
 0x3e5 PF: > { %p4354_p13 = scmp.eq.s32.totalorder %s2384_s10, 3  ;;  %s2918_s16 = smov [#allocation4]  }
 0x3e6   : > { %s2274_s17 = sshll.u32 %s2918_s16, 4  ;;  %s2275_s17 = int_to_ptr.vmem [resolvable:$true] %s2274_s17 }
 0x3e7   : > { %s2846_s27 = scalar_lea.vmem %s2275_s17, 2048  ;;  %p2853_p3 = scmp.lt.s32.totalorder %s2275_s17, %s2275_s17 }
 0x3e8   : > { %p2847_p0 = scmp.ne.s32.totalorder %s2275_s17, %s2846_s27  ;;  %p2854_p4 = scmp.lt.s32.totalorder %s2846_s27, %s2846_s27 }
 0x3ea   : > { %p2848_p1 = pnand %p2847_p0, %p4354_p13  ;;  %p2855_p5 = por %p2854_p4, %p2853_p3 }
 0x3ec   : > { %p2849_p2 = pneg %p2848_p1 }
 0x3ee   : > { %p2856_p6 = pnand %p2855_p5, %p2849_p2 }
 0x3f0   : > { %2859 = shalt.err (!%p2856_p6)
}
 0x3f1   : > { %s2860_s10 = scalar_lea.hbm %s4403_s8, 2048 }
 0x3f2   : > { %p2861_p7 = scmp.ne.s32.totalorder %s4403_s8, %s2860_s10  ;;  %p2866_p10 = scmp.lt.u32.totalorder %s2860_s10, %s4403_s8 }
 0x3f4   : > { %p2862_p8 = pnand %p2861_p7, %p4354_p13 }
 0x3f6   : > { %p2863_p9 = pneg %p2862_p8 }
 0x3f8   : > { %p2868_p11 = pnand %p2866_p10, %p2863_p9 }
 0x3fa   : > { %2871 = shalt.err (!%p2868_p11)
}
 0x3fb   : > { %s2919_s23 = smov 128   ;;  %s2920_s13 = smov 8  }
 0x3fc   : > { %2592 = dma.vmem_to_hbm [thread:$0]  (%p4354_p13), %s2275_s17, 2048, %s4403_s8, [#allocation5], %s2919_s23, %s2919_s23, %s2920_s13  }
 0x3fd   : > { %2893 = dma.done.wait (%p4354_p13), [#allocation5], 2048  }
 0x3fe   : > { %2895 = vsyncadd (%p4354_p13), [#allocation5], 4294965248 }
 0x3ff PF: > { %s19_s9 = sadd.s32 1, %s2914_s9   ;;  %s4659_s27 = smov %s2902_s28 }
 0x400   : > { %p16_p12 = scmp.ge.s32.totalorder %s19_s9, 6   ;;  %s4660_s28 = smov %s3002_s14 }
 0x401   : > { %s4661_s29 = smov %s2910_s30  ;;  %s4662_s30 = smov %s4664_s11 }
 0x402   :  { %18 = sbr.rel (!%p16_p12) target bundleno = 3 (0x3), region = 128 }
 0x409   :  { %2290 = vsyncpa [#allocation5], 1 }
 0x40a   :  { %2292 = vsyncpa [#allocation5 + $0x1], 1 }

</bundles_post_ra>
